<compile_context>
chip_gen: v5e
topology: v5e:2x2
jax: 0.10.0
libtpu: 0.0.40
codegen_flags: <defaults>
</compile_context>

<pallas_src>
import numpy as np

import jax
import jax.numpy as jnp
from jax.experimental import pallas as pl
from jax.experimental.pallas import tpu as pltpu

L = 1024          # sequence length (fc1 requires last dim == 1024)
C_IN = 8          # input channels (inconv path: x.shape[1] == 8)
C_MID = 10        # channels after double_conv / inside CBAM
N_CLASS = 58
HEAD_W = 128      # lane-dense packed width: [score | 58 class probs | zeros]
BN_EPS = 1e-5
TB_MAX = 16       # samples per grid step (multiple of 8; ~12 on v5e, ~24 on v6e ok)
MATMUL_DTYPE = jnp.bfloat16   # dtype of SE fc1/fc2 and fc1 matmul operands


def taa_kernel(x_ref, w1_ref, s1_ref, t1_ref, w2_ref, s2_ref, t2_ref,
               sew1_ref, sew2_ref, caw1_ref, caw2_ref, saw_ref,
               fc1w_ref, fc1b_ref, fc2w_ref, fc2b_ref,
               headw_ref, headb_ref,
               feat_ref, sp_ref):
    f32 = jnp.float32
    _, TB, _ = x_ref.shape

    # Hoisted boundary masks for the k=3 / pad=1 convolutions (built once).
    lane = jax.lax.broadcasted_iota(jnp.int32, (1, L), 1)
    not_first = (lane > 0).astype(f32)          # zero at l == 0
    not_last = (lane < L - 1).astype(f32)       # zero at l == L-1

    def sr(y):    # y[:, l-1], zero-padded at l == 0
        return pltpu.roll(y, 1, axis=1) * not_first

    def sl(y):    # y[:, l+1], zero-padded at l == L-1
        return pltpu.roll(y, L - 1, axis=1) * not_last

    def taps(y):  # stack the 3 conv taps along sublanes: (R, L) -> (3R, L)
        return jnp.concatenate([sr(y), y, sl(y)], axis=0)

    # ---- double_conv (inconv): 8 -> 10 -> 10, each conv as ONE block-diagonal
    #      matmul over all TB samples; BN folded (running stats) + ReLU --------
    x2d = x_ref[...].astype(f32).reshape(C_IN * TB, L)          # channel-major rows
    h = jnp.dot(w1_ref[...], taps(x2d), preferred_element_type=f32)
    h = jnp.maximum(h * s1_ref[...] + t1_ref[...], 0.0)         # (10*TB, L)
    z = jnp.dot(w2_ref[...], taps(h), preferred_element_type=f32)
    x10_2d = jnp.maximum(z * s2_ref[...] + t2_ref[...], 0.0)    # (10*TB, L)
    x10 = x10_2d.reshape(C_MID, TB, L)                          # (10, TB, L)

    # ---- SELayer_1d(1024) on x.permute(0,2,1): squeeze over the 10-channel
    #      axis, FC over the 1024 axis; bf16 operands, f32 accumulation -------
    y_avg = jnp.mean(x10, axis=0)                               # (TB, L)
    z1 = jnp.maximum(
        jnp.dot(y_avg.astype(sew1_ref.dtype), sew1_ref[...],
                preferred_element_type=f32), 0.0)               # (TB, 64)
    z2 = jax.nn.sigmoid(
        jnp.dot(z1.astype(sew2_ref.dtype), sew2_ref[...],
                preferred_element_type=f32))                    # (TB, L)
    attn = x10 * z2[None, :, :]                                 # (10, TB, L)

    # ---- CBAM: channel attention ---------------------------------------------
    mx_c = jnp.max(attn, axis=2)                                # (10, TB)
    av_c = jnp.mean(attn, axis=2)                               # (10, TB)
    caw1 = caw1_ref[...]                                        # (10, 1)
    t_mx = jnp.maximum(jnp.sum(caw1 * mx_c, axis=0, keepdims=True), 0.0)  # (1, TB)
    t_av = jnp.maximum(jnp.sum(caw1 * av_c, axis=0, keepdims=True), 0.0)  # (1, TB)
    ca = jax.nn.sigmoid(caw2_ref[...] * (t_mx + t_av))          # (10, TB)
    out = attn * ca[:, :, None]                                 # (10, TB, L)

    # ---- CBAM: spatial attention (Conv1d(2 -> 1, k=3, pad=1) + sigmoid) ------
    mx_s = jnp.max(out, axis=0)                                 # (TB, L)
    av_s = jnp.mean(out, axis=0)                                # (TB, L)
    sa = jax.nn.sigmoid(saw_ref[2] * mx_s + saw_ref[3] * av_s
                        + saw_ref[0] * sr(mx_s) + saw_ref[1] * sr(av_s)
                        + saw_ref[4] * sl(mx_s) + saw_ref[5] * sl(av_s)
                        + saw_ref[6])
    out = out * sa[None, :, :] + attn                           # CBAM residual add

    # ---- fc1 (bf16) -> fc2 (f32, N padded to 128 => lane-dense feat store) ---
    out2d = out.reshape(C_MID * TB, L)                          # free (TB 8-aligned)
    h1 = jnp.maximum(
        jnp.dot(out2d.astype(fc1w_ref.dtype), fc1w_ref[...],
                preferred_element_type=f32) + fc1b_ref[...], 0.0)       # (10*TB, 256)
    feat = jnp.maximum(
        jnp.dot(h1, fc2w_ref[...], preferred_element_type=f32)
        + fc2b_ref[...], 0.0)                                   # (10*TB, 128), cols 64+ are 0
    feat3 = feat.reshape(C_MID, TB, HEAD_W)
    feat_ref[...] = feat3

    # ---- fused score|class head on the per-sample channel mean (affine heads
    #      commute with mean(1)); softmax over the 58 class columns only ------
    featmean = jnp.mean(feat3, axis=0)                          # (TB, 128)
    head = (jnp.dot(featmean, headw_ref[...], preferred_element_type=f32)
            + headb_ref[...])                                   # (TB, 128)

    col = jax.lax.broadcasted_iota(jnp.int32, (1, HEAD_W), 1)
    is_score = col == 0
    is_class = (col >= 1) & (col <= N_CLASS)
    masked = jnp.where(is_class, head, -1e30)
    m = jnp.max(masked, axis=1, keepdims=True)
    e = jnp.exp(masked - m)                                     # exactly 0 outside classes
    probs = e * pl.reciprocal(jnp.sum(e, axis=1, keepdims=True), approx=True)
    sp_ref[...] = jnp.where(is_score, head, 0.0) + probs        # [score | probs | zeros]


# ------------------------------ parameter setup ------------------------------

def init_params(key):
    """Torch-layout parameters of the reference TAA module (BN in eval mode)."""
    ks = iter(jax.random.split(key, 32))

    def nrm(shape, scale):
        return jax.random.normal(next(ks), shape, jnp.float32) * scale

    p = {}
    p["conv1_w"] = nrm((C_MID, C_IN, 3), 1.0 / np.sqrt(C_IN * 3))
    p["conv1_b"] = nrm((C_MID,), 0.05)
    p["bn1"] = (1.0 + nrm((C_MID,), 0.05), nrm((C_MID,), 0.05),
                nrm((C_MID,), 0.05), 1.0 + 0.1 * jnp.abs(nrm((C_MID,), 1.0)))
    p["conv2_w"] = nrm((C_MID, C_MID, 3), 1.0 / np.sqrt(C_MID * 3))
    p["conv2_b"] = nrm((C_MID,), 0.05)
    p["bn2"] = (1.0 + nrm((C_MID,), 0.05), nrm((C_MID,), 0.05),
                nrm((C_MID,), 0.05), 1.0 + 0.1 * jnp.abs(nrm((C_MID,), 1.0)))
    # SELayer_1d(1024, reduction=16): Linear(1024,64) / Linear(64,1024), no bias
    p["se_w1"] = nrm((64, L), 1.0 / np.sqrt(L))
    p["se_w2"] = nrm((L, 64), 1.0 / np.sqrt(64))
    # CBAM ChannelAttention(10, reduction=10): Conv1d(10,1,1), Conv1d(1,10,1) no bias
    p["ca_w1"] = nrm((1, C_MID, 1), 1.0 / np.sqrt(C_MID))
    p["ca_w2"] = nrm((C_MID, 1, 1), 1.0)
    # CBAM SpatialAttention(kernel=3): Conv1d(2,1,3,pad=1) with bias
    p["sa_w"] = nrm((1, 2, 3), 1.0 / np.sqrt(6))
    p["sa_b"] = nrm((1,), 0.05)
    # heads
    p["fc1_w"] = nrm((256, L), 1.0 / np.sqrt(L));      p["fc1_b"] = nrm((256,), 0.05)
    p["fc2_w"] = nrm((64, 256), 1.0 / np.sqrt(256));   p["fc2_b"] = nrm((64,), 0.05)
    p["sc_w"] = nrm((1, 64), 1.0 / np.sqrt(64));       p["sc_b"] = nrm((1,), 0.05)
    p["cl_w"] = nrm((N_CLASS, 64), 1.0 / np.sqrt(64)); p["cl_b"] = nrm((N_CLASS,), 0.05)
    return p


def prepare_kernel_params(p, TB):
    """Re-layout torch-style params for the kernel at per-step batch TB."""
    f32 = np.float32

    def bd(w):
        # (Cout, Cin, 3) -> channel-major block-diagonal (Cout*TB, 3*Cin*TB):
        # W[co*TB+t, tap*Cin*TB + ci*TB + t] = w[co, ci, tap]
        w = np.asarray(w, f32)
        cout, cin, _ = w.shape
        wt = np.transpose(w, (0, 2, 1))                   # (cout, 3, cin)
        W = np.zeros((cout, TB, 3, cin, TB), f32)
        for t in range(TB):
            W[:, t, :, :, t] = wt
        return W.reshape(cout * TB, 3 * cin * TB)

    def fold_bn(conv_b, bn):
        gamma, beta, mean, var = (np.asarray(a, f32) for a in bn)
        s = gamma / np.sqrt(var + BN_EPS)
        t = (np.asarray(conv_b, f32) - mean) * s + beta
        return s, t

    def cm(v):   # per-channel vector -> channel-major per-row column
        return np.repeat(np.asarray(v, f32), TB)[:, None]

    s1, t1 = fold_bn(p["conv1_b"], p["bn1"])
    s2, t2 = fold_bn(p["conv2_b"], p["bn2"])

    sa_w = np.asarray(p["sa_w"], f32)
    sa = np.array([sa_w[0, 0, 0], sa_w[0, 1, 0],          # tap l-1: max, avg
                   sa_w[0, 0, 1], sa_w[0, 1, 1],          # center : max, avg
                   sa_w[0, 0, 2], sa_w[0, 1, 2],          # tap l+1: max, avg
                   float(np.asarray(p["sa_b"], f32)[0])], f32)

    fc2_pad = np.zeros((256, HEAD_W), f32)
    fc2_pad[:, :64] = np.asarray(p["fc2_w"], f32).T
    fc2b_pad = np.zeros((1, HEAD_W), f32)
    fc2b_pad[0, :64] = np.asarray(p["fc2_b"], f32)

    head_w = np.zeros((HEAD_W, HEAD_W), f32)               # rows 64+ stay zero
    head_w[:64, 0] = np.asarray(p["sc_w"], f32)[0]
    head_w[:64, 1:1 + N_CLASS] = np.asarray(p["cl_w"], f32).T
    head_b = np.zeros((1, HEAD_W), f32)
    head_b[0, 0] = float(np.asarray(p["sc_b"], f32)[0])
    head_b[0, 1:1 + N_CLASS] = np.asarray(p["cl_b"], f32)

    kp = {
        "w1": jnp.asarray(bd(p["conv1_w"])),
        "s1": jnp.asarray(cm(s1)), "t1": jnp.asarray(cm(t1)),
        "w2": jnp.asarray(bd(p["conv2_w"])),
        "s2": jnp.asarray(cm(s2)), "t2": jnp.asarray(cm(t2)),
        "se_w1t": jnp.asarray(np.asarray(p["se_w1"], f32).T).astype(MATMUL_DTYPE),
        "se_w2t": jnp.asarray(np.asarray(p["se_w2"], f32).T).astype(MATMUL_DTYPE),
        "ca_w1": jnp.asarray(np.asarray(p["ca_w1"], f32).reshape(C_MID, 1)),
        "ca_w2": jnp.asarray(np.asarray(p["ca_w2"], f32).reshape(C_MID, 1)),
        "sa_w": jnp.asarray(sa),
        "fc1_wt": jnp.asarray(np.asarray(p["fc1_w"], f32).T).astype(MATMUL_DTYPE),
        "fc1_b": jnp.asarray(np.asarray(p["fc1_b"], f32).reshape(1, 256)),
        "fc2_wt": jnp.asarray(fc2_pad),
        "fc2_b": jnp.asarray(fc2b_pad),
        "head_w": jnp.asarray(head_w),
        "head_b": jnp.asarray(head_b),
    }
    return kp


# ------------------------------ pallas_call wrapper --------------------------

@jax.jit
def _taa_call(xcm, kp):
    _, Bp, _ = xcm.shape
    TB = kp["s1"].shape[0] // C_MID          # static (from shape)
    nsteps = Bp // TB
    full2 = lambda b: (0, 0)

    in_specs = [
        pl.BlockSpec((C_IN, TB, L), lambda b: (0, b, 0)),        # x (channel-major)
        pl.BlockSpec(kp["w1"].shape, full2),                     # conv1 block-diag
        pl.BlockSpec(kp["s1"].shape, full2),                     # bn1 scale
        pl.BlockSpec(kp["t1"].shape, full2),                     # bn1 shift
        pl.BlockSpec(kp["w2"].shape, full2),                     # conv2 block-diag
        pl.BlockSpec(kp["s2"].shape, full2),                     # bn2 scale
        pl.BlockSpec(kp["t2"].shape, full2),                     # bn2 shift
        pl.BlockSpec((L, 64), full2),                            # SE fc1^T (bf16)
        pl.BlockSpec((64, L), full2),                            # SE fc2^T (bf16)
        pl.BlockSpec((C_MID, 1), full2),                         # CA conv1
        pl.BlockSpec((C_MID, 1), full2),                         # CA conv2
        pl.BlockSpec(memory_space=pltpu.MemorySpace.SMEM),       # SA conv scalars (7,)
        pl.BlockSpec((L, 256), full2),                           # fc1^T (bf16)
        pl.BlockSpec((1, 256), full2),                           # fc1 bias
        pl.BlockSpec((256, HEAD_W), full2),                      # fc2^T (lane-padded)
        pl.BlockSpec((1, HEAD_W), full2),                        # fc2 bias (padded)
        pl.BlockSpec((HEAD_W, HEAD_W), full2),                   # fused score|class W
        pl.BlockSpec((1, HEAD_W), full2),                        # fused head bias
    ]
    out_specs = [
        pl.BlockSpec((C_MID, TB, HEAD_W), lambda b: (0, b, 0)),  # feat (channel-major)
        pl.BlockSpec((TB, HEAD_W), lambda b: (b, 0)),            # packed [score|probs]
    ]
    out_shape = (
        jax.ShapeDtypeStruct((C_MID, Bp, HEAD_W), jnp.float32),
        jax.ShapeDtypeStruct((Bp, HEAD_W), jnp.float32),
    )

    return pl.pallas_call(
        taa_kernel,
        grid=(nsteps,),
        in_specs=in_specs,
        out_specs=out_specs,
        out_shape=out_shape,
        compiler_params=pltpu.CompilerParams(
            dimension_semantics=("parallel",),
            vmem_limit_bytes=32 * 1024 * 1024),
    )(xcm, kp["w1"], kp["s1"], kp["t1"], kp["w2"], kp["s2"], kp["t2"],
      kp["se_w1t"], kp["se_w2t"], kp["ca_w1"], kp["ca_w2"], kp["sa_w"],
      kp["fc1_wt"], kp["fc1_b"], kp["fc2_wt"], kp["fc2_b"],
      kp["head_w"], kp["head_b"])


def taa_forward(x, params):
    B = x.shape[0]
    assert x.shape[1] == C_IN and x.shape[2] == L  # kernel implements the channels==8 path

    # TB is kept a multiple of 8 so every in-kernel reshape stays tile-aligned.
    TB = min(TB_MAX, ((B + 7) // 8) * 8)
    Bp = ((B + TB - 1) // TB) * TB
    kp = prepare_kernel_params(params, TB)        # cache per TB in real use

    xp = jnp.pad(x, ((0, Bp - B), (0, 0), (0, 0))) if Bp != B else x
    xcm = jnp.transpose(xp, (1, 0, 2))            # (C_IN, Bp, L)

    feat_cm, sp = _taa_call(xcm, kp)

    feat = jnp.transpose(feat_cm[:, :B, :64], (1, 0, 2))   # (B, 10, 64)
    score = sp[:B, 0:1]
    pred = sp[:B, 1:1 + N_CLASS]

    h = (B + 1) // 2                              # torch.chunk(..., 2, dim=0) semantics
    return (feat[:h], feat[h:], score[:h], score[h:], pred[:h], pred[h:])


if __name__ == "__main__":
    key = jax.random.PRNGKey(0)
    kx, kparam = jax.random.split(key)
    x = jax.random.normal(kx, (2, C_IN, L), dtype=jnp.float32)  # batch=2, channels=8, seq=1024
    params = init_params(kparam)
    outs = taa_forward(x, params)
    outs = jax.block_until_ready(outs)
    print("KERNEL_OK")
</pallas_src>

<mosaic_0001>
module attributes {stable_mosaic.version = 11 : i64} {
  func.func @taa_kernel(%arg0: i32, %arg1: memref<8x8x1024xf32, #tpu.memory_space<vmem>>, %arg2: memref<80x192xf32, #tpu.memory_space<vmem>>, %arg3: memref<80x1xf32, #tpu.memory_space<vmem>>, %arg4: memref<80x1xf32, #tpu.memory_space<vmem>>, %arg5: memref<80x240xf32, #tpu.memory_space<vmem>>, %arg6: memref<80x1xf32, #tpu.memory_space<vmem>>, %arg7: memref<80x1xf32, #tpu.memory_space<vmem>>, %arg8: memref<1024x64xbf16, #tpu.memory_space<vmem>>, %arg9: memref<64x1024xbf16, #tpu.memory_space<vmem>>, %arg10: memref<10x1xf32, #tpu.memory_space<vmem>>, %arg11: memref<10x1xf32, #tpu.memory_space<vmem>>, %arg12: memref<7xf32, #tpu.memory_space<smem>>, %arg13: memref<1024x256xbf16, #tpu.memory_space<vmem>>, %arg14: memref<1x256xf32, #tpu.memory_space<vmem>>, %arg15: memref<256x128xf32, #tpu.memory_space<vmem>>, %arg16: memref<1x128xf32, #tpu.memory_space<vmem>>, %arg17: memref<128x128xf32, #tpu.memory_space<vmem>>, %arg18: memref<1x128xf32, #tpu.memory_space<vmem>>, %arg19: memref<10x8x128xf32, #tpu.memory_space<vmem>>, %arg20: memref<8x128xf32, #tpu.memory_space<vmem>>) attributes {dimension_semantics = [#tpu.dimension_semantics<parallel>], iteration_bounds = array<i64: 1>, scalar_prefetch = 0 : i64, scratch_operands = 0 : i64, tpu.core_type = #tpu.core_type<tc>, window_params = [{transform_indices = @transform_0, window_bounds = array<i64: 8, 8, 1024>}, {pipeline_mode = #tpu.pipeline_mode<synchronous>, transform_indices = @transform_1, window_bounds = array<i64: 80, 192>}, {pipeline_mode = #tpu.pipeline_mode<synchronous>, transform_indices = @transform_2, window_bounds = array<i64: 80, 1>}, {pipeline_mode = #tpu.pipeline_mode<synchronous>, transform_indices = @transform_3, window_bounds = array<i64: 80, 1>}, {pipeline_mode = #tpu.pipeline_mode<synchronous>, transform_indices = @transform_4, window_bounds = array<i64: 80, 240>}, {pipeline_mode = #tpu.pipeline_mode<synchronous>, transform_indices = @transform_5, window_bounds = array<i64: 80, 1>}, {pipeline_mode = #tpu.pipeline_mode<synchronous>, transform_indices = @transform_6, window_bounds = array<i64: 80, 1>}, {pipeline_mode = #tpu.pipeline_mode<synchronous>, transform_indices = @transform_7, window_bounds = array<i64: 1024, 64>}, {pipeline_mode = #tpu.pipeline_mode<synchronous>, transform_indices = @transform_8, window_bounds = array<i64: 64, 1024>}, {pipeline_mode = #tpu.pipeline_mode<synchronous>, transform_indices = @transform_9, window_bounds = array<i64: 10, 1>}, {pipeline_mode = #tpu.pipeline_mode<synchronous>, transform_indices = @transform_10, window_bounds = array<i64: 10, 1>}, {transform_indices = @transform_11, window_bounds = array<i64: 7>}, {pipeline_mode = #tpu.pipeline_mode<synchronous>, transform_indices = @transform_12, window_bounds = array<i64: 1024, 256>}, {pipeline_mode = #tpu.pipeline_mode<synchronous>, transform_indices = @transform_13, window_bounds = array<i64: 1, 256>}, {pipeline_mode = #tpu.pipeline_mode<synchronous>, transform_indices = @transform_14, window_bounds = array<i64: 256, 128>}, {pipeline_mode = #tpu.pipeline_mode<synchronous>, transform_indices = @transform_15, window_bounds = array<i64: 1, 128>}, {pipeline_mode = #tpu.pipeline_mode<synchronous>, transform_indices = @transform_16, window_bounds = array<i64: 128, 128>}, {pipeline_mode = #tpu.pipeline_mode<synchronous>, transform_indices = @transform_17, window_bounds = array<i64: 1, 128>}, {transform_indices = @transform_18, window_bounds = array<i64: 10, 8, 128>}, {transform_indices = @transform_19, window_bounds = array<i64: 8, 128>}]} {
    %0 = tpu.iota {dimensions = array<i32: 1>} : vector<1x1024xi32>
    %c0_i32 = arith.constant 0 : i32
    %1 = vector.broadcast %c0_i32 : i32 to vector<1x1024xi32>
    %2 = arith.cmpi sgt, %0, %1 : vector<1x1024xi32>
    %3 = arith.extui %2 : vector<1x1024xi1> to vector<1x1024xi32>
    %4 = arith.sitofp %3 : vector<1x1024xi32> to vector<1x1024xf32>
    %c1023_i32 = arith.constant 1023 : i32
    %5 = vector.broadcast %c1023_i32 : i32 to vector<1x1024xi32>
    %6 = arith.cmpi slt, %0, %5 : vector<1x1024xi32>
    %7 = arith.extui %6 : vector<1x1024xi1> to vector<1x1024xi32>
    %8 = arith.sitofp %7 : vector<1x1024xi32> to vector<1x1024xf32>
    %c0 = arith.constant 0 : index
    %c0_0 = arith.constant 0 : index
    %c0_1 = arith.constant 0 : index
    %9 = vector.load %arg1[%c0, %c0_0, %c0_1] : memref<8x8x1024xf32, #tpu.memory_space<vmem>>, vector<8x8x1024xf32>
    %10 = vector.shape_cast %9 : vector<8x8x1024xf32> to vector<64x1024xf32>
    %c0_2 = arith.constant 0 : index
    %c0_3 = arith.constant 0 : index
    %11 = vector.load %arg2[%c0_2, %c0_3] : memref<80x192xf32, #tpu.memory_space<vmem>>, vector<80x192xf32>
    %c1_i32 = arith.constant 1 : i32
    %12 = tpu.dynamic_rotate %10 by %c1_i32 dim 1 : vector<64x1024xf32>, i32 -> vector<64x1024xf32>
    %13 = vector.broadcast %4 : vector<1x1024xf32> to vector<64x1024xf32>
    %14 = arith.mulf %12, %13 : vector<64x1024xf32>
    %c1023_i32_4 = arith.constant 1023 : i32
    %15 = tpu.dynamic_rotate %10 by %c1023_i32_4 dim 1 : vector<64x1024xf32>, i32 -> vector<64x1024xf32>
    %16 = vector.broadcast %8 : vector<1x1024xf32> to vector<64x1024xf32>
    %17 = arith.mulf %15, %16 : vector<64x1024xf32>
    %18 = tpu.concatenate %14, %10, %17 in 0 : vector<64x1024xf32>, vector<64x1024xf32>, vector<64x1024xf32> -> vector<192x1024xf32>
    %cst = arith.constant dense<0.000000e+00> : vector<80x1024xf32>
    %19 = tpu.matmul %11, %18, %cst {dimension_numbers = #tpu.dot_dimension_numbers<[1], [0], [0], [1], [0, 0, 1, 1], [], []>} : vector<80x192xf32>, vector<192x1024xf32>, vector<80x1024xf32> -> vector<80x1024xf32>
    %c0_5 = arith.constant 0 : index
    %c0_6 = arith.constant 0 : index
    %20 = vector.load %arg3[%c0_5, %c0_6] : memref<80x1xf32, #tpu.memory_space<vmem>>, vector<80x1xf32>
    %21 = vector.broadcast %20 : vector<80x1xf32> to vector<80x1024xf32>
    %22 = arith.mulf %19, %21 : vector<80x1024xf32>
    %c0_7 = arith.constant 0 : index
    %c0_8 = arith.constant 0 : index
    %23 = vector.load %arg4[%c0_7, %c0_8] : memref<80x1xf32, #tpu.memory_space<vmem>>, vector<80x1xf32>
    %24 = vector.broadcast %23 : vector<80x1xf32> to vector<80x1024xf32>
    %25 = arith.addf %22, %24 : vector<80x1024xf32>
    %cst_9 = arith.constant 0.000000e+00 : f32
    %26 = vector.broadcast %cst_9 : f32 to vector<80x1024xf32>
    %27 = arith.maximumf %25, %26 : vector<80x1024xf32>
    %c0_10 = arith.constant 0 : index
    %c0_11 = arith.constant 0 : index
    %28 = vector.load %arg5[%c0_10, %c0_11] : memref<80x240xf32, #tpu.memory_space<vmem>>, vector<80x240xf32>
    %c1_i32_12 = arith.constant 1 : i32
    %29 = tpu.dynamic_rotate %27 by %c1_i32_12 dim 1 : vector<80x1024xf32>, i32 -> vector<80x1024xf32>
    %30 = vector.broadcast %4 : vector<1x1024xf32> to vector<80x1024xf32>
    %31 = arith.mulf %29, %30 : vector<80x1024xf32>
    %c1023_i32_13 = arith.constant 1023 : i32
    %32 = tpu.dynamic_rotate %27 by %c1023_i32_13 dim 1 : vector<80x1024xf32>, i32 -> vector<80x1024xf32>
    %33 = vector.broadcast %8 : vector<1x1024xf32> to vector<80x1024xf32>
    %34 = arith.mulf %32, %33 : vector<80x1024xf32>
    %35 = tpu.concatenate %31, %27, %34 in 0 : vector<80x1024xf32>, vector<80x1024xf32>, vector<80x1024xf32> -> vector<240x1024xf32>
    %cst_14 = arith.constant dense<0.000000e+00> : vector<80x1024xf32>
    %36 = tpu.matmul %28, %35, %cst_14 {dimension_numbers = #tpu.dot_dimension_numbers<[1], [0], [0], [1], [0, 0, 1, 1], [], []>} : vector<80x240xf32>, vector<240x1024xf32>, vector<80x1024xf32> -> vector<80x1024xf32>
    %c0_15 = arith.constant 0 : index
    %c0_16 = arith.constant 0 : index
    %37 = vector.load %arg6[%c0_15, %c0_16] : memref<80x1xf32, #tpu.memory_space<vmem>>, vector<80x1xf32>
    %38 = vector.broadcast %37 : vector<80x1xf32> to vector<80x1024xf32>
    %39 = arith.mulf %36, %38 : vector<80x1024xf32>
    %c0_17 = arith.constant 0 : index
    %c0_18 = arith.constant 0 : index
    %40 = vector.load %arg7[%c0_17, %c0_18] : memref<80x1xf32, #tpu.memory_space<vmem>>, vector<80x1xf32>
    %41 = vector.broadcast %40 : vector<80x1xf32> to vector<80x1024xf32>
    %42 = arith.addf %39, %41 : vector<80x1024xf32>
    %cst_19 = arith.constant 0.000000e+00 : f32
    %43 = vector.broadcast %cst_19 : f32 to vector<80x1024xf32>
    %44 = arith.maximumf %42, %43 : vector<80x1024xf32>
    %45 = vector.shape_cast %44 : vector<80x1024xf32> to vector<10x8x1024xf32>
    %cst_20 = arith.constant dense<0.000000e+00> : vector<8x1024xf32>
    %46 = vector.multi_reduction <add>, %45, %cst_20 [0] : vector<10x8x1024xf32> to vector<8x1024xf32>
    %cst_21 = arith.constant 1.000000e+01 : f32
    %47 = vector.broadcast %cst_21 : f32 to vector<8x1024xf32>
    %48 = arith.divf %46, %47 : vector<8x1024xf32>
    %49 = arith.truncf %48 : vector<8x1024xf32> to vector<8x1024xbf16>
    %c0_22 = arith.constant 0 : index
    %c0_23 = arith.constant 0 : index
    %50 = vector.load %arg8[%c0_22, %c0_23] : memref<1024x64xbf16, #tpu.memory_space<vmem>>, vector<1024x64xbf16>
    %cst_24 = arith.constant dense<0.000000e+00> : vector<8x64xf32>
    %51 = tpu.matmul %49, %50, %cst_24 {dimension_numbers = #tpu.dot_dimension_numbers<[1], [0], [0], [1], [0, 0, 1, 1], [], []>} : vector<8x1024xbf16>, vector<1024x64xbf16>, vector<8x64xf32> -> vector<8x64xf32>
    %cst_25 = arith.constant 0.000000e+00 : f32
    %52 = vector.broadcast %cst_25 : f32 to vector<8x64xf32>
    %53 = arith.maximumf %51, %52 : vector<8x64xf32>
    %54 = arith.truncf %53 : vector<8x64xf32> to vector<8x64xbf16>
    %c0_26 = arith.constant 0 : index
    %c0_27 = arith.constant 0 : index
    %55 = vector.load %arg9[%c0_26, %c0_27] : memref<64x1024xbf16, #tpu.memory_space<vmem>>, vector<64x1024xbf16>
    %cst_28 = arith.constant dense<0.000000e+00> : vector<8x1024xf32>
    %56 = tpu.matmul %54, %55, %cst_28 {dimension_numbers = #tpu.dot_dimension_numbers<[1], [0], [0], [1], [0, 0, 1, 1], [], []>} : vector<8x64xbf16>, vector<64x1024xbf16>, vector<8x1024xf32> -> vector<8x1024xf32>
    %57 = arith.negf %56 : vector<8x1024xf32>
    %58 = math.exp %57 : vector<8x1024xf32>
    %cst_29 = arith.constant 1.000000e+00 : f32
    %59 = vector.broadcast %cst_29 : f32 to vector<8x1024xf32>
    %60 = arith.addf %59, %58 : vector<8x1024xf32>
    %61 = arith.divf %59, %60 : vector<8x1024xf32>
    %62 = vector.shape_cast %61 : vector<8x1024xf32> to vector<1x8x1024xf32>
    %63 = vector.broadcast %62 : vector<1x8x1024xf32> to vector<10x8x1024xf32>
    %64 = arith.mulf %45, %63 : vector<10x8x1024xf32>
    %cst_30 = arith.constant dense<0xFF800000> : vector<10x8xf32>
    %65 = vector.multi_reduction <maximumf>, %64, %cst_30 [2] : vector<10x8x1024xf32> to vector<10x8xf32>
    %cst_31 = arith.constant dense<0.000000e+00> : vector<10x8xf32>
    %66 = vector.multi_reduction <add>, %64, %cst_31 [2] : vector<10x8x1024xf32> to vector<10x8xf32>
    %cst_32 = arith.constant 1.024000e+03 : f32
    %67 = vector.broadcast %cst_32 : f32 to vector<10x8xf32>
    %68 = arith.divf %66, %67 : vector<10x8xf32>
    %c0_33 = arith.constant 0 : index
    %c0_34 = arith.constant 0 : index
    %69 = vector.load %arg10[%c0_33, %c0_34] : memref<10x1xf32, #tpu.memory_space<vmem>>, vector<10x1xf32>
    %70 = vector.broadcast %69 : vector<10x1xf32> to vector<10x8xf32>
    %71 = arith.mulf %70, %65 : vector<10x8xf32>
    %cst_35 = arith.constant dense<0.000000e+00> : vector<8xf32>
    %72 = vector.multi_reduction <add>, %71, %cst_35 [0] : vector<10x8xf32> to vector<8xf32>
    %73 = vector.shape_cast %72 : vector<8xf32> to vector<1x8xf32>
    %cst_36 = arith.constant 0.000000e+00 : f32
    %74 = vector.broadcast %cst_36 : f32 to vector<1x8xf32>
    %75 = arith.maximumf %73, %74 : vector<1x8xf32>
    %76 = vector.broadcast %69 : vector<10x1xf32> to vector<10x8xf32>
    %77 = arith.mulf %76, %68 : vector<10x8xf32>
    %cst_37 = arith.constant dense<0.000000e+00> : vector<8xf32>
    %78 = vector.multi_reduction <add>, %77, %cst_37 [0] : vector<10x8xf32> to vector<8xf32>
    %79 = vector.shape_cast %78 : vector<8xf32> to vector<1x8xf32>
    %cst_38 = arith.constant 0.000000e+00 : f32
    %80 = vector.broadcast %cst_38 : f32 to vector<1x8xf32>
    %81 = arith.maximumf %79, %80 : vector<1x8xf32>
    %c0_39 = arith.constant 0 : index
    %c0_40 = arith.constant 0 : index
    %82 = vector.load %arg11[%c0_39, %c0_40] : memref<10x1xf32, #tpu.memory_space<vmem>>, vector<10x1xf32>
    %83 = arith.addf %75, %81 : vector<1x8xf32>
    %84 = vector.broadcast %82 : vector<10x1xf32> to vector<10x8xf32>
    %85 = vector.broadcast %83 : vector<1x8xf32> to vector<10x8xf32>
    %86 = arith.mulf %84, %85 : vector<10x8xf32>
    %87 = arith.negf %86 : vector<10x8xf32>
    %88 = math.exp %87 : vector<10x8xf32>
    %cst_41 = arith.constant 1.000000e+00 : f32
    %89 = vector.broadcast %cst_41 : f32 to vector<10x8xf32>
    %90 = arith.addf %89, %88 : vector<10x8xf32>
    %91 = arith.divf %89, %90 : vector<10x8xf32>
    %92 = vector.shape_cast %91 : vector<10x8xf32> to vector<10x8x1xf32>
    %93 = vector.broadcast %92 : vector<10x8x1xf32> to vector<10x8x1024xf32>
    %94 = arith.mulf %64, %93 : vector<10x8x1024xf32>
    %cst_42 = arith.constant dense<0xFF800000> : vector<8x1024xf32>
    %95 = vector.multi_reduction <maximumf>, %94, %cst_42 [0] : vector<10x8x1024xf32> to vector<8x1024xf32>
    %cst_43 = arith.constant dense<0.000000e+00> : vector<8x1024xf32>
    %96 = vector.multi_reduction <add>, %94, %cst_43 [0] : vector<10x8x1024xf32> to vector<8x1024xf32>
    %cst_44 = arith.constant 1.000000e+01 : f32
    %97 = vector.broadcast %cst_44 : f32 to vector<8x1024xf32>
    %98 = arith.divf %96, %97 : vector<8x1024xf32>
    %c2 = arith.constant 2 : index
    %99 = memref.load %arg12[%c2] : memref<7xf32, #tpu.memory_space<smem>>
    %100 = vector.broadcast %99 : f32 to vector<8x1024xf32>
    %101 = arith.mulf %100, %95 : vector<8x1024xf32>
    %c3 = arith.constant 3 : index
    %102 = memref.load %arg12[%c3] : memref<7xf32, #tpu.memory_space<smem>>
    %103 = vector.broadcast %102 : f32 to vector<8x1024xf32>
    %104 = arith.mulf %103, %98 : vector<8x1024xf32>
    %105 = arith.addf %101, %104 : vector<8x1024xf32>
    %c0_45 = arith.constant 0 : index
    %106 = memref.load %arg12[%c0_45] : memref<7xf32, #tpu.memory_space<smem>>
    %c1_i32_46 = arith.constant 1 : i32
    %107 = tpu.dynamic_rotate %95 by %c1_i32_46 dim 1 : vector<8x1024xf32>, i32 -> vector<8x1024xf32>
    %108 = vector.broadcast %4 : vector<1x1024xf32> to vector<8x1024xf32>
    %109 = arith.mulf %107, %108 : vector<8x1024xf32>
    %110 = vector.broadcast %106 : f32 to vector<8x1024xf32>
    %111 = arith.mulf %110, %109 : vector<8x1024xf32>
    %112 = arith.addf %105, %111 : vector<8x1024xf32>
    %c1 = arith.constant 1 : index
    %113 = memref.load %arg12[%c1] : memref<7xf32, #tpu.memory_space<smem>>
    %c1_i32_47 = arith.constant 1 : i32
    %114 = tpu.dynamic_rotate %98 by %c1_i32_47 dim 1 : vector<8x1024xf32>, i32 -> vector<8x1024xf32>
    %115 = vector.broadcast %4 : vector<1x1024xf32> to vector<8x1024xf32>
    %116 = arith.mulf %114, %115 : vector<8x1024xf32>
    %117 = vector.broadcast %113 : f32 to vector<8x1024xf32>
    %118 = arith.mulf %117, %116 : vector<8x1024xf32>
    %119 = arith.addf %112, %118 : vector<8x1024xf32>
    %c4 = arith.constant 4 : index
    %120 = memref.load %arg12[%c4] : memref<7xf32, #tpu.memory_space<smem>>
    %c1023_i32_48 = arith.constant 1023 : i32
    %121 = tpu.dynamic_rotate %95 by %c1023_i32_48 dim 1 : vector<8x1024xf32>, i32 -> vector<8x1024xf32>
    %122 = vector.broadcast %8 : vector<1x1024xf32> to vector<8x1024xf32>
    %123 = arith.mulf %121, %122 : vector<8x1024xf32>
    %124 = vector.broadcast %120 : f32 to vector<8x1024xf32>
    %125 = arith.mulf %124, %123 : vector<8x1024xf32>
    %126 = arith.addf %119, %125 : vector<8x1024xf32>
    %c5 = arith.constant 5 : index
    %127 = memref.load %arg12[%c5] : memref<7xf32, #tpu.memory_space<smem>>
    %c1023_i32_49 = arith.constant 1023 : i32
    %128 = tpu.dynamic_rotate %98 by %c1023_i32_49 dim 1 : vector<8x1024xf32>, i32 -> vector<8x1024xf32>
    %129 = vector.broadcast %8 : vector<1x1024xf32> to vector<8x1024xf32>
    %130 = arith.mulf %128, %129 : vector<8x1024xf32>
    %131 = vector.broadcast %127 : f32 to vector<8x1024xf32>
    %132 = arith.mulf %131, %130 : vector<8x1024xf32>
    %133 = arith.addf %126, %132 : vector<8x1024xf32>
    %c6 = arith.constant 6 : index
    %134 = memref.load %arg12[%c6] : memref<7xf32, #tpu.memory_space<smem>>
    %135 = vector.broadcast %134 : f32 to vector<8x1024xf32>
    %136 = arith.addf %133, %135 : vector<8x1024xf32>
    %137 = arith.negf %136 : vector<8x1024xf32>
    %138 = math.exp %137 : vector<8x1024xf32>
    %cst_50 = arith.constant 1.000000e+00 : f32
    %139 = vector.broadcast %cst_50 : f32 to vector<8x1024xf32>
    %140 = arith.addf %139, %138 : vector<8x1024xf32>
    %141 = arith.divf %139, %140 : vector<8x1024xf32>
    %142 = vector.shape_cast %141 : vector<8x1024xf32> to vector<1x8x1024xf32>
    %143 = vector.broadcast %142 : vector<1x8x1024xf32> to vector<10x8x1024xf32>
    %144 = arith.mulf %94, %143 : vector<10x8x1024xf32>
    %145 = arith.addf %144, %64 : vector<10x8x1024xf32>
    %146 = vector.shape_cast %145 : vector<10x8x1024xf32> to vector<80x1024xf32>
    %147 = arith.truncf %146 : vector<80x1024xf32> to vector<80x1024xbf16>
    %c0_51 = arith.constant 0 : index
    %c0_52 = arith.constant 0 : index
    %148 = vector.load %arg13[%c0_51, %c0_52] : memref<1024x256xbf16, #tpu.memory_space<vmem>>, vector<1024x256xbf16>
    %cst_53 = arith.constant dense<0.000000e+00> : vector<80x256xf32>
    %149 = tpu.matmul %147, %148, %cst_53 {dimension_numbers = #tpu.dot_dimension_numbers<[1], [0], [0], [1], [0, 0, 1, 1], [], []>} : vector<80x1024xbf16>, vector<1024x256xbf16>, vector<80x256xf32> -> vector<80x256xf32>
    %c0_54 = arith.constant 0 : index
    %c0_55 = arith.constant 0 : index
    %150 = vector.load %arg14[%c0_54, %c0_55] : memref<1x256xf32, #tpu.memory_space<vmem>>, vector<1x256xf32>
    %151 = vector.broadcast %150 : vector<1x256xf32> to vector<80x256xf32>
    %152 = arith.addf %149, %151 : vector<80x256xf32>
    %cst_56 = arith.constant 0.000000e+00 : f32
    %153 = vector.broadcast %cst_56 : f32 to vector<80x256xf32>
    %154 = arith.maximumf %152, %153 : vector<80x256xf32>
    %c0_57 = arith.constant 0 : index
    %c0_58 = arith.constant 0 : index
    %155 = vector.load %arg15[%c0_57, %c0_58] : memref<256x128xf32, #tpu.memory_space<vmem>>, vector<256x128xf32>
    %cst_59 = arith.constant dense<0.000000e+00> : vector<80x128xf32>
    %156 = tpu.matmul %154, %155, %cst_59 {dimension_numbers = #tpu.dot_dimension_numbers<[1], [0], [0], [1], [0, 0, 1, 1], [], []>} : vector<80x256xf32>, vector<256x128xf32>, vector<80x128xf32> -> vector<80x128xf32>
    %c0_60 = arith.constant 0 : index
    %c0_61 = arith.constant 0 : index
    %157 = vector.load %arg16[%c0_60, %c0_61] : memref<1x128xf32, #tpu.memory_space<vmem>>, vector<1x128xf32>
    %158 = vector.broadcast %157 : vector<1x128xf32> to vector<80x128xf32>
    %159 = arith.addf %156, %158 : vector<80x128xf32>
    %cst_62 = arith.constant 0.000000e+00 : f32
    %160 = vector.broadcast %cst_62 : f32 to vector<80x128xf32>
    %161 = arith.maximumf %159, %160 : vector<80x128xf32>
    %162 = vector.shape_cast %161 : vector<80x128xf32> to vector<10x8x128xf32>
    %c0_63 = arith.constant 0 : index
    %c0_64 = arith.constant 0 : index
    %c0_65 = arith.constant 0 : index
    %163 = vector.load %arg19[%c0_63, %c0_64, %c0_65] : memref<10x8x128xf32, #tpu.memory_space<vmem>>, vector<10x8x128xf32>
    tpu.vector_store %arg19[%c0_63, %c0_64, %c0_65], %162 {strides = array<i32>} : memref<10x8x128xf32, #tpu.memory_space<vmem>>, vector<10x8x128xf32>,
    %cst_66 = arith.constant dense<0.000000e+00> : vector<8x128xf32>
    %164 = vector.multi_reduction <add>, %162, %cst_66 [0] : vector<10x8x128xf32> to vector<8x128xf32>
    %cst_67 = arith.constant 1.000000e+01 : f32
    %165 = vector.broadcast %cst_67 : f32 to vector<8x128xf32>
    %166 = arith.divf %164, %165 : vector<8x128xf32>
    %c0_68 = arith.constant 0 : index
    %c0_69 = arith.constant 0 : index
    %167 = vector.load %arg17[%c0_68, %c0_69] : memref<128x128xf32, #tpu.memory_space<vmem>>, vector<128x128xf32>
    %cst_70 = arith.constant dense<0.000000e+00> : vector<8x128xf32>
    %168 = tpu.matmul %166, %167, %cst_70 {dimension_numbers = #tpu.dot_dimension_numbers<[1], [0], [0], [1], [0, 0, 1, 1], [], []>} : vector<8x128xf32>, vector<128x128xf32>, vector<8x128xf32> -> vector<8x128xf32>
    %c0_71 = arith.constant 0 : index
    %c0_72 = arith.constant 0 : index
    %169 = vector.load %arg18[%c0_71, %c0_72] : memref<1x128xf32, #tpu.memory_space<vmem>>, vector<1x128xf32>
    %170 = vector.broadcast %169 : vector<1x128xf32> to vector<8x128xf32>
    %171 = arith.addf %168, %170 : vector<8x128xf32>
    %172 = tpu.iota {dimensions = array<i32: 1>} : vector<1x128xi32>
    %c0_i32_73 = arith.constant 0 : i32
    %173 = vector.broadcast %c0_i32_73 : i32 to vector<1x128xi32>
    %174 = arith.cmpi eq, %172, %173 : vector<1x128xi32>
    %c1_i32_74 = arith.constant 1 : i32
    %175 = vector.broadcast %c1_i32_74 : i32 to vector<1x128xi32>
    %176 = arith.cmpi sge, %172, %175 : vector<1x128xi32>
    %c58_i32 = arith.constant 58 : i32
    %177 = vector.broadcast %c58_i32 : i32 to vector<1x128xi32>
    %178 = arith.cmpi sle, %172, %177 : vector<1x128xi32>
    %179 = arith.andi %176, %178 : vector<1x128xi1>
    %cst_75 = arith.constant -1.000000e+30 : f32
    %180 = vector.shape_cast %179 : vector<1x128xi1> to vector<1x128xi1>
    %181 = vector.broadcast %180 : vector<1x128xi1> to vector<8x128xi1>
    %182 = vector.broadcast %cst_75 : f32 to vector<8x128xf32>
    %183 = arith.select %181, %171, %182 : vector<8x128xi1>, vector<8x128xf32>
    %cst_76 = arith.constant dense<0xFF800000> : vector<8xf32>
    %184 = vector.multi_reduction <maximumf>, %183, %cst_76 [1] : vector<8x128xf32> to vector<8xf32>
    %185 = vector.shape_cast %184 : vector<8xf32> to vector<8x1xf32>
    %186 = vector.broadcast %185 : vector<8x1xf32> to vector<8x128xf32>
    %187 = arith.subf %183, %186 : vector<8x128xf32>
    %188 = math.exp %187 : vector<8x128xf32>
    %cst_77 = arith.constant dense<0.000000e+00> : vector<8xf32>
    %189 = vector.multi_reduction <add>, %188, %cst_77 [1] : vector<8x128xf32> to vector<8xf32>
    %190 = vector.shape_cast %189 : vector<8xf32> to vector<8x1xf32>
    %191 = tpu.reciprocal %190 {approx = true} : vector<8x1xf32> -> vector<8x1xf32>
    %192 = vector.broadcast %191 : vector<8x1xf32> to vector<8x128xf32>
    %193 = arith.mulf %188, %192 : vector<8x128xf32>
    %cst_78 = arith.constant 0.000000e+00 : f32
    %194 = vector.shape_cast %174 : vector<1x128xi1> to vector<1x128xi1>
    %195 = vector.broadcast %194 : vector<1x128xi1> to vector<8x128xi1>
    %196 = vector.broadcast %cst_78 : f32 to vector<8x128xf32>
    %197 = arith.select %195, %171, %196 : vector<8x128xi1>, vector<8x128xf32>
    %198 = arith.addf %197, %193 : vector<8x128xf32>
    %c0_79 = arith.constant 0 : index
    %c0_80 = arith.constant 0 : index
    %199 = vector.load %arg20[%c0_79, %c0_80] : memref<8x128xf32, #tpu.memory_space<vmem>>, vector<8x128xf32>
    tpu.vector_store %arg20[%c0_79, %c0_80], %198 {strides = array<i32>} : memref<8x128xf32, #tpu.memory_space<vmem>>, vector<8x128xf32>,
    return
  }
  func.func @transform_0(%arg0: i32) -> (i32, i32, i32) {
    %c0_i32 = arith.constant 0 : i32
    %c0_i32_0 = arith.constant 0 : i32
    %c0_i32_1 = arith.constant 0 : i32
    return %c0_i32, %arg0, %c0_i32_0 : i32, i32, i32
  }
  func.func @transform_1(%arg0: i32) -> (i32, i32) {
    %c0_i32 = arith.constant 0 : i32
    %c0_i32_0 = arith.constant 0 : i32
    %c0_i32_1 = arith.constant 0 : i32
    return %c0_i32, %c0_i32_0 : i32, i32
  }
  func.func @transform_2(%arg0: i32) -> (i32, i32) {
    %c0_i32 = arith.constant 0 : i32
    %c0_i32_0 = arith.constant 0 : i32
    %c0_i32_1 = arith.constant 0 : i32
    return %c0_i32, %c0_i32_0 : i32, i32
  }
  func.func @transform_3(%arg0: i32) -> (i32, i32) {
    %c0_i32 = arith.constant 0 : i32
    %c0_i32_0 = arith.constant 0 : i32
    %c0_i32_1 = arith.constant 0 : i32
    return %c0_i32, %c0_i32_0 : i32, i32
  }
  func.func @transform_4(%arg0: i32) -> (i32, i32) {
    %c0_i32 = arith.constant 0 : i32
    %c0_i32_0 = arith.constant 0 : i32
    %c0_i32_1 = arith.constant 0 : i32
    return %c0_i32, %c0_i32_0 : i32, i32
  }
  func.func @transform_5(%arg0: i32) -> (i32, i32) {
    %c0_i32 = arith.constant 0 : i32
    %c0_i32_0 = arith.constant 0 : i32
    %c0_i32_1 = arith.constant 0 : i32
    return %c0_i32, %c0_i32_0 : i32, i32
  }
  func.func @transform_6(%arg0: i32) -> (i32, i32) {
    %c0_i32 = arith.constant 0 : i32
    %c0_i32_0 = arith.constant 0 : i32
    %c0_i32_1 = arith.constant 0 : i32
    return %c0_i32, %c0_i32_0 : i32, i32
  }
  func.func @transform_7(%arg0: i32) -> (i32, i32) {
    %c0_i32 = arith.constant 0 : i32
    %c0_i32_0 = arith.constant 0 : i32
    %c0_i32_1 = arith.constant 0 : i32
    return %c0_i32, %c0_i32_0 : i32, i32
  }
  func.func @transform_8(%arg0: i32) -> (i32, i32) {
    %c0_i32 = arith.constant 0 : i32
    %c0_i32_0 = arith.constant 0 : i32
    %c0_i32_1 = arith.constant 0 : i32
    return %c0_i32, %c0_i32_0 : i32, i32
  }
  func.func @transform_9(%arg0: i32) -> (i32, i32) {
    %c0_i32 = arith.constant 0 : i32
    %c0_i32_0 = arith.constant 0 : i32
    %c0_i32_1 = arith.constant 0 : i32
    return %c0_i32, %c0_i32_0 : i32, i32
  }
  func.func @transform_10(%arg0: i32) -> (i32, i32) {
    %c0_i32 = arith.constant 0 : i32
    %c0_i32_0 = arith.constant 0 : i32
    %c0_i32_1 = arith.constant 0 : i32
    return %c0_i32, %c0_i32_0 : i32, i32
  }
  func.func @transform_11(%arg0: i32) -> i32 {
    %c0_i32 = arith.constant 0 : i32
    %c0_i32_0 = arith.constant 0 : i32
    return %c0_i32 : i32
  }
  func.func @transform_12(%arg0: i32) -> (i32, i32) {
    %c0_i32 = arith.constant 0 : i32
    %c0_i32_0 = arith.constant 0 : i32
    %c0_i32_1 = arith.constant 0 : i32
    return %c0_i32, %c0_i32_0 : i32, i32
  }
  func.func @transform_13(%arg0: i32) -> (i32, i32) {
    %c0_i32 = arith.constant 0 : i32
    %c0_i32_0 = arith.constant 0 : i32
    %c0_i32_1 = arith.constant 0 : i32
    return %c0_i32, %c0_i32_0 : i32, i32
  }
  func.func @transform_14(%arg0: i32) -> (i32, i32) {
    %c0_i32 = arith.constant 0 : i32
    %c0_i32_0 = arith.constant 0 : i32
    %c0_i32_1 = arith.constant 0 : i32
    return %c0_i32, %c0_i32_0 : i32, i32
  }
  func.func @transform_15(%arg0: i32) -> (i32, i32) {
    %c0_i32 = arith.constant 0 : i32
    %c0_i32_0 = arith.constant 0 : i32
    %c0_i32_1 = arith.constant 0 : i32
    return %c0_i32, %c0_i32_0 : i32, i32
  }
  func.func @transform_16(%arg0: i32) -> (i32, i32) {
    %c0_i32 = arith.constant 0 : i32
    %c0_i32_0 = arith.constant 0 : i32
    %c0_i32_1 = arith.constant 0 : i32
    return %c0_i32, %c0_i32_0 : i32, i32
  }
  func.func @transform_17(%arg0: i32) -> (i32, i32) {
    %c0_i32 = arith.constant 0 : i32
    %c0_i32_0 = arith.constant 0 : i32
    %c0_i32_1 = arith.constant 0 : i32
    return %c0_i32, %c0_i32_0 : i32, i32
  }
  func.func @transform_18(%arg0: i32) -> (i32, i32, i32) {
    %c0_i32 = arith.constant 0 : i32
    %c0_i32_0 = arith.constant 0 : i32
    %c0_i32_1 = arith.constant 0 : i32
    return %c0_i32, %arg0, %c0_i32_0 : i32, i32, i32
  }
  func.func @transform_19(%arg0: i32) -> (i32, i32) {
    %c0_i32 = arith.constant 0 : i32
    %c0_i32_0 = arith.constant 0 : i32
    return %arg0, %c0_i32 : i32, i32
  }
}

</mosaic_0001>

<bundles_post_ra>
// kernel: _taa_call.1
= control target key start
LH: loop header
LB: loop body
LE: loop exit
PB: predicated region body
PF: predicated region fallthrough
CT: control target
= control target key end

     0   :  { %s18063_s0 = inlined_call_operand.vmem [shape: f32[8,8,1024], index: 0, kind: input, shape index: {}]   ;;  %s18064_s1 = inlined_call_operand.hbm [shape: f32[80,192], index: 1, kind: input, shape index: {}]   ;;  %s18065_s2 = inlined_call_operand.vmem [shape: f32[80,1], index: 2, kind: input, shape index: {}]   ;;  %s18066_s3 = inlined_call_operand.vmem [shape: f32[80,1], index: 3, kind: input, shape index: {}]   ;;  %s18067_s4 = inlined_call_operand.hbm [shape: f32[80,240], index: 4, kind: input, shape index: {}]   ;;  %s18068_s5 = inlined_call_operand.vmem [shape: f32[80,1], index: 5, kind: input, shape index: {}]   ;;  %s18069_s6 = inlined_call_operand.vmem [shape: f32[80,1], index: 6, kind: input, shape index: {}]   ;;  %s18070_s7 = inlined_call_operand.vmem [shape: bf16[1024,64], index: 7, kind: input, shape index: {}]   ;;  %s18071_s8 = inlined_call_operand.vmem [shape: bf16[64,1024], index: 8, kind: input, shape index: {}]   ;;  %s18072_s9 = inlined_call_operand.vmem [shape: f32[10,1], index: 9, kind: input, shape index: {}]   ;;  %s18073_s10 = inlined_call_operand.vmem [shape: f32[10,1], index: 10, kind: input, shape index: {}]   ;;  %s18074_s11 = inlined_call_operand.vmem [shape: f32[7], index: 11, kind: input, shape index: {}]   ;;  %s18075_s12 = inlined_call_operand.hbm [shape: bf16[1024,256], index: 12, kind: input, shape index: {}]   ;;  %s18076_s13 = inlined_call_operand.vmem [shape: f32[1,256], index: 13, kind: input, shape index: {}]   ;;  %s18077_s14 = inlined_call_operand.hbm [shape: f32[256,128], index: 14, kind: input, shape index: {}]   ;;  %s18078_s15 = inlined_call_operand.vmem [shape: f32[1,128], index: 15, kind: input, shape index: {}]   ;;  %s18079_s16 = inlined_call_operand.hbm [shape: f32[128,128], index: 16, kind: input, shape index: {}]   ;;  %s18080_s17 = inlined_call_operand.vmem [shape: f32[1,128], index: 17, kind: input, shape index: {}]   ;;  %s18081_s18 = inlined_call_operand.hbm [shape: f32[10,8,128], index: 18, kind: output, shape index: {0}]   ;;  %s18082_s19 = inlined_call_operand.hbm [shape: f32[8,128], index: 19, kind: output, shape index: {1}]  }
   0x1   :  { %18670 = sst [smem:[#allocation175_spill]] %s18063_s0 }
   0x2   :  { %18671 = sst [smem:[#allocation176_spill]] %s18064_s1 }
   0x3   :  { %18672 = sst [smem:[#allocation177_spill]] %s18065_s2 }
   0x4   :  { %18673 = sst [smem:[#allocation178_spill]] %s18066_s3 }
   0x5   :  { %18674 = sst [smem:[#allocation179_spill]] %s18082_s19 }
   0x6   :  { %25 = vsyncpa [#allocation3], 0 }
   0x7   :  { %26 = vsyncpa [#allocation7], 0 }
   0x8   :  { %27 = vsyncpa [#allocation5], 0 }
   0x9   :  { %28 = vsyncpa [#allocation11], 0 }
   0xa   :  { %29 = vsyncpa [#allocation4], 0 }
   0xb   :  { %30 = vsyncpa [#allocation15], 0  ;;  %s54_s20 = sshll.u32 %s18067_s4, 4  ;;  %s10062_s21 = smov [#allocation6]   ;;  %s55_s20 = int_to_ptr.hbm [resolvable:$true] %s54_s20 }
   0xc   :  { %s56_s1 = sshll.u32 %s10062_s21, 4  ;;  %s10063_s22 = smov 256   ;;  %s57_s1 = int_to_ptr.vmem [resolvable:$true] %s56_s1 }
   0xd   :  { %s10064_s2 = smov 16   ;;  %s103_s25 = sshll.u32 %s18077_s14, 4  ;;  %s104_s25 = int_to_ptr.hbm [resolvable:$true] %s103_s25 }
   0xe   :  { %62 = dma.hbm_to_vmem [thread:$0]  %s55_s20, 2560, %s57_s1, [#allocation7], %s10063_s22, %s10063_s22, %s10064_s2  }
   0xf   :  { %s10065_s3 = smov [#allocation10]   ;;  %s18675_s29 = sld [smem:[#allocation176_spill]] }
  0x10   :  { %s105_s26 = sshll.u32 %s10065_s3, 4  ;;  %s10066_s4 = smov 128   ;;  %s106_s26 = int_to_ptr.vmem [resolvable:$true] %s105_s26 }
  0x11   :  { %s10067_s0 = smov 8   ;;  %s80_s21 = sshll.u32 %s18074_s11, 4  ;;  %s81_s21 = int_to_ptr.vmem [resolvable:$true] %s80_s21 }
  0x12   :  { %111 = dma.hbm_to_vmem [thread:$0]  %s104_s25, 4096, %s106_s26, [#allocation11], %s10066_s4, %s10066_s4, %s10067_s0  }
  0x13   :  { %s10068_s14 = smov [#allocation2]   ;;  %s10069_s23 = smov [#allocation8]  }
  0x14   :  { %s39_s1 = sshll.u32 %s10068_s14, 4  ;;  %s88_s27 = sshll.u32 %s18075_s12, 4  ;;  %s40_s1 = int_to_ptr.vmem [resolvable:$true] %s39_s1  ;;  %s89_s27 = int_to_ptr.hbm [resolvable:$true] %s88_s27 }
  0x15   :  { %s37_s19 = sshll.u32 %s18675_s29, 4  ;;  %s10070_s28 = smov [#allocation9]   ;;  %s38_s19 = int_to_ptr.hbm [resolvable:$true] %s37_s19 }
  0x16   :  { %45 = dma.hbm_to_vmem [thread:$0]  %s38_s19, 2560, %s40_s1, [#allocation3], %s10063_s22, %s10063_s22, %s10064_s2  }
  0x17   :  { %83 = dma.vmem_to_smem %s81_s21, 16, %s10069_s23, [#allocation5]  }
  0x18   :  { %s90_s29 = sshll.u32 %s10070_s28, 4  ;;  %s118_s30 = sshll.u32 %s18079_s16, 4  ;;  %s91_s29 = int_to_ptr.vmem [resolvable:$true] %s90_s29  ;;  %s119_s30 = int_to_ptr.hbm [resolvable:$true] %s118_s30 }
  0x19   :  { %96 = dma.hbm_to_vmem [thread:$0]  %s89_s27, 16384, %s91_s29, [#allocation7], %s10066_s4, %s10066_s4, %s10067_s0  }
  0x1a   :  { %s10071_s11 = smov [#allocation12]  }
  0x1b   :  { %s120_s19 = sshll.u32 %s10071_s11, 4  ;;  %s121_s19 = int_to_ptr.vmem [resolvable:$true] %s120_s19 }
  0x1c   :  { %126 = dma.hbm_to_vmem [thread:$0]  %s119_s30, 2048, %s121_s19, [#allocation11], %s10066_s4, %s10066_s4, %s10067_s0  }
  0x1d   :  { %10048 = dma.done.wait [#allocation3], 2560  }
  0x1e   :  { %10049 = vsyncadd [#allocation3], 4294964736 }
  0x1f   :  { %10050 = dma.done.wait [#allocation7], 2560  }
  0x20   :  { %10051 = vsyncadd [#allocation7], 4294964736 }
  0x21   :  { %10052 = dma.done.wait [#allocation5], 16  }
  0x22   :  { %10053 = vsyncadd [#allocation5], 4294967280 }
  0x23   :  { %10054 = dma.done.wait [#allocation7], 16384  }
  0x24   :  { %10055 = vsyncadd [#allocation7], 4294950912 }
  0x25   :  { %10056 = dma.done.wait [#allocation11], 6144  }
  0x26   :  { %10057 = vsyncadd [#allocation11], 4294961152 }
  0x27   :  { %153 = sfence }
  0x28   :  { %s18676_s22 = sld [smem:[#allocation175_spill]]  ;;  %s10072_s1 = smov 1   ;;  %vm810_vm3 = vcmask 523264   ;;  %vm2613_vm5 = vcmask 916480  }
  0x29   :  { %s10073_s27 = smov 127   ;;  %s18707_s19 = sld [smem:[#allocation177_spill]] }
  0x2a   :  { %s18708_s2 = sld [smem:[#allocation178_spill]]  ;;  %s7812_s26 = sshll.u32 %s18081_s18, 4  ;;  %s7813_s26 = int_to_ptr.hbm [resolvable:$true] %s7812_s26 }
  0x2b   :  { %s8410_s24 = sld [smem:[#allocation8 + $0x1]] }
  0x2c   :  { %s8412_s3 = sld [smem:[#allocation8 + $0x5]] }
  0x2d   :  { %s19916_s12 = sld [smem:[#allocation179_spill]] }
  0x2e   :  { %v10210_v0 = vld [vmem:[%s18676_s22 + $0x1c0] sm:$0xff]  ;;  %v10220_v2 = vld [vmem:[%s18676_s22 + $0x108] sm:$0xff]  ;;  %v10269_v10 = vld [vmem:[%s18676_s22 + $0x1f8] sm:$0xff] }
  0x2f   :  { %v10215_v1 = vld [vmem:[%s18676_s22 + $0x180] sm:$0xff]  ;;  %310 = vrot.lane.b32.xlu0 %v10210_v0, %s10072_s1  ;;  %v10229_v3 = vld [vmem:[%s18676_s22 + $0x148] sm:$0xff]  ;;  %841 = vmatpush.msra.mxu0 %v10210_v0  ;;  %v10300_v15 = vld [vmem:[%s18676_s22 + $0x1b8] sm:$0xff] }
  0x30   :  { %308 = vrot.lane.b32.xlu1 %v10215_v1, %s10072_s1  ;;  %v9181_v4 = vpack.i.bf16 %v10220_v2, %v10229_v3  ;;  %v10236_v5 = vld [vmem:[%s18676_s22 + $0x188] sm:$0xff]  ;;  %v10252_v8 = vld [vmem:[%s18676_s22 + $0x140] sm:$0xff]  ;;  %v10338_v21 = vld [vmem:[%s18676_s22 + $0x178] sm:$0xff] }
  0x31   :  { %v10241_v6 = vld [vmem:[%s18676_s22 + $0x1c8] sm:$0xff]  ;;  %842 = vmatpush.msra.mxu0 %v10215_v1  ;;  %v10259_v9 = vld [vmem:[%s18676_s22 + $0x100] sm:$0xff]  ;;  %v10348_v22 = vld [vmem:[%s18676_s22 + $0x138] sm:$0xff] }
  0x32   :  { %935 = vmatpush.msra.mxu2 %v10241_v6  ;;  %9182 = vrot.lane.b32.xlu2 %v9181_v4, %s10072_s1  ;;  %v9176_v7 = vpack.i.bf16 %v10236_v5, %v10241_v6  ;;  %v10274_v11 = vld [vmem:[%s18676_s22 + $0xc0] sm:$0xff]  ;;  %v10288_v13 = vld [vmem:[%s18676_s22 + $0xc8] sm:$0xff]  ;;  %v10360_v24 = vld [vmem:[%s18676_s22 + $0xf8] sm:$0xff] }
  0x33   :  { %843 = vmatpush.msra.mxu0 %v10252_v8  ;;  %v10281_v12 = vld [vmem:[%s18676_s22 + $0x80] sm:$0xff]  ;;  %v10305_v16 = vld [vmem:[%s18676_s22 + $0x88] sm:$0xff]  ;;  %v10369_v25 = vld [vmem:[%s18676_s22 + $0xb8] sm:$0xff] }
  0x34   :  { %936 = vmatpush.msra.mxu2 %v10236_v5  ;;  %v10294_v14 = vld [vmem:[%s18676_s22 + $0x40] sm:$0xff]  ;;  %v10322_v18 = vld [vmem:[%s18676_s22 + $0x48] sm:$0xff]  ;;  %v9186_v20 = vpack.i.bf16 %v10305_v16, %v10288_v13  ;;  %v10376_v26 = vld [vmem:[%s18676_s22 + $0x1d8] sm:$0xff] }
  0x35   :  { %844 = vmatpush.msra.mxu0 %v10259_v9  ;;  %v10311_v17 = vld [vmem:[%s18676_s22] sm:$0xff]  ;;  %v10328_v19 = vld [vmem:[%s18676_s22 + $0x8] sm:$0xff]  ;;  %v10386_v28 = vld [vmem:[%s18676_s22 + $0x78] sm:$0xff] }
  0x36   :  { %937 = vmatpush.msra.mxu2 %v10229_v3  ;;  %v9191_v23 = vpack.i.bf16 %v10328_v19, %v10322_v18  ;;  %v10381_v27 = vld [vmem:[%s18676_s22 + $0x1e0] sm:$0xff]  ;;  %v10391_v29 = vld [vmem:[%s18676_s22 + $0x38] sm:$0xff]  ;;  %v10427_v37 = vld [vmem:[%s18676_s22 + $0x1d0] sm:$0xff] }
  0x37   :  { %9177 = vrot.lane.b32.xlu0 %v9176_v7, %s10072_s1  ;;  %845 = vmatpush.msra.mxu0 %v10274_v11  ;;  %v9196_v30 = vpack.i.bf16 %v10381_v27, %v10376_v26  ;;  %v10402_v31 = vld [vmem:[%s18676_s22 + $0x198] sm:$0xff]  ;;  %v10407_v32 = vld [vmem:[%s18676_s22 + $0x1a0] sm:$0xff]  ;;  %v9211_v38 = vpack.i.bf16 %v10376_v26, %v10427_v37  ;;  %v10446_v41 = vld [vmem:[%s18676_s22 + $0x190] sm:$0xff] }
  0x38   :  { %306 = vrot.lane.b32.xlu1 %v10252_v8, %s10072_s1  ;;  %938 = vmatpush.msra.mxu2 %v10220_v2  ;;  %v10412_v33 = vld [vmem:[%s18676_s22 + $0x158] sm:$0xff]  ;;  %v10417_v34 = vld [vmem:[%s18676_s22 + $0x160] sm:$0xff]  ;;  %v9201_v35 = vpack.i.bf16 %v10407_v32, %v10402_v31  ;;  %v9221_v43 = vpack.i.bf16 %v10402_v31, %v10446_v41  ;;  %v10470_v47 = vld [vmem:[%s18676_s22 + $0x150] sm:$0xff] }
  0x39   :  { %846 = vmatpush.msra.mxu0 %v10281_v12  ;;  %v9206_v36 = vpack.i.bf16 %v10417_v34, %v10412_v33  ;;  %v10436_v39 = vld [vmem:[%s18676_s22 + $0x118] sm:$0xff]  ;;  %v10441_v40 = vld [vmem:[%s18676_s22 + $0x120] sm:$0xff]  ;;  %v9231_v50 = vpack.i.bf16 %v10412_v33, %v10470_v47  ;;  %v10490_v52 = vld [vmem:[%s18676_s22 + $0x110] sm:$0xff] }
  0x3a   :  { %422 = vrot.lane.b32.xlu2 %v10269_v10, %s10072_s1  ;;  %939 = vmatpush.msra.mxu2 %v10288_v13  ;;  %v9216_v42 = vpack.i.bf16 %v10441_v40, %v10436_v39  ;;  %v10456_v44 = vld [vmem:[%s18676_s22 + $0xd8] sm:$0xff]  ;;  %v10461_v45 = vld [vmem:[%s18676_s22 + $0xe0] sm:$0xff]  ;;  %v9241_v53 = vpack.i.bf16 %v10436_v39, %v10490_v52  ;;  %v10509_v56 = vld [vmem:[%s18676_s22 + $0xd0] sm:$0xff] }
  0x3b   :  { %847 = vmatpush.msra.mxu0 %v10294_v14  ;;  %v9226_v46 = vpack.i.bf16 %v10461_v45, %v10456_v44  ;;  %v10475_v48 = vld [vmem:[%s18676_s22 + $0x98] sm:$0xff]  ;;  %v10480_v49 = vld [vmem:[%s18676_s22 + $0xa0] sm:$0xff]  ;;  %v9251_v58 = vpack.i.bf16 %v10456_v44, %v10509_v56  ;;  %v10533_v62 = vld [vmem:[%s18676_s22 + $0x90] sm:$0xff] }
  0x3c   :  { %940 = vmatpush.msra.mxu2 %v10305_v16  ;;  %v9236_v51 = vpack.i.bf16 %v10480_v49, %v10475_v48  ;;  %v10499_v54 = vld [vmem:[%s18676_s22 + $0x58] sm:$0xff]  ;;  %v10504_v55 = vld [vmem:[%s18676_s22 + $0x60] sm:$0xff]  ;;  %v10538_v63 = vld [vmem:[%s18676_s22 + $0x50] sm:$0xff]  ;;  %v9261_v4 = vpack.i.bf16 %v10475_v48, %v10533_v62 }
  0x3d   :  { %848 = vmatpush.msra.mxu0 %v10311_v17  ;;  %v9246_v57 = vpack.i.bf16 %v10504_v55, %v10499_v54  ;;  %v10519_v59 = vld [vmem:[%s18676_s22 + $0x18] sm:$0xff]  ;;  %v10524_v60 = vld [vmem:[%s18676_s22 + $0x20] sm:$0xff]  ;;  %18677 = vst [vmem:[#allocation23_spill] sm:$0xff] %v10538_v63  ;;  %v9266_v7 = vpack.i.bf16 %v10499_v54, %v10538_v63 }
  0x3e   :  { %941 = vmatpush.msra.mxu2 %v10322_v18  ;;  %v9256_v61 = vpack.i.bf16 %v10524_v60, %v10519_v59 }
  0x3f   :  { %304 = vrot.lane.b32.xlu0 %v10259_v9, %s10072_s1 }
  0x40   :  { %420 = vrot.lane.b32.xlu1 %v10300_v15, %s10072_s1  ;;  %942 = vmatpush.msra.mxu2 %v10328_v19 }
  0x42   :  { %302 = vrot.lane.b32.xlu2 %v10274_v11, %s10072_s1 }
  0x47   :  { %9187 = vrot.lane.b32.xlu0 %v9186_v20, %s10072_s1  ;;  %v10548_v20 = vld [vmem:[%s18676_s22 + $0x10] sm:$0xff] }
  0x48   :  { %418 = vrot.lane.b32.xlu1 %v10338_v21, %s10072_s1  ;;  %18678 = vst [vmem:[#allocation24_spill] sm:$0xff] %v10548_v20 }
  0x4a   :  { %300 = vrot.lane.b32.xlu2 %v10281_v12, %s10072_s1 }
  0x4f   :  { %416 = vrot.lane.b32.xlu0 %v10348_v22, %s10072_s1 }
  0x50   :  { %298 = vrot.lane.b32.xlu1 %v10294_v14, %s10072_s1 }
  0x52   :  { %9192 = vrot.lane.b32.xlu2 %v9191_v23, %s10072_s1  ;;  %v9271_v23 = vpack.i.bf16 %v10519_v59, %v10548_v20 }
  0x57   :  { %414 = vrot.lane.b32.xlu0 %v10360_v24, %s10072_s1 }
  0x58   :  { %296 = vrot.lane.b32.xlu1 %v10311_v17, %s10072_s1 }
  0x5a   :  { %412 = vrot.lane.b32.xlu2 %v10369_v25, %s10072_s1 }
  0x5f   :  { %410 = vrot.lane.b32.xlu0 %v10386_v28, %s10072_s1 }
  0x60   :  { %408 = vrot.lane.b32.xlu1 %v10391_v29, %s10072_s1 }
  0x62   :  { %9197 = vrot.lane.b32.xlu2 %v9196_v30, %s10073_s27  ;;  %v9276_v30 = vpack.i.bf16 %v10427_v37, %v10241_v6  ;;  %v18086_v6 = vlaneseq }
  0x67   :  { %9202 = vrot.lane.b32.xlu0 %v9201_v35, %s10073_s27  ;;  %v9281_v35 = vpack.i.bf16 %v10446_v41, %v10236_v5  ;;  %v10574_v5 = vand.u32 127, %v18086_v6 }
  0x68   :  { %9207 = vrot.lane.b32.xlu1 %v9206_v36, %s10073_s27 }
  0x69   :  { %18680 = vst [vmem:[#allocation26_spill] sm:$0xff] %v10574_v5  ;;  %vm164_vm0 = vcmp.gt.s32.totalorder %v10574_v5, 0  ;;  %vm424_vm1 = vcmp.lt.s32.totalorder %v10574_v5, 1  ;;  %vm681_vm2 = vcmp.lt.s32.totalorder %v10574_v5, 127 }
  0x6a   :  { %9212 = vrot.lane.b32.xlu2 %v9211_v38, %s10072_s1  ;;  %v9286_v38 = vpack.i.bf16 %v10470_v47, %v10229_v3  ;;  %v9296_v3 = vpack.i.bf16 %v10509_v56, %v10288_v13 }
  0x6f   :  { %9217 = vrot.lane.b32.xlu0 %v9216_v42, %s10073_s27  ;;  %v9291_v42 = vpack.i.bf16 %v10490_v52, %v10220_v2  ;;  %v9301_v2 = vpack.i.bf16 %v10533_v62, %v10305_v16 }
  0x70   :  { %9222 = vrot.lane.b32.xlu1 %v9221_v43, %s10072_s1 }
  0x72   :  { %9227 = vrot.lane.b32.xlu2 %v9226_v46, %s10073_s27 }
  0x77   :  { %9232 = vrot.lane.b32.xlu0 %v9231_v50, %s10072_s1 }
  0x78   :  { %9237 = vrot.lane.b32.xlu1 %v9236_v51, %s10073_s27 }
  0x7a   :  { %9242 = vrot.lane.b32.xlu2 %v9241_v53, %s10072_s1  ;;  %v9306_v53 = vpack.i.bf16 %v10538_v63, %v10322_v18  ;;  %v9311_v18 = vpack.i.bf16 %v10548_v20, %v10328_v19 }
  0x7f   :  { %9247 = vrot.lane.b32.xlu0 %v9246_v57, %s10073_s27 }
  0x80   :  { %9252 = vrot.lane.b32.xlu1 %v9251_v58, %s10072_s1 }
  0x82   :  { %9257 = vrot.lane.b32.xlu2 %v9256_v61, %s10073_s27 }
  0x87   :  { %9262 = vrot.lane.b32.xlu0 %v9261_v4, %s10072_s1 }
  0x88   :  { %9267 = vrot.lane.b32.xlu1 %v9266_v7, %s10072_s1  ;;  %v10615_v7 = vld [vmem:[%s18676_s22 + $0x1e8] sm:$0xff] }
  0x89   :  { %v9331_v6 = vpack.i.bf16 %v10615_v7, %v10381_v27 }
  0x8a   :  { %9272 = vrot.lane.b32.xlu2 %v9271_v23, %s10072_s1 }
  0x8c   :  { %v10559_v36 = vpop.permute.xlu2 %9182 }
  0x8f   :  { %9277 = vrot.lane.b32.xlu0 %v9276_v30, %s10073_s27  ;;  %v18088_v30 = vunpack.i.l.bf16 %v10559_v36 }
  0x90   :  { %9282 = vrot.lane.b32.xlu1 %v9281_v35, %s10073_s27 }
  0x92   :  { %9287 = vrot.lane.b32.xlu2 %v9286_v38, %s10073_s27  ;;  %v18092_v38 = vunpack.i.h.bf16 %v10559_v36 }
  0x94   :  { %v10568_v43 = vpop.permute.xlu2 %422 }
  0x95   :  { %18679 = vst [vmem:[#allocation25_spill] sm:$0xff] %v10568_v43 }
  0x97   :  { %567 = vrot.lane.b32.xlu0 %v10210_v0, %s10073_s27  ;;  %v18087_v0 = vmov 0.0  }
  0x98   :  { %9292 = vrot.lane.b32.xlu1 %v9291_v42, %s10073_s27  ;;  %v10642_v42 = vld [vmem:[%s18676_s22 + $0x1a8] sm:$0xff] }
  0x9a   :  { %565 = vrot.lane.b32.xlu2 %v10215_v1, %s10073_s27  ;;  %v10590_v1 = vsel %vm164_vm0, 1.0, %v18087_v0  ;;  %v10700_v0 = vld [vmem:[%s18676_s22 + $0x128] sm:$0xff] }
  0x9b   :  { %18681 = vst [vmem:[#allocation27_spill] sm:$0xff] %v10590_v1 }
  0x9c   :  { %v10580_v46 = vpop.permute.xlu2 %302 }
  0x9f   :  { %9297 = vrot.lane.b32.xlu0 %v9296_v3, %s10073_s27  ;;  %v10647_v3 = vld [vmem:[%s18676_s22 + $0x1b0] sm:$0xff] }
  0xa0   :  { %563 = vrot.lane.b32.xlu1 %v10252_v8, %s10073_s27 }
  0xa1   :  { %v311_v50 = vpop.permute.xlu0 %310 }
  0xa2   :  { %v309_v13 = vpop.permute.xlu1 %308  ;;  %9302 = vrot.lane.b32.xlu2 %v9301_v2, %s10073_s27  ;;  %v488_v51 = vsel %vm424_vm1, %v10568_v43, %v311_v50 }
  0xa3   :  { %v545_v16 = vmul.f32 %v10590_v1, %v488_v51 }
  0xa4   :  { %v10599_v8 = vpop.permute.xlu2 %300 }
  0xa5   :  { %849 = vmatpush.msra.mxu0 %v545_v16 }
  0xa7   :  { %561 = vrot.lane.b32.xlu0 %v10259_v9, %s10073_s27  ;;  %v10620_v9 = vld [vmem:[%s18676_s22 + $0x1f0] sm:$0xff] }
  0xa8   :  { %9307 = vrot.lane.b32.xlu1 %v9306_v53, %s10073_s27  ;;  %v9316_v19 = vpack.i.bf16 %v10620_v9, %v10615_v7 }
  0xa9   :  { %v10604_v57 = vpop.permute.xlu0 %9177 }
  0xaa   :  { %v307_v58 = vpop.permute.xlu1 %306  ;;  %v18093_v61 = vunpack.i.l.bf16 %v10604_v57  ;;  %559 = vrot.lane.b32.xlu2 %v10274_v11, %s10073_s27  ;;  %v18089_v4 = vunpack.i.h.bf16 %v10604_v57 }
  0xac   :  { %v10622_v23 = vpop.permute.xlu2 %9192  ;;  %v480_v11 = vsel %vm424_vm1, %v311_v50, %v18093_v61  ;;  %v479_v35 = vsel %vm424_vm1, %v309_v13, %v18089_v4  ;;  %v478_v50 = vsel %vm424_vm1, %v307_v58, %v18088_v30 }
  0xad   :  { %943 = vmatpush.msra.mxu2 %v480_v11  ;;  %v18096_v27 = vunpack.i.l.bf16 %v10622_v23 }
  0xaf   :  { %9312 = vrot.lane.b32.xlu0 %v9311_v18, %s10073_s27  ;;  %944 = vmatpush.msra.mxu2 %v479_v35  ;;  %v9321_v18 = vpack.i.bf16 %v10647_v3, %v10642_v42 }
  0xb0   :  { %557 = vrot.lane.b32.xlu1 %v10281_v12, %s10073_s27 }
  0xb1   :  { %v305_v12 = vpop.permute.xlu0 %304  ;;  %945 = vmatpush.msra.mxu2 %v478_v50 }
  0xb2   :  { %v10649_v2 = vpop.permute.xlu1 %420  ;;  %9317 = vrot.lane.b32.xlu2 %v9316_v19, %s10073_s27  ;;  %v477_v51 = vsel %vm424_vm1, %v305_v12, %v18092_v38  ;;  %v10674_v19 = vld [vmem:[%s18676_s22 + $0x168] sm:$0xff]  ;;  %v9341_v38 = vpack.i.bf16 %v10642_v42, %v10407_v32  ;;  %v18686_v32 = vunpack.i.l.bf16 %v10604_v57 }
  0xb3   :  { %18682 = vst [vmem:[#allocation28_spill] sm:$0xff] %v10649_v2  ;;  %v487_v16 = vsel %vm424_vm1, %v10649_v2, %v309_v13  ;;  %946 = vmatpush.msra.mxu2 %v477_v51  ;;  %v10679_v13 = vld [vmem:[%s18676_s22 + $0x170] sm:$0xff] }
  0xb4   :  { %v537_v53 = vmul.f32 %v10590_v1, %v487_v16  ;;  %v10666_v11 = vpop.permute.xlu2 %412 }
  0xb5   :  { %18683 = vst [vmem:[#allocation29_spill] sm:$0xff] %v10666_v11 }
  0xb6   :  { %850 = vmatpush.msra.mxu0 %v537_v53 }
  0xb7   :  { %555 = vrot.lane.b32.xlu0 %v10294_v14, %s10073_s27 }
  0xb8   :  { %9322 = vrot.lane.b32.xlu1 %v9321_v18, %s10073_s27  ;;  %v9326_v18 = vpack.i.bf16 %v10679_v13, %v10674_v19 }
  0xb9   :  { %v10683_v50 = vpop.permute.xlu0 %9187 }
  0xba   :  { %v10681_v35 = vpop.permute.xlu1 %418  ;;  %v18091_v51 = vunpack.i.l.bf16 %v10683_v50  ;;  %553 = vrot.lane.b32.xlu2 %v10311_v17, %s10073_s27  ;;  %v18090_v16 = vunpack.i.h.bf16 %v10683_v50  ;;  %v10705_v17 = vld [vmem:[%s18676_s22 + $0x130] sm:$0xff] }
  0xbb   :  { %18684 = vst [vmem:[#allocation30_spill] sm:$0xff] %v10681_v35  ;;  %v486_v14 = vsel %vm424_vm1, %v10681_v35, %v307_v58  ;;  %v9336_v30 = vpack.i.bf16 %v10705_v17, %v10700_v0 }
  0xbc   :  { %v529_v53 = vmul.f32 %v10590_v1, %v486_v14  ;;  %v10707_v58 = vpop.permute.xlu2 %9197  ;;  %v476_v14 = vsel %vm424_vm1, %v10580_v46, %v18091_v51  ;;  %v475_v4 = vsel %vm424_vm1, %v10599_v8, %v18090_v16 }
  0xbd   :  { %947 = vmatpush.msra.mxu2 %v476_v14  ;;  %v10732_v14 = vld [vmem:[%s18676_s22 + $0xf0] sm:$0xff] }
  0xbe   :  { %851 = vmatpush.msra.mxu0 %v529_v53  ;;  %v10727_v53 = vld [vmem:[%s18676_s22 + $0xe8] sm:$0xff] }
  0xbf   :  { %9327 = vrot.lane.b32.xlu0 %v9326_v18, %s10073_s27  ;;  %948 = vmatpush.msra.mxu2 %v475_v4  ;;  %v9346_v61 = vpack.i.bf16 %v10732_v14, %v10727_v53 }
  0xc0   :  { %9332 = vrot.lane.b32.xlu1 %v9331_v6, %s10072_s1 }
  0xc1   :  { %v10734_v18 = vpop.permute.xlu0 %416 }
  0xc2   :  { %18685 = vst [vmem:[#allocation31_spill] sm:$0xff] %v10734_v18  ;;  %v299_v6 = vpop.permute.xlu1 %298  ;;  %9337 = vrot.lane.b32.xlu2 %v9336_v30, %s10073_s27  ;;  %v485_v16 = vsel %vm424_vm1, %v10734_v18, %v305_v12  ;;  %v18100_v12 = vunpack.i.h.bf16 %v10622_v23  ;;  %v9351_v18 = vpack.i.bf16 %v10674_v19, %v10417_v34  ;;  %v10773_v34 = vld [vmem:[%s18676_s22 + $0xb0] sm:$0xff] }
  0xc3   :  { %v474_v4 = vsel %vm424_vm1, %v299_v6, %v18096_v27  ;;  %v521_v51 = vmul.f32 %v10590_v1, %v485_v16 }
  0xc4   :  { %949 = vmatpush.msra.mxu2 %v474_v4  ;;  %v10749_v35 = vpop.permute.xlu2 %9212  ;;  %v10777_v4 = vld [vmem:[#allocation2] sm:$0xff] }
  0xc5   :  { %v18097_v30 = vunpack.i.l.bf16 %v10749_v35  ;;  %852 = vmatpush.msra.mxu0 %v521_v51  ;;  %v10768_v51 = vld [vmem:[%s18676_s22 + $0xa8] sm:$0xff] }
  0xc6   :  { %v9356_v27 = vpack.i.bf16 %v10773_v34, %v10768_v51 }
  0xc7   :  { %9342 = vrot.lane.b32.xlu0 %v9341_v38, %s10072_s1  ;;  %v10763_v16 = vsel %vm424_vm1, %v18686_v32, %v18097_v30  ;;  %v9361_v32 = vpack.i.bf16 %v10700_v0, %v10441_v40 }
  0xc8   :  { %9347 = vrot.lane.b32.xlu1 %v9346_v61, %s10073_s27  ;;  %18687 = vst [vmem:[#allocation32_spill] sm:$0xff] %v10763_v16 }
  0xc9   :  { %v10775_v38 = vpop.permute.xlu0 %414 }
  0xca   :  { %18688 = vst [vmem:[#allocation33_spill] sm:$0xff] %v10775_v38  ;;  %v297_v61 = vpop.permute.xlu1 %296  ;;  %9352 = vrot.lane.b32.xlu2 %v9351_v18, %s10072_s1  ;;  %v484_v2 = vsel %vm424_vm1, %v10775_v38, %v10580_v46  ;;  %v483_v18 = vsel %vm424_vm1, %v10666_v11, %v10599_v8  ;;  %v10807_v46 = vld [vmem:[%s18676_s22 + $0x70] sm:$0xff]  ;;  %v18690_v11 = vunpack.i.l.bf16 %v10707_v58 }
  0xcb   :  { %v473_v30 = vsel %vm424_vm1, %v297_v61, %v18100_v12  ;;  %v513_v43 = vmul.f32 %v10590_v1, %v484_v2  ;;  %v10802_v12 = vld [vmem:[%s18676_s22 + $0x68] sm:$0xff]  ;;  %v505_v40 = vmul.f32 %v10590_v1, %v483_v18  ;;  %v10832_v18 = vld [vmem:[%s18676_s22 + $0x30] sm:$0xff] }
  0xcc   :  { %950 = vmatpush.msra.mxu2 %v473_v30  ;;  %v10809_v2 = vpop.permute.xlu2 %9227  ;;  %v9366_v8 = vpack.i.bf16 %v10807_v46, %v10802_v12  ;;  %v18689_v30 = vunpack.i.h.bf16 %v10707_v58 }
  0xcd   :  { %951 = vmatmul.f32.vlgmr.msra.gmra.mxu2 %v10777_v4  ;;  %853 = vmatpush.msra.mxu0 %v513_v43  ;;  %v10827_v43 = vld [vmem:[%s18676_s22 + $0x28] sm:$0xff] }
  0xce   :  { %v713_v38 = vsel %vm681_vm2, %v18690_v11, %v18689_v30  ;;  %v10838_v11 = vld [vmem:[#allocation2 + $0x10] sm:$0xff] }
  0xcf   :  { %9357 = vrot.lane.b32.xlu0 %v9356_v27, %s10073_s27  ;;  %854 = vmatpush.msra.mxu0 %v505_v40  ;;  %v9371_v40 = vpack.i.bf16 %v10727_v53, %v10461_v45  ;;  %v18693_v45 = vunpack.i.h.bf16 %v10559_v36 }
  0xd0   :  { %9362 = vrot.lane.b32.xlu1 %v9361_v32, %s10072_s1  ;;  %1178 = vmatpush.msrb.mxu2 %v713_v38  ;;  %v9376_v38 = vpack.i.bf16 %v10832_v18, %v10827_v43 }
  0xd1   :  { %v10834_v16 = vpop.permute.xlu0 %410 }
  0xd2   :  { %18691 = vst [vmem:[#allocation34_spill] sm:$0xff] %v10834_v16  ;;  %v10836_v20 = vpop.permute.xlu1 %408  ;;  %9367 = vrot.lane.b32.xlu2 %v9366_v8, %s10073_s27  ;;  %v482_v27 = vsel %vm424_vm1, %v10834_v16, %v299_v6 }
  0xd3   :  { %18692 = vst [vmem:[#allocation35_spill] sm:$0xff] %v10836_v20  ;;  %v497_v32 = vmul.f32 %v10590_v1, %v482_v27  ;;  %v481_v30 = vsel %vm424_vm1, %v10836_v20, %v297_v61  ;;  %v9381_v27 = vpack.i.bf16 %v10768_v51, %v10480_v49  ;;  %v10874_v49 = vld [vmem:[#allocation2 + $0x20] sm:$0xff] }
  0xd4   :  { %v10852_v63 = vpop.permute.xlu2 %9242  ;;  %v489_v6 = vmul.f32 %v10590_v1, %v481_v30 }
  0xd5   :  { %954 = vmatmul.f32.gmra.mxu2 %v10838_v11  ;;  %v18107_v8 = vunpack.i.l.bf16 %v10852_v63  ;;  %855 = vmatpush.msra.mxu0 %v497_v32 }
  0xd7   :  { %9372 = vrot.lane.b32.xlu0 %v9371_v40, %s10072_s1  ;;  %v10867_v61 = vsel %vm424_vm1, %v18693_v45, %v18107_v8  ;;  %856 = vmatpush.msra.mxu0 %v489_v6  ;;  %v9386_v6 = vpack.i.bf16 %v10802_v12, %v10504_v55  ;;  %v9391_v8 = vpack.i.bf16 %v10827_v43, %v10524_v60  ;;  %v18115_v55 = vunpack.i.l.bf16 %v10809_v2 }
  0xd8   :  { %9377 = vrot.lane.b32.xlu1 %v9376_v38, %s10073_s27  ;;  %857 = vmatmul.f32.vlgmr.msra.gmra.mxu0 %v10777_v4 }
  0xd9   :  { %v10870_v32 = vpop.permute.xlu0 %9202  ;;  %1123 = vmatpush.msrb.mxu0 %v10376_v26 }
  0xda   :  { %v10872_v30 = vpop.permute.xlu1 %9207  ;;  %v18110_v40 = vunpack.i.h.bf16 %v10870_v32  ;;  %v18112_v38 = vunpack.i.l.bf16 %v10870_v32  ;;  %9382 = vrot.lane.b32.xlu2 %v9381_v27, %s10072_s1 }
  0xdb   :  { %v18109_v1 = vunpack.i.h.bf16 %v10872_v30  ;;  %v18111_v45 = vunpack.i.l.bf16 %v10872_v30  ;;  %1124 = vmatpush.msrb.mxu0 %v10402_v31  ;;  %v18113_v31 = vunpack.i.h.bf16 %v10809_v2 }
  0xdc   :  { %v10886_v20 = vpop.permute.xlu2 %9257  ;;  %v712_v27 = vsel %vm681_vm2, %v18112_v38, %v18110_v40  ;;  %v18695_v38 = vunpack.i.h.bf16 %v10604_v57 }
  0xdd   :  { %957 = vmatmul.f32.gmra.mxu2 %v10874_v49  ;;  %v711_v26 = vsel %vm681_vm2, %v18111_v45, %v18109_v1  ;;  %1125 = vmatpush.msrb.mxu0 %v10412_v33  ;;  %v10913_v1 = vld [vmem:[#allocation2 + $0x30] sm:$0xff] }
  0xde   :  { %1179 = vmatpush.msrb.mxu2 %v712_v27 }
  0xdf   :  { %9387 = vrot.lane.b32.xlu0 %v9386_v6, %s10072_s1  ;;  %1126 = vmatpush.msrb.mxu0 %v10436_v39 }
  0xe0   :  { %9392 = vrot.lane.b32.xlu1 %v9391_v8, %s10072_s1  ;;  %1180 = vmatpush.msrb.mxu2 %v711_v26 }
  0xe1   :  { %860 = vmatmul.f32.gmra.mxu0 %v10838_v11  ;;  %v10909_v60 = vpop.permute.xlu0 %9217 }
  0xe2   :  { %v10911_v27 = vpop.permute.xlu1 %9222  ;;  %v18114_v33 = vunpack.i.h.bf16 %v10909_v60  ;;  %v18116_v6 = vunpack.i.l.bf16 %v10909_v60  ;;  %679 = vrot.lane.b32.xlu2 %v10269_v10, %s10073_s27  ;;  %1127 = vmatpush.msrb.mxu0 %v10456_v44  ;;  %v709_v44 = vsel %vm681_vm2, %v18115_v55, %v18113_v31  ;;  %v18697_v31 = vunpack.i.l.bf16 %v10749_v35 }
  0xe3   :  { %v9224_v39 = vunpack.i.l.bf16 %v10911_v27  ;;  %v18119_v10 = vunpack.i.h.bf16 %v10911_v27 }
  0xe4   :  { %v10922_v26 = vpop.permute.xlu2 %9272  ;;  %1128 = vmatpush.msrb.mxu0 %v10475_v48  ;;  %v710_v40 = vsel %vm681_vm2, %v18116_v6, %v18114_v33  ;;  %v10075_v48 = vmov 0   ;;  %v9396_v6 = vpack.i.bf16 %v10647_v3, %v10620_v9  ;;  %v18699_v9 = vunpack.i.l.bf16 %v10852_v63 }
  0xe5   :  { %18694 = vst [vmem:[#allocation36_spill] sm:$0xff] %v10922_v26  ;;  %960 = vmatmul.f32.gmra.mxu2 %v10913_v1  ;;  %v18117_v45 = vunpack.i.l.bf16 %v10922_v26  ;;  %9418 = vset.pattern.permute.xlu1 %v10075_v48  ;;  %v10944_v8 = vsel %vm424_vm1, %v18695_v38, %v9224_v39  ;;  %v18698_v38 = vunpack.i.h.bf16 %v10622_v23 }
  0xe6   :  { %1181 = vmatpush.msrb.mxu2 %v710_v40  ;;  %1129 = vmatpush.msrb.mxu0 %v10499_v54  ;;  %v18696_v40 = vunpack.i.h.bf16 %v10749_v35 }
  0xe7   :  { %9417 = vset.pattern.permute.xlu0 %v10075_v48  ;;  %v10963_v54 = vsel %vm424_vm1, %v18698_v38, %v18117_v45  ;;  %9416 = vset.pattern.permute.xlu2 %v10075_v48  ;;  %v18124_v48 = vunpack.i.h.bf16 %v10886_v20 }
  0xe8   :  { %677 = vrot.lane.b32.xlu0 %v10300_v15, %s10073_s27  ;;  %675 = vrot.lane.b32.xlu1 %v10338_v21, %s10073_s27  ;;  %v464_v57 = vsel %vm424_vm1, %v18697_v31, %v18696_v40  ;;  %v18120_v15 = vunpack.i.h.bf16 %v10852_v63  ;;  %v10972_v31 = vld [vmem:[#allocation2 + $0x40] sm:$0xff]  ;;  %v463_v40 = vsel %vm424_vm1, %v9224_v39, %v18119_v10  ;;  %v11017_v10 = vld [vmem:[#allocation2 + $0x50] sm:$0xff] }
  0xe9   :  { %1130 = vmatpush.msrb.mxu0 %v10519_v59  ;;  %1182 = vmatpush.msrb.mxu2 %v709_v44  ;;  %v10968_v21 = vpop.permute.xlu0 %9232 }
  0xea   :  { %863 = vmatmul.f32.gmra.mxu0 %v10874_v49  ;;  %v10970_v33 = vpop.permute.xlu1 %9237  ;;  %v18118_v38 = vunpack.i.h.bf16 %v10968_v21  ;;  %v18125_v59 = vunpack.i.l.bf16 %v10968_v21  ;;  %673 = vrot.lane.b32.xlu2 %v10348_v22, %s10073_s27  ;;  %v461_v3 = vsel %vm424_vm1, %v18699_v9, %v18120_v15  ;;  %v9401_v9 = vpack.i.bf16 %v10705_v17, %v10679_v13 }
  0xeb   :  { %v18121_v44 = vunpack.i.h.bf16 %v10970_v33  ;;  %v18131_v55 = vunpack.i.l.bf16 %v10970_v33  ;;  %1131 = vmatpush.msrb.mxu0 %v464_v57  ;;  %v18126_v57 = vunpack.i.l.bf16 %v10886_v20 }
  0xec   :  { %v10986_v45 = vpop.permute.xlu2 %9287  ;;  %v462_v22 = vsel %vm424_vm1, %v18125_v59, %v18118_v38 }
  0xed   :  { %963 = vmatmul.f32.gmra.mxu2 %v10972_v31  ;;  %1132 = vmatpush.msrb.mxu0 %v463_v40  ;;  %v708_v39 = vsel %vm681_vm2, %v18131_v55, %v18121_v44  ;;  %v18701_v44 = vunpack.i.l.bf16 %v10683_v50  ;;  %v706_v17 = vsel %vm681_vm2, %v18126_v57, %v18124_v48  ;;  %v9411_v48 = vpack.i.bf16 %v10832_v18, %v10807_v46  ;;  %v1602_v18 = vld [vmem:[%s18707_s19 + $0x48] sm:$0xff]  ;;  %v1600_v55 = vld [vmem:[%s18707_s19 + $0x38] sm:$0xff] }
  0xee   :  { %1183 = vmatpush.msrb.mxu2 %v708_v39  ;;  %v18704_v57 = vunpack.i.h.bf16 %v10683_v50  ;;  %v18706_v50 = vunpack.i.l.bf16 %v10922_v26 }
  0xef   :  { %1133 = vmatpush.msrb.mxu0 %v462_v22 }
  0xf0   :  { %9397 = vrot.lane.b32.xlu0 %v9396_v6, %s10072_s1  ;;  %671 = vrot.lane.b32.xlu1 %v10360_v24, %s10073_s27 }
  0xf1   :  { %1134 = vmatpush.msrb.mxu0 %v461_v3  ;;  %v11013_v40 = vpop.permute.xlu0 %9247 }
  0xf2   :  { %866 = vmatmul.f32.gmra.mxu0 %v10913_v1  ;;  %v11015_v38 = vpop.permute.xlu1 %9252  ;;  %v18123_v22 = vunpack.i.h.bf16 %v11013_v40  ;;  %v18127_v6 = vunpack.i.l.bf16 %v11013_v40  ;;  %669 = vrot.lane.b32.xlu2 %v10369_v25, %s10073_s27 }
  0xf3   :  { %18700 = vst [vmem:[#allocation37_spill] sm:$0xff] %v11015_v38  ;;  %v18122_v24 = vunpack.i.h.bf16 %v11015_v38  ;;  %v9254_v39 = vunpack.i.l.bf16 %v11015_v38 }
  0xf4   :  { %v11027_v3 = vpop.permute.xlu2 %565  ;;  %v707_v15 = vsel %vm681_vm2, %v18127_v6, %v18123_v22 }
  0xf5   :  { %966 = vmatmul.f32.gmra.mxu2 %v11017_v10  ;;  %v460_v25 = vsel %vm424_vm1, %v9254_v39, %v18122_v24  ;;  %v11044_v13 = vsel %vm424_vm1, %v18701_v44, %v9254_v39 }
  0xf6   :  { %1184 = vmatpush.msrb.mxu2 %v707_v15  ;;  %1135 = vmatpush.msrb.mxu0 %v460_v25  ;;  %v11060_v15 = vld [vmem:[#allocation2 + $0x60] sm:$0xff]  ;;  %v18128_v25 = vunpack.i.h.bf16 %v10922_v26  ;;  %v1738_v26 = vld [vmem:[%s18708_s2 + $0x28] sm:$0xff] }
  0xf8   :  { %9402 = vrot.lane.b32.xlu0 %v9401_v9, %s10072_s1  ;;  %667 = vrot.lane.b32.xlu1 %v10386_v28, %s10073_s27 }
  0xf9   :  { %1185 = vmatpush.msrb.mxu2 %v706_v17  ;;  %v11056_v24 = vpop.permute.xlu0 %9262  ;;  %v9406_v17 = vpack.i.bf16 %v10773_v34, %v10732_v14  ;;  %v18705_v14 = vunpack.i.l.bf16 %v10622_v23  ;;  %v457_v23 = vsel %vm424_vm1, %v18706_v50, %v18128_v25  ;;  %v1742_v25 = vld [vmem:[%s18708_s2 + $0x48] sm:$0xff] }
  0xfa   :  { %869 = vmatmul.f32.gmra.mxu0 %v10972_v31  ;;  %18702 = vst [vmem:[#allocation38_spill] sm:$0xff] %v11056_v24  ;;  %v11058_v44 = vpop.permute.xlu1 %9267  ;;  %v18130_v39 = vunpack.i.h.bf16 %v11056_v24  ;;  %v9264_v22 = vunpack.i.l.bf16 %v11056_v24  ;;  %665 = vrot.lane.b32.xlu2 %v10391_v29, %s10073_s27 }
  0xfb   :  { %18703 = vst [vmem:[#allocation39_spill] sm:$0xff] %v11058_v44  ;;  %v18129_v9 = vunpack.i.h.bf16 %v11058_v44  ;;  %v9269_v28 = vunpack.i.l.bf16 %v11058_v44  ;;  %v11262_v44 = vld [vmem:[#allocation2 + $0x18] sm:$0xff] }
  0xfc   :  { %v11073_v59 = vpop.permute.xlu2 %9302  ;;  %v459_v29 = vsel %vm424_vm1, %v9264_v22, %v18130_v39  ;;  %v11084_v6 = vsel %vm424_vm1, %v18704_v57, %v9264_v22 }
  0xfd   :  { %969 = vmatmul.f32.gmra.mxu2 %v11060_v15  ;;  %v11090_v34 = vsel %vm424_vm1, %v18705_v14, %v9269_v28  ;;  %1136 = vmatpush.msrb.mxu0 %v459_v29  ;;  %v458_v46 = vsel %vm424_vm1, %v9269_v28, %v18129_v9  ;;  %v11112_v28 = vld [vmem:[#allocation2 + $0x70] sm:$0xff]  ;;  %v9289_v14 = vunpack.i.l.bf16 %v10986_v45  ;;  %v1601_v9 = vld [vmem:[%s18707_s19 + $0x40] sm:$0xff] }
  0xff   :  { %1137 = vmatpush.msrb.mxu0 %v458_v46 }
 0x100   :  { %9407 = vrot.lane.b32.xlu0 %v9406_v17, %s10072_s1  ;;  %9412 = vrot.lane.b32.xlu1 %v9411_v48, %s10072_s1 }
 0x101   :  { %v11108_v57 = vpop.permute.xlu0 %9277  ;;  %1138 = vmatpush.msrb.mxu0 %v457_v23 }
 0x102   :  { %872 = vmatmul.f32.gmra.mxu0 %v11017_v10  ;;  %v11110_v22 = vpop.permute.xlu1 %9282  ;;  %v18134_v48 = vunpack.i.h.bf16 %v11108_v57  ;;  %v9279_v17 = vunpack.i.l.bf16 %v11108_v57  ;;  %1650 = vperm.xlu2 %9416, %v1602_v18   ;;  %v18133_v18 = vunpack.i.h.bf16 %v10986_v45 }
 0x103   :  { %v9284_v29 = vunpack.i.l.bf16 %v11110_v22  ;;  %v18132_v46 = vunpack.i.h.bf16 %v11110_v22  ;;  %1311 = vmatpush.msra.mxu0 %v10615_v7 }
 0x104   :  { %v11120_v50 = vpop.permute.xlu2 %559  ;;  %v729_v23 = vsel %vm681_vm2, %v9279_v17, %v18134_v48  ;;  %v727_v39 = vsel %vm681_vm2, %v9289_v14, %v18133_v18  ;;  %v1741_v48 = vld [vmem:[%s18708_s2 + $0x40] sm:$0xff] }
 0x105   :  { %972 = vmatmul.f32.gmra.mxu2 %v11112_v28  ;;  %990 = vmatpush.msra.mxu3 %v729_v23  ;;  %v728_v7 = vsel %vm681_vm2, %v9284_v29, %v18132_v46 }
 0x106   :  { %1312 = vmatpush.msra.mxu0 %v10642_v42  ;;  %v11152_v42 = vld [vmem:[#allocation2 + $0x80] sm:$0xff] }
 0x107   :  { %991 = vmatpush.msra.mxu3 %v728_v7  ;;  %18709 = vst [vmem:[#allocation40_spill] sm:$0xff] %v11152_v42 }
 0x108   :  { %1790 = vperm.xlu1 %9418, %v1742_v25   ;;  %1645 = vperm.xlu0 %9417, %v1601_v9  }
 0x109   :  { %1313 = vmatpush.msra.mxu0 %v10674_v19  ;;  %v11148_v23 = vpop.permute.xlu0 %567  ;;  %v736_v19 = vsel %vm681_vm2, %v11027_v3, %v9284_v29  ;;  %992 = vmatpush.msra.mxu3 %v727_v39  ;;  %v9304_v39 = vunpack.i.l.bf16 %v11073_v59 }
 0x10a   :  { %875 = vmatmul.f32.gmra.mxu0 %v11060_v15  ;;  %v11150_v46 = vpop.permute.xlu1 %9292  ;;  %v737_v18 = vsel %vm681_vm2, %v11148_v23, %v9279_v17  ;;  %1640 = vperm.xlu2 %9416, %v1600_v55   ;;  %v1740_v55 = vld [vmem:[%s18708_s2 + $0x38] sm:$0xff] }
 0x10b   :  { %v18135_v9 = vunpack.i.h.bf16 %v11150_v46  ;;  %v9294_v25 = vunpack.i.l.bf16 %v11150_v46  ;;  %896 = vmatpush.msra.mxu1 %v737_v18  ;;  %1314 = vmatpush.msra.mxu0 %v10700_v0  ;;  %v1599_v0 = vld [vmem:[%s18707_s19 + $0x30] sm:$0xff] }
 0x10c   :  { %v11163_v7 = vpop.permute.xlu2 %9317 }
 0x10d   :  { %975 = vmatmul.f32.gmra.mxu2 %v11152_v42  ;;  %v726_v17 = vsel %vm681_vm2, %v9294_v25, %v18135_v9  ;;  %897 = vmatpush.msra.mxu1 %v736_v19  ;;  %v11187_v19 = vld [vmem:[#allocation2 + $0x90] sm:$0xff] }
 0x10e   :  { %993 = vmatpush.msra.mxu3 %v726_v17  ;;  %1315 = vmatpush.msra.mxu0 %v10727_v53  ;;  %18710 = vst [vmem:[#allocation41_spill] sm:$0xff] %v11187_v19  ;;  %v18137_v53 = vunpack.i.h.bf16 %v11073_v59 }
 0x110   :  { %1785 = vperm.xlu1 %9418, %v1741_v48   ;;  %1780 = vperm.xlu0 %9417, %v1740_v55  }
 0x111   :  { %1316 = vmatpush.msra.mxu0 %v10768_v51  ;;  %v11183_v29 = vpop.permute.xlu0 %9297  ;;  %v1598_v51 = vld [vmem:[%s18707_s19 + $0x28] sm:$0xff] }
 0x112   :  { %878 = vmatmul.f32.gmra.mxu0 %v11112_v28  ;;  %v11185_v18 = vpop.permute.xlu1 %563  ;;  %v18136_v48 = vunpack.i.h.bf16 %v11183_v29  ;;  %v9299_v17 = vunpack.i.l.bf16 %v11183_v29  ;;  %1635 = vperm.xlu2 %9416, %v1599_v0  }
 0x113   :  { %v735_v55 = vsel %vm681_vm2, %v11185_v18, %v9289_v14  ;;  %1317 = vmatpush.msra.mxu0 %v10802_v12  ;;  %v724_v14 = vsel %vm681_vm2, %v9304_v39, %v18137_v53  ;;  %v1597_v12 = vld [vmem:[%s18707_s19 + $0x20] sm:$0xff] }
 0x114   :  { %898 = vmatpush.msra.mxu1 %v735_v55  ;;  %v725_v9 = vsel %vm681_vm2, %v9299_v17, %v18136_v48  ;;  %v11212_v0 = vpop.permute.xlu2 %553  ;;  %v1739_v55 = vld [vmem:[%s18708_s2 + $0x30] sm:$0xff]  ;;  %v18145_v48 = vunpack.i.l.bf16 %v11163_v7 }
 0x115   :  { %978 = vmatmul.f32.gmra.mxu2 %v11187_v19  ;;  %1318 = vmatpush.msra.mxu0 %v10827_v43 }
 0x116   :  { %994 = vmatpush.msra.mxu3 %v725_v9  ;;  %v11223_v9 = vld [vmem:[#allocation2 + $0x8] sm:$0xff] }
 0x118   :  { %1630 = vperm.xlu1 %9418, %v1598_v51   ;;  %995 = vmatpush.msra.mxu3 %v724_v14 }
 0x119   :  { %1625 = vperm.xlu0 %9417, %v1597_v12   ;;  %v11219_v53 = vpop.permute.xlu0 %561  ;;  %v733_v12 = vsel %vm681_vm2, %v11120_v50, %v9299_v17  ;;  %v1737_v17 = vld [vmem:[%s18708_s2 + $0x20] sm:$0xff] }
 0x11a   :  { %881 = vmatmul.f32.gmra.mxu0 %v11152_v42  ;;  %v11221_v43 = vpop.permute.xlu1 %9307  ;;  %v734_v14 = vsel %vm681_vm2, %v11219_v53, %v9294_v25  ;;  %1775 = vperm.xlu2 %9416, %v1739_v55   ;;  %v18711_v55 = vunpack.i.h.bf16 %v11163_v7  ;;  %v1596_v42 = vld [vmem:[%s18707_s19 + $0x18] sm:$0xff] }
 0x11b   :  { %v18142_v16 = vunpack.i.h.bf16 %v11221_v43  ;;  %v9309_v51 = vunpack.i.l.bf16 %v11221_v43  ;;  %899 = vmatpush.msra.mxu1 %v734_v14 }
 0x11c   :  { %v697_v14 = vsel %vm681_vm2, %v18145_v48, %v18711_v55  ;;  %v18715_v48 = vunpack.i.l.bf16 %v10870_v32 }
 0x11d   :  { %7876 = vmatmul.msk.f32.vlgmr.msrb.gmra.mxu2 %vm810_vm3, %v11223_v9  ;;  %v723_v25 = vsel %vm681_vm2, %v9309_v51, %v18142_v16  ;;  %900 = vmatpush.msra.mxu1 %v733_v12  ;;  %v11255_v16 = vpop.permute.xlu2 %9337 }
 0x11e   :  { %996 = vmatpush.msra.mxu3 %v723_v25  ;;  %1366 = vmatpush.msra.mxu2 %v697_v14  ;;  %v1595_v14 = vld [vmem:[%s18707_s19 + $0x10] sm:$0xff] }
 0x120   :  { %1770 = vperm.xlu1 %9418, %v1738_v26  }
 0x121   :  { %1765 = vperm.xlu0 %9417, %v1737_v17   ;;  %v11258_v12 = vpop.permute.xlu0 %9312 }
 0x122   :  { %884 = vmatmul.f32.gmra.mxu0 %v11187_v19  ;;  %v11260_v25 = vpop.permute.xlu1 %557  ;;  %v9315_v24 = vunpack.i.h.bf16 %v11258_v12  ;;  %v9314_v26 = vunpack.i.l.bf16 %v11258_v12  ;;  %1620 = vperm.xlu2 %9416, %v1596_v42   ;;  %v1594_v12 = vld [vmem:[%s18707_s19 + $0x8] sm:$0xff]  ;;  %v18713_v42 = vunpack.i.l.bf16 %v10707_v58  ;;  %v18716_v19 = vunpack.i.h.bf16 %v11110_v22 }
 0x123   :  { %18712 = vst [vmem:[#allocation42_spill] sm:$0xff] %v11260_v25  ;;  %v732_v55 = vsel %vm681_vm2, %v11260_v25, %v9304_v39  ;;  %v18714_v39 = vunpack.i.h.bf16 %v11108_v57  ;;  %v18718_v25 = vunpack.i.h.bf16 %v10986_v45  ;;  %v18720_v45 = vunpack.i.h.bf16 %v11150_v46 }
 0x124   :  { %901 = vmatpush.msra.mxu1 %v732_v55  ;;  %v722_v17 = vsel %vm681_vm2, %v9314_v26, %v9315_v24  ;;  %v720_v38 = vsel %vm681_vm2, %v18716_v19, %v18715_v48  ;;  %v18719_v48 = vunpack.i.l.bf16 %v10909_v60  ;;  %v18721_v46 = vunpack.i.l.bf16 %v10809_v2 }
 0x125   :  { %7877 = vmatmul.msk.f32.gmra.mxu2 %vm810_vm3, %v11262_v44  ;;  %997 = vmatpush.msra.mxu3 %v722_v17  ;;  %v721_v55 = vsel %vm681_vm2, %v18714_v39, %v18713_v42  ;;  %v1736_v17 = vld [vmem:[%s18708_s2 + $0x18] sm:$0xff]  ;;  %v11303_v39 = vpop.permute.xlu2 %9352 }
 0x126   :  { %7856 = vmatmul.msk.f32.vlgmr.msra.gmra.mxu3 %vm810_vm3, %v11223_v9 }
 0x127   :  { %1084 = vmatpush.msrb.mxu3 %v721_v55  ;;  %v18717_v55 = vunpack.i.l.bf16 %v10872_v30 }
 0x128   :  { %1615 = vperm.xlu1 %9418, %v1595_v14   ;;  %v11301_v14 = vld [vmem:[#allocation2 + $0x28] sm:$0xff] }
 0x129   :  { %1610 = vperm.xlu0 %9417, %v1594_v12   ;;  %1085 = vmatpush.msrb.mxu3 %v720_v38  ;;  %v11297_v57 = vpop.permute.xlu0 %555  ;;  %v719_v22 = vsel %vm681_vm2, %v18718_v25, %v18717_v55  ;;  %v718_v25 = vsel %vm681_vm2, %v18720_v45, %v18719_v48  ;;  %v1734_v12 = vld [vmem:[%s18708_s2 + $0x8] sm:$0xff]  ;;  %v11359_v45 = vld [vmem:[#allocation2 + $0x38] sm:$0xff] }
 0x12a   :  { %1139 = vmatmul.f32.vlgmr.msrb.gmra.mxu0 %v10777_v4  ;;  %v11299_v42 = vpop.permute.xlu1 %9322  ;;  %v731_v38 = vsel %vm681_vm2, %v11297_v57, %v9309_v51  ;;  %v730_v4 = vsel %vm681_vm2, %v11212_v0, %v9314_v26  ;;  %1760 = vperm.xlu2 %9416, %v1736_v17   ;;  %v1735_v26 = vld [vmem:[%s18708_s2 + $0x10] sm:$0xff]  ;;  %v18722_v17 = vunpack.i.h.bf16 %v11183_v29 }
 0x12b   :  { %v9325_v19 = vunpack.i.h.bf16 %v11299_v42  ;;  %1086 = vmatpush.msrb.mxu3 %v719_v22  ;;  %902 = vmatpush.msra.mxu1 %v731_v38  ;;  %v9324_v51 = vunpack.i.l.bf16 %v11299_v42  ;;  %v18723_v38 = vunpack.i.l.bf16 %v10970_v33  ;;  %v18771_v42 = vunpack.i.h.bf16 %v11255_v16 }
 0x12c   :  { %v717_v55 = vsel %vm681_vm2, %v18722_v17, %v18721_v46  ;;  %v18166_v46 = vunpack.i.h.bf16 %v11255_v16 }
 0x12d   :  { %7878 = vmatmul.msk.f32.gmra.mxu2 %vm810_vm3, %v11301_v14  ;;  %1087 = vmatpush.msrb.mxu3 %v718_v25  ;;  %v696_v22 = vsel %vm681_vm2, %v9324_v51, %v9325_v19  ;;  %v1593_v25 = vld [vmem:[%s18707_s19] sm:$0xff]  ;;  %v11374_v17 = vpop.permute.xlu2 %9367  ;;  %s8413_s19 = sld [smem:[#allocation8 + $0x6]] }
 0x12e   :  { %903 = vmatpush.msra.mxu1 %v730_v4  ;;  %7857 = vmatmul.msk.f32.gmra.mxu3 %vm810_vm3, %v11262_v44  ;;  %v18724_v4 = vunpack.i.h.bf16 %v11073_v59 }
 0x12f   :  { %7846 = vmatmul.msk.f32.vlgmr.msra.gmra.mxu1 %vm810_vm3, %v11223_v9  ;;  %1088 = vmatpush.msrb.mxu3 %v717_v55 }
 0x130   :  { %1029 = vmatpush.msrb.mxu1 %v10427_v37  ;;  %1755 = vperm.xlu1 %9418, %v1735_v26   ;;  %v716_v48 = vsel %vm681_vm2, %v18724_v4, %v18723_v38  ;;  %v18725_v26 = vunpack.i.l.bf16 %v11013_v40  ;;  %v1733_v4 = vld [vmem:[%s18708_s2] sm:$0xff] }
 0x131   :  { %1750 = vperm.xlu0 %9417, %v1734_v12   ;;  %1089 = vmatpush.msrb.mxu3 %v716_v48  ;;  %v11355_v29 = vpop.permute.xlu0 %9327  ;;  %v18726_v12 = vunpack.i.h.bf16 %v11221_v43  ;;  %v18729_v43 = vunpack.i.h.bf16 %v10707_v58  ;;  %v18730_v58 = vunpack.i.h.bf16 %v10870_v32 }
 0x132   :  { %1030 = vmatpush.msrb.mxu1 %v10446_v41  ;;  %v11357_v37 = vpop.permute.xlu1 %9332  ;;  %1142 = vmatmul.f32.gmra.mxu0 %v10838_v11  ;;  %v9330_v59 = vunpack.i.h.bf16 %v11355_v29  ;;  %v9329_v55 = vunpack.i.l.bf16 %v11355_v29  ;;  %v18727_v11 = vunpack.i.l.bf16 %v10886_v20  ;;  %v9821_v29 = vld [vmem:[%s18676_s22 + $0x1f0] sm:$0xff] }
 0x133   :  { %v715_v41 = vsel %vm681_vm2, %v18726_v12, %v18725_v26  ;;  %1367 = vmatpush.msra.mxu2 %v696_v22  ;;  %1605 = vperm.xlu2 %9416, %v1593_v25   ;;  %v704_v48 = vsel %vm681_vm2, %v18730_v58, %v9324_v51  ;;  %v18157_v26 = vunpack.i.h.bf16 %v11357_v37  ;;  %v11421_v51 = vld [vmem:[#allocation2 + $0x48] sm:$0xff]  ;;  %v18736_v58 = vld [vmem:[#allocation32_spill] sm:$0xff] }
 0x134   :  { %1031 = vmatpush.msrb.mxu1 %v10470_v47  ;;  %1090 = vmatpush.msrb.mxu3 %v715_v41  ;;  %v714_v38 = vsel %vm681_vm2, %v9315_v24, %v18727_v11  ;;  %v18728_v47 = vunpack.i.l.bf16 %v11163_v7  ;;  %v9339_v24 = vunpack.i.l.bf16 %v11255_v16 }
 0x135   :  { %7879 = vmatmul.msk.f32.gmra.mxu2 %vm810_vm3, %v11359_v45 }
 0x136   :  { %1032 = vmatpush.msrb.mxu1 %v10490_v52  ;;  %1091 = vmatpush.msrb.mxu3 %v714_v38  ;;  %v705_v22 = vsel %vm681_vm2, %v18729_v43, %v18728_v47  ;;  %v695_v52 = vsel %vm681_vm2, %v9329_v55, %v9330_v59  ;;  %v694_v25 = vsel %vm681_vm2, %v9339_v24, %v18166_v46  ;;  %v18732_v47 = vld [vmem:[#allocation23_spill] sm:$0xff]  ;;  %v18733_v43 = vunpack.i.h.bf16 %v10909_v60 }
 0x137   :  { %7847 = vmatmul.msk.f32.gmra.mxu1 %vm810_vm3, %v11262_v44  ;;  %7858 = vmatmul.msk.f32.gmra.mxu3 %vm810_vm3, %v11301_v14 }
 0x138   :  { %1272 = vmatpush.msra.mxu3 %v705_v22  ;;  %1033 = vmatpush.msrb.mxu1 %v10509_v56  ;;  %v18731_v56 = vunpack.i.h.bf16 %v10872_v30  ;;  %v702_v30 = vsel %vm681_vm2, %v18733_v43, %v9339_v24  ;;  %v11450_v24 = vpop.permute.xlu2 %9382 }
 0x139   :  { %1745 = vperm.xlu1 %9418, %v1733_v4   ;;  %v11413_v12 = vpop.permute.xlu0 %9342  ;;  %1368 = vmatpush.msra.mxu2 %v695_v52  ;;  %v18735_v4 = vld [vmem:[#allocation24_spill] sm:$0xff] }
 0x13a   :  { %1273 = vmatpush.msra.mxu3 %v704_v48  ;;  %1034 = vmatpush.msrb.mxu1 %v10533_v62  ;;  %v11415_v41 = vpop.permute.xlu1 %9347  ;;  %v703_v32 = vsel %vm681_vm2, %v18731_v56, %v9329_v55  ;;  %v9334_v62 = vunpack.i.l.bf16 %v11357_v37  ;;  %v18150_v55 = vunpack.i.h.bf16 %v11413_v12  ;;  %v9344_v52 = vunpack.i.l.bf16 %v11413_v12 }
 0x13b   :  { %1145 = vmatmul.f32.gmra.mxu0 %v10874_v49  ;;  %v18162_v11 = vunpack.i.h.bf16 %v11415_v41  ;;  %v9349_v38 = vunpack.i.l.bf16 %v11415_v41  ;;  %1369 = vmatpush.msra.mxu2 %v694_v25  ;;  %v18734_v49 = vunpack.i.h.bf16 %v10809_v2  ;;  %v18159_v25 = vunpack.i.h.bf16 %v11374_v17 }
 0x13c   :  { %1274 = vmatpush.msra.mxu3 %v703_v32  ;;  %1035 = vmatpush.msrb.mxu1 %v18732_v47  ;;  %v448_v2 = vsel %vm424_vm1, %v9334_v62, %v18157_v26  ;;  %v447_v48 = vsel %vm424_vm1, %v9344_v52, %v18150_v55  ;;  %v18156_v47 = vunpack.i.h.bf16 %v11303_v39  ;;  %v11637_v26 = vld [vmem:[#allocation2 + $0x88] sm:$0xff] }
 0x13d   :  { %v701_v22 = vsel %vm681_vm2, %v18734_v49, %v9349_v38  ;;  %7880 = vmatmul.msk.f32.gmra.mxu2 %vm810_vm3, %v11421_v51  ;;  %v693_v60 = vsel %vm681_vm2, %v9349_v38, %v18162_v11  ;;  %1319 = vmatpush.msra.mxu0 %v448_v2  ;;  %v11470_v38 = vld [vmem:[#allocation2 + $0x58] sm:$0xff]  ;;  %v18737_v49 = vunpack.i.l.bf16 %v10968_v21  ;;  %v9354_v2 = vunpack.i.l.bf16 %v11303_v39  ;;  %v18760_v11 = vld [vmem:[#allocation28_spill] sm:$0xff] }
 0x13e   :  { %1275 = vmatpush.msra.mxu3 %v702_v30  ;;  %1036 = vmatpush.msrb.mxu1 %v18735_v4  ;;  %v9369_v4 = vunpack.i.l.bf16 %v11374_v17 }
 0x13f   :  { %1370 = vmatpush.msra.mxu2 %v693_v60  ;;  %7848 = vmatmul.msk.f32.gmra.mxu1 %vm810_vm3, %v11301_v14  ;;  %v163_v60 = vadd.s32 896, %v10574_v5 }
 0x140   :  { %1276 = vmatpush.msra.mxu3 %v701_v22  ;;  %1037 = vmatpush.msrb.mxu1 %v18736_v58  ;;  %v18738_v22 = vunpack.i.l.bf16 %v10559_v36  ;;  %v18739_v58 = vunpack.i.h.bf16 %v10970_v33 }
 0x141   :  { %7859 = vmatmul.msk.f32.gmra.mxu3 %vm810_vm3, %v11359_v45  ;;  %v11466_v56 = vpop.permute.xlu0 %9357  ;;  %1320 = vmatpush.msra.mxu0 %v447_v48  ;;  %v691_v48 = vsel %vm681_vm2, %v9369_v4, %v18159_v25  ;;  %vm195_vm4 = vcmp.lt.s32.totalorder %v163_v60, 1023 }
 0x142   :  { %1038 = vmatpush.msrb.mxu1 %v10944_v8  ;;  %v11468_v32 = vpop.permute.xlu1 %9362  ;;  %v18161_v43 = vunpack.i.h.bf16 %v11466_v56  ;;  %v9359_v30 = vunpack.i.l.bf16 %v11466_v56  ;;  %v470_v8 = vsel %vm424_vm1, %v18738_v22, %v18737_v49  ;;  %v11517_v49 = vpop.permute.xlu2 %679 }
 0x143   :  { %1148 = vmatmul.f32.gmra.mxu0 %v10913_v1  ;;  %v18153_v1 = vunpack.i.h.bf16 %v11468_v32  ;;  %v9364_v33 = vunpack.i.l.bf16 %v11468_v32 }
 0x144   :  { %1039 = vmatpush.msrb.mxu1 %v470_v8  ;;  %v700_v55 = vsel %vm681_vm2, %v18739_v58, %v9359_v30  ;;  %v692_v36 = vsel %vm681_vm2, %v9359_v30, %v18161_v43  ;;  %v446_v30 = vsel %vm424_vm1, %v9354_v2, %v18156_v47  ;;  %v11530_v8 = vld [vmem:[#allocation2 + $0x68] sm:$0xff] }
 0x145   :  { %7881 = vmatmul.msk.f32.gmra.mxu2 %vm810_vm3, %v11470_v38  ;;  %1277 = vmatpush.msra.mxu3 %v700_v55  ;;  %v445_v22 = vsel %vm424_vm1, %v9364_v33, %v18153_v1 }
 0x146   :  { %1040 = vmatpush.msrb.mxu1 %v10867_v61  ;;  %1371 = vmatpush.msra.mxu2 %v692_v36  ;;  %v18740_v61 = vunpack.i.h.bf16 %v11013_v40  ;;  %v18741_v36 = vmov 0.0  }
 0x147   :  { %7849 = vmatmul.msk.f32.gmra.mxu1 %vm810_vm3, %v11359_v45  ;;  %1321 = vmatpush.msra.mxu0 %v446_v30  ;;  %v18152_v30 = vunpack.i.h.bf16 %v11450_v24 }
 0x148   :  { %1041 = vmatpush.msrb.mxu1 %v11044_v13  ;;  %v699_v55 = vsel %vm681_vm2, %v18740_v61, %v9369_v4  ;;  %1372 = vmatpush.msra.mxu2 %v691_v48  ;;  %v11537_v48 = vsel %vm195_vm4, 1.0, %v18741_v36  ;;  %v18743_v61 = vunpack.i.h.bf16 %v10886_v20  ;;  %v9804_v20 = vld [vmem:[%s18676_s22 + $0x1e0] sm:$0xff] }
 0x149   :  { %7860 = vmatmul.msk.f32.gmra.mxu3 %vm810_vm3, %v11421_v51  ;;  %v11526_v13 = vpop.permute.xlu0 %9372  ;;  %18742 = vst [vmem:[#allocation23_spill] sm:$0xff] %v11537_v48  ;;  %1322 = vmatpush.msra.mxu0 %v445_v22 }
 0x14a   :  { %1278 = vmatpush.msra.mxu3 %v699_v55  ;;  %1042 = vmatpush.msrb.mxu1 %v11084_v6  ;;  %v11528_v40 = vpop.permute.xlu1 %9377  ;;  %v18151_v60 = vunpack.i.h.bf16 %v11526_v13  ;;  %v745_v6 = vsel %vm681_vm2, %v11517_v49, %v11148_v23  ;;  %v11597_v1 = vpop.permute.xlu2 %673 }
 0x14b   :  { %1151 = vmatmul.f32.gmra.mxu0 %v10972_v31  ;;  %v18158_v4 = vunpack.i.h.bf16 %v11528_v40  ;;  %v9379_v58 = vunpack.i.l.bf16 %v11528_v40  ;;  %v9374_v31 = vunpack.i.l.bf16 %v11526_v13  ;;  %v809_v23 = vmul.f32 %v11537_v48, %v745_v6 }
 0x14c   :  { %1043 = vmatpush.msrb.mxu1 %v11090_v34  ;;  %v9384_v34 = vunpack.i.l.bf16 %v11450_v24 }
 0x14d   :  { %v698_v55 = vsel %vm681_vm2, %v18743_v61, %v9379_v58  ;;  %v690_v36 = vsel %vm681_vm2, %v9379_v58, %v18158_v4  ;;  %7882 = vmatmul.msk.f32.gmra.mxu2 %vm810_vm3, %v11530_v8  ;;  %v444_v22 = vsel %vm424_vm1, %v9374_v31, %v18151_v60  ;;  %v9805_v58 = vld [vmem:[%s18676_s22 + $0x1a0] sm:$0xff] }
 0x14e   :  { %1044 = vmatpush.msrb.mxu1 %v10963_v54  ;;  %1279 = vmatpush.msra.mxu3 %v698_v55  ;;  %v443_v6 = vsel %vm424_vm1, %v9384_v34, %v18152_v30  ;;  %v9806_v60 = vld [vmem:[%s18676_s22 + $0x160] sm:$0xff] }
 0x14f   :  { %1373 = vmatpush.msra.mxu2 %v690_v36  ;;  %7850 = vmatmul.msk.f32.gmra.mxu1 %vm810_vm3, %v11421_v51  ;;  %v11587_v36 = vld [vmem:[#allocation2 + $0x78] sm:$0xff] }
 0x150   :  { %1217 = vmatpush.msra.mxu1 %v9804_v20  ;;  %v11572_v54 = vpop.f32.mrf.mxu2  ;;  %1323 = vmatpush.msra.mxu0 %v444_v22  ;;  %18744 = vst [vmem:[#allocation24_spill] sm:$0xff] %v11587_v36 }
 0x151   :  { %7861 = vmatmul.msk.f32.gmra.mxu3 %vm810_vm3, %v11470_v38  ;;  %1554 = vmatpush.msrb.mxu2 %v809_v23  ;;  %v11583_v61 = vpop.permute.xlu0 %9387 }
 0x152   :  { %1218 = vmatpush.msra.mxu1 %v9805_v58  ;;  %v11585_v55 = vpop.permute.xlu1 %9392  ;;  %v18154_v23 = vunpack.i.h.bf16 %v11583_v61  ;;  %v9389_v20 = vunpack.i.l.bf16 %v11583_v61  ;;  %1324 = vmatpush.msra.mxu0 %v443_v6 }
 0x153   :  { %1154 = vmatmul.f32.gmra.mxu0 %v11017_v10  ;;  %v18155_v58 = vunpack.i.h.bf16 %v11585_v55  ;;  %v9394_v30 = vunpack.i.l.bf16 %v11585_v55  ;;  %v9807_v10 = vld [vmem:[%s18676_s22 + $0x120] sm:$0xff] }
 0x154   :  { %1219 = vmatpush.msra.mxu1 %v9806_v60  ;;  %v442_v22 = vsel %vm424_vm1, %v9389_v20, %v18154_v23  ;;  %v9809_v23 = vld [vmem:[%s18676_s22 + $0xa0] sm:$0xff] }
 0x155   :  { %7883 = vmatmul.msk.f32.gmra.mxu2 %vm810_vm3, %v11587_v36  ;;  %1325 = vmatpush.msra.mxu0 %v442_v22  ;;  %v441_v60 = vsel %vm424_vm1, %v9394_v30, %v18155_v58  ;;  %v11616_v6 = vpop.f32.mrf.mxu0  ;;  %v9810_v58 = vld [vmem:[%s18676_s22 + $0x1f8] sm:$0xff] }
 0x156   :  { %1220 = vmatpush.msra.mxu1 %v9807_v10  ;;  %v9808_v10 = vld [vmem:[%s18676_s22 + $0xe0] sm:$0xff] }
 0x157   :  { %7851 = vmatmul.msk.f32.gmra.mxu1 %vm810_vm3, %v11470_v38  ;;  %1326 = vmatpush.msra.mxu0 %v441_v60 }
 0x158   :  { %1221 = vmatpush.msra.mxu1 %v9808_v10  ;;  %v11625_v22 = vpop.f32.mrf.mxu2 }
 0x159   :  { %7862 = vmatmul.msk.f32.gmra.mxu3 %vm810_vm3, %v11530_v8  ;;  %1499 = vmatpush.msrb.mxu0 %v9810_v58  ;;  %v9812_v58 = vld [vmem:[%s18676_s22 + $0x1b8] sm:$0xff] }
 0x15a   :  { %1222 = vmatpush.msra.mxu1 %v9809_v23  ;;  %v11633_v10 = vpop.permute.xlu0 %677  ;;  %v11635_v47 = vpop.permute.xlu1 %675  ;;  %v9811_v23 = vld [vmem:[%s18676_s22 + $0x60] sm:$0xff] }
 0x15b   :  { %1157 = vmatmul.f32.gmra.mxu0 %v11060_v15  ;;  %v744_v4 = vsel %vm681_vm2, %v11633_v10, %v11027_v3  ;;  %v743_v15 = vsel %vm681_vm2, %v11635_v47, %v11185_v18  ;;  %v9813_v3 = vld [vmem:[%s18676_s22 + $0x20] sm:$0xff] }
 0x15c   :  { %1223 = vmatpush.msra.mxu1 %v9811_v23  ;;  %1500 = vmatpush.msrb.mxu0 %v9812_v58  ;;  %v801_v60 = vmul.f32 %v11537_v48, %v744_v4  ;;  %v9814_v23 = vld [vmem:[%s18676_s22 + $0x178] sm:$0xff]  ;;  %v18745_v4 = vunpack.i.h.bf16 %v10749_v35  ;;  %v742_v58 = vsel %vm681_vm2, %v11597_v1, %v11219_v53  ;;  %v18746_v35 = vunpack.i.h.bf16 %v10911_v27 }
 0x15d   :  { %7884 = vmatmul.msk.f32.gmra.mxu2 %vm810_vm3, %v11637_v26  ;;  %v793_v53 = vmul.f32 %v11537_v48, %v743_v15  ;;  %v18747_v27 = vunpack.i.h.bf16 %v10968_v21  ;;  %v785_v15 = vmul.f32 %v11537_v48, %v742_v58  ;;  %v18748_v21 = vunpack.i.h.bf16 %v10852_v63  ;;  %v18749_v58 = vld [vmem:[#allocation42_spill] sm:$0xff]  ;;  %v18750_v63 = vld [vmem:[#allocation37_spill] sm:$0xff] }
 0x15e   :  { %1224 = vmatpush.msra.mxu1 %v9813_v3  ;;  %1501 = vmatpush.msrb.mxu0 %v9814_v23  ;;  %v456_v18 = vsel %vm424_vm1, %v18745_v4, %v9334_v62  ;;  %v11673_v3 = vpop.permute.xlu2 %669  ;;  %v11675_v25 = vpop.f32.mrf.mxu0  ;;  %v455_v62 = vsel %vm424_vm1, %v18746_v35, %v9344_v52  ;;  %v9815_v23 = vld [vmem:[%s18676_s22 + $0x138] sm:$0xff] }
 0x15f   :  { %1555 = vmatpush.msrb.mxu2 %v801_v60  ;;  %7852 = vmatmul.msk.f32.gmra.mxu1 %vm810_vm3, %v11530_v8  ;;  %v454_v52 = vsel %vm424_vm1, %v18747_v27, %v9354_v2  ;;  %v11704_v35 = vld [vmem:[#allocation2 + $0x98] sm:$0xff]  ;;  %v453_v2 = vsel %vm424_vm1, %v18748_v21, %v9364_v33  ;;  %v18751_v33 = vunpack.i.h.bf16 %v18750_v63 }
 0x160   :  { %1225 = vmatpush.msra.mxu1 %v456_v18  ;;  %v11688_v60 = vpop.f32.mrf.mxu2  ;;  %1502 = vmatpush.msrb.mxu0 %v9815_v23  ;;  %v9817_v23 = vld [vmem:[%s18676_s22 + $0xb8] sm:$0xff] }
 0x161   :  { %7863 = vmatmul.msk.f32.gmra.mxu3 %vm810_vm3, %v11587_v36  ;;  %1556 = vmatpush.msrb.mxu2 %v793_v53  ;;  %v9816_v53 = vld [vmem:[%s18676_s22 + $0xf8] sm:$0xff]  ;;  %v452_v27 = vsel %vm424_vm1, %v18751_v33, %v9374_v31 }
 0x162   :  { %1226 = vmatpush.msra.mxu1 %v455_v62  ;;  %v11693_v4 = vpop.permute.xlu0 %9397  ;;  %v11695_v18 = vpop.permute.xlu1 %671  ;;  %1503 = vmatpush.msrb.mxu0 %v9816_v53  ;;  %v18752_v53 = vld [vmem:[#allocation38_spill] sm:$0xff]  ;;  %v9819_v63 = vld [vmem:[%s18676_s22 + $0x38] sm:$0xff] }
 0x163   :  { %1160 = vmatmul.f32.gmra.mxu0 %v11112_v28  ;;  %v741_v62 = vsel %vm681_vm2, %v11695_v18, %v11120_v50  ;;  %1557 = vmatpush.msrb.mxu2 %v785_v15  ;;  %v740_v50 = vsel %vm681_vm2, %v11673_v3, %v18749_v58  ;;  %v18753_v21 = vunpack.i.h.bf16 %v18752_v53  ;;  %v18756_v53 = vld [vmem:[#allocation40_spill] sm:$0xff] }
 0x164   :  { %1227 = vmatpush.msra.mxu1 %v454_v52  ;;  %v777_v28 = vmul.f32 %v11537_v48, %v741_v62  ;;  %1504 = vmatpush.msrb.mxu0 %v9817_v23  ;;  %v18160_v52 = vunpack.i.l.bf16 %v11693_v4  ;;  %v9818_v62 = vld [vmem:[%s18676_s22 + $0x78] sm:$0xff]  ;;  %v18165_v23 = vunpack.i.h.bf16 %v11693_v4 }
 0x165   :  { %7885 = vmatmul.msk.f32.gmra.mxu2 %vm810_vm3, %v11704_v35  ;;  %v451_v31 = vsel %vm424_vm1, %v18753_v21, %v9384_v34  ;;  %v18757_v21 = vld [vmem:[#allocation25_spill] sm:$0xff] }
 0x166   :  { %1228 = vmatpush.msra.mxu1 %v453_v2  ;;  %1558 = vmatpush.msrb.mxu2 %v777_v28  ;;  %v769_v2 = vmul.f32 %v11537_v48, %v740_v50  ;;  %v11753_v58 = vpop.permute.xlu2 %665  ;;  %v18754_v50 = vld [vmem:[#allocation39_spill] sm:$0xff] }
 0x167   :  { %v11737_v15 = vpop.f32.mrf.mxu0  ;;  %1505 = vmatpush.msrb.mxu0 %v9818_v62  ;;  %7853 = vmatmul.msk.f32.gmra.mxu1 %vm810_vm3, %v11587_v36 }
 0x168   :  { %1229 = vmatpush.msra.mxu1 %v452_v27  ;;  %v11751_v28 = vpop.f32.mrf.mxu2  ;;  %1559 = vmatpush.msrb.mxu2 %v769_v2  ;;  %v18755_v27 = vunpack.i.h.bf16 %v18754_v50  ;;  %v18758_v50 = vld [vmem:[#allocation36_spill] sm:$0xff] }
 0x169   :  { %7864 = vmatmul.msk.f32.gmra.mxu3 %vm810_vm3, %v11637_v26  ;;  %1506 = vmatpush.msrb.mxu0 %v9819_v63 }
 0x16a   :  { %1230 = vmatpush.msra.mxu1 %v451_v31  ;;  %v11761_v33 = vpop.permute.xlu0 %9402  ;;  %v11763_v34 = vpop.permute.xlu1 %667  ;;  %v450_v62 = vsel %vm424_vm1, %v18755_v27, %v9389_v20  ;;  %v432_v31 = vsel %vm424_vm1, %v18160_v52, %v18757_v21  ;;  %v738_v20 = vsel %vm681_vm2, %v11753_v58, %v11212_v0  ;;  %v18759_v27 = vunpack.i.h.bf16 %v18758_v50  ;;  %v18761_v0 = vld [vmem:[#allocation30_spill] sm:$0xff] }
 0x16b   :  { %1163 = vmatmul.f32.gmra.mxu0 %v18756_v53  ;;  %v18163_v2 = vunpack.i.l.bf16 %v11761_v33  ;;  %v739_v63 = vsel %vm681_vm2, %v11763_v34, %v11297_v57  ;;  %v18164_v43 = vunpack.i.h.bf16 %v11761_v33  ;;  %v431_v57 = vsel %vm424_vm1, %v18165_v23, %v18760_v11 }
 0x16c   :  { %1231 = vmatpush.msra.mxu1 %v450_v62  ;;  %1507 = vmatpush.msrb.mxu0 %v432_v31  ;;  %v449_v21 = vsel %vm424_vm1, %v18759_v27, %v9394_v30  ;;  %v761_v52 = vmul.f32 %v11537_v48, %v739_v63  ;;  %v753_v31 = vmul.f32 %v11537_v48, %v738_v20  ;;  %v18762_v63 = vld [vmem:[#allocation31_spill] sm:$0xff] }
 0x16d   :  { %v430_v62 = vsel %vm424_vm1, %v18163_v2, %v18761_v0  ;;  %7896 = vmatmul.msk.f32.vlgmr.msra.gmra.mxu2 %vm810_vm3, %v11223_v9  ;;  %v429_v50 = vsel %vm424_vm1, %v18164_v43, %v18762_v63  ;;  %v18765_v2 = vld [vmem:[#allocation33_spill] sm:$0xff] }
 0x16e   :  { %1232 = vmatpush.msra.mxu1 %v449_v21  ;;  %1508 = vmatpush.msrb.mxu0 %v431_v57  ;;  %v18764_v21 = vld [vmem:[#allocation41_spill] sm:$0xff] }
 0x16f   :  { %1560 = vmatpush.msrb.mxu2 %v761_v52  ;;  %v11806_v30 = vpop.f32.mrf.mxu0  ;;  %7854 = vmatmul.msk.f32.gmra.mxu1 %vm810_vm3, %v11637_v26  ;;  %v11820_v52 = vpop.permute.xlu2 %1650  ;;  %v18766_v43 = vld [vmem:[#allocation29_spill] sm:$0xff] }
 0x170   :  { %1509 = vmatpush.msrb.mxu0 %v430_v62  ;;  %v11811_v11 = vpop.f32.mrf.mxu2  ;;  %18763 = vst [vmem:[#allocation32_spill] sm:$0xff] %v11820_v52 }
 0x171   :  { %7865 = vmatmul.msk.f32.gmra.mxu3 %vm810_vm3, %v11704_v35  ;;  %1561 = vmatpush.msrb.mxu2 %v753_v31 }
 0x172   :  { %1510 = vmatpush.msrb.mxu0 %v429_v50  ;;  %v11822_v20 = vpop.permute.xlu0 %9407  ;;  %v11824_v27 = vpop.permute.xlu1 %9412 }
 0x173   :  { %1166 = vmatmul.f32.gmra.mxu0 %v18764_v21  ;;  %v18168_v57 = vunpack.i.h.bf16 %v11822_v20  ;;  %v18167_v0 = vunpack.i.l.bf16 %v11822_v20  ;;  %v9414_v62 = vunpack.i.l.bf16 %v11824_v27  ;;  %v9415_v63 = vunpack.i.h.bf16 %v11824_v27 }
 0x175   :  { %v428_v31 = vsel %vm424_vm1, %v18167_v0, %v18765_v2  ;;  %7897 = vmatmul.msk.f32.gmra.mxu2 %vm810_vm3, %v11262_v44  ;;  %v427_v23 = vsel %vm424_vm1, %v18168_v57, %v18766_v43  ;;  %v18767_v2 = vunpack.i.h.bf16 %v11163_v7  ;;  %v18768_v0 = vld [vmem:[#allocation34_spill] sm:$0xff]  ;;  %v688_v7 = vsel %vm681_vm2, %v9325_v19, %v11633_v10 }
 0x176   :  { %1511 = vmatpush.msrb.mxu0 %v428_v31  ;;  %v426_v43 = vsel %vm424_vm1, %v9414_v62, %v18768_v0  ;;  %v686_v19 = vsel %vm681_vm2, %v18771_v42, %v11597_v1  ;;  %v11907_v1 = vld [vmem:[#allocation2 + $0x10] sm:$0xff] }
 0x177   :  { %v11838_v50 = vpop.f32.mrf.mxu0  ;;  %7855 = vmatmul.msk.f32.gmra.mxu1 %vm810_vm3, %v11704_v35  ;;  %v689_v31 = vsel %vm681_vm2, %v18767_v2, %v11517_v49  ;;  %v18770_v49 = vld [vmem:[#allocation35_spill] sm:$0xff]  ;;  %v11876_v2 = vpop.permute.xlu2 %1640 }
 0x178   :  { %1512 = vmatpush.msrb.mxu0 %v427_v23  ;;  %v11847_v46 = vpop.f32.mrf.mxu2  ;;  %v11863_v23 = vld [vmem:[#allocation2] sm:$0xff]  ;;  %v425_v0 = vsel %vm424_vm1, %v9415_v63, %v18770_v49  ;;  %v9824_v49 = vld [vmem:[%s18676_s22 + $0x170] sm:$0xff] }
 0x179   :  { %7866 = vmatmul.msk.f32.vlgmr.msrb.gmra.mxu3 %vm810_vm3, %v11223_v9 }
 0x17a   :  { %1460 = vmatpush.msrb.mxu3 %v689_v31  ;;  %v11861_v57 = vpop.permute.xlu1 %1790  ;;  %1513 = vmatpush.msrb.mxu0 %v426_v43  ;;  %v687_v31 = vsel %vm681_vm2, %v9330_v59, %v11635_v47  ;;  %v18772_v59 = vunpack.i.h.bf16 %v11415_v41  ;;  %v18773_v41 = vunpack.i.h.bf16 %v11466_v56  ;;  %v11926_v42 = vpop.permute.xlu0 %1645 }
 0x17b   :  { %18769 = vst [vmem:[#allocation42_spill] sm:$0xff] %v11861_v57  ;;  %1327 = vmatmul.f32.vlgmr.msra.gmra.mxu0 %v11863_v23  ;;  %v12100_v57 = vld [vmem:[#allocation2 + $0x70] sm:$0xff] }
 0x17c   :  { %1461 = vmatpush.msrb.mxu3 %v688_v7  ;;  %1514 = vmatpush.msrb.mxu0 %v425_v0  ;;  %v685_v16 = vsel %vm681_vm2, %v18772_v59, %v11695_v18  ;;  %v9823_v7 = vld [vmem:[%s18676_s22 + $0x1b0] sm:$0xff]  ;;  %v684_v18 = vsel %vm681_vm2, %v18773_v41, %v11673_v3  ;;  %v18774_v0 = vunpack.i.h.bf16 %v11374_v17  ;;  %18803 = vst [vmem:[#allocation35_spill] sm:$0xff] %v12100_v57 }
 0x17d   :  { %7898 = vmatmul.msk.f32.gmra.mxu2 %vm810_vm3, %v11301_v14  ;;  %v9825_v3 = vld [vmem:[%s18676_s22 + $0x130] sm:$0xff] }
 0x17e   :  { %1462 = vmatpush.msrb.mxu3 %v687_v31  ;;  %v683_v31 = vsel %vm681_vm2, %v18774_v0, %v11763_v34  ;;  %v9826_v59 = vld [vmem:[%s18676_s22 + $0xf0] sm:$0xff]  ;;  %v18776_v0 = vunpack.i.l.bf16 %v11693_v4 }
 0x17f   :  { %v11890_v10 = vpop.f32.mrf.mxu0  ;;  %1045 = vmatmul.f32.vlgmr.msrb.gmra.mxu1 %v11863_v23  ;;  %v11930_v56 = vpop.permute.xlu2 %1635  ;;  %v9830_v41 = vld [vmem:[%s18676_s22 + $0x30] sm:$0xff] }
 0x180   :  { %1463 = vmatpush.msrb.mxu3 %v686_v19  ;;  %v11893_v43 = vpop.f32.mrf.mxu2  ;;  %1405 = vmatpush.msrb.mxu1 %v9821_v29  ;;  %v18775_v19 = vunpack.i.h.bf16 %v11528_v40  ;;  %v11952_v40 = vld [vmem:[#allocation2 + $0x20] sm:$0xff] }
 0x181   :  { %7867 = vmatmul.msk.f32.gmra.mxu3 %vm810_vm3, %v11262_v44 }
 0x182   :  { %1464 = vmatpush.msrb.mxu3 %v685_v16  ;;  %v11905_v47 = vpop.permute.xlu1 %1785  ;;  %1406 = vmatpush.msrb.mxu1 %v9823_v7  ;;  %v682_v17 = vsel %vm681_vm2, %v18775_v19, %v11753_v58  ;;  %v9828_v58 = vld [vmem:[%s18676_s22 + $0xb0] sm:$0xff] }
 0x183   :  { %1330 = vmatmul.f32.gmra.mxu0 %v11907_v1  ;;  %v9829_v7 = vld [vmem:[%s18676_s22 + $0x70] sm:$0xff] }
 0x184   :  { %1465 = vmatpush.msrb.mxu3 %v684_v18  ;;  %1407 = vmatpush.msrb.mxu1 %v9824_v49  ;;  %v11968_v49 = vpop.permute.xlu0 %1780 }
 0x185   :  { %7899 = vmatmul.msk.f32.gmra.mxu2 %vm810_vm3, %v11359_v45 }
 0x186   :  { %1466 = vmatpush.msrb.mxu3 %v683_v31  ;;  %1408 = vmatpush.msrb.mxu1 %v9825_v3  ;;  %v18777_v31 = vunpack.i.h.bf16 %v11357_v37  ;;  %v11991_v37 = vld [vmem:[#allocation2 + $0x30] sm:$0xff] }
 0x187   :  { %v11940_v34 = vpop.f32.mrf.mxu0  ;;  %1048 = vmatmul.f32.gmra.mxu1 %v11907_v1  ;;  %v11977_v19 = vpop.permute.xlu2 %1775 }
 0x188   :  { %1467 = vmatpush.msrb.mxu3 %v682_v17  ;;  %v11943_v29 = vpop.f32.mrf.mxu2  ;;  %1409 = vmatpush.msrb.mxu1 %v9826_v59  ;;  %v440_v3 = vsel %vm424_vm1, %v18777_v31, %v18776_v0  ;;  %v18779_v59 = vunpack.i.h.bf16 %v11693_v4  ;;  %v18782_v0 = vunpack.i.l.bf16 %v11761_v33  ;;  %v18783_v31 = vunpack.i.h.bf16 %v11303_v39 }
 0x189   :  { %7868 = vmatmul.msk.f32.gmra.mxu3 %vm810_vm3, %v11301_v14  ;;  %v18785_v4 = vunpack.i.h.bf16 %v11468_v32  ;;  %v18786_v39 = vunpack.i.l.bf16 %v11822_v20 }
 0x18a   :  { %v11950_v16 = vpop.permute.xlu1 %1630  ;;  %1410 = vmatpush.msrb.mxu1 %v9828_v58  ;;  %v18780_v58 = vunpack.i.h.bf16 %v11413_v12  ;;  %v18784_v12 = vunpack.i.h.bf16 %v11761_v33 }
 0x18b   :  { %1333 = vmatmul.f32.gmra.mxu0 %v11952_v40 }
 0x18c   :  { %1411 = vmatpush.msrb.mxu1 %v9829_v7  ;;  %v439_v7 = vsel %vm424_vm1, %v18780_v58, %v18779_v59  ;;  %v437_v59 = vsel %vm424_vm1, %v18785_v4, %v18784_v12  ;;  %v12021_v32 = vpop.permute.xlu0 %1625  ;;  %v18790_v12 = vunpack.i.h.bf16 %v11450_v24  ;;  %v12031_v4 = vld [vmem:[#allocation2 + $0x40] sm:$0xff]  ;;  %v18792_v24 = vunpack.i.h.bf16 %v11585_v55 }
 0x18d   :  { %7900 = vmatmul.msk.f32.gmra.mxu2 %vm810_vm3, %v11421_v51  ;;  %18788 = vst [vmem:[#allocation39_spill] sm:$0xff] %v12021_v32 }
 0x18e   :  { %1412 = vmatpush.msrb.mxu1 %v9830_v41 }
 0x18f   :  { %v11966_v18 = vpop.f32.mrf.mxu0  ;;  %1051 = vmatmul.f32.gmra.mxu1 %v11952_v40  ;;  %v12023_v33 = vpop.permute.xlu2 %1620 }
 0x190   :  { %v11979_v17 = vpop.f32.mrf.mxu2  ;;  %1413 = vmatpush.msrb.mxu1 %v440_v3  ;;  %v438_v3 = vsel %vm424_vm1, %v18783_v31, %v18782_v0 }
 0x191   :  { %18778 = vst [vmem:[#allocation37_spill] sm:$0xff] %v11979_v17  ;;  %7869 = vmatmul.msk.f32.gmra.mxu3 %vm810_vm3, %v11359_v45 }
 0x192   :  { %v11989_v41 = vpop.permute.xlu1 %1770  ;;  %1414 = vmatpush.msrb.mxu1 %v439_v7  ;;  %v18787_v7 = vunpack.i.h.bf16 %v11526_v13 }
 0x193   :  { %18781 = vst [vmem:[#allocation38_spill] sm:$0xff] %v11989_v41  ;;  %1336 = vmatmul.f32.gmra.mxu0 %v11991_v37 }
 0x194   :  { %1415 = vmatpush.msrb.mxu1 %v438_v3  ;;  %v436_v0 = vsel %vm424_vm1, %v18787_v7, %v18786_v39  ;;  %v18789_v3 = vunpack.i.h.bf16 %v11822_v20  ;;  %v18791_v39 = vunpack.i.h.bf16 %v11583_v61  ;;  %v433_v20 = vsel %vm424_vm1, %v18792_v24, %v9415_v63  ;;  %v12060_v27 = vpop.permute.xlu0 %1765 }
 0x195   :  { %7901 = vmatmul.msk.f32.gmra.mxu2 %vm810_vm3, %v11470_v38  ;;  %18795 = vst [vmem:[#allocation36_spill] sm:$0xff] %v12060_v27 }
 0x196   :  { %1416 = vmatpush.msrb.mxu1 %v437_v59  ;;  %v435_v13 = vsel %vm424_vm1, %v18790_v12, %v18789_v3  ;;  %v434_v7 = vsel %vm424_vm1, %v18791_v39, %v9414_v62  ;;  %v12057_v62 = vld [vmem:[#allocation2 + $0x50] sm:$0xff]  ;;  %v12077_v39 = vld [vmem:[#allocation2 + $0x60] sm:$0xff] }
 0x197   :  { %v12008_v58 = vpop.f32.mrf.mxu0  ;;  %1054 = vmatmul.f32.gmra.mxu1 %v11991_v37  ;;  %v12062_v55 = vpop.permute.xlu2 %1760  ;;  %18798 = vst [vmem:[#allocation31_spill] sm:$0xff] %v12077_v39 }
 0x198   :  { %v12017_v31 = vpop.f32.mrf.mxu2  ;;  %1417 = vmatpush.msrb.mxu1 %v436_v0 }
 0x199   :  { %7870 = vmatmul.msk.f32.gmra.mxu3 %vm810_vm3, %v11421_v51 }
 0x19a   :  { %1418 = vmatpush.msrb.mxu1 %v435_v13  ;;  %v12034_v59 = vpop.permute.xlu1 %1615 }
 0x19b   :  { %1339 = vmatmul.f32.gmra.mxu0 %v12031_v4 }
 0x19c   :  { %1419 = vmatpush.msrb.mxu1 %v434_v7  ;;  %v12080_v24 = vpop.permute.xlu0 %1610 }
 0x19d   :  { %7902 = vmatmul.msk.f32.gmra.mxu2 %vm810_vm3, %v11530_v8 }
 0x19e   :  { %1420 = vmatpush.msrb.mxu1 %v433_v20 }
 0x19f   :  { %v12050_v0 = vpop.f32.mrf.mxu0  ;;  %1057 = vmatmul.f32.gmra.mxu1 %v12031_v4  ;;  %v12085_v48 = vpop.permute.xlu2 %1605 }
 0x1a0   :  { %18793 = vst [vmem:[#allocation40_spill] sm:$0xff] %v12050_v0  ;;  %v12053_v61 = vpop.f32.mrf.mxu2 }
 0x1a1   :  { %18794 = vst [vmem:[#allocation25_spill] sm:$0xff] %v12053_v61  ;;  %7871 = vmatmul.msk.f32.gmra.mxu3 %vm810_vm3, %v11470_v38 }
 0x1a2   :  { %v12064_v3 = vpop.permute.xlu1 %1755  ;;  %18799 = vst [vmem:[#allocation41_spill] sm:$0xff] %v12085_v48 }
 0x1a3   :  { %1342 = vmatmul.f32.gmra.mxu0 %v12057_v62 }
 0x1a5   :  { %7903 = vmatmul.msk.f32.gmra.mxu2 %vm810_vm3, %v11587_v36 }
 0x1a7   :  { %v12068_v63 = vpop.f32.mrf.mxu0  ;;  %1060 = vmatmul.f32.gmra.mxu1 %v12057_v62 }
 0x1a8   :  { %18796 = vst [vmem:[#allocation28_spill] sm:$0xff] %v12068_v63  ;;  %v12071_v12 = vpop.f32.mrf.mxu2 }
 0x1a9   :  { %18797 = vst [vmem:[#allocation30_spill] sm:$0xff] %v12071_v12  ;;  %7872 = vmatmul.msk.f32.gmra.mxu3 %vm810_vm3, %v11530_v8  ;;  %v12075_v13 = vpop.f32.mrf.mxu3 }
 0x1ab   :  { %1345 = vmatmul.f32.gmra.mxu0 %v12077_v39  ;;  %v12087_v12 = vpop.permute.xlu1 %1745 }
 0x1ac   :  { %v905_v7 = vpop.f32.mrf.mxu1  ;;  %18800 = vst [vmem:[#allocation33_spill] sm:$0xff] %v12087_v12 }
 0x1ad   :  { %v906_v20 = vadd.f32 %v905_v7, %v11616_v6  ;;  %7904 = vmatmul.msk.f32.gmra.mxu2 %vm810_vm3, %v11637_v26 }
 0x1af   :  { %v1653_v61 = vmul.f32 %v12085_v48, %v906_v20  ;;  %v12090_v63 = vpop.f32.mrf.mxu0  ;;  %1063 = vmatmul.f32.gmra.mxu1 %v12077_v39 }
 0x1b0   :  { %18801 = vst [vmem:[#allocation29_spill] sm:$0xff] %v12090_v63  ;;  %v12093_v5 = vpop.f32.mrf.mxu2 }
 0x1b1   :  { %18802 = vst [vmem:[#allocation34_spill] sm:$0xff] %v12093_v5  ;;  %7873 = vmatmul.msk.f32.gmra.mxu3 %vm810_vm3, %v11587_v36  ;;  %v1793_v6 = vadd.f32 %v12087_v12, %v1653_v61  ;;  %v12098_v7 = vpop.f32.mrf.mxu3  ;;  %v12110_v5 = vpop.permute.xlu0 %1750 }
 0x1b3   :  { %1348 = vmatmul.f32.gmra.mxu0 %v12100_v57  ;;  %v12103_v52 = vmax.f32 %v1793_v6, 0.0 }
 0x1b4   :  { %v908_v20 = vpop.f32.mrf.mxu1 }
 0x1b5   :  { %v909_v63 = vadd.f32 %v908_v20, %v11675_v25  ;;  %2293 = vrot.lane.b32.xlu0 %v12103_v52, %s10073_s27  ;;  %7905 = vmatmul.msk.f32.gmra.mxu2 %vm810_vm3, %v11704_v35 }
 0x1b7   :  { %v1661_v61 = vmul.f32 %v12080_v24, %v909_v63  ;;  %1066 = vmatmul.f32.gmra.mxu1 %v12100_v57 }
 0x1b8   :  { %v12113_v39 = vpop.f32.mrf.mxu0  ;;  %v12116_v36 = vpop.f32.mrf.mxu2 }
 0x1b9   :  { %18804 = vst [vmem:[#allocation43_spill] sm:$0xff] %v12113_v39  ;;  %7874 = vmatmul.msk.f32.gmra.mxu3 %vm810_vm3, %v11637_v26  ;;  %v1801_v25 = vadd.f32 %v12110_v5, %v1661_v61 }
 0x1ba   :  { %18805 = vst [vmem:[#allocation44_spill] sm:$0xff] %v12116_v36  ;;  %v1005_v6 = vpop.f32.mrf.mxu3 }
 0x1bb   :  { %1351 = vmatmul.f32.gmra.mxu0 %v18756_v53  ;;  %v12122_v20 = vmax.f32 %v1801_v25, 0.0  ;;  %v1006_v63 = vadd.f32 %v1005_v6, %v11688_v60 }
 0x1bc   :  { %v911_v17 = vpop.f32.mrf.mxu1 }
 0x1bd   :  { %v912_v0 = vadd.f32 %v911_v17, %v11737_v15  ;;  %2295 = vrot.lane.b32.xlu2 %v12122_v20, %s10073_s27  ;;  %7916 = vmatmul.msk.f32.vlgmr.msrb.gmra.mxu2 %vm810_vm3, %v11223_v9  ;;  %v1670_v17 = vmul.f32 %v12034_v59, %v1006_v63 }
 0x1bf   :  { %v1669_v39 = vmul.f32 %v12034_v59, %v912_v0  ;;  %1069 = vmatmul.f32.gmra.mxu1 %v18756_v53  ;;  %v1810_v53 = vadd.f32 %v12064_v3, %v1670_v17 }
 0x1c0   :  { %v12131_v36 = vpop.f32.mrf.mxu0  ;;  %v12134_v61 = vpop.f32.mrf.mxu2 }
 0x1c1   :  { %18806 = vst [vmem:[#allocation45_spill] sm:$0xff] %v12134_v61  ;;  %7875 = vmatmul.msk.f32.gmra.mxu3 %vm810_vm3, %v11704_v35  ;;  %v1809_v15 = vadd.f32 %v12064_v3, %v1669_v39 }
 0x1c3   :  { %1354 = vmatmul.f32.gmra.mxu0 %v18764_v21  ;;  %v12141_v57 = vmax.f32 %v1809_v15, 0.0 }
 0x1c4   :  { %v1008_v25 = vpop.f32.mrf.mxu3  ;;  %v914_v0 = vpop.f32.mrf.mxu1 }
 0x1c5   :  { %v1009_v60 = vadd.f32 %v1008_v25, %v11751_v28  ;;  %v915_v6 = vadd.f32 %v914_v0, %v11806_v30  ;;  %2297 = vrot.lane.b32.xlu1 %v12141_v57, %s10073_s27  ;;  %7917 = vmatmul.msk.f32.gmra.mxu2 %vm810_vm3, %v11262_v44  ;;  %v12161_v25 = vmax.f32 %v1810_v53, 0.0 }
 0x1c7   :  { %v1678_v39 = vmul.f32 %v12023_v33, %v1009_v60  ;;  %v1677_v63 = vmul.f32 %v12023_v33, %v915_v6  ;;  %1072 = vmatmul.f32.gmra.mxu1 %v18764_v21 }
 0x1c8   :  { %v12153_v61 = vpop.f32.mrf.mxu0  ;;  %v12156_v28 = vpop.f32.mrf.mxu2 }
 0x1c9   :  { %v1818_v15 = vadd.f32 %v12062_v55, %v1678_v39  ;;  %18807 = vst [vmem:[#allocation46_spill] sm:$0xff] %v12153_v61  ;;  %7886 = vmatmul.msk.f32.vlgmr.msra.gmra.mxu3 %vm810_vm3, %v11223_v9  ;;  %v1817_v30 = vadd.f32 %v12062_v55, %v1677_v63 }
 0x1ca   :  { %18808 = vst [vmem:[#allocation47_spill] sm:$0xff] %v12156_v28 }
 0x1cb   :  { %v12163_v17 = vmax.f32 %v1818_v15, 0.0  ;;  %1515 = vmatmul.f32.vlgmr.msrb.gmra.mxu0 %v11863_v23  ;;  %v1897_v0 = vmax.f32 %v1817_v30, 0.0 }
 0x1cc   :  { %v1011_v60 = vpop.f32.mrf.mxu3  ;;  %v917_v39 = vpop.f32.mrf.mxu1 }
 0x1cd   :  { %v9419_v6 = vpack.i.bf16 %v12161_v25, %v12163_v17  ;;  %1979 = vrot.lane.b32.xlu0 %v1897_v0, %s10072_s1  ;;  %2299 = vrot.lane.b32.xlu2 %v1897_v0, %s10073_s27  ;;  %v918_v9 = vadd.f32 %v917_v39, %v11838_v50  ;;  %v1012_v21 = vadd.f32 %v1011_v60, %v11811_v11 }
 0x1ce   :  { %7918 = vmatmul.msk.f32.gmra.mxu2 %vm810_vm3, %v11301_v14 }
 0x1cf   :  { %9420 = vrot.lane.b32.xlu1 %v9419_v6, %s10072_s1  ;;  %v1685_v53 = vmul.f32 %v12021_v32, %v918_v9  ;;  %1233 = vmatmul.f32.vlgmr.msra.gmra.mxu1 %v11863_v23  ;;  %v1686_v6 = vmul.f32 %v12021_v32, %v1012_v21  ;;  %v1003_v9 = vadd.f32 %v12098_v7, %v11625_v22 }
 0x1d0   :  { %v12176_v63 = vpop.f32.mrf.mxu0  ;;  %v12179_v15 = vpop.f32.mrf.mxu2 }
 0x1d1   :  { %7887 = vmatmul.msk.f32.gmra.mxu3 %vm810_vm3, %v11262_v44  ;;  %v1825_v50 = vadd.f32 %v12060_v27, %v1685_v53  ;;  %v1000_v44 = vadd.f32 %v12075_v13, %v11572_v54  ;;  %v1826_v22 = vadd.f32 %v12060_v27, %v1686_v6 }
 0x1d3   :  { %1518 = vmatmul.f32.gmra.mxu0 %v11907_v1  ;;  %v1905_v60 = vmax.f32 %v1825_v50, 0.0 }
 0x1d4   :  { %v1014_v30 = vpop.f32.mrf.mxu3  ;;  %v920_v39 = vpop.f32.mrf.mxu1 }
 0x1d5   :  { %v1015_v11 = vadd.f32 %v1014_v30, %v11847_v46  ;;  %v921_v28 = vadd.f32 %v920_v39, %v11890_v10  ;;  %v1662_v10 = vmul.f32 %v12080_v24, %v1003_v9 }
 0x1d6   :  { %7919 = vmatmul.msk.f32.gmra.mxu2 %vm810_vm3, %v11359_v45 }
 0x1d7   :  { %v1694_v61 = vmul.f32 %v11950_v16, %v1015_v11  ;;  %2301 = vrot.lane.b32.xlu1 %v1905_v60, %s10073_s27  ;;  %v1693_v46 = vmul.f32 %v11950_v16, %v921_v28  ;;  %1236 = vmatmul.f32.gmra.mxu1 %v11907_v1  ;;  %v12213_v28 = vmax.f32 %v1826_v22, 0.0 }
 0x1d8   :  { %v12198_v53 = vpop.f32.mrf.mxu0  ;;  %v12202_v7 = vpop.f32.mrf.mxu2 }
 0x1d9   :  { %v1834_v21 = vadd.f32 %v11989_v41, %v1694_v61  ;;  %18809 = vst [vmem:[#allocation48_spill] sm:$0xff] %v12202_v7  ;;  %7888 = vmatmul.msk.f32.gmra.mxu3 %vm810_vm3, %v11301_v14  ;;  %v1833_v54 = vadd.f32 %v11989_v41, %v1693_v46  ;;  %v1654_v61 = vmul.f32 %v12085_v48, %v1000_v44 }
 0x1da   :  { %v1802_v14 = vadd.f32 %v12110_v5, %v1662_v10 }
 0x1db   :  { %v12207_v50 = vmax.f32 %v1834_v21, 0.0  ;;  %1521 = vmatmul.f32.gmra.mxu0 %v11952_v40  ;;  %v1913_v30 = vmax.f32 %v1833_v54, 0.0  ;;  %v1794_v9 = vadd.f32 %v12087_v12, %v1654_v61 }
 0x1dc   :  { %v1017_v13 = vpop.f32.mrf.mxu3  ;;  %v923_v6 = vpop.f32.mrf.mxu1 }
 0x1dd   :  { %2738 = vmatpush.msra.mxu0 %v12207_v50  ;;  %2303 = vrot.lane.b32.xlu0 %v1913_v30, %s10073_s27  ;;  %v924_v11 = vadd.f32 %v923_v6, %v11940_v34  ;;  %v12232_v34 = vmax.f32 %v1802_v14, 0.0  ;;  %v1018_v54 = vadd.f32 %v1017_v13, %v11893_v43 }
 0x1de   :  { %2644 = vmatpush.msra.mxu1 %v1913_v30  ;;  %7920 = vmatmul.msk.f32.gmra.mxu2 %vm810_vm3, %v11421_v51 }
 0x1df   :  { %2739 = vmatpush.msra.mxu0 %v12213_v28  ;;  %1981 = vrot.lane.b32.xlu1 %v1905_v60, %s10072_s1  ;;  %v1701_v46 = vmul.f32 %v11930_v56, %v924_v11 }
 0x1e0   :  { %v12220_v39 = vpop.f32.mrf.mxu0  ;;  %1239 = vmatmul.f32.gmra.mxu1 %v11952_v40  ;;  %v12225_v44 = vpop.f32.mrf.mxu2 }
 0x1e1   :  { %18810 = vst [vmem:[#allocation49_spill] sm:$0xff] %v12220_v39  ;;  %2740 = vmatpush.msra.mxu0 %v12163_v17  ;;  %2645 = vmatpush.msra.mxu1 %v1905_v60  ;;  %v12238_v60 = vmax.f32 %v1794_v9, 0.0  ;;  %v1841_v43 = vadd.f32 %v11977_v19, %v1701_v46 }
 0x1e2   :  { %7889 = vmatmul.msk.f32.gmra.mxu3 %vm810_vm3, %v11359_v45  ;;  %v9424_v45 = vpack.i.bf16 %v12213_v28, %v12207_v50 }
 0x1e3   :  { %2741 = vmatpush.msra.mxu0 %v12161_v25  ;;  %2646 = vmatpush.msra.mxu1 %v1897_v0  ;;  %v12266_v9 = vmax.f32 %v1841_v43, 0.0 }
 0x1e4   :  { %1524 = vmatmul.f32.gmra.mxu0 %v11991_v37  ;;  %v1020_v21 = vpop.f32.mrf.mxu3  ;;  %v926_v10 = vpop.f32.mrf.mxu1 }
 0x1e5   :  { %v1021_v22 = vadd.f32 %v1020_v21, %v11943_v29  ;;  %2742 = vmatpush.msra.mxu0 %v12232_v34  ;;  %2647 = vmatpush.msra.mxu1 %v12141_v57  ;;  %v927_v61 = vadd.f32 %v926_v10, %v11966_v18  ;;  %v1702_v18 = vmul.f32 %v11930_v56, %v1018_v54 }
 0x1e6   :  { %1983 = vrot.lane.b32.xlu0 %v1913_v30, %s10072_s1  ;;  %7921 = vmatmul.msk.f32.gmra.mxu2 %vm810_vm3, %v11470_v38  ;;  %18811 = vst [vmem:[#allocation50_spill] sm:$0xff] %v12266_v9 }
 0x1e7   :  { %2743 = vmatpush.msra.mxu0 %v12238_v60  ;;  %9425 = vrot.lane.b32.xlu1 %v9424_v45, %s10072_s1  ;;  %v1710_v29 = vmul.f32 %v11876_v2, %v1021_v22  ;;  %v1709_v0 = vmul.f32 %v11876_v2, %v927_v61  ;;  %v1842_v22 = vadd.f32 %v11977_v19, %v1702_v18 }
 0x1e8   :  { %2648 = vmatpush.msra.mxu1 %v12122_v20  ;;  %v12251_v6 = vpop.f32.mrf.mxu0  ;;  %v12255_v13 = vpop.f32.mrf.mxu2 }
 0x1e9   :  { %1242 = vmatmul.f32.gmra.mxu1 %v11991_v37  ;;  %v1849_v30 = vadd.f32 %v11968_v49, %v1709_v0  ;;  %v1850_v14 = vadd.f32 %v11968_v49, %v1710_v29 }
 0x1ea   :  { %2649 = vmatpush.msra.mxu1 %v12103_v52  ;;  %7890 = vmatmul.msk.f32.gmra.mxu3 %vm810_vm3, %v11421_v51 }
 0x1eb   :  { %v12268_v21 = vmax.f32 %v1849_v30, 0.0  ;;  %v12278_v45 = vmax.f32 %v1850_v14, 0.0 }
 0x1ec   :  { %1527 = vmatmul.f32.gmra.mxu0 %v12031_v4  ;;  %v1023_v11 = vpop.f32.mrf.mxu3  ;;  %v929_v46 = vpop.f32.mrf.mxu1 }
 0x1ed   :  { %18812 = vst [vmem:[#allocation51_spill] sm:$0xff] %v12268_v21  ;;  %v930_v51 = vadd.f32 %v929_v46, %v12008_v58  ;;  %2307 = vrot.lane.b32.xlu2 %v12268_v21, %s10073_s27  ;;  %v12288_v58 = vmax.f32 %v1842_v22, 0.0  ;;  %v18817_v46 = vld [vmem:[#allocation40_spill] sm:$0xff]  ;;  %v18818_v22 = vld [vmem:[#allocation37_spill] sm:$0xff] }
 0x1ee   :  { %1985 = vrot.lane.b32.xlu0 %v12266_v9, %s10072_s1  ;;  %18813 = vst [vmem:[#allocation52_spill] sm:$0xff] %v12278_v45  ;;  %7922 = vmatmul.msk.f32.gmra.mxu2 %vm810_vm3, %v11530_v8 }
 0x1ef   :  { %2305 = vrot.lane.b32.xlu1 %v12266_v9, %s10073_s27  ;;  %v1717_v10 = vmul.f32 %v11926_v42, %v930_v51  ;;  %18815 = vst [vmem:[#allocation54_spill] sm:$0xff] %v12288_v58  ;;  %v9429_v43 = vpack.i.bf16 %v12288_v58, %v12278_v45  ;;  %v1024_v51 = vadd.f32 %v1023_v11, %v18818_v22  ;;  %v18823_v11 = vld [vmem:[#allocation42_spill] sm:$0xff] }
 0x1f0   :  { %v12281_v54 = vpop.f32.mrf.mxu0  ;;  %v12284_v61 = vpop.f32.mrf.mxu2 }
 0x1f1   :  { %1245 = vmatmul.f32.gmra.mxu1 %v12031_v4  ;;  %18814 = vst [vmem:[#allocation53_spill] sm:$0xff] %v12284_v61  ;;  %v1857_v29 = vadd.f32 %v11905_v47, %v1717_v10  ;;  %v18819_v10 = vld [vmem:[#allocation32_spill] sm:$0xff] }
 0x1f2   :  { %7891 = vmatmul.msk.f32.gmra.mxu3 %vm810_vm3, %v11470_v38 }
 0x1f3   :  { %v12296_v18 = vmax.f32 %v1857_v29, 0.0 }
 0x1f4   :  { %1530 = vmatmul.f32.gmra.mxu0 %v12057_v62  ;;  %v1026_v0 = vpop.f32.mrf.mxu3  ;;  %v932_v14 = vpop.f32.mrf.mxu1 }
 0x1f5   :  { %18816 = vst [vmem:[#allocation55_spill] sm:$0xff] %v12296_v18  ;;  %v1027_v30 = vadd.f32 %v1026_v0, %v12017_v31  ;;  %v933_v38 = vadd.f32 %v932_v14, %v18817_v46  ;;  %9430 = vrot.lane.b32.xlu2 %v9429_v43, %s10072_s1  ;;  %v18822_v0 = vld [vmem:[#allocation24_spill] sm:$0xff]  ;;  %v1718_v14 = vmul.f32 %v11926_v42, %v1024_v51  ;;  %v18824_v46 = vld [vmem:[#allocation31_spill] sm:$0xff] }
 0x1f6   :  { %2309 = vrot.lane.b32.xlu0 %v12296_v18, %s10073_s27  ;;  %7923 = vmatmul.msk.f32.gmra.mxu2 %vm810_vm3, %v18822_v0 }
 0x1f7   :  { %1987 = vrot.lane.b32.xlu1 %v12268_v21, %s10072_s1  ;;  %v1725_v61 = vmul.f32 %v18819_v10, %v933_v38  ;;  %v1726_v29 = vmul.f32 %v18819_v10, %v1027_v30 }
 0x1f8   :  { %v12307_v9 = vpop.f32.mrf.mxu0  ;;  %v12310_v31 = vpop.f32.mrf.mxu2 }
 0x1f9   :  { %18820 = vst [vmem:[#allocation40_spill] sm:$0xff] %v12307_v9  ;;  %1248 = vmatmul.f32.gmra.mxu1 %v12057_v62  ;;  %v1865_v43 = vadd.f32 %v18823_v11, %v1725_v61  ;;  %v1866_v9 = vadd.f32 %v18823_v11, %v1726_v29 }
 0x1fa   :  { %18821 = vst [vmem:[#allocation37_spill] sm:$0xff] %v12310_v31  ;;  %7892 = vmatmul.msk.f32.gmra.mxu3 %vm810_vm3, %v11530_v8  ;;  %v1858_v8 = vadd.f32 %v11905_v47, %v1718_v14  ;;  %v18830_v14 = vld [vmem:[#allocation35_spill] sm:$0xff] }
 0x1fb   :  { %v12320_v22 = vmax.f32 %v1865_v43, 0.0 }
 0x1fc   :  { %1533 = vmatmul.f32.gmra.mxu0 %v18824_v46  ;;  %v1093_v38 = vpop.f32.mrf.mxu3  ;;  %v1046_v31 = vpop.f32.mrf.mxu1  ;;  %v12343_v43 = vmax.f32 %v1858_v8, 0.0 }
 0x1fd   :  { %18825 = vst [vmem:[#allocation32_spill] sm:$0xff] %v12320_v22  ;;  %v1094_v21 = vadd.f32 %v1093_v38, %v1046_v31  ;;  %1991 = vrot.lane.b32.xlu2 %v12320_v22, %s10072_s1  ;;  %v12336_v31 = vmax.f32 %v1866_v9, 0.0 }
 0x1fe   :  { %1989 = vrot.lane.b32.xlu0 %v12296_v18, %s10072_s1  ;;  %7924 = vmatmul.msk.f32.gmra.mxu2 %vm810_vm3, %v11637_v26  ;;  %18829 = vst [vmem:[#allocation56_spill] sm:$0xff] %v12343_v43 }
 0x1ff   :  { %2311 = vrot.lane.b32.xlu1 %v12320_v22, %s10073_s27  ;;  %v1655_v61 = vmul.f32 %v12085_v48, %v1094_v21  ;;  %18828 = vst [vmem:[#allocation31_spill] sm:$0xff] %v12336_v31  ;;  %v9434_v9 = vpack.i.bf16 %v12343_v43, %v12336_v31 }
 0x200   :  { %v12331_v30 = vpop.f32.mrf.mxu0  ;;  %v12334_v51 = vpop.f32.mrf.mxu2 }
 0x201   :  { %18826 = vst [vmem:[#allocation24_spill] sm:$0xff] %v12331_v30  ;;  %1251 = vmatmul.f32.gmra.mxu1 %v18824_v46  ;;  %v1795_v29 = vadd.f32 %v12087_v12, %v1655_v61 }
 0x202   :  { %18827 = vst [vmem:[#allocation42_spill] sm:$0xff] %v12334_v51  ;;  %7893 = vmatmul.msk.f32.gmra.mxu3 %vm810_vm3, %v18822_v0 }
 0x203   :  { %v12346_v21 = vmax.f32 %v1795_v29, 0.0  ;;  %v12365_v29 = vld [vmem:[#allocation2 + $0x80] sm:$0xff] }
 0x204   :  { %1536 = vmatmul.f32.gmra.mxu0 %v18830_v14  ;;  %v1096_v38 = vpop.f32.mrf.mxu3  ;;  %v1049_v30 = vpop.f32.mrf.mxu1 }
 0x205   :  { %18831 = vst [vmem:[#allocation35_spill] sm:$0xff] %v12346_v21  ;;  %v1097_v51 = vadd.f32 %v1096_v38, %v1049_v30  ;;  %v9439_v0 = vpack.i.bf16 %v12346_v21, %v12238_v60  ;;  %v12382_v21 = vld [vmem:[#allocation2 + $0x90] sm:$0xff] }
 0x206   :  { %9435 = vrot.lane.b32.xlu0 %v9434_v9, %s10072_s1  ;;  %7925 = vmatmul.msk.f32.gmra.mxu2 %vm810_vm3, %v11704_v35 }
 0x207   :  { %v1663_v61 = vmul.f32 %v12080_v24, %v1097_v51  ;;  %9440 = vrot.lane.b32.xlu2 %v9439_v0, %s10073_s27 }
 0x208   :  { %v12354_v18 = vpop.f32.mrf.mxu0  ;;  %v12358_v8 = vpop.f32.mrf.mxu2 }
 0x209   :  { %18832 = vst [vmem:[#allocation57_spill] sm:$0xff] %v12354_v18  ;;  %1254 = vmatmul.f32.gmra.mxu1 %v18830_v14  ;;  %v1803_v30 = vadd.f32 %v12110_v5, %v1663_v61 }
 0x20a   :  { %18833 = vst [vmem:[#allocation58_spill] sm:$0xff] %v12358_v8  ;;  %7894 = vmatmul.msk.f32.gmra.mxu3 %vm810_vm3, %v11637_v26 }
 0x20b   :  { %v12368_v51 = vmax.f32 %v1803_v30, 0.0 }
 0x20c   :  { %1539 = vmatmul.f32.gmra.mxu0 %v12365_v29  ;;  %v1099_v38 = vpop.f32.mrf.mxu3  ;;  %v1052_v9 = vpop.f32.mrf.mxu1 }
 0x20d   :  { %18834 = vst [vmem:[#allocation59_spill] sm:$0xff] %v12368_v51  ;;  %v1100_v18 = vadd.f32 %v1099_v38, %v1052_v9  ;;  %v9444_v0 = vpack.i.bf16 %v12368_v51, %v12232_v34 }
 0x20f   :  { %v1671_v8 = vmul.f32 %v12034_v59, %v1100_v18  ;;  %9445 = vrot.lane.b32.xlu0 %v9444_v0, %s10073_s27 }
 0x210   :  { %v12373_v26 = vpop.f32.mrf.mxu0  ;;  %v12377_v61 = vpop.f32.mrf.mxu2 }
 0x211   :  { %18835 = vst [vmem:[#allocation60_spill] sm:$0xff] %v12373_v26  ;;  %1257 = vmatmul.f32.gmra.mxu1 %v12365_v29  ;;  %v1811_v30 = vadd.f32 %v12064_v3, %v1671_v8  ;;  %v9838_v8 = vld [vmem:[#allocation2 + $0x8] sm:$0xff] }
 0x212   :  { %18836 = vst [vmem:[#allocation61_spill] sm:$0xff] %v12377_v61  ;;  %7895 = vmatmul.msk.f32.gmra.mxu3 %vm810_vm3, %v11704_v35 }
 0x213   :  { %v12385_v38 = vmax.f32 %v1811_v30, 0.0 }
 0x214   :  { %1542 = vmatmul.f32.gmra.mxu0 %v12382_v21  ;;  %v1102_v18 = vpop.f32.mrf.mxu3  ;;  %v1055_v9 = vpop.f32.mrf.mxu1 }
 0x215   :  { %18837 = vst [vmem:[#allocation62_spill] sm:$0xff] %v12385_v38  ;;  %v1103_v26 = vadd.f32 %v1102_v18, %v1055_v9  ;;  %v9449_v22 = vpack.i.bf16 %v12385_v38, %v12161_v25 }
 0x217   :  { %v1679_v0 = vmul.f32 %v12023_v33, %v1103_v26  ;;  %9450 = vrot.lane.b32.xlu2 %v9449_v22, %s10073_s27 }
 0x218   :  { %v12390_v61 = vpop.f32.mrf.mxu0  ;;  %v12394_v35 = vpop.f32.mrf.mxu2 }
 0x219   :  { %18838 = vst [vmem:[#allocation63_spill] sm:$0xff] %v12390_v61  ;;  %1260 = vmatmul.f32.gmra.mxu1 %v12382_v21  ;;  %v1819_v30 = vadd.f32 %v12062_v55, %v1679_v0 }
 0x21a   :  { %18839 = vst [vmem:[#allocation64_spill] sm:$0xff] %v12394_v35  ;;  %7906 = vmatmul.msk.f32.vlgmr.msrb.gmra.mxu3 %vm810_vm3, %v9838_v8  ;;  %v9839_v8 = vld [vmem:[#allocation2 + $0x18] sm:$0xff] }
 0x21b   :  { %v12398_v51 = vmax.f32 %v1819_v30, 0.0 }
 0x21c   :  { %v1105_v18 = vpop.f32.mrf.mxu3  ;;  %v1058_v9 = vpop.f32.mrf.mxu1 }
 0x21d   :  { %18840 = vst [vmem:[#allocation65_spill] sm:$0xff] %v12398_v51  ;;  %v1106_v25 = vadd.f32 %v1105_v18, %v1058_v9  ;;  %v9454_v26 = vpack.i.bf16 %v12398_v51, %v12163_v17 }
 0x21f   :  { %v1687_v38 = vmul.f32 %v12021_v32, %v1106_v25  ;;  %9455 = vrot.lane.b32.xlu1 %v9454_v26, %s10073_s27 }
 0x220   :  { %v12403_v61 = vpop.f32.mrf.mxu0  ;;  %v12407_v22 = vpop.f32.mrf.mxu2 }
 0x221   :  { %18841 = vst [vmem:[#allocation66_spill] sm:$0xff] %v12403_v61  ;;  %1421 = vmatmul.f32.vlgmr.msrb.gmra.mxu1 %v11863_v23  ;;  %v1827_v0 = vadd.f32 %v12060_v27, %v1687_v38 }
 0x222   :  { %18842 = vst [vmem:[#allocation67_spill] sm:$0xff] %v12407_v22  ;;  %7907 = vmatmul.msk.f32.gmra.mxu3 %vm810_vm3, %v9839_v8  ;;  %v9840_v8 = vld [vmem:[#allocation2 + $0x28] sm:$0xff] }
 0x223   :  { %v12411_v30 = vmax.f32 %v1827_v0, 0.0 }
 0x224   :  { %v1108_v18 = vpop.f32.mrf.mxu3  ;;  %v1061_v9 = vpop.f32.mrf.mxu1 }
 0x225   :  { %18843 = vst [vmem:[#allocation68_spill] sm:$0xff] %v12411_v30  ;;  %v1109_v17 = vadd.f32 %v1108_v18, %v1061_v9  ;;  %v9459_v25 = vpack.i.bf16 %v12411_v30, %v12213_v28 }
 0x227   :  { %v1695_v35 = vmul.f32 %v11950_v16, %v1109_v17  ;;  %9460 = vrot.lane.b32.xlu2 %v9459_v25, %s10073_s27 }
 0x228   :  { %v12416_v23 = vpop.f32.mrf.mxu0  ;;  %v12420_v26 = vpop.f32.mrf.mxu2 }
 0x229   :  { %18844 = vst [vmem:[#allocation69_spill] sm:$0xff] %v12416_v23  ;;  %1424 = vmatmul.f32.gmra.mxu1 %v11907_v1  ;;  %v1835_v38 = vadd.f32 %v11989_v41, %v1695_v35 }
 0x22a   :  { %18845 = vst [vmem:[#allocation70_spill] sm:$0xff] %v12420_v26  ;;  %7908 = vmatmul.msk.f32.gmra.mxu3 %vm810_vm3, %v9840_v8  ;;  %v9841_v8 = vld [vmem:[#allocation2 + $0x38] sm:$0xff] }
 0x22b   :  { %v12424_v0 = vmax.f32 %v1835_v38, 0.0 }
 0x22c   :  { %v1111_v18 = vpop.f32.mrf.mxu3  ;;  %v1064_v9 = vpop.f32.mrf.mxu1 }
 0x22d   :  { %18846 = vst [vmem:[#allocation71_spill] sm:$0xff] %v12424_v0  ;;  %v1112_v28 = vadd.f32 %v1111_v18, %v1064_v9  ;;  %v9464_v17 = vpack.i.bf16 %v12424_v0, %v12207_v50 }
 0x22f   :  { %v1703_v61 = vmul.f32 %v11930_v56, %v1112_v28  ;;  %9465 = vrot.lane.b32.xlu0 %v9464_v17, %s10073_s27 }
 0x230   :  { %v12429_v1 = vpop.f32.mrf.mxu0  ;;  %v12433_v25 = vpop.f32.mrf.mxu2 }
 0x231   :  { %18847 = vst [vmem:[#allocation72_spill] sm:$0xff] %v12429_v1  ;;  %1427 = vmatmul.f32.gmra.mxu1 %v11952_v40  ;;  %v1843_v35 = vadd.f32 %v11977_v19, %v1703_v61 }
 0x232   :  { %18848 = vst [vmem:[#allocation73_spill] sm:$0xff] %v12433_v25  ;;  %7909 = vmatmul.msk.f32.gmra.mxu3 %vm810_vm3, %v9841_v8  ;;  %v9842_v8 = vld [vmem:[#allocation2 + $0x48] sm:$0xff] }
 0x233   :  { %v12437_v38 = vmax.f32 %v1843_v35, 0.0  ;;  %v9844_v25 = vld [vmem:[#allocation2 + $0x68] sm:$0xff] }
 0x234   :  { %v1114_v18 = vpop.f32.mrf.mxu3  ;;  %v1067_v9 = vpop.f32.mrf.mxu1 }
 0x235   :  { %18849 = vst [vmem:[#allocation74_spill] sm:$0xff] %v12437_v38  ;;  %v1115_v50 = vadd.f32 %v1114_v18, %v1067_v9  ;;  %v9469_v28 = vpack.i.bf16 %v12437_v38, %v12288_v58 }
 0x237   :  { %v1711_v22 = vmul.f32 %v11876_v2, %v1115_v50  ;;  %9470 = vrot.lane.b32.xlu1 %v9469_v28, %s10073_s27  ;;  %v12454_v0 = vpop.permute.xlu1 %2297 }
 0x238   :  { %v12442_v40 = vpop.f32.mrf.mxu0  ;;  %v12446_v17 = vpop.f32.mrf.mxu2  ;;  %18853 = vst [vmem:[#allocation78_spill] sm:$0xff] %v12454_v0  ;;  %v9847_v0 = vld [vmem:[#allocation2 + $0x98] sm:$0xff] }
 0x239   :  { %18850 = vst [vmem:[#allocation75_spill] sm:$0xff] %v12442_v40  ;;  %1430 = vmatmul.f32.gmra.mxu1 %v11991_v37  ;;  %v1851_v61 = vadd.f32 %v11968_v49, %v1711_v22  ;;  %v9843_v22 = vld [vmem:[#allocation2 + $0x58] sm:$0xff] }
 0x23a   :  { %18851 = vst [vmem:[#allocation76_spill] sm:$0xff] %v12446_v17  ;;  %7910 = vmatmul.msk.f32.gmra.mxu3 %vm810_vm3, %v9842_v8  ;;  %v12461_v8 = vpop.permute.xlu0 %2293 }
 0x23b   :  { %v12450_v35 = vmax.f32 %v1851_v61, 0.0  ;;  %18855 = vst [vmem:[#allocation80_spill] sm:$0xff] %v12461_v8 }
 0x23c   :  { %v1117_v18 = vpop.f32.mrf.mxu3  ;;  %v1070_v9 = vpop.f32.mrf.mxu1 }
 0x23d   :  { %18852 = vst [vmem:[#allocation77_spill] sm:$0xff] %v12450_v35  ;;  %v1118_v23 = vadd.f32 %v1117_v18, %v1070_v9  ;;  %v9474_v50 = vpack.i.bf16 %v12450_v35, %v12278_v45 }
 0x23f   :  { %v1719_v37 = vmul.f32 %v11926_v42, %v1118_v23  ;;  %9475 = vrot.lane.b32.xlu2 %v9474_v50, %s10073_s27 }
 0x240   :  { %v12457_v28 = vpop.f32.mrf.mxu0  ;;  %v12464_v61 = vpop.f32.mrf.mxu2 }
 0x241   :  { %18854 = vst [vmem:[#allocation79_spill] sm:$0xff] %v12457_v28  ;;  %1433 = vmatmul.f32.gmra.mxu1 %v12031_v4  ;;  %v1859_v18 = vadd.f32 %v11905_v47, %v1719_v37 }
 0x242   :  { %7911 = vmatmul.msk.f32.gmra.mxu3 %vm810_vm3, %v9843_v22  ;;  %v12476_v22 = vpop.permute.xlu0 %1979 }
 0x243   :  { %v12467_v9 = vmax.f32 %v1859_v18, 0.0  ;;  %18857 = vst [vmem:[#allocation82_spill] sm:$0xff] %v12476_v22  ;;  %v12481_v18 = vpop.permute.xlu1 %9420 }
 0x244   :  { %v1120_v17 = vpop.f32.mrf.mxu3  ;;  %v1073_v58 = vpop.f32.mrf.mxu1  ;;  %18858 = vst [vmem:[#allocation83_spill] sm:$0xff] %v12481_v18 }
 0x245   :  { %18856 = vst [vmem:[#allocation81_spill] sm:$0xff] %v12467_v9  ;;  %v1121_v23 = vadd.f32 %v1120_v17, %v1073_v58  ;;  %v9479_v28 = vpack.i.bf16 %v12467_v9, %v12343_v43 }
 0x247   :  { %v1727_v4 = vmul.f32 %v18819_v10, %v1121_v23  ;;  %9480 = vrot.lane.b32.xlu0 %v9479_v28, %s10073_s27 }
 0x248   :  { %v12472_v50 = vpop.f32.mrf.mxu0  ;;  %v12479_v37 = vpop.f32.mrf.mxu2 }
 0x249   :  { %1436 = vmatmul.f32.gmra.mxu1 %v12057_v62  ;;  %v1867_v58 = vadd.f32 %v18823_v11, %v1727_v4  ;;  %v9845_v4 = vld [vmem:[#allocation2 + $0x78] sm:$0xff] }
 0x24a   :  { %7912 = vmatmul.msk.f32.gmra.mxu3 %vm810_vm3, %v9844_v25 }
 0x24b   :  { %v12484_v17 = vmax.f32 %v1867_v58, 0.0  ;;  %v12503_v45 = vpop.permute.xlu1 %2301 }
 0x24c   :  { %v12486_v23 = vpop.f32.mrf.mxu3  ;;  %v12488_v40 = vpop.f32.mrf.mxu1  ;;  %18863 = vst [vmem:[#allocation88_spill] sm:$0xff] %v12503_v45 }
 0x24d   :  { %18859 = vst [vmem:[#allocation84_spill] sm:$0xff] %v12484_v17  ;;  %v9484_v62 = vpack.i.bf16 %v12484_v17, %v12336_v31  ;;  %v12509_v31 = vpop.permute.xlu2 %2295 }
 0x24e   :  { %18860 = vst [vmem:[#allocation85_spill] sm:$0xff] %v12486_v23 }
 0x24f   :  { %18861 = vst [vmem:[#allocation86_spill] sm:$0xff] %v12488_v40  ;;  %1977 = vrot.lane.b32.xlu0 %v12141_v57, %s10072_s1  ;;  %v12497_v25 = vpop.permute.xlu0 %2303  ;;  %9485 = vrot.lane.b32.xlu2 %v9484_v62, %s10073_s27  ;;  %v9846_v62 = vld [vmem:[#allocation2 + $0x88] sm:$0xff] }
 0x250   :  { %v12492_v28 = vpop.f32.mrf.mxu0  ;;  %18862 = vst [vmem:[#allocation87_spill] sm:$0xff] %v12497_v25 }
 0x251   :  { %1439 = vmatmul.f32.gmra.mxu1 %v18824_v46  ;;  %v12501_v58 = vpop.f32.mrf.mxu2  ;;  %18866 = vst [vmem:[#allocation91_spill] sm:$0xff] %v12509_v31 }
 0x252   :  { %7913 = vmatmul.msk.f32.gmra.mxu3 %vm810_vm3, %v9845_v4 }
 0x253   :  { %v12523_v1 = vpop.permute.xlu1 %1981 }
 0x254   :  { %v12505_v43 = vpop.f32.mrf.mxu3  ;;  %v12507_v35 = vpop.f32.mrf.mxu1  ;;  %18870 = vst [vmem:[#allocation95_spill] sm:$0xff] %v12523_v1 }
 0x255   :  { %18864 = vst [vmem:[#allocation89_spill] sm:$0xff] %v12505_v43  ;;  %v12525_v8 = vpop.permute.xlu2 %2299 }
 0x256   :  { %18865 = vst [vmem:[#allocation90_spill] sm:$0xff] %v12507_v35 }
 0x257   :  { %18871 = vst [vmem:[#allocation96_spill] sm:$0xff] %v12525_v8 }
 0x258   :  { %v12511_v46 = vpop.f32.mrf.mxu0  ;;  %v12514_v57 = vpop.permute.xlu0 %1983 }
 0x259   :  { %1442 = vmatmul.f32.gmra.mxu1 %v18830_v14  ;;  %18867 = vst [vmem:[#allocation92_spill] sm:$0xff] %v12514_v57  ;;  %v12517_v4 = vpop.f32.mrf.mxu2 }
 0x25a   :  { %7914 = vmatmul.msk.f32.gmra.mxu3 %vm810_vm3, %v9846_v62 }
 0x25b   :  { %v12539_v25 = vpop.permute.xlu1 %9425 }
 0x25c   :  { %v12519_v51 = vpop.f32.mrf.mxu3  ;;  %18874 = vst [vmem:[#allocation99_spill] sm:$0xff] %v12539_v25 }
 0x25d   :  { %18868 = vst [vmem:[#allocation93_spill] sm:$0xff] %v12519_v51  ;;  %v12521_v26 = vpop.f32.mrf.mxu1  ;;  %v12537_v45 = vpop.permute.xlu2 %2307 }
 0x25e   :  { %18869 = vst [vmem:[#allocation94_spill] sm:$0xff] %v12521_v26 }
 0x25f   :  { %18873 = vst [vmem:[#allocation98_spill] sm:$0xff] %v12537_v45 }
 0x260   :  { %v12530_v14 = vpop.permute.xlu0 %1985 }
 0x261   :  { %v12527_v31 = vpop.f32.mrf.mxu0  ;;  %1445 = vmatmul.f32.gmra.mxu1 %v12365_v29  ;;  %18872 = vst [vmem:[#allocation97_spill] sm:$0xff] %v12530_v14  ;;  %v1575_v30 = vpop.f32.mrf.mxu2 }
 0x262   :  { %7915 = vmatmul.msk.f32.gmra.mxu3 %vm810_vm3, %v9847_v0 }
 0x265   :  { %v12533_v62 = vpop.f32.mrf.mxu3  ;;  %v12552_v23 = vpop.permute.xlu2 %9430 }
 0x266   :  { %v12535_v38 = vpop.f32.mrf.mxu1  ;;  %18879 = vst [vmem:[#allocation104_spill] sm:$0xff] %v12552_v23 }
 0x268   :  { %v12542_v26 = vpop.permute.xlu0 %2309 }
 0x269   :  { %v1528_v51 = vpop.f32.mrf.mxu0  ;;  %1448 = vmatmul.f32.gmra.mxu1 %v12382_v21  ;;  %18875 = vst [vmem:[#allocation100_spill] sm:$0xff] %v12542_v26  ;;  %v1578_v9 = vpop.f32.mrf.mxu2 }
 0x26a   :  { %v1576_v8 = vadd.f32 %v1575_v30, %v1528_v51  ;;  %v12558_v21 = vpop.permute.xlu1 %2305 }
 0x26b   :  { %18881 = vst [vmem:[#allocation106_spill] sm:$0xff] %v12558_v21 }
 0x26c   :  { %v1692_v29 = vmul.f32 %v12021_v32, %v1576_v8 }
 0x26d   :  { %v12545_v17 = vpop.f32.mrf.mxu3  ;;  %v12574_v21 = vpop.permute.xlu2 %1991 }
 0x26e   :  { %18876 = vst [vmem:[#allocation101_spill] sm:$0xff] %v12545_v17  ;;  %v12547_v0 = vpop.f32.mrf.mxu1  ;;  %v1832_v43 = vadd.f32 %v12060_v27, %v1692_v29 }
 0x26f   :  { %18877 = vst [vmem:[#allocation102_spill] sm:$0xff] %v12547_v0  ;;  %v18232_v0 = vunpack.i.l.bf16 %v12552_v23 }
 0x270   :  { %v12550_v35 = vmax.f32 %v1832_v43, 0.0  ;;  %v12554_v12 = vpop.permute.xlu0 %1989  ;;  %18884 = vst [vmem:[#allocation109_spill] sm:$0xff] %v12574_v21 }
 0x271   :  { %v1531_v45 = vpop.f32.mrf.mxu0  ;;  %18880 = vst [vmem:[#allocation105_spill] sm:$0xff] %v12554_v12  ;;  %v1581_v29 = vpop.f32.mrf.mxu2 }
 0x272   :  { %18878 = vst [vmem:[#allocation103_spill] sm:$0xff] %v12550_v35  ;;  %v1579_v40 = vadd.f32 %v1578_v9, %v1531_v45  ;;  %2121 = vrot.lane.b32.xlu2 %v12550_v35, %s10072_s1  ;;  %v12577_v17 = vpop.permute.xlu1 %1987 }
 0x273   :  { %18885 = vst [vmem:[#allocation110_spill] sm:$0xff] %v12577_v17 }
 0x274   :  { %v1700_v51 = vmul.f32 %v11950_v16, %v1579_v40 }
 0x275   :  { %v12561_v30 = vpop.f32.mrf.mxu3 }
 0x276   :  { %v12563_v8 = vpop.f32.mrf.mxu1  ;;  %v1840_v43 = vadd.f32 %v11989_v41, %v1700_v51  ;;  %v18235_v41 = vunpack.i.h.bf16 %v12552_v23  ;;  %v14404_v51 = vld [vmem:[#allocation6 + $0x88] sm:$0xff] }
 0x278   :  { %v12566_v26 = vmax.f32 %v1840_v43, 0.0  ;;  %v12568_v9 = vpop.permute.xlu0 %9435 }
 0x279   :  { %v1534_v27 = vpop.f32.mrf.mxu0  ;;  %18883 = vst [vmem:[#allocation108_spill] sm:$0xff] %v12568_v9  ;;  %v18230_v40 = vunpack.i.l.bf16 %v12568_v9  ;;  %v18887_v7 = vunpack.i.h.bf16 %v12568_v9 }
 0x27a   :  { %18882 = vst [vmem:[#allocation107_spill] sm:$0xff] %v12566_v26  ;;  %v1582_v45 = vadd.f32 %v1581_v29, %v1534_v27  ;;  %2123 = vrot.lane.b32.xlu2 %v12566_v26, %s10072_s1  ;;  %v1584_v26 = vpop.f32.mrf.mxu2 }
 0x27b   :  { %v2202_v27 = vsel %vm424_vm1, %v12574_v21, %v18230_v40 }
 0x27c   :  { %v1708_v32 = vmul.f32 %v11930_v56, %v1582_v45  ;;  %2744 = vmatpush.msra.mxu0 %v2202_v27  ;;  %v2201_v45 = vsel %vm424_vm1, %v12554_v12, %v18887_v7 }
 0x27d   :  { %v1299_v29 = vpop.f32.mrf.mxu3 }
 0x27e   :  { %v1252_v43 = vpop.f32.mrf.mxu1  ;;  %v1848_v35 = vadd.f32 %v11977_v19, %v1708_v32  ;;  %2745 = vmatpush.msra.mxu0 %v2201_v45  ;;  %v2200_v32 = vsel %vm424_vm1, %v12577_v17, %v18232_v0  ;;  %v18889_v0 = vunpack.i.l.bf16 %v12539_v25 }
 0x280   :  { %v12591_v39 = vmax.f32 %v1848_v35, 0.0  ;;  %2746 = vmatpush.msra.mxu0 %v2200_v32  ;;  %v2199_v35 = vsel %vm424_vm1, %v12530_v14, %v18235_v41  ;;  %v18890_v41 = vunpack.i.h.bf16 %v12539_v25 }
 0x281   :  { %v1537_v27 = vpop.f32.mrf.mxu0 }
 0x282   :  { %18888 = vst [vmem:[#allocation111_spill] sm:$0xff] %v12591_v39  ;;  %v1585_v21 = vadd.f32 %v1584_v26, %v1537_v27  ;;  %2125 = vrot.lane.b32.xlu2 %v12591_v39, %s10072_s1  ;;  %2747 = vmatpush.msra.mxu0 %v2199_v35  ;;  %v2198_v26 = vsel %vm424_vm1, %v12514_v57, %v18889_v0  ;;  %v1587_v7 = vpop.f32.mrf.mxu2  ;;  %v18892_v0 = vunpack.i.l.bf16 %v12481_v18 }
 0x284   :  { %v1716_v45 = vmul.f32 %v11876_v2, %v1585_v21  ;;  %2748 = vmatpush.msra.mxu0 %v2198_v26  ;;  %v2197_v21 = vsel %vm424_vm1, %v12523_v1, %v18890_v41  ;;  %v2196_v26 = vsel %vm424_vm1, %v12476_v22, %v18892_v0  ;;  %v18928_v22 = vld [vmem:[#allocation101_spill] sm:$0xff] }
 0x285   :  { %v12615_v27 = vpop.f32.mrf.mxu3 }
 0x286   :  { %v12617_v32 = vpop.f32.mrf.mxu1  ;;  %v1856_v23 = vadd.f32 %v11968_v49, %v1716_v45  ;;  %2749 = vmatpush.msra.mxu0 %v2197_v21  ;;  %v12636_v45 = vpop.permute.xlu2 %9440 }
 0x287   :  { %18893 = vst [vmem:[#allocation113_spill] sm:$0xff] %v12636_v45 }
 0x288   :  { %v12625_v35 = vmax.f32 %v1856_v23, 0.0  ;;  %2750 = vmatpush.msra.mxu0 %v2196_v26 }
 0x289   :  { %v1540_v40 = vpop.f32.mrf.mxu0 }
 0x28a   :  { %18891 = vst [vmem:[#allocation112_spill] sm:$0xff] %v12625_v35  ;;  %v1588_v9 = vadd.f32 %v1587_v7, %v1540_v40  ;;  %2127 = vrot.lane.b32.xlu1 %v12625_v35, %s10072_s1  ;;  %1975 = vrot.lane.b32.xlu2 %v12122_v20, %s10072_s1  ;;  %v1590_v1 = vpop.f32.mrf.mxu2  ;;  %v1215_v40 = vadd.f32 %v12255_v13, %v12281_v54 }
 0x28b   :  { %v1567_v20 = vadd.f32 %v12479_v37, %v12492_v28 }
 0x28c   :  { %v1724_v41 = vmul.f32 %v11926_v42, %v1588_v9  ;;  %v1573_v9 = vadd.f32 %v12517_v4, %v12527_v31  ;;  %v1728_v13 = vmul.f32 %v18819_v10, %v1215_v40  ;;  %v9489_v31 = vpack.i.bf16 %v12238_v60, %v12232_v34 }
 0x28d   :  { %v1305_v23 = vpop.f32.mrf.mxu3 }
 0x28e   :  { %v1258_v21 = vpop.f32.mrf.mxu1  ;;  %v1864_v25 = vadd.f32 %v11905_v47, %v1724_v41  ;;  %v12652_v26 = vpop.permute.xlu2 %9450  ;;  %v1684_v28 = vmul.f32 %v12023_v33, %v1573_v9  ;;  %v1868_v40 = vadd.f32 %v18823_v11, %v1728_v13 }
 0x28f   :  { %18895 = vst [vmem:[#allocation115_spill] sm:$0xff] %v12652_v26 }
 0x290   :  { %v12640_v57 = vmax.f32 %v1864_v25, 0.0 }
 0x291   :  { %v1543_v7 = vpop.f32.mrf.mxu0 }
 0x292   :  { %18894 = vst [vmem:[#allocation114_spill] sm:$0xff] %v12640_v57  ;;  %v1591_v0 = vadd.f32 %v1590_v1, %v1543_v7  ;;  %2129 = vrot.lane.b32.xlu0 %v12640_v57, %s10072_s1  ;;  %1973 = vrot.lane.b32.xlu2 %v12103_v52, %s10072_s1  ;;  %v1668_v7 = vmul.f32 %v12080_v24, %v1567_v20 }
 0x293   :  { %v1300_v57 = vadd.f32 %v1299_v29, %v1252_v43  ;;  %v1306_v52 = vadd.f32 %v1305_v23, %v1258_v21  ;;  %v1212_v20 = vadd.f32 %v12225_v44, %v12251_v6  ;;  %v1824_v44 = vadd.f32 %v12062_v55, %v1684_v28 }
 0x294   :  { %v1732_v25 = vmul.f32 %v18819_v10, %v1591_v0  ;;  %v1206_v0 = vadd.f32 %v12179_v15, %v12198_v53  ;;  %v1808_v60 = vadd.f32 %v12110_v5, %v1668_v7  ;;  %v1570_v15 = vadd.f32 %v12501_v58, %v12511_v46 }
 0x295   :  { %v1308_v54 = vpop.f32.mrf.mxu3  ;;  %v1705_v29 = vmul.f32 %v11930_v56, %v1300_v57  ;;  %v1721_v43 = vmul.f32 %v11926_v42, %v1306_v52  ;;  %v12682_v23 = vmax.f32 %v1868_v40, 0.0  ;;  %v1291_v58 = vadd.f32 %v12533_v62, %v12535_v38  ;;  %v18904_v62 = vld [vmem:[#allocation47_spill] sm:$0xff] }
 0x296   :  { %v1261_v1 = vpop.f32.mrf.mxu1  ;;  %v1872_v41 = vadd.f32 %v18823_v11, %v1732_v25  ;;  %v12677_v53 = vpop.permute.xlu2 %9460  ;;  %v1704_v6 = vmul.f32 %v11930_v56, %v1206_v0  ;;  %v12696_v13 = vmax.f32 %v1808_v60, 0.0  ;;  %v12702_v7 = vmax.f32 %v1824_v44, 0.0 }
 0x297   :  { %v1309_v37 = vadd.f32 %v1308_v54, %v1261_v1  ;;  %18897 = vst [vmem:[#allocation117_spill] sm:$0xff] %v12677_v53  ;;  %v1845_v46 = vadd.f32 %v11977_v19, %v1705_v29  ;;  %v1676_v54 = vmul.f32 %v12034_v59, %v1570_v15  ;;  %v1297_v1 = vadd.f32 %v12561_v30, %v12563_v8 }
 0x298   :  { %v12661_v4 = vmax.f32 %v1872_v41, 0.0  ;;  %18898 = vst [vmem:[#allocation118_spill] sm:$0xff] %v12682_v23  ;;  %v1861_v41 = vadd.f32 %v11905_v47, %v1721_v43  ;;  %v1844_v38 = vadd.f32 %v11977_v19, %v1704_v6  ;;  %v1203_v52 = vadd.f32 %v18904_v62, %v12176_v63  ;;  %v12759_v62 = vpop.permute.xlu0 %9445 }
 0x299   :  { %v1729_v35 = vmul.f32 %v18819_v10, %v1309_v37  ;;  %18901 = vst [vmem:[#allocation121_spill] sm:$0xff] %v12696_v13  ;;  %v18903_v37 = vld [vmem:[#allocation44_spill] sm:$0xff]  ;;  %v1564_v30 = vadd.f32 %v12464_v61, %v12472_v50  ;;  %v12718_v8 = vmax.f32 %v1845_v46, 0.0  ;;  %v1697_v0 = vmul.f32 %v11950_v16, %v1297_v1 }
 0x29a   :  { %18896 = vst [vmem:[#allocation116_spill] sm:$0xff] %v12661_v4  ;;  %9490 = vrot.lane.b32.xlu0 %v9489_v31, %s10072_s1  ;;  %2131 = vrot.lane.b32.xlu1 %v12661_v4, %s10072_s1  ;;  %v1197_v28 = vadd.f32 %v18903_v37, %v12131_v36  ;;  %v1681_v36 = vmul.f32 %v12023_v33, %v1291_v58  ;;  %v12721_v40 = vmax.f32 %v1861_v41, 0.0  ;;  %v18912_v37 = vld [vmem:[#allocation49_spill] sm:$0xff]  ;;  %v18927_v4 = vld [vmem:[#allocation102_spill] sm:$0xff] }
 0x29b   :  { %v1869_v34 = vadd.f32 %v18823_v11, %v1729_v35  ;;  %v1720_v35 = vmul.f32 %v11926_v42, %v1212_v20  ;;  %18902 = vst [vmem:[#allocation122_spill] sm:$0xff] %v12702_v7  ;;  %v1816_v20 = vadd.f32 %v12064_v3, %v1676_v54  ;;  %v1696_v61 = vmul.f32 %v11950_v16, %v1203_v52 }
 0x29c   :  { %18905 = vst [vmem:[#allocation44_spill] sm:$0xff] %v12718_v8  ;;  %v1680_v29 = vmul.f32 %v12023_v33, %v1197_v28  ;;  %v1660_v43 = vmul.f32 %v12085_v48, %v1564_v30  ;;  %v1821_v44 = vadd.f32 %v12062_v55, %v1681_v36  ;;  %v1303_v46 = vadd.f32 %v12615_v27, %v12617_v32  ;;  %v18913_v28 = vld [vmem:[#allocation48_spill] sm:$0xff]  ;;  %v12757_v32 = vpop.permute.xlu1 %2311  ;;  %v18919_v36 = vld [vmem:[#allocation33_spill] sm:$0xff] }
 0x29d   :  { %v12684_v21 = vmax.f32 %v1869_v34, 0.0  ;;  %v12686_v57 = vpop.f32.mrf.mxu3  ;;  %v1860_v31 = vadd.f32 %v11905_v47, %v1720_v35  ;;  %18906 = vst [vmem:[#allocation47_spill] sm:$0xff] %v12721_v40  ;;  %v12727_v34 = vmax.f32 %v1844_v38, 0.0  ;;  %v18910_v35 = vld [vmem:[#allocation38_spill] sm:$0xff]  ;;  %v1209_v38 = vadd.f32 %v18913_v28, %v18912_v37  ;;  %v18921_v37 = vld [vmem:[#allocation85_spill] sm:$0xff] }
 0x29e   :  { %18899 = vst [vmem:[#allocation119_spill] sm:$0xff] %v12686_v57  ;;  %v12689_v9 = vpop.f32.mrf.mxu1  ;;  %v12723_v63 = vpop.permute.xlu2 %9475  ;;  %v1837_v58 = vadd.f32 %v18910_v35, %v1697_v0  ;;  %v1820_v1 = vadd.f32 %v12062_v55, %v1680_v29  ;;  %v1836_v41 = vadd.f32 %v18910_v35, %v1696_v61  ;;  %v12755_v27 = vmax.f32 %v1821_v44, 0.0 }
 0x29f   :  { %18900 = vst [vmem:[#allocation120_spill] sm:$0xff] %v12689_v9  ;;  %v9494_v25 = vpack.i.bf16 %v12684_v21, %v12682_v23  ;;  %v12732_v50 = vmax.f32 %v1860_v31, 0.0  ;;  %v9509_v6 = vpack.i.bf16 %v12718_v8, %v12727_v34  ;;  %v1713_v31 = vmul.f32 %v11876_v2, %v1303_v46  ;;  %v18948_v9 = vld [vmem:[#allocation98_spill] sm:$0xff] }
 0x2a0   :  { %18907 = vst [vmem:[#allocation123_spill] sm:$0xff] %v12723_v63  ;;  %v12761_v52 = vmax.f32 %v1837_v58, 0.0  ;;  %v1800_v0 = vadd.f32 %v18919_v36, %v1660_v43  ;;  %v18920_v58 = vld [vmem:[#allocation86_spill] sm:$0xff]  ;;  %v1294_v39 = vadd.f32 %v18928_v22, %v18927_v4 }
 0x2a1   :  { %9495 = vrot.lane.b32.xlu2 %v9494_v25, %s10073_s27  ;;  %18908 = vst [vmem:[#allocation124_spill] sm:$0xff] %v12727_v34  ;;  %v12743_v25 = vmax.f32 %v1816_v20, 0.0  ;;  %v9499_v54 = vpack.i.bf16 %v12721_v40, %v12732_v50  ;;  %v12767_v20 = vmax.f32 %v1820_v1, 0.0  ;;  %v1282_v28 = vadd.f32 %v18921_v37, %v18920_v58  ;;  %v18926_v37 = vld [vmem:[#allocation25_spill] sm:$0xff]  ;;  %v12813_v4 = vpop.permute.xlu0 %9465  ;;  %v18942_v40 = vld [vmem:[#allocation36_spill] sm:$0xff] }
 0x2a2   :  { %2119 = vrot.lane.b32.xlu1 %v12702_v7, %s10072_s1  ;;  %2115 = vrot.lane.b32.xlu0 %v12696_v13, %s10072_s1  ;;  %18909 = vst [vmem:[#allocation125_spill] sm:$0xff] %v12732_v50  ;;  %v18923_v13 = vld [vmem:[#allocation89_spill] sm:$0xff]  ;;  %v1853_v7 = vadd.f32 %v11968_v49, %v1713_v31 }
 0x2a3   :  { %18911 = vst [vmem:[#allocation38_spill] sm:$0xff] %v12743_v25 }
 0x2a4   :  { %18914 = vst [vmem:[#allocation49_spill] sm:$0xff] %v12755_v27  ;;  %v12811_v22 = vpop.permute.xlu1 %9455 }
 0x2a5   :  { %v12729_v60 = vpop.f32.mrf.mxu3  ;;  %18915 = vst [vmem:[#allocation48_spill] sm:$0xff] %v12757_v32 }
 0x2a6   :  { %v12734_v15 = vpop.f32.mrf.mxu1  ;;  %18916 = vst [vmem:[#allocation126_spill] sm:$0xff] %v12759_v62 }
 0x2a7   :  { %18917 = vst [vmem:[#allocation127_spill] sm:$0xff] %v12761_v52 }
 0x2a8   :  { %18933 = vst [vmem:[#allocation85_spill] sm:$0xff] %v12811_v22 }
 0x2a9   :  { %9510 = vrot.lane.b32.xlu2 %v9509_v6, %s10073_s27  ;;  %v12764_v30 = vpop.permute.xlu2 %9485  ;;  %v12773_v6 = vmax.f32 %v1836_v41, 0.0 }
 0x2aa   :  { %2117 = vrot.lane.b32.xlu1 %v12743_v25, %s10072_s1  ;;  %9500 = vrot.lane.b32.xlu0 %v9499_v54, %s10073_s27  ;;  %18918 = vst [vmem:[#allocation128_spill] sm:$0xff] %v12764_v30  ;;  %v18258_v29 = vunpack.i.h.bf16 %v12764_v30  ;;  %v9487_v61 = vunpack.i.l.bf16 %v12764_v30  ;;  %v1712_v54 = vmul.f32 %v11876_v2, %v1209_v38  ;;  %v18922_v25 = vld [vmem:[#allocation90_spill] sm:$0xff]  ;;  %v9524_v38 = vpack.i.bf16 %v12755_v27, %v12767_v20 }
 0x2ab   :  { %v1285_v43 = vadd.f32 %v18923_v13, %v18922_v25  ;;  %v9514_v58 = vpack.i.bf16 %v12761_v52, %v12773_v6  ;;  %v12794_v13 = vmax.f32 %v1800_v0, 0.0  ;;  %v18925_v25 = vld [vmem:[#allocation28_spill] sm:$0xff]  ;;  %v18931_v0 = vld [vmem:[#allocation46_spill] sm:$0xff]  ;;  %18934 = vst [vmem:[#allocation90_spill] sm:$0xff] %v12813_v4 }
 0x2ac   :  { %v2522_v1 = vsel %vm681_vm2, %v12757_v32, %v9487_v61  ;;  %v2512_v41 = vsel %vm681_vm2, %v9487_v61, %v18258_v29  ;;  %v1188_v32 = vadd.f32 %v18926_v37, %v18925_v25  ;;  %v18929_v61 = vld [vmem:[#allocation29_spill] sm:$0xff]  ;;  %v18930_v29 = vld [vmem:[#allocation30_spill] sm:$0xff]  ;;  %v1852_v31 = vadd.f32 %v11968_v49, %v1712_v54 }
 0x2ad   :  { %v12771_v44 = vpop.f32.mrf.mxu3  ;;  %2693 = vmatpush.msra.mxu3 %v2522_v1  ;;  %2787 = vmatpush.msra.mxu2 %v2512_v41  ;;  %18924 = vst [vmem:[#allocation86_spill] sm:$0xff] %v12794_v13  ;;  %v1191_v14 = vadd.f32 %v18930_v29, %v18929_v61  ;;  %v18932_v1 = vld [vmem:[#allocation45_spill] sm:$0xff]  ;;  %v1657_v25 = vmul.f32 %v12085_v48, %v1282_v28  ;;  %v18936_v29 = vld [vmem:[#allocation39_spill] sm:$0xff] }
 0x2ae   :  { %v12778_v46 = vpop.f32.mrf.mxu1  ;;  %v1200_v41 = vadd.f32 %v18932_v1, %v18931_v0  ;;  %v1665_v37 = vmul.f32 %v12080_v24, %v1285_v43  ;;  %v1689_v54 = vmul.f32 %v18936_v29, %v1294_v39  ;;  %v12822_v17 = vmax.f32 %v1852_v31, 0.0  ;;  %v18939_v39 = vld [vmem:[#allocation84_spill] sm:$0xff]  ;;  %v18941_v31 = vld [vmem:[#allocation93_spill] sm:$0xff] }
 0x2af   :  { %v1797_v43 = vadd.f32 %v18919_v36, %v1657_v25  ;;  %v9529_v12 = vpack.i.bf16 %v12682_v23, %v18939_v39 }
 0x2b0   :  { %18937 = vst [vmem:[#allocation28_spill] sm:$0xff] %v12822_v17  ;;  %v1688_v28 = vmul.f32 %v18936_v29, %v1200_v41  ;;  %v1805_v1 = vadd.f32 %v12110_v5, %v1665_v37  ;;  %v1829_v52 = vadd.f32 %v18942_v40, %v1689_v54  ;;  %v18943_v37 = vld [vmem:[#allocation43_spill] sm:$0xff]  ;;  %v12850_v54 = vpop.permute.xlu1 %9470 }
 0x2b1   :  { %9525 = vrot.lane.b32.xlu2 %v9524_v38, %s10073_s27  ;;  %v12815_v38 = vmax.f32 %v1853_v7, 0.0  ;;  %v18938_v7 = vld [vmem:[#allocation81_spill] sm:$0xff]  ;;  %v12846_v39 = vmax.f32 %v1797_v43, 0.0  ;;  %18945 = vst [vmem:[#allocation25_spill] sm:$0xff] %v12850_v54 }
 0x2b2   :  { %9515 = vrot.lane.b32.xlu0 %v9514_v58, %s10073_s27  ;;  %2113 = vrot.lane.b32.xlu1 %v12794_v13, %s10072_s1  ;;  %v1656_v58 = vmul.f32 %v12085_v48, %v1188_v32  ;;  %v1664_v13 = vmul.f32 %v12080_v24, %v1191_v14  ;;  %v9539_v27 = vpack.i.bf16 %v12732_v50, %v18938_v7  ;;  %v18940_v14 = vld [vmem:[#allocation94_spill] sm:$0xff] }
 0x2b3   :  { %18935 = vst [vmem:[#allocation89_spill] sm:$0xff] %v12815_v38  ;;  %v9504_v32 = vpack.i.bf16 %v12815_v38, %v12822_v17  ;;  %v1288_v8 = vadd.f32 %v18941_v31, %v18940_v14  ;;  %v18944_v50 = vld [vmem:[#allocation34_spill] sm:$0xff]  ;;  %v1828_v23 = vadd.f32 %v18942_v40, %v1688_v28  ;;  %v12848_v14 = vmax.f32 %v1805_v1, 0.0 }
 0x2b4   :  { %v1796_v41 = vadd.f32 %v18919_v36, %v1656_v58  ;;  %v1804_v25 = vadd.f32 %v12110_v5, %v1664_v13  ;;  %v1194_v7 = vadd.f32 %v18944_v50, %v18943_v37  ;;  %v12859_v31 = vmax.f32 %v1829_v52, 0.0  ;;  %v18947_v36 = vld [vmem:[#allocation100_spill] sm:$0xff] }
 0x2b5   :  { %v12818_v61 = vpop.f32.mrf.mxu3  ;;  %v1673_v50 = vmul.f32 %v12034_v59, %v1288_v8  ;;  %v9472_v1 = vunpack.i.l.bf16 %v12850_v54  ;;  %v12878_v48 = vmax.f32 %v1828_v23, 0.0 }
 0x2b6   :  { %v12824_v0 = vpop.f32.mrf.mxu1  ;;  %v12863_v43 = vmax.f32 %v1796_v41, 0.0  ;;  %v12875_v8 = vmax.f32 %v1804_v25, 0.0  ;;  %v1672_v52 = vmul.f32 %v12034_v59, %v1194_v7  ;;  %v18949_v25 = vunpack.i.h.bf16 %v12723_v63 }
 0x2b7   :  { %v9462_v41 = vunpack.i.l.bf16 %v12677_v53 }
 0x2b8   :  { %v9554_v57 = vpack.i.bf16 %v12846_v39, %v12863_v43  ;;  %v9544_v23 = vpack.i.bf16 %v12848_v14, %v12875_v8 }
 0x2b9   :  { %9540 = vrot.lane.b32.xlu2 %v9539_v27, %s10072_s1  ;;  %v12852_v27 = vpop.permute.xlu0 %9480 }
 0x2ba   :  { %9530 = vrot.lane.b32.xlu0 %v9529_v12, %s10072_s1  ;;  %9505 = vrot.lane.b32.xlu1 %v9504_v32, %s10073_s27  ;;  %18946 = vst [vmem:[#allocation102_spill] sm:$0xff] %v12852_v27  ;;  %v9477_v12 = vunpack.i.l.bf16 %v12723_v63  ;;  %v18279_v32 = vunpack.i.h.bf16 %v12852_v27  ;;  %v9482_v13 = vunpack.i.l.bf16 %v12852_v27 }
 0x2bc   :  { %v2521_v58 = vsel %vm681_vm2, %v18947_v36, %v9482_v13  ;;  %v2511_v30 = vsel %vm681_vm2, %v9482_v13, %v18279_v32  ;;  %v9467_v36 = vunpack.i.l.bf16 %v12813_v4  ;;  %v2520_v27 = vsel %vm681_vm2, %v18948_v9, %v9477_v12  ;;  %v18952_v32 = vld [vmem:[#allocation87_spill] sm:$0xff]  ;;  %v18955_v9 = vld [vmem:[#allocation88_spill] sm:$0xff] }
 0x2bd   :  { %v12861_v28 = vpop.f32.mrf.mxu3  ;;  %2694 = vmatpush.msra.mxu3 %v2521_v58  ;;  %2788 = vmatpush.msra.mxu2 %v2511_v30  ;;  %v2510_v7 = vsel %vm681_vm2, %v9477_v12, %v18949_v25  ;;  %v1813_v58 = vadd.f32 %v12064_v3, %v1673_v50  ;;  %v9519_v13 = vpack.i.bf16 %v12859_v31, %v12878_v48  ;;  %v18950_v12 = vld [vmem:[#allocation106_spill] sm:$0xff]  ;;  %v18951_v30 = vunpack.i.h.bf16 %v12850_v54 }
 0x2be   :  { %v12866_v37 = vpop.f32.mrf.mxu1  ;;  %v2519_v25 = vsel %vm681_vm2, %v18950_v12, %v9472_v1  ;;  %v1812_v50 = vadd.f32 %v12064_v3, %v1672_v52  ;;  %v2518_v12 = vsel %vm681_vm2, %v18952_v32, %v9467_v36  ;;  %v18953_v52 = vunpack.i.h.bf16 %v12481_v18  ;;  %v18958_v18 = vld [vmem:[#allocation68_spill] sm:$0xff] }
 0x2bf   :  { %2695 = vmatpush.msra.mxu3 %v2520_v27  ;;  %2789 = vmatpush.msra.mxu2 %v2510_v7  ;;  %v12922_v27 = vmax.f32 %v1813_v58, 0.0 }
 0x2c0   :  { %v12936_v58 = vmax.f32 %v1812_v50, 0.0  ;;  %v18959_v50 = vld [vmem:[#allocation74_spill] sm:$0xff] }
 0x2c1   :  { %9555 = vrot.lane.b32.xlu2 %v9554_v57, %s10073_s27  ;;  %v12907_v7 = vpop.permute.xlu0 %1977  ;;  %2696 = vmatpush.msra.mxu3 %v2519_v25  ;;  %v2509_v57 = vsel %vm681_vm2, %v9472_v1, %v18951_v30  ;;  %v18954_v1 = vunpack.i.h.bf16 %v12813_v4  ;;  %v9559_v4 = vpack.i.bf16 %v12727_v34, %v18959_v50  ;;  %v18966_v50 = vld [vmem:[#allocation80_spill] sm:$0xff] }
 0x2c2   :  { %9545 = vrot.lane.b32.xlu0 %v9544_v23, %s10073_s27  ;;  %9520 = vrot.lane.b32.xlu1 %v9519_v13, %s10073_s27  ;;  %v9457_v23 = vunpack.i.l.bf16 %v12811_v22  ;;  %v2195_v13 = vsel %vm424_vm1, %v12907_v7, %v18953_v52  ;;  %v2517_v52 = vsel %vm681_vm2, %v18955_v9, %v9462_v41  ;;  %v9569_v9 = vpack.i.bf16 %v12878_v48, %v18958_v18 }
 0x2c3   :  { %2790 = vmatpush.msra.mxu2 %v2509_v57  ;;  %2697 = vmatpush.msra.mxu3 %v2518_v12  ;;  %v2508_v30 = vsel %vm681_vm2, %v9467_v36, %v18954_v1  ;;  %v9452_v12 = vunpack.i.l.bf16 %v12652_v26  ;;  %v18957_v1 = vld [vmem:[#allocation96_spill] sm:$0xff] }
 0x2c4   :  { %2751 = vmatpush.msra.mxu0 %v2195_v13  ;;  %v18956_v13 = vunpack.i.h.bf16 %v12677_v53  ;;  %v18960_v53 = vunpack.i.h.bf16 %v12811_v22  ;;  %v18973_v22 = vld [vmem:[#allocation31_spill] sm:$0xff] }
 0x2c5   :  { %v12929_v57 = vpop.f32.mrf.mxu3  ;;  %2791 = vmatpush.msra.mxu2 %v2508_v30  ;;  %2698 = vmatpush.msra.mxu3 %v2517_v52  ;;  %v2516_v30 = vsel %vm681_vm2, %v18957_v1, %v9457_v23  ;;  %v9447_v52 = vunpack.i.l.bf16 %v12759_v62  ;;  %v9442_v1 = vunpack.i.l.bf16 %v12636_v45 }
 0x2c6   :  { %v12931_v32 = vpop.f32.mrf.mxu1  ;;  %v2507_v36 = vsel %vm681_vm2, %v9462_v41, %v18956_v13  ;;  %v2506_v41 = vsel %vm681_vm2, %v9457_v23, %v18960_v53  ;;  %v9534_v13 = vpack.i.bf16 %v12922_v27, %v12936_v58  ;;  %v18962_v53 = vunpack.i.h.bf16 %v12652_v26  ;;  %v18970_v26 = vld [vmem:[#allocation59_spill] sm:$0xff] }
 0x2c7   :  { %2792 = vmatpush.msra.mxu2 %v2507_v36  ;;  %2699 = vmatpush.msra.mxu3 %v2516_v30  ;;  %v18961_v30 = vld [vmem:[#allocation78_spill] sm:$0xff] }
 0x2c8   :  { %v2515_v25 = vsel %vm681_vm2, %v18961_v30, %v9452_v12  ;;  %v2505_v23 = vsel %vm681_vm2, %v9452_v12, %v18962_v53  ;;  %v18967_v12 = vunpack.i.h.bf16 %v12636_v45 }
 0x2c9   :  { %2793 = vmatpush.msra.mxu2 %v2506_v41  ;;  %9570 = vrot.lane.b32.xlu2 %v9569_v9, %s10072_s1  ;;  %v18964_v41 = vld [vmem:[#allocation91_spill] sm:$0xff] }
 0x2ca   :  { %9560 = vrot.lane.b32.xlu0 %v9559_v4, %s10072_s1  ;;  %9535 = vrot.lane.b32.xlu1 %v9534_v13, %s10073_s27  ;;  %v2514_v36 = vsel %vm681_vm2, %v18964_v41, %v9447_v52  ;;  %v18965_v4 = vunpack.i.h.bf16 %v12759_v62  ;;  %v2503_v53 = vsel %vm681_vm2, %v9442_v1, %v18967_v12  ;;  %v18969_v41 = vld [vmem:[#allocation70_spill] sm:$0xff] }
 0x2cb   :  { %2700 = vmatpush.msra.mxu3 %v2515_v25  ;;  %2794 = vmatpush.msra.mxu2 %v2505_v23  ;;  %v2513_v25 = vsel %vm681_vm2, %v18966_v50, %v9442_v1  ;;  %v18968_v23 = vld [vmem:[#allocation72_spill] sm:$0xff]  ;;  %v18974_v50 = vld [vmem:[#allocation77_spill] sm:$0xff]  ;;  %v18975_v1 = vld [vmem:[#allocation55_spill] sm:$0xff] }
 0x2cc   :  { %v12971_v9 = vpop.permute.xlu2 %2121  ;;  %v2504_v13 = vsel %vm681_vm2, %v9447_v52, %v18965_v4  ;;  %v1397_v62 = vadd.f32 %v18969_v41, %v18968_v23  ;;  %v9584_v52 = vpack.i.bf16 %v12875_v8, %v18970_v26  ;;  %v9549_v45 = vpack.i.bf16 %v12822_v17, %v18974_v50  ;;  %v18978_v23 = vld [vmem:[#allocation51_spill] sm:$0xff] }
 0x2cd   :  { %18963 = vst [vmem:[#allocation101_spill] sm:$0xff] %v12971_v9  ;;  %v1487_v34 = vpop.f32.mrf.mxu3  ;;  %2701 = vmatpush.msra.mxu3 %v2514_v36  ;;  %2795 = vmatpush.msra.mxu2 %v2504_v13  ;;  %v18971_v36 = vld [vmem:[#allocation65_spill] sm:$0xff]  ;;  %v18972_v13 = vld [vmem:[#allocation32_spill] sm:$0xff]  ;;  %v18982_v50 = vld [vmem:[#allocation75_spill] sm:$0xff] }
 0x2ce   :  { %v1440_v30 = vpop.f32.mrf.mxu1  ;;  %v9574_v4 = vpack.i.bf16 %v12767_v20, %v18971_v36  ;;  %v1714_v41 = vmul.f32 %v11876_v2, %v1397_v62  ;;  %v18983_v62 = vld [vmem:[#allocation73_spill] sm:$0xff] }
 0x2cf   :  { %2702 = vmatpush.msra.mxu3 %v2513_v25  ;;  %2796 = vmatpush.msra.mxu2 %v2503_v53  ;;  %v18976_v25 = vld [vmem:[#allocation56_spill] sm:$0xff]  ;;  %v1400_v54 = vadd.f32 %v18983_v62, %v18982_v50  ;;  %v1488_v63 = vadd.f32 %v1487_v34, %v1440_v30  ;;  %v18989_v50 = vld [vmem:[#allocation67_spill] sm:$0xff] }
 0x2d1   :  { %2703 = vmatpush.msra.mxu3 %v18972_v13  ;;  %2797 = vmatpush.msra.mxu2 %v18973_v22  ;;  %v18979_v13 = vld [vmem:[#allocation52_spill] sm:$0xff]  ;;  %v1707_v30 = vmul.f32 %v11930_v56, %v1488_v63  ;;  %v1476_v63 = vadd.f32 %v12771_v44, %v12778_v46  ;;  %v18999_v46 = vld [vmem:[#allocation58_spill] sm:$0xff] }
 0x2d2   :  { %9585 = vrot.lane.b32.xlu2 %v9584_v52, %s10072_s1  ;;  %9575 = vrot.lane.b32.xlu0 %v9574_v4, %s10072_s1  ;;  %v18980_v52 = vld [vmem:[#allocation50_spill] sm:$0xff]  ;;  %v18981_v4 = vld [vmem:[#allocation35_spill] sm:$0xff] }
 0x2d3   :  { %9550 = vrot.lane.b32.xlu1 %v9549_v45, %s10072_s1  ;;  %2704 = vmatpush.msra.mxu3 %v18975_v1  ;;  %v9589_v45 = vpack.i.bf16 %v12863_v43, %v18981_v4  ;;  %v1854_v1 = vadd.f32 %v11968_v49, %v1714_v41  ;;  %v18988_v41 = vld [vmem:[#allocation69_spill] sm:$0xff] }
 0x2d4   :  { %2798 = vmatpush.msra.mxu2 %v18976_v25  ;;  %v13003_v12 = vpop.permute.xlu2 %2123  ;;  %v1482_v25 = vadd.f32 %v12861_v28, %v12866_v37  ;;  %v1394_v62 = vadd.f32 %v18989_v50, %v18988_v41  ;;  %v18995_v41 = vld [vmem:[#allocation62_spill] sm:$0xff] }
 0x2d5   :  { %18977 = vst [vmem:[#allocation29_spill] sm:$0xff] %v13003_v12  ;;  %v1490_v53 = vpop.f32.mrf.mxu3  ;;  %2705 = vmatpush.msra.mxu3 %v18978_v23  ;;  %v18984_v23 = vld [vmem:[#allocation54_spill] sm:$0xff]  ;;  %v13026_v28 = vmax.f32 %v1854_v1, 0.0  ;;  %v9579_v50 = vpack.i.bf16 %v12936_v58, %v18995_v41 }
 0x2d6   :  { %v1443_v22 = vpop.f32.mrf.mxu1  ;;  %2799 = vmatpush.msra.mxu2 %v18979_v13  ;;  %v18985_v13 = vld [vmem:[#allocation71_spill] sm:$0xff] }
 0x2d7   :  { %v1491_v17 = vadd.f32 %v1490_v53, %v1443_v22  ;;  %2706 = vmatpush.msra.mxu3 %v18980_v52  ;;  %v9564_v53 = vpack.i.bf16 %v12773_v6, %v18985_v13  ;;  %v18986_v22 = vld [vmem:[#allocation63_spill] sm:$0xff]  ;;  %v18987_v52 = vld [vmem:[#allocation61_spill] sm:$0xff]  ;;  %18990 = vst [vmem:[#allocation30_spill] sm:$0xff] %v13026_v28 }
 0x2d8   :  { %2800 = vmatpush.msra.mxu2 %v18984_v23  ;;  %v1388_v36 = vadd.f32 %v18987_v52, %v18986_v22  ;;  %v18994_v22 = vld [vmem:[#allocation64_spill] sm:$0xff] }
 0x2d9   :  { %v1715_v26 = vmul.f32 %v11876_v2, %v1491_v17  ;;  %v1722_v2 = vmul.f32 %v11926_v42, %v1400_v54  ;;  %v1691_v17 = vmul.f32 %v18936_v29, %v1482_v25  ;;  %v18993_v54 = vld [vmem:[#allocation66_spill] sm:$0xff] }
 0x2da   :  { %9590 = vrot.lane.b32.xlu0 %v9589_v45, %s10072_s1  ;;  %v1391_v25 = vadd.f32 %v18994_v22, %v18993_v54 }
 0x2db   :  { %v1855_v4 = vadd.f32 %v11968_v49, %v1715_v26  ;;  %9565 = vrot.lane.b32.xlu1 %v9564_v53, %s10072_s1  ;;  %v1690_v49 = vmul.f32 %v18936_v29, %v1388_v36  ;;  %v1485_v26 = vadd.f32 %v12929_v57, %v12931_v32  ;;  %v1862_v52 = vadd.f32 %v11905_v47, %v1722_v2 }
 0x2dc   :  { %v13036_v45 = vpop.permute.xlu2 %2125  ;;  %v1831_v29 = vadd.f32 %v18942_v40, %v1691_v17  ;;  %v1479_v57 = vadd.f32 %v12818_v61, %v12824_v0  ;;  %v1847_v36 = vadd.f32 %v11977_v19, %v1707_v30  ;;  %v1698_v61 = vmul.f32 %v11950_v16, %v1391_v25 }
 0x2dd   :  { %v13030_v34 = vmax.f32 %v1855_v4, 0.0  ;;  %v1493_v37 = vpop.f32.mrf.mxu3  ;;  %18992 = vst [vmem:[#allocation45_spill] sm:$0xff] %v13036_v45  ;;  %v1706_v4 = vmul.f32 %v11930_v56, %v1394_v62  ;;  %v1830_v62 = vadd.f32 %v18942_v40, %v1690_v49  ;;  %v1699_v2 = vmul.f32 %v11950_v16, %v1485_v26 }
 0x2de   :  { %v1446_v23 = vpop.f32.mrf.mxu1  ;;  %v13064_v30 = vmax.f32 %v1862_v52, 0.0  ;;  %v13067_v40 = vmax.f32 %v1831_v29, 0.0  ;;  %v13072_v26 = vmax.f32 %v1847_v36, 0.0  ;;  %v19005_v29 = vld [vmem:[#allocation79_spill] sm:$0xff] }
 0x2df   :  { %18991 = vst [vmem:[#allocation46_spill] sm:$0xff] %v13030_v34  ;;  %v1494_v53 = vadd.f32 %v1493_v37, %v1446_v23  ;;  %v9599_v1 = vpack.i.bf16 %v13030_v34, %v13026_v28  ;;  %v18996_v37 = vld [vmem:[#allocation57_spill] sm:$0xff]  ;;  %v18997_v23 = vld [vmem:[#allocation42_spill] sm:$0xff]  ;;  %v1846_v0 = vadd.f32 %v11977_v19, %v1706_v4  ;;  %v13075_v54 = vmax.f32 %v1830_v62, 0.0 }
 0x2e0   :  { %v1382_v56 = vadd.f32 %v18997_v23, %v18996_v37  ;;  %19000 = vst [vmem:[#allocation39_spill] sm:$0xff] %v13064_v30  ;;  %v1839_v16 = vadd.f32 %v18910_v35, %v1699_v2 }
 0x2e1   :  { %v1723_v32 = vmul.f32 %v11926_v42, %v1494_v53  ;;  %v18998_v42 = vld [vmem:[#allocation60_spill] sm:$0xff]  ;;  %v1675_v53 = vmul.f32 %v12034_v59, %v1476_v63  ;;  %19001 = vst [vmem:[#allocation94_spill] sm:$0xff] %v13067_v40  ;;  %v13081_v52 = vmax.f32 %v1846_v0, 0.0  ;;  %v1838_v63 = vadd.f32 %v18910_v35, %v1698_v61 }
 0x2e2   :  { %9600 = vrot.lane.b32.xlu0 %v9599_v1, %s10073_s27  ;;  %v1385_v17 = vadd.f32 %v18999_v46, %v18998_v42  ;;  %19003 = vst [vmem:[#allocation36_spill] sm:$0xff] %v13072_v26  ;;  %v1674_v1 = vmul.f32 %v12034_v59, %v1382_v56  ;;  %v13096_v56 = vmax.f32 %v1839_v16, 0.0  ;;  %v13106_v46 = vld [vmem:[#allocation6 + $0x8] sm:$0xff]  ;;  %v1473_v61 = vadd.f32 %v12729_v60, %v12734_v15 }
 0x2e3   :  { %v1863_v44 = vadd.f32 %v11905_v47, %v1723_v32  ;;  %9580 = vrot.lane.b32.xlu1 %v9579_v50, %s10072_s1  ;;  %v1683_v47 = vmul.f32 %v12023_v33, %v1479_v57  ;;  %19004 = vst [vmem:[#allocation43_spill] sm:$0xff] %v13081_v52  ;;  %v19006_v32 = vld [vmem:[#allocation76_spill] sm:$0xff]  ;;  %v1815_v59 = vadd.f32 %v12064_v3, %v1675_v53  ;;  %v13101_v2 = vmax.f32 %v1838_v63, 0.0 }
 0x2e4   :  { %v1682_v4 = vmul.f32 %v12023_v33, %v1385_v17  ;;  %v1403_v57 = vadd.f32 %v19006_v32, %v19005_v29  ;;  %v13087_v36 = vpop.permute.xlu2 %1975  ;;  %v9614_v50 = vpack.i.bf16 %v13067_v40, %v13075_v54  ;;  %v9604_v33 = vpack.i.bf16 %v13072_v26, %v13081_v52  ;;  %19007 = vst [vmem:[#allocation34_spill] sm:$0xff] %v13096_v56  ;;  %v13142_v32 = vld [vmem:[#allocation6 + $0x18] sm:$0xff] }
 0x2e5   :  { %v13069_v49 = vmax.f32 %v1863_v44, 0.0  ;;  %v1496_v22 = vpop.f32.mrf.mxu3  ;;  %v1823_v37 = vadd.f32 %v12062_v55, %v1683_v47  ;;  %v1814_v35 = vadd.f32 %v12064_v3, %v1674_v1  ;;  %v13104_v42 = vmax.f32 %v1815_v59, 0.0  ;;  %7936 = vmatmul.msk.f32.vlgmr.msra.gmra.mxu2 %vm2613_vm5, %v13106_v46  ;;  %7926 = vmatmul.msk.f32.vlgmr.msra.gmra.mxu3 %vm2613_vm5, %v13106_v46  ;;  %v19010_v47 = vld [vmem:[#allocation24_spill] sm:$0xff]  ;;  %v19011_v1 = vld [vmem:[#allocation37_spill] sm:$0xff] }
 0x2e6   :  { %v1449_v19 = vpop.f32.mrf.mxu1  ;;  %v1822_v62 = vadd.f32 %v12062_v55, %v1682_v4  ;;  %v1730_v44 = vmul.f32 %v18819_v10, %v1403_v57  ;;  %v9609_v0 = vpack.i.bf16 %v13096_v56, %v13101_v2  ;;  %v1379_v16 = vadd.f32 %v19011_v1, %v19010_v47  ;;  %v19018_v1 = vld [vmem:[#allocation41_spill] sm:$0xff] }
 0x2e7   :  { %19002 = vst [vmem:[#allocation93_spill] sm:$0xff] %v13069_v49  ;;  %v9594_v25 = vpack.i.bf16 %v13069_v49, %v13064_v30  ;;  %v1497_v23 = vadd.f32 %v1496_v22, %v1449_v19  ;;  %v13108_v17 = vmax.f32 %v1823_v37, 0.0  ;;  %v13115_v55 = vmax.f32 %v1814_v35, 0.0  ;;  %v19014_v37 = vld [vmem:[#allocation119_spill] sm:$0xff] }
 0x2e8   :  { %19008 = vst [vmem:[#allocation68_spill] sm:$0xff] %v13104_v42  ;;  %v13121_v53 = vmax.f32 %v1822_v62, 0.0  ;;  %v1667_v15 = vmul.f32 %v12080_v24, %v1473_v61  ;;  %v1666_v4 = vmul.f32 %v12080_v24, %v1379_v16  ;;  %v9649_v24 = vpack.i.bf16 %v13026_v28, %v12815_v38  ;;  %v19035_v28 = vld [vmem:[#allocation97_spill] sm:$0xff] }
 0x2e9   :  { %9595 = vrot.lane.b32.xlu2 %v9594_v25, %s10073_s27  ;;  %19009 = vst [vmem:[#allocation72_spill] sm:$0xff] %v13108_v17  ;;  %v1731_v3 = vmul.f32 %v18819_v10, %v1497_v23  ;;  %v1870_v10 = vadd.f32 %v18823_v11, %v1730_v44  ;;  %v9629_v19 = vpack.i.bf16 %v13104_v42, %v13115_v55  ;;  %v19016_v44 = vld [vmem:[#allocation40_spill] sm:$0xff] }
 0x2ea   :  { %9615 = vrot.lane.b32.xlu0 %v9614_v50, %s10073_s27  ;;  %v9619_v60 = vpack.i.bf16 %v13108_v17, %v13121_v53  ;;  %v1806_v59 = vadd.f32 %v12110_v5, %v1666_v4  ;;  %v19013_v50 = vld [vmem:[#allocation120_spill] sm:$0xff] }
 0x2eb   :  { %9605 = vrot.lane.b32.xlu1 %v9604_v33, %s10073_s27  ;;  %v1871_v22 = vadd.f32 %v18823_v11, %v1731_v3  ;;  %v13138_v63 = vmax.f32 %v1870_v10, 0.0  ;;  %v1807_v11 = vadd.f32 %v12110_v5, %v1667_v15  ;;  %v1470_v23 = vadd.f32 %v19014_v37, %v19013_v50  ;;  %v19017_v3 = vld [vmem:[#allocation53_spill] sm:$0xff]  ;;  %v19019_v10 = vld [vmem:[#allocation128_spill] sm:$0xff]  ;;  %v19023_v37 = vld [vmem:[#allocation47_spill] sm:$0xff] }
 0x2ec   :  { %v13133_v25 = vpop.permute.xlu2 %1973  ;;  %v1376_v5 = vadd.f32 %v19017_v3, %v19016_v44  ;;  %v13169_v47 = vmax.f32 %v1806_v59, 0.0  ;;  %v13180_v15 = vld [vmem:[#allocation6 + $0x28] sm:$0xff] }
 0x2ed   :  { %v13140_v29 = vmax.f32 %v1871_v22, 0.0  ;;  %v9624_v57 = vpack.i.bf16 %v13138_v63, %v12684_v21  ;;  %7937 = vmatmul.msk.f32.gmra.mxu2 %vm2613_vm5, %v13142_v32  ;;  %7927 = vmatmul.msk.f32.gmra.mxu3 %vm2613_vm5, %v13142_v32  ;;  %v13159_v35 = vmax.f32 %v1807_v11, 0.0  ;;  %v1659_v16 = vmul.f32 %v19018_v1, %v1470_v23 }
 0x2ee   :  { %v1658_v11 = vmul.f32 %v19018_v1, %v1376_v5  ;;  %v9639_v23 = vpack.i.bf16 %v13064_v30, %v19023_v37  ;;  %v19027_v1 = vld [vmem:[#allocation44_spill] sm:$0xff] }
 0x2ef   :  { %19012 = vst [vmem:[#allocation70_spill] sm:$0xff] %v13140_v29  ;;  %v9634_v33 = vpack.i.bf16 %v13140_v29, %v13138_v63  ;;  %v9644_v4 = vpack.i.bf16 %v13159_v35, %v13169_v47  ;;  %v13650_v37 = vld [vmem:[#allocation6 + $0x80] sm:$0xff] }
 0x2f0   :  { %19015 = vst [vmem:[#allocation32_spill] sm:$0xff] %v13159_v35 }
 0x2f1   :  { %9610 = vrot.lane.b32.xlu2 %v9609_v0, %s10073_s27 }
 0x2f2   :  { %9630 = vrot.lane.b32.xlu0 %v9629_v19, %s10073_s27  ;;  %v19020_v19 = vunpack.i.h.bf16 %v19019_v10 }
 0x2f3   :  { %9620 = vrot.lane.b32.xlu1 %v9619_v60, %s10073_s27 }
 0x2f5   :  { %7938 = vmatmul.msk.f32.gmra.mxu2 %vm2613_vm5, %v13180_v15  ;;  %7928 = vmatmul.msk.f32.gmra.mxu3 %vm2613_vm5, %v13180_v15 }
 0x2f9   :  { %9625 = vrot.lane.b32.xlu2 %v9624_v57, %s10072_s1  ;;  %v19021_v57 = vld [vmem:[#allocation127_spill] sm:$0xff] }
 0x2fa   :  { %9650 = vrot.lane.b32.xlu0 %v9649_v24, %s10072_s1  ;;  %v9664_v59 = vpack.i.bf16 %v13101_v2, %v19021_v57  ;;  %v19022_v24 = vld [vmem:[#allocation33_spill] sm:$0xff] }
 0x2fb   :  { %v13162_v62 = vpop.permute.xlu2 %9495  ;;  %9635 = vrot.lane.b32.xlu1 %v9634_v33, %s10073_s27  ;;  %v1799_v50 = vadd.f32 %v19022_v24, %v1659_v16  ;;  %v1798_v33 = vadd.f32 %v19022_v24, %v1658_v11  ;;  %v9659_v16 = vpack.i.bf16 %v13081_v52, %v19027_v1 }
 0x2fc   :  { %v18292_v61 = vunpack.i.h.bf16 %v13162_v62  ;;  %v9497_v0 = vunpack.i.l.bf16 %v13162_v62  ;;  %v13197_v44 = vpop.permute.xlu1 %2127 }
 0x2fd   :  { %19024 = vst [vmem:[#allocation31_spill] sm:$0xff] %v13197_v44  ;;  %v13202_v5 = vmax.f32 %v1799_v50, 0.0  ;;  %v13208_v10 = vmax.f32 %v1798_v33, 0.0  ;;  %v19030_v33 = vld [vmem:[#allocation109_spill] sm:$0xff] }
 0x2fe   :  { %v2502_v22 = vsel %vm681_vm2, %v19020_v19, %v9497_v0  ;;  %v2492_v60 = vsel %vm681_vm2, %v9497_v0, %v18292_v61  ;;  %v13204_v0 = vld [vmem:[#allocation6 + $0x38] sm:$0xff]  ;;  %v13238_v61 = vld [vmem:[#allocation6 + $0x48] sm:$0xff] }
 0x2ff   :  { %2881 = vmatpush.msrb.mxu3 %v2502_v22  ;;  %2975 = vmatpush.msrb.mxu2 %v2492_v60  ;;  %19026 = vst [vmem:[#allocation56_spill] sm:$0xff] %v13202_v5  ;;  %v9679_v22 = vpack.i.bf16 %v13115_v55, %v12922_v27  ;;  %v9654_v60 = vpack.i.bf16 %v13202_v5, %v13208_v10 }
 0x300   :  { %7939 = vmatmul.msk.f32.gmra.mxu2 %vm2613_vm5, %v13204_v0  ;;  %7929 = vmatmul.msk.f32.gmra.mxu3 %vm2613_vm5, %v13204_v0 }
 0x301   :  { %9645 = vrot.lane.b32.xlu2 %v9644_v4, %s10073_s27 }
 0x302   :  { %9665 = vrot.lane.b32.xlu0 %v9664_v59, %s10072_s1  ;;  %v19029_v59 = vld [vmem:[#allocation105_spill] sm:$0xff] }
 0x303   :  { %9640 = vrot.lane.b32.xlu1 %v9639_v23, %s10072_s1  ;;  %v13214_v19 = vpop.permute.xlu2 %9510 }
 0x304   :  { %v13200_v3 = vpop.permute.xlu0 %2129 }
 0x305   :  { %19025 = vst [vmem:[#allocation55_spill] sm:$0xff] %v13200_v3  ;;  %v2211_v24 = vsel %vm424_vm1, %v13200_v3, %v19029_v59  ;;  %v19032_v59 = vld [vmem:[#allocation49_spill] sm:$0xff]  ;;  %v19033_v3 = vld [vmem:[#allocation110_spill] sm:$0xff] }
 0x306   :  { %v9674_v50 = vpack.i.bf16 %v13121_v53, %v19032_v59  ;;  %v2210_v1 = vsel %vm424_vm1, %v13197_v44, %v19033_v3  ;;  %v9669_v3 = vpack.i.bf16 %v13075_v54, %v12859_v31 }
 0x308   :  { %7940 = vmatmul.msk.f32.gmra.mxu2 %vm2613_vm5, %v13238_v61  ;;  %7930 = vmatmul.msk.f32.gmra.mxu3 %vm2613_vm5, %v13238_v61 }
 0x309   :  { %9660 = vrot.lane.b32.xlu2 %v9659_v16, %s10072_s1 }
 0x30a   :  { %9680 = vrot.lane.b32.xlu0 %v9679_v22, %s10072_s1  ;;  %v19031_v22 = vld [vmem:[#allocation27_spill] sm:$0xff] }
 0x30b   :  { %9655 = vrot.lane.b32.xlu1 %v9654_v60, %s10073_s27 }
 0x30c   :  { %v13223_v4 = vpop.permute.xlu0 %9490  ;;  %v13225_v11 = vpop.permute.xlu1 %2131 }
 0x30d   :  { %19028 = vst [vmem:[#allocation51_spill] sm:$0xff] %v13225_v11  ;;  %v18296_v23 = vunpack.i.l.bf16 %v13223_v4  ;;  %v2212_v16 = vsel %vm424_vm1, %v13225_v11, %v19030_v33  ;;  %v2277_v33 = vmul.f32 %v19031_v22, %v2211_v24  ;;  %v19034_v11 = vunpack.i.h.bf16 %v13223_v4  ;;  %v13268_v24 = vpop.permute.xlu2 %9525 }
 0x30e   :  { %v2285_v60 = vmul.f32 %v19031_v22, %v2212_v16  ;;  %v13252_v16 = vld [vmem:[#allocation6] sm:$0xff] }
 0x30f   :  { %v2194_v52 = vsel %vm424_vm1, %v13087_v36, %v18296_v23  ;;  %v2193_v23 = vsel %vm424_vm1, %v13133_v25, %v19034_v11  ;;  %v2269_v11 = vmul.f32 %v19031_v22, %v2210_v1  ;;  %v19040_v1 = vld [vmem:[#allocation95_spill] sm:$0xff] }
 0x310   :  { %2650 = vmatpush.msra.mxu1 %v2285_v60  ;;  %2752 = vmatpush.msra.mxu0 %v2194_v52  ;;  %v2209_v52 = vsel %vm424_vm1, %v13036_v45, %v19035_v28  ;;  %v19037_v60 = vld [vmem:[#allocation92_spill] sm:$0xff] }
 0x311   :  { %9675 = vrot.lane.b32.xlu2 %v9674_v50, %s10072_s1  ;;  %v19036_v50 = vld [vmem:[#allocation111_spill] sm:$0xff]  ;;  %v2208_v44 = vsel %vm424_vm1, %v13003_v12, %v19037_v60  ;;  %v19055_v12 = vld [vmem:[#allocation65_spill] sm:$0xff] }
 0x312   :  { %2651 = vmatpush.msra.mxu1 %v2277_v33  ;;  %2753 = vmatpush.msra.mxu0 %v2193_v23  ;;  %v2261_v33 = vmul.f32 %v19031_v22, %v2209_v52  ;;  %v13295_v60 = vld [vmem:[#allocation6 + $0x58] sm:$0xff] }
 0x313   :  { %2445 = vrot.lane.b32.xlu0 %v19036_v50, %s10073_s27  ;;  %2754 = vmatmul.f32.vlgmr.msra.gmra.mxu0 %v13252_v16  ;;  %v2207_v50 = vsel %vm424_vm1, %v12971_v9, %v19040_v1  ;;  %v19042_v1 = vld [vmem:[#allocation116_spill] sm:$0xff] }
 0x314   :  { %9670 = vrot.lane.b32.xlu1 %v9669_v3, %s10072_s1  ;;  %2926 = vmatpush.msrb.mxu0 %v12773_v6  ;;  %v13280_v28 = vpop.permute.xlu1 %2119  ;;  %v13282_v23 = vpop.permute.xlu0 %2115  ;;  %v2253_v6 = vmul.f32 %v19031_v22, %v2208_v44  ;;  %v9689_v3 = vpack.i.bf16 %v13208_v10, %v12846_v39  ;;  %v9684_v44 = vpack.i.bf16 %v13169_v47, %v12848_v14 }
 0x315   :  { %19038 = vst [vmem:[#allocation52_spill] sm:$0xff] %v13280_v28  ;;  %2652 = vmatpush.msra.mxu1 %v2269_v11  ;;  %v19041_v11 = vld [vmem:[#allocation82_spill] sm:$0xff]  ;;  %7941 = vmatmul.msk.f32.gmra.mxu2 %vm2613_vm5, %v13295_v60 }
 0x316   :  { %19039 = vst [vmem:[#allocation50_spill] sm:$0xff] %v13282_v23  ;;  %2927 = vmatpush.msrb.mxu0 %v12878_v48  ;;  %v2206_v52 = vsel %vm424_vm1, %v13280_v28, %v19041_v11  ;;  %v2245_v48 = vmul.f32 %v19031_v22, %v2207_v50  ;;  %7931 = vmatmul.msk.f32.gmra.mxu3 %vm2613_vm5, %v13295_v60 }
 0x317   :  { %2653 = vmatpush.msra.mxu1 %v2261_v33  ;;  %v13304_v33 = vld [vmem:[#allocation6 + $0x10] sm:$0xff] }
 0x318   :  { %2928 = vmatpush.msrb.mxu0 %v12767_v20  ;;  %v2237_v20 = vmul.f32 %v19031_v22, %v2206_v52 }
 0x319   :  { %2654 = vmatpush.msra.mxu1 %v2253_v6  ;;  %9690 = vrot.lane.b32.xlu2 %v9689_v3, %s10072_s1  ;;  %v13318_v6 = vpop.permute.xlu2 %9540 }
 0x31a   :  { %2929 = vmatpush.msrb.mxu0 %v12936_v58  ;;  %v2204_v58 = vsel %vm424_vm1, %v13282_v23, %v13087_v36  ;;  %v19044_v36 = vld [vmem:[#allocation102_spill] sm:$0xff]  ;;  %v13346_v23 = vld [vmem:[#allocation6 + $0x68] sm:$0xff]  ;;  %v9542_v9 = vunpack.i.l.bf16 %v13318_v6 }
 0x31b   :  { %2655 = vmatpush.msra.mxu1 %v2245_v48  ;;  %2451 = vrot.lane.b32.xlu0 %v19042_v1, %s10073_s27  ;;  %19046 = vst [vmem:[#allocation73_spill] sm:$0xff] %v13346_v23 }
 0x31c   :  { %9685 = vrot.lane.b32.xlu1 %v9684_v44, %s10072_s1  ;;  %2757 = vmatmul.f32.gmra.mxu0 %v13304_v33  ;;  %v13316_v50 = vpop.permute.xlu1 %2117  ;;  %v13329_v11 = vpop.permute.xlu0 %9500 }
 0x31d   :  { %19043 = vst [vmem:[#allocation75_spill] sm:$0xff] %v13316_v50  ;;  %2930 = vmatpush.msrb.mxu0 %v12875_v8  ;;  %2656 = vmatpush.msra.mxu1 %v2237_v20  ;;  %v2205_v3 = vsel %vm424_vm1, %v13316_v50, %v12907_v7  ;;  %v18301_v48 = vunpack.i.h.bf16 %v13329_v11  ;;  %v9502_v44 = vunpack.i.l.bf16 %v13329_v11  ;;  %v2221_v8 = vmul.f32 %v19031_v22, %v2204_v58  ;;  %v13348_v50 = vld [vmem:[#allocation6 + $0x20] sm:$0xff]  ;;  %v19048_v58 = vld [vmem:[#allocation122_spill] sm:$0xff] }
 0x31e   :  { %v2229_v52 = vmul.f32 %v19031_v22, %v2205_v3  ;;  %v19045_v20 = vunpack.i.h.bf16 %v19044_v36  ;;  %7942 = vmatmul.msk.f32.gmra.mxu2 %vm2613_vm5, %v13346_v23  ;;  %7932 = vmatmul.msk.f32.gmra.mxu3 %vm2613_vm5, %v13346_v23 }
 0x31f   :  { %2931 = vmatpush.msrb.mxu0 %v12863_v43  ;;  %v2491_v3 = vsel %vm681_vm2, %v9502_v44, %v18301_v48  ;;  %v19047_v43 = vld [vmem:[#allocation112_spill] sm:$0xff]  ;;  %v13375_v48 = vld [vmem:[#allocation6 + $0x30] sm:$0xff] }
 0x320   :  { %2657 = vmatpush.msra.mxu1 %v2229_v52  ;;  %v2501_v7 = vsel %vm681_vm2, %v19045_v20, %v9502_v44  ;;  %2976 = vmatpush.msrb.mxu2 %v2491_v3  ;;  %v19049_v52 = vld [vmem:[#allocation114_spill] sm:$0xff]  ;;  %v13372_v3 = vld [vmem:[#allocation6 + $0x78] sm:$0xff] }
 0x321   :  { %2882 = vmatpush.msrb.mxu3 %v2501_v7  ;;  %2447 = vrot.lane.b32.xlu2 %v19047_v43, %s10073_s27  ;;  %v13370_v7 = vpop.permute.xlu2 %9555  ;;  %19051 = vst [vmem:[#allocation71_spill] sm:$0xff] %v13372_v3  ;;  %v19052_v43 = vld [vmem:[#allocation103_spill] sm:$0xff] }
 0x322   :  { %2658 = vmatpush.msra.mxu1 %v2221_v8 }
 0x323   :  { %2439 = vrot.lane.b32.xlu0 %v19048_v58, %s10073_s27  ;;  %v19063_v58 = vld [vmem:[#allocation25_spill] sm:$0xff] }
 0x324   :  { %2449 = vrot.lane.b32.xlu1 %v19049_v52, %s10073_s27  ;;  %2760 = vmatmul.f32.gmra.mxu0 %v13348_v50  ;;  %v13359_v44 = vpop.permute.xlu1 %2113  ;;  %v13361_v36 = vpop.permute.xlu0 %9515 }
 0x325   :  { %19050 = vst [vmem:[#allocation54_spill] sm:$0xff] %v13359_v44  ;;  %v2203_v8 = vsel %vm424_vm1, %v13359_v44, %v13133_v25  ;;  %v19053_v25 = vld [vmem:[#allocation121_spill] sm:$0xff] }
 0x326   :  { %v2213_v20 = vmul.f32 %v19031_v22, %v2203_v8  ;;  %7943 = vmatmul.msk.f32.gmra.mxu2 %vm2613_vm5, %v13372_v3  ;;  %v19054_v8 = vld [vmem:[#allocation107_spill] sm:$0xff]  ;;  %7933 = vmatmul.msk.f32.gmra.mxu3 %vm2613_vm5, %v13372_v3 }
 0x328   :  { %2659 = vmatpush.msra.mxu1 %v2213_v20 }
 0x329   :  { %2660 = vmatmul.f32.vlgmr.msra.gmra.mxu1 %v13252_v16  ;;  %2441 = vrot.lane.b32.xlu2 %v19052_v43, %s10073_s27  ;;  %v9512_v43 = vunpack.i.l.bf16 %v13214_v19 }
 0x32a   :  { %2832 = vmatpush.msrb.mxu1 %v18985_v13 }
 0x32b   :  { %2435 = vrot.lane.b32.xlu0 %v19053_v25, %s10073_s27 }
 0x32c   :  { %2443 = vrot.lane.b32.xlu1 %v19054_v8, %s10073_s27  ;;  %2763 = vmatmul.f32.gmra.mxu0 %v13375_v48  ;;  %v13387_v20 = vpop.permute.xlu1 %9505  ;;  %v13390_v22 = vpop.permute.xlu0 %9530  ;;  %v18315_v8 = vunpack.i.h.bf16 %v13268_v24 }
 0x32d   :  { %2833 = vmatpush.msrb.mxu1 %v18958_v18  ;;  %v9507_v44 = vunpack.i.l.bf16 %v13387_v20  ;;  %v9532_v52 = vunpack.i.l.bf16 %v13390_v22  ;;  %v19056_v18 = vld [vmem:[#allocation123_spill] sm:$0xff]  ;;  %v19058_v25 = vunpack.i.h.bf16 %v13387_v20  ;;  %v19059_v1 = vunpack.i.h.bf16 %v13390_v22 }
 0x32e   :  { %v19057_v45 = vunpack.i.h.bf16 %v19056_v18  ;;  %v9694_v18 = vpack.i.bf16 %v13069_v49, %v13140_v29  ;;  %v19064_v49 = vunpack.i.h.bf16 %v19063_v58 }
 0x32f   :  { %2834 = vmatpush.msrb.mxu1 %v19055_v12  ;;  %v2490_v28 = vsel %vm681_vm2, %v9507_v44, %v19058_v25  ;;  %v2182_v12 = vsel %vm424_vm1, %v9532_v52, %v19059_v1  ;;  %v19061_v1 = vunpack.i.h.bf16 %v13318_v6  ;;  %v19062_v25 = vld [vmem:[#allocation38_spill] sm:$0xff] }
 0x330   :  { %v2500_v13 = vsel %vm681_vm2, %v19057_v45, %v9507_v44  ;;  %2977 = vmatpush.msrb.mxu2 %v2490_v28  ;;  %v13417_v45 = vpop.permute.xlu2 %9570  ;;  %2932 = vmatpush.msrb.mxu0 %v2182_v12  ;;  %v9704_v44 = vpack.i.bf16 %v13067_v40, %v13096_v56  ;;  %v19060_v28 = vld [vmem:[#allocation59_spill] sm:$0xff]  ;;  %v13432_v12 = vld [vmem:[#allocation6 + $0x40] sm:$0xff] }
 0x331   :  { %2883 = vmatpush.msrb.mxu3 %v2500_v13  ;;  %2835 = vmatpush.msrb.mxu1 %v18995_v41  ;;  %v9517_v13 = vunpack.i.l.bf16 %v13361_v36  ;;  %v2181_v41 = vsel %vm424_vm1, %v9542_v9, %v19061_v1  ;;  %v19106_v38 = vunpack.i.h.bf16 %v13417_v45 }
 0x332   :  { %2663 = vmatmul.f32.gmra.mxu1 %v13304_v33  ;;  %9695 = vrot.lane.b32.xlu2 %v9694_v18, %s10072_s1  ;;  %v2499_v18 = vsel %vm681_vm2, %v19064_v49, %v9512_v43  ;;  %v19067_v49 = vld [vmem:[#allocation90_spill] sm:$0xff] }
 0x333   :  { %2836 = vmatpush.msrb.mxu1 %v19060_v28  ;;  %9705 = vrot.lane.b32.xlu0 %v9704_v44, %s10072_s1  ;;  %v19065_v28 = vunpack.i.h.bf16 %v13214_v19  ;;  %v19068_v40 = vunpack.i.h.bf16 %v19067_v49  ;;  %v19072_v49 = vld [vmem:[#allocation117_spill] sm:$0xff] }
 0x334   :  { %2933 = vmatpush.msrb.mxu0 %v2181_v41  ;;  %2437 = vrot.lane.b32.xlu1 %v19062_v25, %s10073_s27  ;;  %v13444_v29 = vpop.permute.xlu0 %9545  ;;  %v13446_v1 = vpop.permute.xlu1 %9520  ;;  %v19066_v41 = vld [vmem:[#allocation35_spill] sm:$0xff]  ;;  %v19073_v56 = vunpack.i.h.bf16 %v19072_v49 }
 0x335   :  { %v2489_v44 = vsel %vm681_vm2, %v9512_v43, %v19065_v28  ;;  %2884 = vmatpush.msrb.mxu3 %v2499_v18  ;;  %2766 = vmatmul.f32.gmra.mxu0 %v13432_v12  ;;  %v9522_v25 = vunpack.i.l.bf16 %v13446_v1  ;;  %v2498_v3 = vsel %vm681_vm2, %v19068_v40, %v9517_v13  ;;  %v19069_v43 = vunpack.i.h.bf16 %v13361_v36 }
 0x336   :  { %2978 = vmatpush.msrb.mxu2 %v2489_v44  ;;  %2837 = vmatpush.msrb.mxu1 %v19066_v41  ;;  %v9527_v28 = vunpack.i.l.bf16 %v13268_v24  ;;  %v19070_v44 = vld [vmem:[#allocation108_spill] sm:$0xff]  ;;  %v19074_v23 = vunpack.i.h.bf16 %v13446_v1 }
 0x337   :  { %v2488_v18 = vsel %vm681_vm2, %v9517_v13, %v19069_v43  ;;  %2885 = vmatpush.msrb.mxu3 %v2498_v3  ;;  %v19071_v41 = vunpack.i.l.bf16 %v19070_v44  ;;  %v2497_v40 = vsel %vm681_vm2, %v19073_v56, %v9522_v25  ;;  %v9699_v3 = vpack.i.bf16 %v13072_v26, %v13030_v34  ;;  %v13537_v34 = vld [vmem:[#allocation6 + $0x60] sm:$0xff] }
 0x338   :  { %2979 = vmatpush.msrb.mxu2 %v2488_v18  ;;  %v2487_v13 = vsel %vm681_vm2, %v9522_v25, %v19074_v23  ;;  %v19075_v43 = vunpack.i.h.bf16 %v19070_v44  ;;  %v13484_v56 = vpop.permute.xlu2 %9585  ;;  %v19076_v23 = vld [vmem:[#allocation85_spill] sm:$0xff]  ;;  %v2486_v49 = vsel %vm681_vm2, %v9527_v28, %v18315_v8  ;;  %v3536_v8 = vld [vmem:[%s18069_s6] sm:$0xff]  ;;  %v9557_v26 = vunpack.i.l.bf16 %v13370_v7 }
 0x339   :  { %v2192_v58 = vsel %vm424_vm1, %v19071_v41, %v9532_v52  ;;  %v3396_v52 = vld [vmem:[%s18068_s5] sm:$0xff]  ;;  %2886 = vmatpush.msrb.mxu3 %v2497_v40  ;;  %v19077_v25 = vunpack.i.h.bf16 %v19076_v23  ;;  %v13491_v41 = vld [vmem:[#allocation6 + $0x50] sm:$0xff]  ;;  %v13493_v44 = vld [vmem:[#allocation6 + $0x88] sm:$0xff] }
 0x33a   :  { %2838 = vmatpush.msrb.mxu1 %v2192_v58  ;;  %v2191_v58 = vsel %vm424_vm1, %v19075_v43, %v9542_v9  ;;  %2980 = vmatpush.msrb.mxu2 %v2487_v13  ;;  %19078 = vst [vmem:[#allocation63_spill] sm:$0xff] %v13491_v41  ;;  %v19080_v9 = vld [vmem:[#allocation86_spill] sm:$0xff]  ;;  %v9547_v43 = vunpack.i.l.bf16 %v13444_v29 }
 0x33b   :  { %9700 = vrot.lane.b32.xlu2 %v9699_v3, %s10072_s1  ;;  %2666 = vmatmul.f32.gmra.mxu1 %v13348_v50  ;;  %v2496_v18 = vsel %vm681_vm2, %v19077_v25, %v9527_v28  ;;  %19079 = vst [vmem:[#allocation61_spill] sm:$0xff] %v13493_v44 }
 0x33c   :  { %2839 = vmatpush.msrb.mxu1 %v2191_v58  ;;  %3408 = vperm.xlu0 %9417, %v3396_v52   ;;  %v13501_v40 = vpop.permute.xlu0 %9560  ;;  %v13503_v13 = vpop.permute.xlu1 %9535  ;;  %v19081_v58 = vld [vmem:[#allocation115_spill] sm:$0xff] }
 0x33d   :  { %2433 = vrot.lane.b32.xlu1 %v19080_v9, %s10073_s27  ;;  %2887 = vmatpush.msrb.mxu3 %v2496_v18  ;;  %v18317_v3 = vunpack.i.h.bf16 %v13503_v13  ;;  %v9537_v52 = vunpack.i.l.bf16 %v13503_v13  ;;  %v19082_v23 = vunpack.i.h.bf16 %v19081_v58 }
 0x33e   :  { %2981 = vmatpush.msrb.mxu2 %v2486_v49  ;;  %7934 = vmatmul.msk.f32.gmra.mxu3 %vm2613_vm5, %v13493_v44  ;;  %v9714_v49 = vpack.i.bf16 %v13202_v5, %v13159_v35  ;;  %v19092_v5 = vld [vmem:[#allocation118_spill] sm:$0xff] }
 0x33f   :  { %2769 = vmatmul.f32.gmra.mxu0 %v13491_v41  ;;  %7944 = vmatmul.msk.f32.gmra.mxu2 %vm2613_vm5, %v13493_v44  ;;  %v2495_v25 = vsel %vm681_vm2, %v19082_v23, %v9537_v52  ;;  %v2485_v18 = vsel %vm681_vm2, %v9537_v52, %v18317_v3  ;;  %v9709_v23 = vpack.i.bf16 %v13104_v42, %v13108_v17  ;;  %v19083_v52 = vld [vmem:[#allocation126_spill] sm:$0xff]  ;;  %v19102_v17 = vld [vmem:[#allocation124_spill] sm:$0xff] }
 0x340   :  { %2888 = vmatpush.msrb.mxu3 %v2495_v25  ;;  %2982 = vmatpush.msrb.mxu2 %v2485_v18  ;;  %v19084_v3 = vunpack.i.h.bf16 %v19083_v52  ;;  %v19085_v25 = vunpack.i.h.bf16 %v13444_v29  ;;  %v19088_v52 = vld [vmem:[#allocation113_spill] sm:$0xff] }
 0x341   :  { %v19089_v58 = vunpack.i.h.bf16 %v19088_v52  ;;  %v19091_v52 = vld [vmem:[#allocation84_spill] sm:$0xff] }
 0x342   :  { %v2494_v28 = vsel %vm681_vm2, %v19084_v3, %v9547_v43  ;;  %v2484_v18 = vsel %vm681_vm2, %v9547_v43, %v19085_v25  ;;  %v19090_v43 = vunpack.i.h.bf16 %v13370_v7 }
 0x343   :  { %9715 = vrot.lane.b32.xlu2 %v9714_v49, %s10072_s1  ;;  %2669 = vmatmul.f32.gmra.mxu1 %v13375_v48  ;;  %v13539_v9 = vpop.permute.xlu2 %9595  ;;  %v13546_v49 = vld [vmem:[#allocation6 + $0x98] sm:$0xff]  ;;  %v2493_v3 = vsel %vm681_vm2, %v19089_v58, %v9557_v26  ;;  %v9562_v58 = vunpack.i.l.bf16 %v13501_v40 }
 0x344   :  { %3548 = vperm.xlu0 %9417, %v3536_v8   ;;  %2889 = vmatpush.msrb.mxu3 %v2494_v28  ;;  %19086 = vst [vmem:[#allocation69_spill] sm:$0xff] %v13546_v49  ;;  %v13548_v8 = vpop.permute.xlu0 %9575 }
 0x345   :  { %9710 = vrot.lane.b32.xlu1 %v9709_v23, %s10072_s1  ;;  %2983 = vmatpush.msrb.mxu2 %v2484_v18  ;;  %19087 = vst [vmem:[#allocation67_spill] sm:$0xff] %v13548_v8  ;;  %v13557_v28 = vpop.permute.xlu1 %9550  ;;  %v2483_v23 = vsel %vm681_vm2, %v9557_v26, %v19090_v43  ;;  %v3398_v43 = vld [vmem:[%s18068_s5 + $0x10] sm:$0xff] }
 0x346   :  { %7935 = vmatmul.msk.f32.gmra.mxu3 %vm2613_vm5, %v13546_v49  ;;  %v18325_v25 = vunpack.i.h.bf16 %v13557_v28  ;;  %v9552_v18 = vunpack.i.l.bf16 %v13557_v28 }
 0x347   :  { %2772 = vmatmul.f32.gmra.mxu0 %v13537_v34  ;;  %2890 = vmatpush.msrb.mxu3 %v2493_v3  ;;  %v19093_v3 = vld [vmem:[#allocation104_spill] sm:$0xff] }
 0x348   :  { %2984 = vmatpush.msrb.mxu2 %v2483_v23  ;;  %v19094_v44 = vunpack.i.l.bf16 %v19093_v3  ;;  %v2180_v26 = vsel %vm424_vm1, %v9552_v18, %v18325_v25  ;;  %v13597_v25 = vld [vmem:[#allocation6 + $0x70] sm:$0xff] }
 0x349   :  { %2891 = vmatpush.msrb.mxu3 %v19091_v52  ;;  %7945 = vmatmul.msk.f32.gmra.mxu2 %vm2613_vm5, %v13546_v49  ;;  %v19095_v52 = vld [vmem:[#allocation81_spill] sm:$0xff] }
 0x34a   :  { %2985 = vmatpush.msrb.mxu2 %v19092_v5  ;;  %v2190_v35 = vsel %vm424_vm1, %v19094_v44, %v9552_v18  ;;  %v3538_v5 = vld [vmem:[%s18069_s6 + $0x10] sm:$0xff]  ;;  %v3397_v44 = vld [vmem:[%s18068_s5 + $0x8] sm:$0xff]  ;;  %2934 = vmatpush.msrb.mxu0 %v2180_v26 }
 0x34b   :  { %2840 = vmatpush.msrb.mxu1 %v2190_v35  ;;  %2892 = vmatpush.msrb.mxu3 %v19095_v52  ;;  %v19096_v49 = vld [vmem:[#allocation125_spill] sm:$0xff]  ;;  %v13590_v18 = vpop.permute.xlu2 %9610  ;;  %v19097_v35 = vunpack.i.h.bf16 %v19093_v3 }
 0x34c   :  { %2986 = vmatpush.msrb.mxu2 %v19096_v49  ;;  %2672 = vmatmul.f32.gmra.mxu1 %v13432_v12  ;;  %v13599_v23 = vpop.permute.xlu0 %9590  ;;  %v19098_v26 = vld [vmem:[#allocation77_spill] sm:$0xff]  ;;  %v19099_v49 = vunpack.i.h.bf16 %v13501_v40 }
 0x34d   :  { %3418 = vperm.xlu2 %9416, %v3398_v43   ;;  %3558 = vperm.xlu0 %9417, %v3538_v5   ;;  %v2189_v52 = vsel %vm424_vm1, %v19097_v35, %v9562_v58  ;;  %v13606_v43 = vpop.permute.xlu1 %9565  ;;  %v19100_v5 = vld [vmem:[#allocation28_spill] sm:$0xff]  ;;  %v19101_v35 = vld [vmem:[#allocation74_spill] sm:$0xff] }
 0x34e   :  { %3413 = vperm.xlu1 %9418, %v3397_v44   ;;  %2841 = vmatpush.msrb.mxu1 %v2189_v52  ;;  %v2179_v42 = vsel %vm424_vm1, %v9562_v58, %v19099_v49  ;;  %v18328_v3 = vunpack.i.h.bf16 %v13606_v43  ;;  %v9567_v44 = vunpack.i.l.bf16 %v13606_v43  ;;  %v19103_v58 = vld [vmem:[#allocation99_spill] sm:$0xff]  ;;  %v9577_v52 = vunpack.i.l.bf16 %v13548_v8 }
 0x34f   :  { %2893 = vmatpush.msrb.mxu3 %v19098_v26  ;;  %2935 = vmatpush.msrb.mxu0 %v2179_v42  ;;  %v9572_v26 = vunpack.i.l.bf16 %v13417_v45  ;;  %v19104_v49 = vunpack.i.l.bf16 %v19103_v58 }
 0x350   :  { %2987 = vmatpush.msrb.mxu2 %v19100_v5  ;;  %2775 = vmatmul.f32.gmra.mxu0 %v13597_v25  ;;  %v2178_v5 = vsel %vm424_vm1, %v9567_v44, %v18328_v3 }
 0x351   :  { %2894 = vmatpush.msrb.mxu3 %v19101_v35  ;;  %v2188_v42 = vsel %vm424_vm1, %v19104_v49, %v9567_v44  ;;  %v3399_v35 = vld [vmem:[%s18068_s5 + $0x18] sm:$0xff]  ;;  %2936 = vmatpush.msrb.mxu0 %v2178_v5  ;;  %v3537_v49 = vld [vmem:[%s18069_s6 + $0x8] sm:$0xff]  ;;  %v2177_v30 = vsel %vm424_vm1, %v9572_v26, %v19106_v38  ;;  %v19109_v38 = vunpack.i.h.bf16 %v13548_v8 }
 0x352   :  { %2988 = vmatpush.msrb.mxu2 %v19102_v17  ;;  %7946 = vmatmul.msk.f32.vlgmr.msrb.gmra.mxu3 %vm2613_vm5, %v13106_v46  ;;  %v3401_v17 = vld [vmem:[%s18068_s5 + $0x28] sm:$0xff]  ;;  %v3539_v8 = vld [vmem:[%s18069_s6 + $0x18] sm:$0xff] }
 0x353   :  { %2842 = vmatpush.msrb.mxu1 %v2188_v42  ;;  %v13636_v44 = vpop.permute.xlu2 %9625  ;;  %7956 = vmatmul.msk.f32.vlgmr.msrb.gmra.mxu2 %vm2613_vm5, %v13106_v46  ;;  %v19105_v42 = vunpack.i.h.bf16 %v19103_v58 }
 0x354   :  { %2675 = vmatmul.f32.gmra.mxu1 %v13491_v41  ;;  %v13652_v46 = vpop.permute.xlu0 %9600  ;;  %2937 = vmatpush.msrb.mxu0 %v2177_v30  ;;  %v9588_v30 = vunpack.i.h.bf16 %v13484_v56 }
 0x355   :  { %3423 = vperm.xlu2 %9416, %v3399_v35   ;;  %3433 = vperm.xlu0 %9417, %v3401_v17   ;;  %v2187_v5 = vsel %vm424_vm1, %v19105_v42, %v9572_v26  ;;  %v13654_v3 = vpop.permute.xlu1 %9580  ;;  %v19107_v17 = vld [vmem:[#allocation83_spill] sm:$0xff]  ;;  %v2176_v26 = vsel %vm424_vm1, %v9577_v52, %v19109_v38 }
 0x356   :  { %3553 = vperm.xlu1 %9418, %v3537_v49   ;;  %2843 = vmatpush.msrb.mxu1 %v2187_v5  ;;  %v9582_v58 = vunpack.i.l.bf16 %v13654_v3  ;;  %v19108_v49 = vunpack.i.l.bf16 %v19107_v17  ;;  %v9587_v5 = vunpack.i.l.bf16 %v13484_v56  ;;  %v19110_v35 = vunpack.i.h.bf16 %v19107_v17 }
 0x357   :  { %2938 = vmatpush.msrb.mxu0 %v2176_v26  ;;  %v9592_v17 = vunpack.i.l.bf16 %v13599_v23  ;;  %v19144_v56 = vunpack.i.h.bf16 %v13599_v23 }
 0x358   :  { %v2186_v42 = vsel %vm424_vm1, %v19108_v49, %v9577_v52  ;;  %2778 = vmatmul.f32.gmra.mxu0 %v13650_v37  ;;  %v2185_v41 = vsel %vm424_vm1, %v19110_v35, %v9582_v58  ;;  %v19111_v49 = vunpack.i.h.bf16 %v13654_v3  ;;  %v3541_v52 = vld [vmem:[%s18069_s6 + $0x28] sm:$0xff]  ;;  %v3400_v35 = vld [vmem:[%s18068_s5 + $0x20] sm:$0xff] }
 0x359   :  { %2844 = vmatpush.msrb.mxu1 %v2186_v42 }
 0x35a   :  { %v2175_v42 = vsel %vm424_vm1, %v9582_v58, %v19111_v49  ;;  %7947 = vmatmul.msk.f32.gmra.mxu3 %vm2613_vm5, %v13142_v32  ;;  %v2174_v49 = vsel %vm424_vm1, %v9587_v5, %v9588_v30 }
 0x35b   :  { %2845 = vmatpush.msrb.mxu1 %v2185_v41  ;;  %2939 = vmatpush.msrb.mxu0 %v2175_v42  ;;  %v13689_v58 = vpop.permute.xlu2 %9645  ;;  %v19112_v41 = vunpack.i.l.bf16 %v13223_v4  ;;  %v13703_v42 = vld [vmem:[#allocation6 + $0x90] sm:$0xff] }
 0x35c   :  { %7957 = vmatmul.msk.f32.gmra.mxu2 %vm2613_vm5, %v13142_v32  ;;  %2678 = vmatmul.f32.gmra.mxu1 %v13537_v34  ;;  %v13705_v32 = vpop.permute.xlu0 %9615 }
 0x35d   :  { %3563 = vperm.xlu2 %9416, %v3539_v8   ;;  %3573 = vperm.xlu0 %9417, %v3541_v52   ;;  %v2184_v26 = vsel %vm424_vm1, %v19112_v41, %v9587_v5  ;;  %v13707_v38 = vpop.permute.xlu1 %9605  ;;  %v19113_v8 = vunpack.i.h.bf16 %v13223_v4  ;;  %v3402_v4 = vld [vmem:[%s18068_s5 + $0x30] sm:$0xff]  ;;  %v3404_v41 = vld [vmem:[%s18068_s5 + $0x40] sm:$0xff] }
 0x35e   :  { %3428 = vperm.xlu1 %9418, %v3400_v35   ;;  %2846 = vmatpush.msrb.mxu1 %v2184_v26  ;;  %v19114_v35 = vunpack.i.h.bf16 %v13599_v23  ;;  %v19147_v23 = vld [vmem:[#allocation100_spill] sm:$0xff] }
 0x35f   :  { %2940 = vmatpush.msrb.mxu0 %v2174_v49  ;;  %v2183_v52 = vsel %vm424_vm1, %v19113_v8, %v9592_v17  ;;  %v9597_v49 = vunpack.i.l.bf16 %v13539_v9  ;;  %v18336_v8 = vunpack.i.h.bf16 %v13539_v9 }
 0x360   :  { %2781 = vmatmul.f32.gmra.mxu0 %v13703_v42  ;;  %2847 = vmatpush.msrb.mxu1 %v2183_v52  ;;  %v2173_v5 = vsel %vm424_vm1, %v9592_v17, %v19114_v35  ;;  %v19116_v52 = vunpack.i.h.bf16 %v13162_v62  ;;  %v5197_v62 = vld [vmem:[%s18072_s9] sm:$0xff] }
 0x361   :  { %2941 = vmatpush.msrb.mxu0 %v2173_v5 }
 0x362   :  { %3020 = vmatpush.msra.mxu1 %v19021_v57  ;;  %7948 = vmatmul.msk.f32.gmra.mxu3 %vm2613_vm5, %v13180_v15 }
 0x363   :  { %3114 = vmatpush.msra.mxu0 %v13101_v2  ;;  %v3540_v2 = vld [vmem:[%s18069_s6 + $0x20] sm:$0xff]  ;;  %v13736_v57 = vpop.permute.xlu2 %9660 }
 0x364   :  { %3021 = vmatpush.msra.mxu1 %v12859_v31  ;;  %7958 = vmatmul.msk.f32.gmra.mxu2 %vm2613_vm5, %v13180_v15  ;;  %v13739_v31 = vpop.permute.xlu0 %9630  ;;  %v18334_v15 = vunpack.i.h.bf16 %v13636_v44 }
 0x365   :  { %3115 = vmatpush.msra.mxu0 %v13075_v54  ;;  %2681 = vmatmul.f32.gmra.mxu1 %v13597_v25  ;;  %v13742_v17 = vpop.permute.xlu1 %9620  ;;  %v9627_v54 = vunpack.i.l.bf16 %v13636_v44 }
 0x366   :  { %3022 = vmatpush.msra.mxu1 %v19032_v59  ;;  %3438 = vperm.xlu2 %9416, %v3402_v4   ;;  %v9602_v4 = vunpack.i.l.bf16 %v13652_v46 }
 0x367   :  { %3116 = vmatpush.msra.mxu0 %v13121_v53  ;;  %3448 = vperm.xlu0 %9417, %v3404_v41   ;;  %v3544_v53 = vld [vmem:[%s18069_s6 + $0x40] sm:$0xff]  ;;  %v18335_v41 = vunpack.i.h.bf16 %v13652_v46 }
 0x368   :  { %3568 = vperm.xlu1 %9418, %v3540_v2   ;;  %3023 = vmatpush.msra.mxu1 %v12922_v27  ;;  %v3542_v27 = vld [vmem:[%s18069_s6 + $0x30] sm:$0xff]  ;;  %v3405_v2 = vld [vmem:[%s18068_s5 + $0x48] sm:$0xff] }
 0x369   :  { %2942 = vmatmul.f32.vlgmr.msrb.gmra.mxu0 %v13252_v16 }
 0x36a   :  { %3117 = vmatpush.msra.mxu0 %v13115_v55  ;;  %3024 = vmatpush.msra.mxu1 %v12848_v14  ;;  %v19115_v14 = vunpack.i.h.bf16 %v13390_v22  ;;  %v2162_v22 = vsel %vm424_vm1, %v9627_v54, %v18334_v15 }
 0x36b   :  { %7949 = vmatmul.msk.f32.gmra.mxu3 %vm2613_vm5, %v13204_v0  ;;  %v13777_v59 = vpop.permute.xlu2 %9675 }
 0x36c   :  { %3118 = vmatpush.msra.mxu0 %v13169_v47  ;;  %3025 = vmatpush.msra.mxu1 %v12846_v39  ;;  %v2172_v55 = vsel %vm424_vm1, %v19115_v14, %v9627_v54  ;;  %v3403_v47 = vld [vmem:[%s18068_s5 + $0x38] sm:$0xff]  ;;  %v13771_v39 = vpop.permute.xlu0 %9650  ;;  %v19117_v54 = vunpack.i.h.bf16 %v13329_v11  ;;  %v9607_v14 = vunpack.i.l.bf16 %v13707_v38  ;;  %v2471_v11 = vsel %vm681_vm2, %v9597_v49, %v18336_v8  ;;  %s10078_s5 = smov [#allocation13]  }
 0x36d   :  { %2684 = vmatmul.f32.gmra.mxu1 %v13650_v37  ;;  %7959 = vmatmul.msk.f32.gmra.mxu2 %vm2613_vm5, %v13204_v0  ;;  %v13779_v26 = vpop.permute.xlu1 %9635  ;;  %v18337_v15 = vunpack.i.h.bf16 %v13771_v39  ;;  %s7810_s30 = sshll.u32 %s10078_s5, 4  ;;  %s7811_s30 = int_to_ptr.vmem [resolvable:$true] %s7810_s30 }
 0x36e   :  { %3119 = vmatpush.msra.mxu0 %v13208_v10  ;;  %3026 = vmatpush.msra.mxu1 %v2172_v55  ;;  %v9638_v0 = vunpack.i.h.bf16 %v13779_v26  ;;  %v9637_v10 = vunpack.i.l.bf16 %v13779_v26  ;;  %v3543_v55 = vld [vmem:[%s18069_s6 + $0x38] sm:$0xff] }
 0x36f   :  { %3578 = vperm.xlu2 %9416, %v3542_v27   ;;  %3588 = vperm.xlu0 %9417, %v3544_v53   ;;  %v2481_v27 = vsel %vm681_vm2, %v19117_v54, %v9597_v49  ;;  %v13806_v53 = vpop.f32.mrf.mxu2  ;;  %v9613_v54 = vunpack.i.h.bf16 %v13590_v18 }
 0x370   :  { %3120 = vmatpush.msra.mxu0 %v2162_v22  ;;  %3443 = vperm.xlu1 %9418, %v3403_v47   ;;  %v2482_v35 = vsel %vm681_vm2, %v19116_v52, %v9637_v10  ;;  %v2472_v5 = vsel %vm681_vm2, %v9637_v10, %v9638_v0  ;;  %v9608_v47 = vunpack.i.h.bf16 %v13707_v38  ;;  %v9612_v10 = vunpack.i.l.bf16 %v13590_v18  ;;  %v19164_v18 = vld [vmem:[#allocation56_spill] sm:$0xff] }
 0x371   :  { %2945 = vmatmul.f32.gmra.mxu0 %v13304_v33  ;;  %3069 = vmatpush.msra.mxu3 %v2482_v35  ;;  %v19118_v35 = vunpack.i.h.bf16 %v13387_v20  ;;  %v9617_v20 = vunpack.i.l.bf16 %v13705_v32 }
 0x372   :  { %3163 = vmatpush.msra.mxu2 %v2472_v5 }
 0x373   :  { %7950 = vmatmul.msk.f32.gmra.mxu3 %vm2613_vm5, %v13238_v61  ;;  %v2480_v5 = vsel %vm681_vm2, %v19118_v35, %v9602_v4  ;;  %v13840_v35 = vpop.permute.xlu2 %9690 }
 0x374   :  { %3070 = vmatpush.msra.mxu3 %v2481_v27  ;;  %3164 = vmatpush.msra.mxu2 %v2471_v11  ;;  %v13820_v22 = vpop.permute.xlu0 %9665  ;;  %v9652_v11 = vunpack.i.l.bf16 %v13771_v39 }
 0x375   :  { %2687 = vmatmul.f32.gmra.mxu1 %v13703_v42  ;;  %v13823_v52 = vpop.permute.xlu1 %9640  ;;  %7960 = vmatmul.msk.f32.gmra.mxu2 %vm2613_vm5, %v13238_v61  ;;  %v9663_v61 = vunpack.i.h.bf16 %v13736_v57 }
 0x376   :  { %v18338_v49 = vunpack.i.h.bf16 %v13823_v52  ;;  %v9642_v27 = vunpack.i.l.bf16 %v13823_v52  ;;  %3071 = vmatpush.msra.mxu3 %v2480_v5 }
 0x377   :  { %3453 = vperm.xlu2 %9416, %v3405_v2   ;;  %5201 = vperm.xlu0 %9417, %v5197_v62   ;;  %v2470_v2 = vsel %vm681_vm2, %v9602_v4, %v18335_v41  ;;  %v9618_v62 = vunpack.i.h.bf16 %v13705_v32  ;;  %v2469_v4 = vsel %vm681_vm2, %v9607_v14, %v9608_v47  ;;  %v19120_v41 = vunpack.i.h.bf16 %v13318_v6 }
 0x378   :  { %3583 = vperm.xlu1 %9418, %v3543_v55   ;;  %3165 = vmatpush.msra.mxu2 %v2470_v2  ;;  %v19119_v55 = vunpack.i.h.bf16 %v13214_v19  ;;  %v2161_v19 = vsel %vm424_vm1, %v9642_v27, %v18338_v49  ;;  %v9662_v2 = vunpack.i.l.bf16 %v13736_v57  ;;  %v9648_v49 = vunpack.i.h.bf16 %v13689_v58 }
 0x379   :  { %2948 = vmatmul.f32.gmra.mxu0 %v13348_v50  ;;  %v2171_v8 = vsel %vm424_vm1, %v19120_v41, %v9642_v27  ;;  %v2468_v41 = vsel %vm681_vm2, %v9612_v10, %v9613_v54  ;;  %v9623_v27 = vunpack.i.h.bf16 %v13742_v17 }
 0x37a   :  { %v2479_v5 = vsel %vm681_vm2, %v19119_v55, %v9607_v14  ;;  %3166 = vmatpush.msra.mxu2 %v2469_v4  ;;  %3027 = vmatpush.msra.mxu1 %v2171_v8  ;;  %v19121_v55 = vunpack.i.h.bf16 %v13361_v36  ;;  %v9622_v14 = vunpack.i.l.bf16 %v13742_v17  ;;  %v3545_v36 = vld [vmem:[%s18069_s6 + $0x48] sm:$0xff]  ;;  %v19122_v8 = vunpack.i.h.bf16 %v13557_v28 }
 0x37b   :  { %3072 = vmatpush.msra.mxu3 %v2479_v5  ;;  %3121 = vmatpush.msra.mxu0 %v2161_v19  ;;  %v19123_v4 = vunpack.i.h.bf16 %v13446_v1  ;;  %v9632_v19 = vunpack.i.l.bf16 %v13739_v31  ;;  %v2467_v28 = vsel %vm681_vm2, %v9617_v20, %v9618_v62 }
 0x37c   :  { %v2478_v6 = vsel %vm681_vm2, %v19121_v55, %v9612_v10  ;;  %3167 = vmatpush.msra.mxu2 %v2468_v41  ;;  %v2170_v5 = vsel %vm424_vm1, %v19122_v8, %v9652_v11  ;;  %v9667_v55 = vunpack.i.l.bf16 %v13820_v22  ;;  %v13895_v1 = vpop.permute.xlu0 %9680  ;;  %v9633_v41 = vunpack.i.h.bf16 %v13739_v31  ;;  %7951 = vmatmul.msk.f32.gmra.mxu3 %vm2613_vm5, %v13295_v60  ;;  %v19175_v31 = vld [vmem:[#allocation69_spill] sm:$0xff] }
 0x37d   :  { %3073 = vmatpush.msra.mxu3 %v2478_v6  ;;  %2848 = vmatmul.f32.vlgmr.msrb.gmra.mxu1 %v13252_v16  ;;  %v2477_v10 = vsel %vm681_vm2, %v19123_v4, %v9617_v20  ;;  %v2160_v16 = vsel %vm424_vm1, %v9652_v11, %v18337_v15  ;;  %v13897_v6 = vpop.f32.mrf.mxu2  ;;  %v9668_v8 = vunpack.i.h.bf16 %v13820_v22  ;;  %v19124_v4 = vunpack.i.h.bf16 %v13501_v40 }
 0x37e   :  { %3028 = vmatpush.msra.mxu1 %v2170_v5  ;;  %3122 = vmatpush.msra.mxu0 %v2160_v16  ;;  %v13901_v5 = vpop.permute.xlu1 %9655  ;;  %v19125_v20 = vunpack.i.h.bf16 %v13268_v24  ;;  %v2159_v40 = vsel %vm424_vm1, %v9662_v2, %v9663_v61  ;;  %v19126_v16 = vunpack.i.h.bf16 %v13606_v43  ;;  %v2465_v43 = vsel %vm681_vm2, %v9632_v19, %v9633_v41 }
 0x37f   :  { %3074 = vmatpush.msra.mxu3 %v2477_v10  ;;  %3168 = vmatpush.msra.mxu2 %v2467_v28  ;;  %v2169_v11 = vsel %vm424_vm1, %v19124_v4, %v9662_v2  ;;  %v9647_v10 = vunpack.i.l.bf16 %v13689_v58  ;;  %v9657_v24 = vunpack.i.l.bf16 %v13901_v5  ;;  %v13931_v2 = vpop.permute.xlu2 %2447 }
 0x380   :  { %3593 = vperm.xlu1 %9418, %v3545_v36   ;;  %3029 = vmatpush.msra.mxu1 %v2169_v11  ;;  %v2476_v15 = vsel %vm681_vm2, %v19125_v20, %v9622_v14  ;;  %v2466_v36 = vsel %vm681_vm2, %v9622_v14, %v9623_v27  ;;  %v2168_v28 = vsel %vm424_vm1, %v19126_v16, %v9667_v55  ;;  %v9658_v11 = vunpack.i.h.bf16 %v13901_v5 }
 0x381   :  { %2951 = vmatmul.f32.gmra.mxu0 %v13375_v48  ;;  %3075 = vmatpush.msra.mxu3 %v2476_v15  ;;  %v19127_v15 = vunpack.i.h.bf16 %v13503_v13  ;;  %v2158_v14 = vsel %vm424_vm1, %v9667_v55, %v9668_v8  ;;  %v19128_v13 = vunpack.i.h.bf16 %v13444_v29  ;;  %v19129_v55 = vunpack.i.h.bf16 %v13370_v7 }
 0x382   :  { %3123 = vmatpush.msra.mxu0 %v2159_v40  ;;  %3169 = vmatpush.msra.mxu2 %v2466_v36  ;;  %v2464_v40 = vsel %vm681_vm2, %v9647_v10, %v9648_v49  ;;  %v2463_v29 = vsel %vm681_vm2, %v9657_v24, %v9658_v11 }
 0x383   :  { %v2475_v4 = vsel %vm681_vm2, %v19127_v15, %v9632_v19  ;;  %3030 = vmatpush.msra.mxu1 %v2168_v28  ;;  %v2474_v20 = vsel %vm681_vm2, %v19128_v13, %v9647_v10  ;;  %v2473_v19 = vsel %vm681_vm2, %v19129_v55, %v9657_v24  ;;  %7961 = vmatmul.msk.f32.gmra.mxu2 %vm2613_vm5, %v13295_v60  ;;  %v9677_v28 = vunpack.i.l.bf16 %v13777_v59  ;;  %v13987_v13 = vpop.f32.mrf.mxu3 }
 0x384   :  { %3076 = vmatpush.msra.mxu3 %v2475_v4  ;;  %3124 = vmatpush.msra.mxu0 %v2158_v14  ;;  %v9678_v24 = vunpack.i.h.bf16 %v13777_v59  ;;  %v19130_v15 = vunpack.i.h.bf16 %v13417_v45  ;;  %v9682_v14 = vunpack.i.l.bf16 %v13895_v1 }
 0x385   :  { %3170 = vmatpush.msra.mxu2 %v2465_v43  ;;  %2851 = vmatmul.f32.gmra.mxu1 %v13304_v33  ;;  %v13955_v36 = vpop.permute.xlu0 %2445  ;;  %v13969_v16 = vpop.f32.mrf.mxu2  ;;  %v19131_v43 = vld [vmem:[#allocation47_spill] sm:$0xff] }
 0x386   :  { %3077 = vmatpush.msra.mxu3 %v2474_v20  ;;  %v13963_v10 = vpop.permute.xlu1 %9670  ;;  %v19133_v20 = vld [vmem:[#allocation89_spill] sm:$0xff] }
 0x387   :  { %3171 = vmatpush.msra.mxu2 %v2464_v40  ;;  %v9673_v33 = vunpack.i.h.bf16 %v13963_v10  ;;  %v9672_v7 = vunpack.i.l.bf16 %v13963_v10  ;;  %v13990_v45 = vpop.permute.xlu2 %2441  ;;  %v19134_v40 = vld [vmem:[#allocation67_spill] sm:$0xff] }
 0x388   :  { %3078 = vmatpush.msra.mxu3 %v2473_v19  ;;  %v19135_v55 = vunpack.i.h.bf16 %v19134_v40  ;;  %v19140_v40 = vld [vmem:[#allocation43_spill] sm:$0xff] }
 0x389   :  { %3172 = vmatpush.msra.mxu2 %v2463_v29  ;;  %2954 = vmatmul.f32.gmra.mxu0 %v13432_v12  ;;  %v2167_v60 = vsel %vm424_vm1, %v19130_v15, %v9672_v7  ;;  %v2157_v4 = vsel %vm424_vm1, %v9672_v7, %v9673_v33  ;;  %v19136_v29 = vld [vmem:[#allocation30_spill] sm:$0xff]  ;;  %v2156_v7 = vsel %vm424_vm1, %v9677_v28, %v9678_v24 }
 0x38a   :  { %3079 = vmatpush.msra.mxu3 %v12684_v21  ;;  %3031 = vmatpush.msra.mxu1 %v2167_v60  ;;  %v19132_v21 = vld [vmem:[#allocation39_spill] sm:$0xff]  ;;  %v2166_v19 = vsel %vm424_vm1, %v19135_v55, %v9677_v28  ;;  %v19137_v60 = vld [vmem:[#allocation44_spill] sm:$0xff] }
 0x38b   :  { %3173 = vmatpush.msra.mxu2 %v13138_v63  ;;  %3125 = vmatpush.msra.mxu0 %v2157_v4  ;;  %v9683_v63 = vunpack.i.h.bf16 %v13895_v1  ;;  %v19138_v4 = vld [vmem:[#allocation48_spill] sm:$0xff]  ;;  %v19141_v55 = vld [vmem:[#allocation23_spill] sm:$0xff]  ;;  %v19192_v1 = vld [vmem:[#allocation50_spill] sm:$0xff] }
 0x38c   :  { %3080 = vmatpush.msra.mxu3 %v19131_v43  ;;  %3032 = vmatpush.msra.mxu1 %v2166_v19 }
 0x38d   :  { %3174 = vmatpush.msra.mxu2 %v19132_v21  ;;  %2854 = vmatmul.f32.gmra.mxu1 %v13348_v50  ;;  %v2452_v15 = vpop.permute.xlu0 %2451 }
 0x38e   :  { %3081 = vmatpush.msra.mxu3 %v19133_v20  ;;  %3126 = vmatpush.msra.mxu0 %v2156_v7  ;;  %v2462_v50 = vsel %vm681_vm2, %v9638_v0, %v2452_v15  ;;  %v2532_v43 = vsel %vm681_vm2, %v2452_v15, %v19138_v4  ;;  %v14011_v21 = vpop.permute.xlu1 %9685  ;;  %v19139_v20 = vunpack.i.h.bf16 %v13654_v3  ;;  %v9693_v0 = vunpack.i.h.bf16 %v13840_v35  ;;  %v19142_v15 = vld [vmem:[#allocation63_spill] sm:$0xff] }
 0x38f   :  { %3175 = vmatpush.msra.mxu2 %v19136_v29  ;;  %v2612_v19 = vmul.f32 %v19141_v55, %v2532_v43  ;;  %v9688_v26 = vunpack.i.h.bf16 %v14011_v21  ;;  %v9687_v29 = vunpack.i.l.bf16 %v14011_v21  ;;  %v9692_v7 = vunpack.i.l.bf16 %v13840_v35 }
 0x390   :  { %3082 = vmatpush.msra.mxu3 %v19137_v60  ;;  %v2165_v28 = vsel %vm424_vm1, %v19139_v20, %v9682_v14  ;;  %v2155_v3 = vsel %vm424_vm1, %v9682_v14, %v9683_v63  ;;  %v19143_v60 = vld [vmem:[#allocation73_spill] sm:$0xff]  ;;  %v14030_v4 = vpop.f32.mrf.mxu0  ;;  %v14044_v14 = vpop.f32.mrf.mxu3 }
 0x391   :  { %3176 = vmatpush.msra.mxu2 %v19140_v40  ;;  %3033 = vmatpush.msra.mxu1 %v2165_v28  ;;  %v2164_v43 = vsel %vm424_vm1, %v9588_v30, %v9687_v29  ;;  %v2154_v20 = vsel %vm424_vm1, %v9687_v29, %v9688_v26  ;;  %v14040_v28 = vpop.f32.mrf.mxu2  ;;  %v2163_v30 = vsel %vm424_vm1, %v19144_v56, %v9692_v7  ;;  %v19145_v29 = vld [vmem:[#allocation34_spill] sm:$0xff]  ;;  %v19149_v56 = vld [vmem:[#allocation71_spill] sm:$0xff] }
 0x392   :  { %2957 = vmatmul.f32.gmra.mxu0 %v19142_v15  ;;  %7962 = vmatmul.msk.f32.gmra.mxu2 %vm2613_vm5, %v19143_v60 }
 0x393   :  { %3127 = vmatpush.msra.mxu0 %v2155_v3  ;;  %3257 = vmatpush.msrb.mxu3 %v2462_v50  ;;  %v2153_v50 = vsel %vm424_vm1, %v9692_v7, %v9693_v0  ;;  %v19146_v3 = vld [vmem:[#allocation107_spill] sm:$0xff] }
 0x394   :  { %3034 = vmatpush.msra.mxu1 %v2164_v43  ;;  %3351 = vmatpush.msrb.mxu2 %v2612_v19  ;;  %v14057_v19 = vpop.permute.xlu2 %9695  ;;  %v19148_v43 = vunpack.i.h.bf16 %v13539_v9 }
 0x395   :  { %3128 = vmatpush.msra.mxu0 %v2154_v20  ;;  %7952 = vmatmul.msk.f32.gmra.mxu3 %vm2613_vm5, %v19143_v60  ;;  %v14055_v40 = vpop.permute.xlu0 %2439 }
 0x396   :  { %2857 = vmatmul.f32.gmra.mxu1 %v13375_v48  ;;  %v2450_v48 = vpop.permute.xlu1 %2449 }
 0x397   :  { %3035 = vmatpush.msra.mxu1 %v2163_v30  ;;  %3129 = vmatpush.msra.mxu0 %v2153_v50  ;;  %v2531_v60 = vsel %vm681_vm2, %v2450_v48, %v19147_v23  ;;  %v2461_v7 = vsel %vm681_vm2, %v19148_v43, %v2450_v48  ;;  %v19150_v30 = vld [vmem:[#allocation98_spill] sm:$0xff] }
 0x398   :  { %v2604_v20 = vmul.f32 %v19141_v55, %v2531_v60  ;;  %v2530_v50 = vsel %vm681_vm2, %v13931_v2, %v19150_v30  ;;  %3258 = vmatpush.msrb.mxu3 %v2461_v7  ;;  %v19153_v48 = vld [vmem:[#allocation106_spill] sm:$0xff]  ;;  %v19154_v60 = vld [vmem:[#allocation72_spill] sm:$0xff] }
 0x399   :  { %3208 = vmatpush.msrb.mxu1 %v19145_v29  ;;  %3302 = vmatpush.msrb.mxu0 %v19146_v3  ;;  %v19151_v29 = vld [vmem:[#allocation94_spill] sm:$0xff]  ;;  %v19152_v3 = vld [vmem:[#allocation103_spill] sm:$0xff]  ;;  %v14078_v9 = vpop.f32.mrf.mxu0  ;;  %v2529_v23 = vsel %vm681_vm2, %v13955_v36, %v19153_v48  ;;  %v2596_v7 = vmul.f32 %v19141_v55, %v2530_v50  ;;  %v9697_v50 = vunpack.i.l.bf16 %v14057_v19 }
 0x39a   :  { %2960 = vmatmul.f32.gmra.mxu0 %v13537_v34  ;;  %7963 = vmatmul.msk.f32.gmra.mxu2 %vm2613_vm5, %v19149_v56  ;;  %v19155_v43 = vld [vmem:[#allocation122_spill] sm:$0xff]  ;;  %v19156_v56 = vunpack.i.h.bf16 %v13652_v46  ;;  %v2459_v46 = vsel %vm681_vm2, %v9608_v47, %v13955_v36  ;;  %v19162_v36 = vld [vmem:[#allocation88_spill] sm:$0xff] }
 0x39b   :  { %3209 = vmatpush.msrb.mxu1 %v19151_v29  ;;  %3303 = vmatpush.msrb.mxu0 %v19152_v3  ;;  %v14091_v29 = vpop.f32.mrf.mxu2  ;;  %v19157_v3 = vld [vmem:[#allocation68_spill] sm:$0xff]  ;;  %v19158_v48 = vld [vmem:[#allocation38_spill] sm:$0xff] }
 0x39c   :  { %3352 = vmatpush.msrb.mxu2 %v2604_v20  ;;  %v2460_v30 = vsel %vm681_vm2, %v19156_v56, %v13931_v2  ;;  %v14095_v20 = vpop.f32.mrf.mxu3  ;;  %v19160_v56 = vld [vmem:[#allocation121_spill] sm:$0xff] }
 0x39d   :  { %3210 = vmatpush.msrb.mxu1 %v19154_v60  ;;  %3304 = vmatpush.msrb.mxu0 %v19155_v43  ;;  %v14104_v2 = vpop.permute.xlu0 %2435  ;;  %v2588_v60 = vmul.f32 %v19141_v55, %v2529_v23  ;;  %v19159_v43 = vld [vmem:[#allocation32_spill] sm:$0xff]  ;;  %v2527_v23 = vsel %vm681_vm2, %v13990_v45, %v19162_v36  ;;  %v19168_v36 = vld [vmem:[#allocation51_spill] sm:$0xff] }
 0x39e   :  { %3259 = vmatpush.msrb.mxu3 %v2460_v30  ;;  %2860 = vmatmul.f32.gmra.mxu1 %v13432_v12  ;;  %v2444_v12 = vpop.permute.xlu1 %2443  ;;  %v19161_v30 = vld [vmem:[#allocation87_spill] sm:$0xff]  ;;  %v2454_v22 = vsel %vm681_vm2, %v9648_v49, %v14104_v2 }
 0x39f   :  { %3211 = vmatpush.msrb.mxu1 %v19157_v3  ;;  %3305 = vmatpush.msrb.mxu0 %v19158_v48  ;;  %v2528_v38 = vsel %vm681_vm2, %v2444_v12, %v19161_v30  ;;  %v2458_v47 = vsel %vm681_vm2, %v9613_v54, %v2444_v12  ;;  %v9698_v48 = vunpack.i.h.bf16 %v14057_v19  ;;  %v19165_v54 = vld [vmem:[#allocation96_spill] sm:$0xff]  ;;  %v19167_v30 = vunpack.i.h.bf16 %v13636_v44 }
 0x3a0   :  { %3260 = vmatpush.msrb.mxu3 %v2459_v46  ;;  %3353 = vmatpush.msrb.mxu2 %v2596_v7  ;;  %v9701_v7 = vpop.permute.xlu2 %9700  ;;  %v2580_v3 = vmul.f32 %v19141_v55, %v2528_v38  ;;  %v19163_v46 = vld [vmem:[#allocation61_spill] sm:$0xff]  ;;  %v2526_v12 = vsel %vm681_vm2, %v14055_v40, %v19165_v54  ;;  %v2457_v54 = vsel %vm681_vm2, %v9618_v62, %v13990_v45 }
 0x3a1   :  { %3212 = vmatpush.msrb.mxu1 %v19159_v43  ;;  %3306 = vmatpush.msrb.mxu0 %v19160_v56  ;;  %v14127_v43 = vpop.f32.mrf.mxu0  ;;  %v19166_v56 = vld [vmem:[#allocation86_spill] sm:$0xff]  ;;  %v2152_v19 = vsel %vm424_vm1, %v19167_v30, %v9697_v50  ;;  %v9702_v38 = vunpack.i.l.bf16 %v9701_v7  ;;  %v9703_v44 = vunpack.i.h.bf16 %v9701_v7  ;;  %v2456_v45 = vsel %vm681_vm2, %v9623_v27, %v14055_v40  ;;  %v19173_v27 = vld [vmem:[#allocation31_spill] sm:$0xff] }
 0x3a2   :  { %2963 = vmatmul.f32.gmra.mxu0 %v13597_v25  ;;  %3354 = vmatpush.msrb.mxu2 %v2588_v60  ;;  %v2572_v60 = vmul.f32 %v19141_v55, %v2527_v23  ;;  %v19169_v23 = vunpack.i.h.bf16 %v13823_v52 }
 0x3a3   :  { %7964 = vmatmul.msk.f32.gmra.mxu2 %vm2613_vm5, %v19163_v46  ;;  %3213 = vmatpush.msrb.mxu1 %v19164_v18  ;;  %v2142_v18 = vsel %vm424_vm1, %v9697_v50, %v19168_v36  ;;  %v19170_v50 = vld [vmem:[#allocation55_spill] sm:$0xff]  ;;  %v14156_v62 = vpop.f32.mrf.mxu2 }
 0x3a4   :  { %3307 = vmatpush.msrb.mxu0 %v19166_v56  ;;  %3261 = vmatpush.msrb.mxu3 %v2458_v47  ;;  %v2564_v47 = vmul.f32 %v19141_v55, %v2526_v12  ;;  %v2151_v56 = vsel %vm424_vm1, %v19169_v23, %v9698_v48  ;;  %v2141_v32 = vsel %vm424_vm1, %v9698_v48, %v19170_v50  ;;  %v14163_v7 = vpop.f32.mrf.mxu3  ;;  %v19172_v12 = vld [vmem:[#allocation78_spill] sm:$0xff]  ;;  %v19174_v36 = vld [vmem:[#allocation91_spill] sm:$0xff]  ;;  %v19176_v23 = vld [vmem:[#allocation45_spill] sm:$0xff] }
 0x3a5   :  { %3214 = vmatpush.msrb.mxu1 %v2152_v19  ;;  %3355 = vmatpush.msrb.mxu2 %v2580_v3  ;;  %v9706_v30 = vpop.permute.xlu0 %9705  ;;  %v19171_v3 = vunpack.i.h.bf16 %v13771_v39  ;;  %v2140_v39 = vsel %vm424_vm1, %v9702_v38, %v19173_v27  ;;  %v19177_v50 = vld [vmem:[#allocation29_spill] sm:$0xff]  ;;  %v19185_v27 = vld [vmem:[#allocation114_spill] sm:$0xff] }
 0x3a6   :  { %3308 = vmatpush.msrb.mxu0 %v2142_v18  ;;  %3262 = vmatpush.msrb.mxu3 %v2457_v54  ;;  %v9707_v52 = vunpack.i.l.bf16 %v9706_v30  ;;  %v2524_v18 = vsel %vm681_vm2, %v14104_v2, %v19174_v36  ;;  %v9708_v54 = vunpack.i.h.bf16 %v9706_v30  ;;  %v14219_v2 = vld [vmem:[#allocation6 + $0x78] sm:$0xff]  ;;  %v14252_v36 = vld [vmem:[#allocation6] sm:$0xff] }
 0x3a7   :  { %2863 = vmatmul.f32.gmra.mxu1 %v19142_v15  ;;  %3356 = vmatpush.msrb.mxu2 %v2572_v60  ;;  %v2438_v15 = vpop.permute.xlu1 %2437  ;;  %v2150_v48 = vsel %vm424_vm1, %v19171_v3, %v9702_v38  ;;  %v14172_v60 = vpop.f32.mrf.mxu1  ;;  %v19181_v3 = vld [vmem:[#allocation70_spill] sm:$0xff] }
 0x3a8   :  { %3215 = vmatpush.msrb.mxu1 %v2151_v56  ;;  %3309 = vmatpush.msrb.mxu0 %v2141_v32  ;;  %v2525_v19 = vsel %vm681_vm2, %v2438_v15, %v19172_v12  ;;  %v2455_v17 = vsel %vm681_vm2, %v9633_v41, %v2438_v15  ;;  %v2149_v41 = vsel %vm424_vm1, %v9663_v61, %v9703_v44  ;;  %v19179_v32 = vld [vmem:[#allocation80_spill] sm:$0xff]  ;;  %v14238_v15 = vld [vmem:[#allocation6 + $0x8] sm:$0xff]  ;;  %v9716_v12 = vpop.permute.xlu2 %9715 }
 0x3a9   :  { %3263 = vmatpush.msrb.mxu3 %v2456_v45  ;;  %3357 = vmatpush.msrb.mxu2 %v2564_v47  ;;  %v2556_v40 = vmul.f32 %v19141_v55, %v2525_v19  ;;  %v14193_v47 = vpop.f32.mrf.mxu0  ;;  %v2148_v38 = vsel %vm424_vm1, %v9668_v8, %v9707_v52  ;;  %v2139_v56 = vsel %vm424_vm1, %v9703_v44, %v19176_v23  ;;  %v19178_v44 = vld [vmem:[#allocation101_spill] sm:$0xff]  ;;  %v19187_v23 = vld [vmem:[#allocation52_spill] sm:$0xff] }
 0x3aa   :  { %2966 = vmatmul.f32.gmra.mxu0 %v13650_v37  ;;  %3216 = vmatpush.msrb.mxu1 %v2150_v48  ;;  %v2138_v57 = vsel %vm424_vm1, %v9707_v52, %v19177_v50  ;;  %v2548_v61 = vmul.f32 %v19141_v55, %v2524_v18  ;;  %v2147_v8 = vsel %vm424_vm1, %v9673_v33, %v9708_v54  ;;  %v19183_v48 = vld [vmem:[#allocation116_spill] sm:$0xff] }
 0x3ab   :  { %3310 = vmatpush.msrb.mxu0 %v2140_v39  ;;  %7965 = vmatmul.msk.f32.gmra.mxu2 %vm2613_vm5, %v19175_v31  ;;  %v2137_v58 = vsel %vm424_vm1, %v9708_v54, %v19178_v44  ;;  %v14232_v30 = vpop.f32.mrf.mxu2  ;;  %v19186_v54 = vld [vmem:[#allocation36_spill] sm:$0xff]  ;;  %v19191_v44 = vld [vmem:[#allocation75_spill] sm:$0xff] }
 0x3ac   :  { %3217 = vmatpush.msrb.mxu1 %v2149_v41  ;;  %3264 = vmatpush.msrb.mxu3 %v2455_v17  ;;  %v14236_v52 = vpop.f32.mrf.mxu3  ;;  %v19184_v17 = vld [vmem:[#allocation46_spill] sm:$0xff]  ;;  %v9717_v41 = vunpack.i.l.bf16 %v9716_v12 }
 0x3ad   :  { %3311 = vmatpush.msrb.mxu0 %v2139_v56  ;;  %3358 = vmatpush.msrb.mxu2 %v2556_v40  ;;  %19180 = vst [vmem:[#allocation66_spill] sm:$0xff] %v14236_v52 }
 0x3ae   :  { %3218 = vmatpush.msrb.mxu1 %v2148_v38  ;;  %3265 = vmatpush.msrb.mxu3 %v2454_v22  ;;  %v14258_v38 = vld [vmem:[#allocation6 + $0x18] sm:$0xff] }
 0x3af   :  { %3312 = vmatpush.msrb.mxu0 %v2138_v57  ;;  %2866 = vmatmul.f32.gmra.mxu1 %v13537_v34  ;;  %v2434_v49 = vpop.permute.xlu1 %2433  ;;  %v14226_v10 = vpop.f32.mrf.mxu1  ;;  %v19188_v57 = vld [vmem:[#allocation112_spill] sm:$0xff] }
 0x3b0   :  { %3219 = vmatpush.msrb.mxu1 %v2147_v8  ;;  %3359 = vmatpush.msrb.mxu2 %v2548_v61  ;;  %v2523_v34 = vsel %vm681_vm2, %v2434_v49, %v19179_v32  ;;  %v2453_v33 = vsel %vm681_vm2, %v9658_v11, %v2434_v49  ;;  %v19182_v11 = vld [vmem:[#allocation93_spill] sm:$0xff]  ;;  %v9718_v61 = vunpack.i.h.bf16 %v9716_v12  ;;  %v2144_v49 = vsel %vm424_vm1, %v9688_v26, %v9717_v41  ;;  %v19193_v26 = vld [vmem:[#allocation54_spill] sm:$0xff] }
 0x3b1   :  { %3313 = vmatpush.msrb.mxu0 %v2137_v58  ;;  %7953 = vmatmul.msk.f32.gmra.mxu3 %vm2613_vm5, %v14219_v2  ;;  %v2540_v45 = vmul.f32 %v19141_v55, %v2523_v34  ;;  %v14298_v34 = vld [vmem:[#allocation6 + $0x10] sm:$0xff] }
 0x3b2   :  { %2969 = vmatmul.f32.gmra.mxu0 %v13703_v42  ;;  %3266 = vmatpush.msrb.mxu3 %v2453_v33  ;;  %v14243_v5 = vpop.f32.mrf.mxu0  ;;  %v2143_v32 = vsel %vm424_vm1, %v9693_v0, %v9718_v61  ;;  %v2133_v33 = vsel %vm424_vm1, %v9718_v61, %v19193_v26 }
 0x3b3   :  { %7976 = vmatmul.msk.f32.vlgmr.msra.gmra.mxu2 %vm2613_vm5, %v14238_v15  ;;  %v14269_v50 = vpop.f32.mrf.mxu2 }
 0x3b4   :  { %3267 = vmatpush.msrb.mxu3 %v19181_v3  ;;  %3360 = vmatpush.msrb.mxu2 %v2540_v45  ;;  %v14272_v22 = vpop.f32.mrf.mxu3  ;;  %v14306_v45 = vld [vmem:[#allocation6 + $0x28] sm:$0xff]  ;;  %v14319_v3 = vld [vmem:[#allocation6 + $0x20] sm:$0xff] }
 0x3b5   :  { %19189 = vst [vmem:[#allocation64_spill] sm:$0xff] %v14272_v22 }
 0x3b6   :  { %3268 = vmatpush.msrb.mxu3 %v19182_v11  ;;  %3361 = vmatpush.msrb.mxu2 %v19183_v48  ;;  %v14322_v11 = vld [vmem:[#allocation6 + $0x38] sm:$0xff] }
 0x3b7   :  { %2869 = vmatmul.f32.gmra.mxu1 %v13597_v25  ;;  %v9711_v19 = vpop.permute.xlu1 %9710 }
 0x3b8   :  { %3269 = vmatpush.msrb.mxu3 %v19184_v17  ;;  %3362 = vmatpush.msrb.mxu2 %v19185_v27  ;;  %v9713_v39 = vunpack.i.h.bf16 %v9711_v19  ;;  %v9712_v40 = vunpack.i.l.bf16 %v9711_v19  ;;  %v14255_v18 = vpop.f32.mrf.mxu1  ;;  %v14337_v27 = vld [vmem:[#allocation6 + $0x30] sm:$0xff] }
 0x3b9   :  { %7954 = vmatmul.msk.f32.gmra.mxu3 %vm2613_vm5, %v19163_v46 }
 0x3ba   :  { %3130 = vmatmul.f32.vlgmr.msra.gmra.mxu0 %v14252_v36  ;;  %3270 = vmatpush.msrb.mxu3 %v19186_v54  ;;  %v2146_v46 = vsel %vm424_vm1, %v9678_v24, %v9712_v40  ;;  %v2136_v56 = vsel %vm424_vm1, %v9712_v40, %v19187_v23  ;;  %v2145_v59 = vsel %vm424_vm1, %v9683_v63, %v9713_v39  ;;  %v19190_v24 = vld [vmem:[#allocation111_spill] sm:$0xff] }
 0x3bb   :  { %7977 = vmatmul.msk.f32.gmra.mxu2 %vm2613_vm5, %v14258_v38  ;;  %3220 = vmatpush.msrb.mxu1 %v2146_v46  ;;  %v2135_v58 = vsel %vm424_vm1, %v9713_v39, %v19191_v44  ;;  %v2134_v63 = vsel %vm424_vm1, %v9717_v41, %v19192_v1  ;;  %v14340_v39 = vld [vmem:[#allocation6 + $0x48] sm:$0xff]  ;;  %v14353_v46 = vld [vmem:[#allocation6 + $0x40] sm:$0xff] }
 0x3bc   :  { %3363 = vmatpush.msrb.mxu2 %v19188_v57  ;;  %v14274_v8 = vpop.f32.mrf.mxu0  ;;  %3314 = vmatpush.msrb.mxu0 %v2136_v56  ;;  %v14358_v56 = vld [vmem:[#allocation6 + $0x58] sm:$0xff] }
 0x3bd   :  { %3221 = vmatpush.msrb.mxu1 %v2145_v59  ;;  %v14369_v59 = vld [vmem:[#allocation6 + $0x50] sm:$0xff] }
 0x3be   :  { %3364 = vmatpush.msrb.mxu2 %v19190_v24  ;;  %3315 = vmatpush.msrb.mxu0 %v2135_v58  ;;  %v14372_v24 = vld [vmem:[#allocation6 + $0x68] sm:$0xff] }
 0x3bf   :  { %2872 = vmatmul.f32.gmra.mxu1 %v13650_v37 }
 0x3c0   :  { %3222 = vmatpush.msrb.mxu1 %v2144_v49  ;;  %3316 = vmatpush.msrb.mxu0 %v2134_v63  ;;  %v14301_v21 = vpop.f32.mrf.mxu1  ;;  %v14387_v63 = vld [vmem:[#allocation6 + $0x60] sm:$0xff] }
 0x3c1   :  { %7955 = vmatmul.msk.f32.gmra.mxu3 %vm2613_vm5, %v19175_v31  ;;  %v14314_v31 = vpop.f32.mrf.mxu3 }
 0x3c2   :  { %3133 = vmatmul.f32.gmra.mxu0 %v14298_v34  ;;  %3223 = vmatpush.msrb.mxu1 %v2143_v32  ;;  %v14312_v0 = vpop.f32.mrf.mxu2  ;;  %19194 = vst [vmem:[#allocation62_spill] sm:$0xff] %v14314_v31 }
 0x3c3   :  { %7978 = vmatmul.msk.f32.gmra.mxu2 %vm2613_vm5, %v14306_v45  ;;  %3317 = vmatpush.msrb.mxu0 %v2133_v33 }
 0x3c4   :  { %v14310_v35 = vpop.f32.mrf.mxu0 }
 0x3c7   :  { %2875 = vmatmul.f32.gmra.mxu1 %v13703_v42 }
 0x3c9   :  { %7966 = vmatmul.msk.f32.vlgmr.msra.gmra.mxu3 %vm2613_vm5, %v14238_v15  ;;  %v14326_v48 = vpop.f32.mrf.mxu1  ;;  %v14333_v17 = vpop.f32.mrf.mxu3 }
 0x3ca   :  { %3136 = vmatmul.f32.gmra.mxu0 %v14319_v3  ;;  %19195 = vst [vmem:[#allocation57_spill] sm:$0xff] %v14326_v48 }
 0x3cb   :  { %7979 = vmatmul.msk.f32.gmra.mxu2 %vm2613_vm5, %v14322_v11  ;;  %19196 = vst [vmem:[#allocation42_spill] sm:$0xff] %v14333_v17  ;;  %v14438_v17 = vpop.permute.xlu1 %3413 }
 0x3cc   :  { %v14331_v19 = vpop.f32.mrf.mxu2 }
 0x3cd   :  { %v14328_v12 = vpop.f32.mrf.mxu0 }
 0x3cf   :  { %3036 = vmatmul.f32.vlgmr.msra.gmra.mxu1 %v14252_v36 }
 0x3d1   :  { %7967 = vmatmul.msk.f32.gmra.mxu3 %vm2613_vm5, %v14258_v38  ;;  %v14344_v40 = vpop.f32.mrf.mxu1  ;;  %v14356_v23 = vpop.f32.mrf.mxu3 }
 0x3d2   :  { %3139 = vmatmul.f32.gmra.mxu0 %v14337_v27  ;;  %19197 = vst [vmem:[#allocation60_spill] sm:$0xff] %v14344_v40 }
 0x3d3   :  { %7980 = vmatmul.msk.f32.gmra.mxu2 %vm2613_vm5, %v14340_v39  ;;  %19199 = vst [vmem:[#allocation79_spill] sm:$0xff] %v14356_v23  ;;  %v14466_v52 = vpop.permute.xlu1 %3553 }
 0x3d5   :  { %v14346_v54 = vpop.f32.mrf.mxu0 }
 0x3d6   :  { %v14351_v41 = vpop.f32.mrf.mxu2 }
 0x3d7   :  { %3039 = vmatmul.f32.gmra.mxu1 %v14298_v34  ;;  %19198 = vst [vmem:[#allocation58_spill] sm:$0xff] %v14351_v41 }
 0x3d9   :  { %7968 = vmatmul.msk.f32.gmra.mxu3 %vm2613_vm5, %v14306_v45  ;;  %v14362_v57 = vpop.f32.mrf.mxu1  ;;  %v14380_v49 = vpop.f32.mrf.mxu3 }
 0x3da   :  { %3142 = vmatmul.f32.gmra.mxu0 %v14353_v46  ;;  %19200 = vst [vmem:[#allocation76_spill] sm:$0xff] %v14362_v57  ;;  %v14459_v57 = vpop.permute.xlu2 %3418 }
 0x3db   :  { %7981 = vmatmul.msk.f32.gmra.mxu2 %vm2613_vm5, %v14358_v56  ;;  %19203 = vst [vmem:[#allocation120_spill] sm:$0xff] %v14380_v49 }
 0x3dd   :  { %v14364_v61 = vpop.f32.mrf.mxu0 }
 0x3df   :  { %3042 = vmatmul.f32.gmra.mxu1 %v14319_v3  ;;  %v14378_v58 = vpop.f32.mrf.mxu2 }
 0x3e0   :  { %19202 = vst [vmem:[#allocation37_spill] sm:$0xff] %v14378_v58 }
 0x3e1   :  { %7969 = vmatmul.msk.f32.gmra.mxu3 %vm2613_vm5, %v14322_v11  ;;  %v14396_v33 = vpop.f32.mrf.mxu3 }
 0x3e2   :  { %3145 = vmatmul.f32.gmra.mxu0 %v14369_v59  ;;  %v14376_v44 = vpop.f32.mrf.mxu1 }
 0x3e3   :  { %7982 = vmatmul.msk.f32.gmra.mxu2 %vm2613_vm5, %v14372_v24  ;;  %19201 = vst [vmem:[#allocation24_spill] sm:$0xff] %v14376_v44  ;;  %v14442_v44 = vld [vmem:[#allocation6 + $0x70] sm:$0xff] }
 0x3e6   :  { %v14382_v1 = vpop.f32.mrf.mxu0 }
 0x3e7   :  { %19204 = vst [vmem:[#allocation119_spill] sm:$0xff] %v14382_v1  ;;  %3045 = vmatmul.f32.gmra.mxu1 %v14337_v27  ;;  %v14394_v26 = vpop.f32.mrf.mxu2 }
 0x3e8   :  { %19206 = vst [vmem:[#allocation53_spill] sm:$0xff] %v14394_v26 }
 0x3e9   :  { %7970 = vmatmul.msk.f32.gmra.mxu3 %vm2613_vm5, %v14340_v39  ;;  %v2899_v49 = vpop.f32.mrf.mxu3 }
 0x3ea   :  { %3148 = vmatmul.f32.gmra.mxu0 %v14387_v63  ;;  %v14392_v32 = vpop.f32.mrf.mxu1 }
 0x3eb   :  { %7983 = vmatmul.msk.f32.gmra.mxu2 %vm2613_vm5, %v14219_v2  ;;  %19205 = vst [vmem:[#allocation40_spill] sm:$0xff] %v14392_v32  ;;  %v14436_v32 = vpop.permute.xlu0 %3408 }
 0x3ee   :  { %v14398_v55 = vpop.f32.mrf.mxu0 }
 0x3ef   :  { %19207 = vst [vmem:[#allocation41_spill] sm:$0xff] %v14398_v55  ;;  %3048 = vmatmul.f32.gmra.mxu1 %v14353_v46 }
 0x3f0   :  { %v14413_v26 = vpop.f32.mrf.mxu2 }
 0x3f1   :  { %7971 = vmatmul.msk.f32.gmra.mxu3 %vm2613_vm5, %v14358_v56  ;;  %19210 = vst [vmem:[#allocation33_spill] sm:$0xff] %v14413_v26 }
 0x3f2   :  { %3151 = vmatmul.f32.gmra.mxu0 %v13597_v25  ;;  %v14408_v41 = vpop.f32.mrf.mxu1  ;;  %v14418_v25 = vld [vmem:[#allocation6 + $0x98] sm:$0xff] }
 0x3f3   :  { %7984 = vmatmul.msk.f32.gmra.mxu2 %vm2613_vm5, %v14404_v51  ;;  %19208 = vst [vmem:[#allocation128_spill] sm:$0xff] %v14408_v41  ;;  %v14464_v40 = vpop.permute.xlu0 %3548 }
 0x3f4   :  { %19211 = vst [vmem:[#allocation105_spill] sm:$0xff] %v14418_v25 }
 0x3f6   :  { %v14410_v1 = vpop.f32.mrf.mxu0 }
 0x3f7   :  { %19209 = vst [vmem:[#allocation127_spill] sm:$0xff] %v14410_v1  ;;  %3051 = vmatmul.f32.gmra.mxu1 %v14369_v59  ;;  %v2902_v1 = vpop.f32.mrf.mxu3 }
 0x3f8   :  { %v14429_v26 = vpop.f32.mrf.mxu2 }
 0x3f9   :  { %7972 = vmatmul.msk.f32.gmra.mxu3 %vm2613_vm5, %v14372_v24  ;;  %19213 = vst [vmem:[#allocation49_spill] sm:$0xff] %v14429_v26 }
 0x3fa   :  { %3154 = vmatmul.f32.gmra.mxu0 %v13650_v37  ;;  %v14422_v58 = vpop.f32.mrf.mxu1 }
 0x3fb   :  { %7985 = vmatmul.msk.f32.gmra.mxu2 %vm2613_vm5, %v14418_v25  ;;  %v14493_v48 = vpop.permute.xlu0 %3558 }
 0x3fe   :  { %v14424_v41 = vpop.f32.mrf.mxu0 }
 0x3ff   :  { %19212 = vst [vmem:[#allocation109_spill] sm:$0xff] %v14424_v41  ;;  %3054 = vmatmul.f32.gmra.mxu1 %v14387_v63  ;;  %v14454_v31 = vpop.f32.mrf.mxu3 }
 0x400   :  { %19217 = vst [vmem:[#allocation95_spill] sm:$0xff] %v14454_v31 }
 0x401   :  { %7973 = vmatmul.msk.f32.gmra.mxu3 %vm2613_vm5, %v14219_v2 }
 0x402   :  { %3157 = vmatmul.f32.gmra.mxu0 %v13703_v42  ;;  %v2852_v55 = vpop.f32.mrf.mxu1 }
 0x403   :  { %7996 = vmatmul.msk.f32.vlgmr.msrb.gmra.mxu2 %vm2613_vm5, %v14238_v15  ;;  %v14434_v23 = vadd.f32 %v2899_v49, %v2852_v55 }
 0x406   :  { %v14440_v41 = vpop.f32.mrf.mxu0  ;;  %v14450_v49 = vpop.f32.mrf.mxu2 }
 0x407   :  { %19214 = vst [vmem:[#allocation110_spill] sm:$0xff] %v14440_v41  ;;  %3057 = vmatmul.f32.gmra.mxu1 %v14442_v44  ;;  %v8949_v41 = vld [vmem:[%s18070_s7 + $0x78] sm:$0xff] }
 0x408   :  { %19215 = vst [vmem:[#allocation97_spill] sm:$0xff] %v14450_v49  ;;  %4376 = vmatpush.bf16.msra.mxu0 %v8949_v41  ;;  %v8947_v41 = vld [vmem:[%s18070_s7 + $0x68] sm:$0xff]  ;;  %v14481_v49 = vpop.f32.mrf.mxu3 }
 0x409   :  { %7974 = vmatmul.msk.f32.gmra.mxu3 %vm2613_vm5, %v14404_v51  ;;  %19219 = vst [vmem:[#allocation102_spill] sm:$0xff] %v14481_v49  ;;  %v14496_v49 = vpop.permute.xlu1 %3428 }
 0x40a   :  { %3318 = vmatmul.f32.vlgmr.msrb.gmra.mxu0 %v14252_v36  ;;  %v2855_v55 = vpop.f32.mrf.mxu1 }
 0x40b   :  { %7997 = vmatmul.msk.f32.gmra.mxu2 %vm2613_vm5, %v14258_v38  ;;  %v14452_v26 = vadd.f32 %v2902_v1, %v2855_v55  ;;  %v8948_v1 = vld [vmem:[%s18070_s7 + $0x70] sm:$0xff] }
 0x40c   :  { %4377 = vmatpush.bf16.msra.mxu0 %v8948_v1  ;;  %v8946_v1 = vld [vmem:[%s18070_s7 + $0x60] sm:$0xff] }
 0x40d   :  { %19216 = vst [vmem:[#allocation92_spill] sm:$0xff] %v14452_v26  ;;  %v14486_v26 = vpop.permute.xlu2 %3423 }
 0x40f   :  { %v14461_v22 = vpop.f32.mrf.mxu0  ;;  %3060 = vmatmul.f32.gmra.mxu1 %v13650_v37 }
 0x410   :  { %19218 = vst [vmem:[#allocation82_spill] sm:$0xff] %v14461_v22  ;;  %4378 = vmatpush.bf16.msra.mxu0 %v8947_v41  ;;  %v14510_v41 = vpop.f32.mrf.mxu3 }
 0x411   :  { %7975 = vmatmul.msk.f32.gmra.mxu3 %vm2613_vm5, %v14418_v25  ;;  %19224 = vst [vmem:[#allocation35_spill] sm:$0xff] %v14510_v41 }
 0x412   :  { %3321 = vmatmul.f32.gmra.mxu0 %v14298_v34 }
 0x413   :  { %7998 = vmatmul.msk.f32.gmra.mxu2 %vm2613_vm5, %v14306_v45  ;;  %v14476_v55 = vpop.f32.mrf.mxu1 }
 0x414   :  { %4379 = vmatpush.bf16.msra.mxu0 %v8946_v1  ;;  %v8944_v1 = vld [vmem:[%s18070_s7 + $0x50] sm:$0xff] }
 0x415   :  { %v3008_v37 = vpop.f32.mrf.mxu2 }
 0x417   :  { %v2961_v22 = vpop.f32.mrf.mxu0  ;;  %3063 = vmatmul.f32.gmra.mxu1 %v13703_v42 }
 0x418   :  { %v14484_v25 = vadd.f32 %v3008_v37, %v2961_v22 }
 0x419   :  { %7986 = vmatmul.msk.f32.vlgmr.msrb.gmra.mxu3 %vm2613_vm5, %v14238_v15  ;;  %v8945_v15 = vld [vmem:[%s18070_s7 + $0x58] sm:$0xff] }
 0x41a   :  { %19220 = vst [vmem:[#allocation65_spill] sm:$0xff] %v14484_v25  ;;  %3324 = vmatmul.f32.gmra.mxu0 %v14319_v3  ;;  %v14518_v25 = vpop.permute.xlu2 %3563 }
 0x41b   :  { %7999 = vmatmul.msk.f32.gmra.mxu2 %vm2613_vm5, %v14322_v11  ;;  %v14500_v42 = vpop.f32.mrf.mxu1  ;;  %4380 = vmatpush.bf16.msra.mxu0 %v8945_v15  ;;  %v14525_v15 = vpop.permute.xlu0 %3433 }
 0x41c   :  { %19221 = vst [vmem:[#allocation123_spill] sm:$0xff] %v14500_v42 }
 0x41d   :  { %v14502_v22 = vpop.f32.mrf.mxu2 }
 0x41e   :  { %19222 = vst [vmem:[#allocation59_spill] sm:$0xff] %v14502_v22 }
 0x41f   :  { %v14507_v37 = vpop.f32.mrf.mxu0  ;;  %3224 = vmatmul.f32.vlgmr.msrb.gmra.mxu1 %v14252_v36  ;;  %4381 = vmatpush.bf16.msra.mxu0 %v8944_v1  ;;  %v8941_v36 = vld [vmem:[%s18070_s7 + $0x38] sm:$0xff]  ;;  %v8940_v1 = vld [vmem:[%s18070_s7 + $0x30] sm:$0xff] }
 0x420   :  { %19223 = vst [vmem:[#allocation25_spill] sm:$0xff] %v14507_v37  ;;  %4363 = vmatpush.bf16.msra.mxu1 %v8941_v36  ;;  %v8943_v37 = vld [vmem:[%s18070_s7 + $0x48] sm:$0xff]  ;;  %v8942_v36 = vld [vmem:[%s18070_s7 + $0x40] sm:$0xff] }
 0x421   :  { %7987 = vmatmul.msk.f32.gmra.mxu3 %vm2613_vm5, %v14258_v38  ;;  %v14529_v38 = vpop.permute.xlu1 %3568 }
 0x422   :  { %3327 = vmatmul.f32.gmra.mxu0 %v14337_v27 }
 0x423   :  { %8000 = vmatmul.msk.f32.gmra.mxu2 %vm2613_vm5, %v14340_v39  ;;  %4382 = vmatpush.bf16.msra.mxu0 %v8943_v37  ;;  %v2803_v37 = vadd.f32 %v13806_v53, %v14030_v4  ;;  %v14571_v4 = vpop.permute.xlu0 %3573 }
 0x424   :  { %v14527_v22 = vpop.f32.mrf.mxu1  ;;  %4364 = vmatpush.bf16.msra.mxu1 %v8940_v1 }
 0x425   :  { %19225 = vst [vmem:[#allocation90_spill] sm:$0xff] %v14527_v22  ;;  %v2806_v22 = vadd.f32 %v13897_v6, %v14078_v9  ;;  %v8939_v9 = vld [vmem:[%s18070_s7 + $0x28] sm:$0xff]  ;;  %v3457_v1 = vmul.f32 %v14436_v32, %v2803_v37  ;;  %v8938_v37 = vld [vmem:[%s18070_s7 + $0x20] sm:$0xff] }
 0x426   :  { %v3014_v41 = vpop.f32.mrf.mxu2 }
 0x427   :  { %v2967_v42 = vpop.f32.mrf.mxu0  ;;  %3227 = vmatmul.f32.gmra.mxu1 %v14298_v34  ;;  %v14548_v34 = vpop.f32.mrf.mxu3  ;;  %v3465_v6 = vmul.f32 %v14438_v17, %v2806_v22  ;;  %4383 = vmatpush.bf16.msra.mxu0 %v8942_v36  ;;  %v8956_v36 = vld [vmem:[%s18070_s7 + $0xb0] sm:$0xff] }
 0x428   :  { %v14538_v31 = vadd.f32 %v3014_v41, %v2967_v42  ;;  %v8957_v42 = vld [vmem:[%s18070_s7 + $0xb8] sm:$0xff]  ;;  %v2809_v41 = vadd.f32 %v13969_v16, %v14127_v43  ;;  %4365 = vmatpush.bf16.msra.mxu1 %v8939_v9  ;;  %v2812_v9 = vadd.f32 %v14040_v28, %v14193_v47  ;;  %v10076_v28 = vmov 10.0  }
 0x429   :  { %7988 = vmatmul.msk.f32.gmra.mxu3 %vm2613_vm5, %v14306_v45  ;;  %v14569_v53 = vadd.f32 %v14466_v52, %v3465_v6  ;;  %v14581_v16 = vpop.permute.xlu1 %3443  ;;  %9724 = vrcp.f32 %v10076_v28  ;;  %v8937_v47 = vld [vmem:[%s18070_s7 + $0x18] sm:$0xff] }
 0x42a   :  { %19226 = vst [vmem:[#allocation108_spill] sm:$0xff] %v14538_v31  ;;  %3330 = vmatmul.f32.gmra.mxu0 %v14353_v46  ;;  %v14566_v31 = vpop.permute.xlu2 %3438  ;;  %v3473_v6 = vmul.f32 %v14459_v57, %v2809_v41 }
 0x42b   :  { %8001 = vmatmul.msk.f32.gmra.mxu2 %vm2613_vm5, %v14358_v56  ;;  %4389 = vmatpush.bf16.msrb.mxu0 %v8957_v42  ;;  %19227 = vst [vmem:[#allocation117_spill] sm:$0xff] %v14569_v53  ;;  %v14579_v42 = vadd.f32 %v14464_v40, %v3457_v1  ;;  %v2815_v1 = vadd.f32 %v14091_v29, %v14243_v5 }
 0x42c   :  { %v14561_v45 = vpop.f32.mrf.mxu1  ;;  %4366 = vmatpush.bf16.msra.mxu1 %v8938_v37  ;;  %v3481_v5 = vmul.f32 %v14486_v26, %v2812_v9 }
 0x42d   :  { %19229 = vst [vmem:[#allocation115_spill] sm:$0xff] %v14579_v42  ;;  %v18343_v41 = vmax.f32 %v14579_v42, 0.0  ;;  %v3489_v28 = vmul.f32 %v14496_v49, %v2815_v1  ;;  %v14659_v42 = vpop.permute.xlu0 %3448 }
 0x42e   :  { %v14573_v22 = vpop.f32.mrf.mxu2  ;;  %v14631_v9 = vadd.f32 %v14518_v25, %v3481_v5  ;;  %v2715_v5 = vadd.f32 %v14095_v20, %v14255_v18  ;;  %v8953_v18 = vld [vmem:[%s18070_s7 + $0x98] sm:$0xff] }
 0x42f   :  { %19228 = vst [vmem:[#allocation85_spill] sm:$0xff] %v14573_v22  ;;  %v14583_v43 = vpop.f32.mrf.mxu0  ;;  %3230 = vmatmul.f32.gmra.mxu1 %v14319_v3  ;;  %4390 = vmatpush.bf16.msrb.mxu0 %v8956_v36  ;;  %v18344_v22 = vmax.f32 %v14569_v53, 0.0  ;;  %v8955_v3 = vld [vmem:[%s18070_s7 + $0xa8] sm:$0xff]  ;;  %v14603_v36 = vadd.f32 %v14493_v48, %v3473_v6 }
 0x430   :  { %19230 = vst [vmem:[#allocation126_spill] sm:$0xff] %v14583_v43  ;;  %4367 = vmatpush.bf16.msra.mxu1 %v8937_v47  ;;  %v2709_v43 = vadd.f32 %v13987_v13, %v14172_v60  ;;  %v14637_v47 = vadd.f32 %v14529_v38, %v3489_v28  ;;  %v8936_v60 = vld [vmem:[%s18070_s7 + $0x10] sm:$0xff] }
 0x431   :  { %7989 = vmatmul.msk.f32.gmra.mxu3 %vm2613_vm5, %v14322_v11  ;;  %19231 = vst [vmem:[#allocation113_spill] sm:$0xff] %v14603_v36  ;;  %v2712_v11 = vadd.f32 %v14044_v14, %v14226_v10  ;;  %v3765_v6 = vadd.f32 %v18344_v22, %v18343_v41  ;;  %v2818_v41 = vadd.f32 %v14156_v62, %v14274_v8  ;;  %v18346_v1 = vmax.f32 %v14603_v36, 0.0  ;;  %v14655_v22 = vpop.eup %9724  ;;  %v19248_v36 = vld [vmem:[#allocation123_spill] sm:$0xff] }
 0x432   :  { %3333 = vmatmul.f32.gmra.mxu0 %v14369_v59  ;;  %19233 = vst [vmem:[#allocation118_spill] sm:$0xff] %v14631_v9  ;;  %v2821_v62 = vadd.f32 %v14232_v30, %v14310_v35  ;;  %v14650_v8 = vpop.permute.xlu2 %3578  ;;  %v2718_v30 = vadd.f32 %v14163_v7, %v14301_v21  ;;  %v18349_v35 = vmax.f32 %v14631_v9, 0.0  ;;  %v8935_v7 = vld [vmem:[%s18070_s7 + $0x8] sm:$0xff]  ;;  %v3472_v21 = vmul.f32 %v14459_v57, %v2715_v5 }
 0x433   :  { %8002 = vmatmul.msk.f32.gmra.mxu2 %vm2613_vm5, %v14372_v24  ;;  %4391 = vmatpush.bf16.msrb.mxu0 %v8955_v3  ;;  %v3464_v14 = vmul.f32 %v14438_v17, %v2712_v11  ;;  %v8954_v3 = vld [vmem:[%s18070_s7 + $0xa0] sm:$0xff]  ;;  %19234 = vst [vmem:[#allocation104_spill] sm:$0xff] %v14637_v47  ;;  %v3456_v11 = vmul.f32 %v14436_v32, %v2709_v43  ;;  %v14661_v43 = vpop.permute.xlu1 %3583  ;;  %vm3833_vm6 = vweird.f32 %v14655_v22 }
 0x434   :  { %v14612_v37 = vpop.f32.mrf.mxu1  ;;  %v14614_v29 = vpop.f32.mrf.mxu3  ;;  %4368 = vmatpush.bf16.msra.mxu1 %v8936_v60  ;;  %v3480_v5 = vmul.f32 %v14486_v26, %v2718_v30  ;;  %v8934_v30 = vld [vmem:[%s18070_s7] sm:$0xff] }
 0x435   :  { %v14653_v28 = vadd.f32 %v14466_v52, %v3464_v14  ;;  %v14666_v20 = vadd.f32 %v14464_v40, %v3456_v11 }
 0x436   :  { %v14625_v10 = vpop.f32.mrf.mxu2 }
 0x437   :  { %19232 = vst [vmem:[#allocation84_spill] sm:$0xff] %v14625_v10  ;;  %v14639_v13 = vpop.f32.mrf.mxu0  ;;  %3233 = vmatmul.f32.gmra.mxu1 %v14337_v27  ;;  %4392 = vmatpush.bf16.msrb.mxu0 %v8954_v3  ;;  %v3766_v27 = vadd.f32 %v3765_v6, %v18346_v1  ;;  %v3497_v6 = vmul.f32 %v14525_v15, %v2818_v41  ;;  %v3829_v41 = vmul.f32 10.0, %v14655_v22  ;;  %v18351_v60 = vmax.f32 %v14666_v20, 0.0 }
 0x438   :  { %19235 = vst [vmem:[#allocation81_spill] sm:$0xff] %v14653_v28  ;;  %v3505_v3 = vmul.f32 %v14566_v31, %v2821_v62  ;;  %4369 = vmatpush.bf16.msra.mxu1 %v8935_v7  ;;  %v14699_v62 = vadd.f32 %v14493_v48, %v3472_v21  ;;  %v2827_v21 = vadd.f32 %v14312_v0, %v14346_v54 }
 0x439   :  { %7990 = vmatmul.msk.f32.gmra.mxu3 %vm2613_vm5, %v14340_v39  ;;  %19236 = vst [vmem:[#allocation125_spill] sm:$0xff] %v14666_v20  ;;  %v2824_v39 = vadd.f32 %v14269_v50, %v14328_v12  ;;  %v14693_v12 = vadd.f32 %v14571_v4, %v3497_v6  ;;  %v3767_v1 = vadd.f32 %v3766_v27, %v18349_v35  ;;  %v19239_v6 = vmax.f32 %v14637_v47, 0.0 }
 0x43a   :  { %3336 = vmatmul.f32.gmra.mxu0 %v14387_v63  ;;  %19238 = vst [vmem:[#allocation28_spill] sm:$0xff] %v14699_v62  ;;  %v14717_v7 = vadd.f32 %v14650_v8, %v3505_v3  ;;  %v2830_v3 = vadd.f32 %v14331_v19, %v14364_v61  ;;  %v2897_v0 = vadd.f32 %v14396_v33, %v14422_v58  ;;  %v8951_v19 = vld [vmem:[%s18070_s7 + $0x88] sm:$0xff]  ;;  %v14748_v61 = vpop.permute.xlu0 %3588 }
 0x43b   :  { %8003 = vmatmul.msk.f32.gmra.mxu2 %vm2613_vm5, %v14219_v2  ;;  %4393 = vmatpush.bf16.msrb.mxu0 %v8953_v18  ;;  %19237 = vst [vmem:[#allocation77_spill] sm:$0xff] %v14693_v12  ;;  %v8952_v18 = vld [vmem:[%s18070_s7 + $0x90] sm:$0xff]  ;;  %v3768_v53 = vadd.f32 %v3767_v1, %v19239_v6  ;;  %v3513_v9 = vmul.f32 %v14581_v16, %v2824_v39  ;;  %v19241_v1 = vmax.f32 %v14653_v28, 0.0  ;;  %v3830_v39 = vsub.f32 1.0, %v3829_v41  ;;  %v14741_v41 = vpop.permute.xlu2 %3453  ;;  %v14750_v58 = vpop.permute.xlu1 %3593 }
 0x43c   :  { %v14688_v11 = vpop.f32.mrf.mxu1  ;;  %v14690_v50 = vpop.f32.mrf.mxu3  ;;  %19240 = vst [vmem:[#allocation74_spill] sm:$0xff] %v14717_v7  ;;  %v18353_v35 = vmax.f32 %v14693_v12, 0.0  ;;  %4370 = vmatpush.bf16.msra.mxu1 %v8934_v30  ;;  %v14739_v54 = vadd.f32 %v14518_v25, %v3480_v5  ;;  %v19247_v12 = vld [vmem:[#allocation92_spill] sm:$0xff]  ;;  %v19249_v28 = vld [vmem:[#allocation102_spill] sm:$0xff] }
 0x43d   :  { %v3756_v6 = vadd.f32 %v19241_v1, %v18351_v60  ;;  %v14732_v47 = vadd.f32 %v14661_v43, %v3513_v9  ;;  %v3831_v30 = vmul.f32 %v14655_v22, %v3830_v39  ;;  %v19244_v1 = vld [vmem:[#allocation95_spill] sm:$0xff]  ;;  %v3458_v39 = vmul.f32 %v14436_v32, %v2897_v0 }
 0x43e   :  { %v14702_v14 = vpop.f32.mrf.mxu2  ;;  %19243 = vst [vmem:[#allocation99_spill] sm:$0xff] %v14739_v54  ;;  %v3769_v33 = vadd.f32 %v3768_v53, %v18353_v35  ;;  %v3521_v53 = vmul.f32 %v14659_v42, %v2827_v21  ;;  %v3529_v35 = vmul.f32 %v14741_v41, %v2830_v3  ;;  %v8950_v21 = vld [vmem:[%s18070_s7 + $0x80] sm:$0xff] }
 0x43f   :  { %v14710_v27 = vpop.f32.mrf.mxu0  ;;  %3236 = vmatmul.f32.gmra.mxu1 %v14353_v46  ;;  %4394 = vmatpush.bf16.msrb.mxu0 %v8952_v18  ;;  %v8965_v46 = vld [vmem:[%s18070_s7 + $0xf8] sm:$0xff]  ;;  %19242 = vst [vmem:[#allocation124_spill] sm:$0xff] %v14732_v47  ;;  %v18354_v18 = vmax.f32 %v14699_v62, 0.0  ;;  %v2909_v62 = vadd.f32 %v19249_v28, %v19248_v36  ;;  %v19255_v36 = vmax.f32 %v14717_v7, 0.0 }
 0x440   :  { %4402 = vmatpush.bf16.msrb.mxu1 %v8965_v46  ;;  %v2906_v46 = vadd.f32 %v19244_v1, %v14476_v55  ;;  %v19245_v55 = vld [vmem:[#allocation57_spill] sm:$0xff]  ;;  %v19246_v1 = vld [vmem:[#allocation66_spill] sm:$0xff] }
 0x441   :  { %7991 = vmatmul.msk.f32.gmra.mxu3 %vm2613_vm5, %v14358_v56  ;;  %v3466_v56 = vmul.f32 %v14438_v17, %v14434_v23  ;;  %v3757_v5 = vadd.f32 %v3756_v6, %v18354_v18  ;;  %v8964_v23 = vld [vmem:[%s18070_s7 + $0xf0] sm:$0xff]  ;;  %v18360_v18 = vmax.f32 %v14739_v54, 0.0  ;;  %v2721_v9 = vadd.f32 %v19246_v1, %v19245_v55 }
 0x442   :  { %3339 = vmatmul.f32.gmra.mxu0 %v14442_v44  ;;  %v14794_v55 = vadd.f32 %v14748_v61, %v3521_v53  ;;  %v3770_v28 = vadd.f32 %v3769_v33, %v19255_v36  ;;  %v19256_v6 = vld [vmem:[#allocation90_spill] sm:$0xff]  ;;  %v19258_v53 = vld [vmem:[#allocation60_spill] sm:$0xff]  ;;  %v3832_v33 = vadd.f32 %v14655_v22, %v3831_v30 }
 0x443   :  { %8004 = vmatmul.msk.f32.gmra.mxu2 %vm2613_vm5, %v14404_v51  ;;  %4395 = vmatpush.bf16.msrb.mxu0 %v8951_v19  ;;  %v3474_v19 = vmul.f32 %v14459_v57, %v19247_v12  ;;  %v14788_v3 = vadd.f32 %v14466_v52, %v3466_v56  ;;  %v14797_v12 = vadd.f32 %v14750_v58, %v3529_v35  ;;  %v8963_v35 = vld [vmem:[%s18070_s7 + $0xe8] sm:$0xff]  ;;  %v19263_v30 = vld [vmem:[#allocation76_spill] sm:$0xff] }
 0x444   :  { %v14764_v60 = vpop.f32.mrf.mxu1  ;;  %v14766_v20 = vpop.f32.mrf.mxu3  ;;  %4403 = vmatpush.bf16.msrb.mxu1 %v8964_v23  ;;  %19253 = vst [vmem:[#allocation89_spill] sm:$0xff] %v14794_v55  ;;  %v3488_v23 = vmul.f32 %v14496_v49, %v2721_v9  ;;  %v14804_v1 = vadd.f32 %v3757_v5, %v18360_v18  ;;  %v3482_v56 = vmul.f32 %v14486_v26, %v2906_v46  ;;  %v19261_v5 = vmax.f32 %v14732_v47, 0.0 }
 0x445   :  { %19251 = vst [vmem:[#allocation47_spill] sm:$0xff] %v14788_v3  ;;  %v14816_v9 = vadd.f32 %v14464_v40, %v3458_v39  ;;  %v19264_v39 = vld [vmem:[#allocation62_spill] sm:$0xff] }
 0x446   :  { %v14782_v10 = vpop.f32.mrf.mxu2  ;;  %19254 = vst [vmem:[#allocation67_spill] sm:$0xff] %v14797_v12  ;;  %v3771_v46 = vadd.f32 %v3770_v28, %v19261_v5  ;;  %v2727_v36 = vadd.f32 %v19264_v39, %v19263_v30  ;;  %v2918_v28 = vadd.f32 %v14614_v29, %v14612_v37  ;;  %v8962_v30 = vld [vmem:[%s18070_s7 + $0xe0] sm:$0xff]  ;;  %v14854_v18 = vadd.f32 %v14529_v38, %v3488_v23  ;;  %v19279_v37 = vld [vmem:[#allocation79_spill] sm:$0xff] }
 0x447   :  { %19250 = vst [vmem:[#allocation83_spill] sm:$0xff] %v14782_v10  ;;  %v14790_v0 = vpop.f32.mrf.mxu0  ;;  %3239 = vmatmul.f32.gmra.mxu1 %v14369_v59  ;;  %v19257_v10 = vld [vmem:[#allocation35_spill] sm:$0xff]  ;;  %4396 = vmatpush.bf16.msrb.mxu0 %v8950_v21  ;;  %v2915_v21 = vadd.f32 %v14548_v34, %v14561_v45  ;;  %v14840_v34 = vadd.f32 %v14518_v25, %v3482_v56  ;;  %v18363_v56 = vmax.f32 %v14816_v9, 0.0 }
 0x448   :  { %19252 = vst [vmem:[#allocation39_spill] sm:$0xff] %v14790_v0  ;;  %v2912_v59 = vadd.f32 %v19257_v10, %v19256_v6  ;;  %v19259_v0 = vld [vmem:[#allocation64_spill] sm:$0xff]  ;;  %v14823_v10 = vadd.f32 %v14493_v48, %v3474_v19  ;;  %v3490_v6 = vmul.f32 %v14496_v49, %v2909_v62  ;;  %4404 = vmatpush.bf16.msrb.mxu1 %v8963_v35  ;;  %v18362_v19 = vmax.f32 %v14794_v55, 0.0 }
 0x449   :  { %v2724_v7 = vadd.f32 %v19259_v0, %v19258_v53  ;;  %19260 = vst [vmem:[#allocation30_spill] sm:$0xff] %v14816_v9  ;;  %7992 = vmatmul.msk.f32.gmra.mxu3 %vm2613_vm5, %v14372_v24  ;;  %v14828_v0 = vld [vmem:[#allocation6 + $0x80] sm:$0xff]  ;;  %v19265_v53 = vld [vmem:[#allocation105_spill] sm:$0xff]  ;;  %v3506_v62 = vmul.f32 %v14566_v31, %v2915_v21  ;;  %v2921_v24 = vadd.f32 %v14690_v50, %v14688_v11  ;;  %v19273_v50 = vmax.f32 %v14797_v12, 0.0 }
 0x44a   :  { %19262 = vst [vmem:[#allocation44_spill] sm:$0xff] %v14823_v10  ;;  %3342 = vmatmul.f32.gmra.mxu0 %v14828_v0  ;;  %v3498_v45 = vmul.f32 %v14525_v15, %v2912_v59  ;;  %v3772_v59 = vadd.f32 %v3771_v46, %v18362_v19  ;;  %v14861_v29 = vadd.f32 %v14529_v38, %v3490_v6  ;;  %v19272_v6 = vmax.f32 %v14788_v3, 0.0 }
 0x44b   :  { %8005 = vmatmul.msk.f32.gmra.mxu2 %vm2613_vm5, %v19265_v53  ;;  %19266 = vst [vmem:[#allocation48_spill] sm:$0xff] %v14840_v34  ;;  %v3496_v39 = vmul.f32 %v14525_v15, %v2724_v7  ;;  %v8981_v7 = vld [vmem:[%s18070_s7 + $0x178] sm:$0xff]  ;;  %v3504_v23 = vmul.f32 %v14566_v31, %v2727_v36  ;;  %v14875_v46 = vsel %vm3833_vm6, %v14655_v22, %v3832_v33 }
 0x44c   :  { %v14845_v35 = vpop.f32.mrf.mxu1  ;;  %v14847_v5 = vpop.f32.mrf.mxu3  ;;  %19269 = vst [vmem:[#allocation73_spill] sm:$0xff] %v14854_v18  ;;  %4405 = vmatpush.bf16.msrb.mxu1 %v8962_v30  ;;  %v3774_v21 = vadd.f32 %v19272_v6, %v18363_v56  ;;  %v3773_v30 = vadd.f32 %v3772_v59, %v19273_v50  ;;  %v14888_v36 = vadd.f32 %v14571_v4, %v3498_v45  ;;  %v8961_v6 = vld [vmem:[%s18070_s7 + $0xd8] sm:$0xff]  ;;  %v19276_v50 = vld [vmem:[#allocation24_spill] sm:$0xff]  ;;  %v19277_v56 = vld [vmem:[#allocation42_spill] sm:$0xff] }
 0x44d   :  { %19267 = vst [vmem:[#allocation43_spill] sm:$0xff] %v14845_v35  ;;  %v3514_v22 = vmul.f32 %v14581_v16, %v2918_v28  ;;  %v2924_v33 = vadd.f32 %v14766_v20, %v14764_v60  ;;  %4428 = vmatpush.bf16.msra.mxu3 %v8981_v7  ;;  %v2730_v19 = vadd.f32 %v19277_v56, %v19276_v50  ;;  %v19278_v45 = vld [vmem:[#allocation40_spill] sm:$0xff]  ;;  %v19280_v20 = vmax.f32 %v14823_v10, 0.0  ;;  %v14913_v59 = vld [vmem:[#allocation6 + $0x90] sm:$0xff] }
 0x44e   :  { %19268 = vst [vmem:[#allocation63_spill] sm:$0xff] %v14847_v5  ;;  %v14866_v47 = vpop.f32.mrf.mxu2  ;;  %v2733_v55 = vadd.f32 %v19279_v37, %v19278_v45  ;;  %v14910_v7 = vadd.f32 %v14650_v8, %v3506_v62  ;;  %v8980_v56 = vld [vmem:[%s18070_s7 + $0x170] sm:$0xff]  ;;  %v19283_v37 = vld [vmem:[#allocation41_spill] sm:$0xff]  ;;  %v19285_v45 = vld [vmem:[#allocation128_spill] sm:$0xff]  ;;  %v19287_v28 = vmax.f32 %v14840_v34, 0.0 }
 0x44f   :  { %19270 = vst [vmem:[#allocation34_spill] sm:$0xff] %v14861_v29  ;;  %v14881_v11 = vpop.f32.mrf.mxu0  ;;  %3242 = vmatmul.f32.gmra.mxu1 %v14387_v63  ;;  %v14897_v63 = vadd.f32 %v14571_v4, %v3496_v39  ;;  %v3775_v60 = vadd.f32 %v3774_v21, %v19280_v20  ;;  %v3522_v39 = vmul.f32 %v14659_v42, %v2921_v24  ;;  %v19284_v21 = vld [vmem:[#allocation37_spill] sm:$0xff]  ;;  %v19286_v62 = vld [vmem:[#allocation120_spill] sm:$0xff] }
 0x450   :  { %19271 = vst [vmem:[#allocation107_spill] sm:$0xff] %v14875_v46  ;;  %4406 = vmatpush.bf16.msrb.mxu1 %v8961_v6  ;;  %v2994_v50 = vadd.f32 %v19284_v21, %v19283_v37  ;;  %v2736_v20 = vadd.f32 %v19286_v62, %v19285_v45  ;;  %v3836_v24 = vmul.f32 %v14875_v46, %v3773_v30  ;;  %v8960_v37 = vld [vmem:[%s18070_s7 + $0xd0] sm:$0xff]  ;;  %v19289_v30 = vmax.f32 %v14854_v18, 0.0  ;;  %v19290_v21 = vld [vmem:[#allocation119_spill] sm:$0xff]  ;;  %v19293_v6 = vld [vmem:[#allocation53_spill] sm:$0xff] }
 0x451   :  { %19274 = vst [vmem:[#allocation100_spill] sm:$0xff] %v14888_v36  ;;  %7993 = vmatmul.msk.f32.gmra.mxu3 %vm2613_vm5, %v14219_v2  ;;  %v14920_v2 = vadd.f32 %v14650_v8, %v3504_v23  ;;  %v3776_v12 = vadd.f32 %v3775_v60, %v19287_v28  ;;  %v14931_v54 = vadd.f32 %v14661_v43, %v3514_v22  ;;  %v19291_v22 = vld [vmem:[#allocation58_spill] sm:$0xff]  ;;  %v19292_v62 = vld [vmem:[#allocation127_spill] sm:$0xff]  ;;  %v18372_v5 = vmax.f32 %v14910_v7, 0.0 }
 0x452   :  { %19275 = vst [vmem:[#allocation71_spill] sm:$0xff] %v14897_v63  ;;  %3345 = vmatmul.f32.gmra.mxu0 %v14913_v59  ;;  %v3530_v9 = vmul.f32 %v14741_v41, %v2924_v33  ;;  %4429 = vmatpush.bf16.msra.mxu3 %v8980_v56  ;;  %v3759_v60 = vadd.f32 %v14804_v1, %v19289_v30  ;;  %v19294_v56 = vmax.f32 %v14861_v29, 0.0  ;;  %v8979_v1 = vld [vmem:[%s18070_s7 + $0x168] sm:$0xff] }
 0x453   :  { %19281 = vst [vmem:[#allocation98_spill] sm:$0xff] %v14910_v7  ;;  %v3512_v28 = vmul.f32 %v14581_v16, %v2730_v19  ;;  %v2991_v45 = vadd.f32 %v19291_v22, %v19290_v21  ;;  %v3520_v33 = vmul.f32 %v14659_v42, %v2733_v55  ;;  %v2997_v34 = vadd.f32 %v19293_v6, %v19292_v62  ;;  %v19297_v30 = vld [vmem:[#allocation109_spill] sm:$0xff] }
 0x454   :  { %19282 = vst [vmem:[#allocation94_spill] sm:$0xff] %v14920_v2  ;;  %v14934_v23 = vpop.f32.mrf.mxu1  ;;  %v14936_v3 = vpop.f32.mrf.mxu3  ;;  %v3777_v10 = vadd.f32 %v3776_v12, %v19294_v56  ;;  %v14954_v35 = vadd.f32 %v14748_v61, %v3522_v39  ;;  %4407 = vmatpush.bf16.msrb.mxu1 %v8960_v37  ;;  %v3467_v19 = vmul.f32 %v14438_v17, %v2994_v50  ;;  %v19298_v21 = vld [vmem:[#allocation33_spill] sm:$0xff]  ;;  %v19299_v37 = vmax.f32 %v14888_v36, 0.0  ;;  %v19328_v36 = vld [vmem:[#allocation83_spill] sm:$0xff] }
 0x455   :  { %19288 = vst [vmem:[#allocation103_spill] sm:$0xff] %v14931_v54  ;;  %v14962_v55 = vadd.f32 %v14661_v43, %v3512_v28  ;;  %v3528_v6 = vmul.f32 %v14741_v41, %v2736_v20  ;;  %v3844_v39 = vpack.c.bf16 %v3836_v24, %v3836_v24  ;;  %v3000_v22 = vadd.f32 %v19298_v21, %v19297_v30  ;;  %v8959_v50 = vld [vmem:[%s18070_s7 + $0xc8] sm:$0xff]  ;;  %v8978_v21 = vld [vmem:[%s18070_s7 + $0x160] sm:$0xff] }
 0x456   :  { %19295 = vst [vmem:[#allocation106_spill] sm:$0xff] %v14954_v35  ;;  %v14956_v18 = vpop.f32.mrf.mxu2  ;;  %v3778_v62 = vadd.f32 %v3777_v10, %v19299_v37  ;;  %v18374_v56 = vmax.f32 %v14931_v54, 0.0  ;;  %v14975_v28 = vadd.f32 %v14750_v58, %v3530_v9  ;;  %4430 = vmatpush.bf16.msra.mxu3 %v8979_v1  ;;  %v18373_v20 = vmax.f32 %v14897_v63, 0.0  ;;  %v19303_v37 = vld [vmem:[#allocation49_spill] sm:$0xff] }
 0x457   :  { %19296 = vst [vmem:[#allocation72_spill] sm:$0xff] %v14962_v55  ;;  %v14966_v12 = vpop.f32.mrf.mxu0  ;;  %3245 = vmatmul.f32.gmra.mxu1 %v14442_v44  ;;  %v3459_v24 = vmul.f32 %v14436_v32, %v2991_v45  ;;  %v14986_v10 = vadd.f32 %v14748_v61, %v3520_v33  ;;  %v3475_v9 = vmul.f32 %v14459_v57, %v2997_v34  ;;  %v19302_v34 = vld [vmem:[#allocation110_spill] sm:$0xff]  ;;  %v19320_v29 = vld [vmem:[#allocation85_spill] sm:$0xff] }
 0x458   :  { %19300 = vst [vmem:[#allocation122_spill] sm:$0xff] %v14975_v28  ;;  %v3779_v1 = vadd.f32 %v3778_v62, %v18372_v5  ;;  %4408 = vmatpush.bf16.msrb.mxu1 %v8959_v50  ;;  %v3760_v45 = vadd.f32 %v3759_v60, %v18373_v20  ;;  %v14999_v33 = vadd.f32 %v14466_v52, %v3467_v19  ;;  %v8958_v19 = vld [vmem:[%s18070_s7 + $0xc0] sm:$0xff]  ;;  %v19307_v20 = vld [vmem:[#allocation97_spill] sm:$0xff] }
 0x459   :  { %7994 = vmatmul.msk.f32.gmra.mxu3 %vm2613_vm5, %v14404_v51  ;;  %19301 = vst [vmem:[#allocation68_spill] sm:$0xff] %v14986_v10  ;;  %v3003_v44 = vadd.f32 %v19303_v37, %v19302_v34  ;;  %v15004_v62 = vadd.f32 %v14750_v58, %v3528_v6  ;;  %v19305_v34 = vmax.f32 %v14920_v2, 0.0  ;;  %v19306_v37 = vld [vmem:[#allocation82_spill] sm:$0xff]  ;;  %v15022_v51 = vadd.f32 %v14464_v40, %v3459_v24  ;;  %v19326_v2 = vld [vmem:[#allocation84_spill] sm:$0xff] }
 0x45a   :  { %4384 = vmatmul.bf16.vlgmr.msra.gmra.mxu0 %v3844_v39  ;;  %v3483_v39 = vmul.f32 %v14486_v26, %v3000_v22  ;;  %v3780_v50 = vadd.f32 %v3779_v1, %v18374_v56  ;;  %4431 = vmatpush.bf16.msra.mxu3 %v8978_v21  ;;  %v3006_v22 = vadd.f32 %v19307_v20, %v19306_v37  ;;  %v19308_v21 = vmax.f32 %v14954_v35, 0.0 }
 0x45b   :  { %19304 = vst [vmem:[#allocation38_spill] sm:$0xff] %v15004_v62  ;;  %v3761_v6 = vadd.f32 %v3760_v45, %v19305_v34  ;;  %v15026_v56 = vadd.f32 %v14493_v48, %v3475_v9  ;;  %v8977_v45 = vld [vmem:[%s18070_s7 + $0x158] sm:$0xff]  ;;  %v19309_v20 = vmax.f32 %v14962_v55, 0.0  ;;  %v3491_v24 = vmul.f32 %v14496_v49, %v3003_v44 }
 0x45c   :  { %v15010_v30 = vpop.f32.mrf.mxu1  ;;  %v15012_v60 = vpop.f32.mrf.mxu3  ;;  %v3781_v5 = vadd.f32 %v3780_v50, %v19308_v21  ;;  %4409 = vmatpush.bf16.msrb.mxu1 %v8958_v19  ;;  %v15044_v21 = vadd.f32 %v14518_v25, %v3483_v39  ;;  %v19310_v19 = vmax.f32 %v14975_v28, 0.0  ;;  %v3499_v55 = vmul.f32 %v14525_v15, %v3006_v22  ;;  %v19315_v22 = vld [vmem:[#allocation65_spill] sm:$0xff]  ;;  %v19319_v28 = vld [vmem:[#allocation126_spill] sm:$0xff] }
 0x45d   :  { %v3762_v34 = vadd.f32 %v3761_v6, %v19309_v20  ;;  %v19311_v6 = vld [vmem:[#allocation25_spill] sm:$0xff]  ;;  %v19312_v20 = vld [vmem:[#allocation59_spill] sm:$0xff]  ;;  %v19313_v9 = vmax.f32 %v14986_v10, 0.0 }
 0x45e   :  { %v15030_v54 = vpop.f32.mrf.mxu2  ;;  %v3782_v1 = vadd.f32 %v3781_v5, %v19310_v19  ;;  %4432 = vmatpush.bf16.msra.mxu3 %v8977_v45  ;;  %v3012_v44 = vadd.f32 %v19312_v20, %v19311_v6  ;;  %v8976_v5 = vld [vmem:[%s18070_s7 + $0x150] sm:$0xff]  ;;  %v15061_v45 = vadd.f32 %v14529_v38, %v3491_v24  ;;  %v3507_v19 = vmul.f32 %v14566_v31, %v19315_v22 }
 0x45f   :  { %v15038_v37 = vpop.f32.mrf.mxu0  ;;  %3248 = vmatmul.f32.gmra.mxu1 %v14828_v0  ;;  %v18381_v0 = vmax.f32 %v15022_v51, 0.0  ;;  %v3763_v50 = vadd.f32 %v3762_v34, %v19313_v9  ;;  %v19317_v20 = vmax.f32 %v15004_v62, 0.0  ;;  %v15078_v24 = vadd.f32 %v14571_v4, %v3499_v55  ;;  %v19323_v55 = vld [vmem:[#allocation108_spill] sm:$0xff] }
 0x460   :  { %19314 = vst [vmem:[#allocation32_spill] sm:$0xff] %v15061_v45  ;;  %v3837_v39 = vmul.f32 %v14875_v46, %v3782_v1  ;;  %v3515_v22 = vmul.f32 %v14581_v16, %v3012_v44  ;;  %v8975_v1 = vld [vmem:[%s18070_s7 + $0x148] sm:$0xff]  ;;  %v3523_v62 = vmul.f32 %v14659_v42, %v19323_v55  ;;  %v3182_v44 = vadd.f32 %v14702_v14, %v14710_v27  ;;  %v19327_v27 = vld [vmem:[#allocation39_spill] sm:$0xff] }
 0x461   :  { %7995 = vmatmul.msk.f32.gmra.mxu3 %vm2613_vm5, %v19265_v53  ;;  %v19316_v53 = vmax.f32 %v14999_v33, 0.0  ;;  %v3764_v34 = vadd.f32 %v3763_v50, %v19317_v20  ;;  %19318 = vst [vmem:[#allocation121_spill] sm:$0xff] %v15078_v24  ;;  %v18386_v9 = vmax.f32 %v15078_v24, 0.0  ;;  %v3179_v14 = vadd.f32 %v19326_v2, %v14639_v13  ;;  %v8973_v2 = vld [vmem:[%s18070_s7 + $0x138] sm:$0xff] }
 0x462   :  { %4433 = vmatpush.bf16.msra.mxu3 %v8976_v5  ;;  %v15090_v5 = vadd.f32 %v14650_v8, %v3507_v19  ;;  %v3845_v7 = vpack.c.bf16 %v3837_v39, %v3837_v39  ;;  %v15102_v19 = vadd.f32 %v14661_v43, %v3515_v22  ;;  %v19329_v39 = vmax.f32 %v15061_v45, 0.0 }
 0x463   :  { %v3783_v6 = vadd.f32 %v19316_v53, %v18381_v0  ;;  %v3018_v53 = vadd.f32 %v19320_v29, %v19319_v28  ;;  %v19321_v0 = vmax.f32 %v15026_v56, 0.0  ;;  %v3835_v28 = vmul.f32 %v14875_v46, %v3764_v34  ;;  %v8974_v34 = vld [vmem:[%s18070_s7 + $0x140] sm:$0xff] }
 0x464   :  { %v15073_v35 = vpop.f32.mrf.mxu1  ;;  %v15075_v10 = vpop.f32.mrf.mxu3  ;;  %19322 = vst [vmem:[#allocation87_spill] sm:$0xff] %v15090_v5  ;;  %v15116_v22 = vadd.f32 %v14748_v61, %v3523_v62  ;;  %v3188_v13 = vadd.f32 %v14866_v47, %v14881_v11  ;;  %v18387_v62 = vmax.f32 %v15102_v19, 0.0  ;;  %v3191_v11 = vadd.f32 %v14956_v18, %v14966_v12  ;;  %v8972_v18 = vld [vmem:[%s18070_s7 + $0x130] sm:$0xff] }
 0x465   :  { %v3784_v50 = vadd.f32 %v3783_v6, %v19321_v0  ;;  %v19324_v0 = vmax.f32 %v15044_v21, 0.0  ;;  %19325 = vst [vmem:[#allocation88_spill] sm:$0xff] %v15102_v19  ;;  %v3531_v55 = vmul.f32 %v14741_v41, %v3018_v53  ;;  %v3469_v53 = vmul.f32 %v14438_v17, %v3182_v44 }
 0x466   :  { %v3196_v20 = vpop.f32.mrf.mxu2  ;;  %4434 = vmatpush.bf16.msra.mxu3 %v8975_v1  ;;  %v18388_v1 = vmax.f32 %v15090_v5, 0.0  ;;  %19330 = vst [vmem:[#allocation61_spill] sm:$0xff] %v15116_v22  ;;  %v8988_v5 = vld [vmem:[%s18070_s7 + $0x1b0] sm:$0xff] }
 0x467   :  { %v3149_v29 = vpop.f32.mrf.mxu0  ;;  %3251 = vmatmul.f32.gmra.mxu1 %v14913_v59  ;;  %v3785_v6 = vadd.f32 %v3784_v50, %v19324_v0  ;;  %v3185_v59 = vadd.f32 %v19328_v36, %v19327_v27  ;;  %v3843_v0 = vpack.c.bf16 %v3835_v28, %v3835_v28  ;;  %v15132_v44 = vadd.f32 %v14750_v58, %v3531_v55 }
 0x468   :  { %v3461_v28 = vmul.f32 %v14436_v32, %v3179_v14  ;;  %v3485_v55 = vmul.f32 %v14486_v26, %v3188_v13  ;;  %v3194_v14 = vadd.f32 %v15030_v54, %v15038_v37  ;;  %v3493_v13 = vmul.f32 %v14496_v49, %v3191_v11 }
 0x469   :  { %v3786_v50 = vadd.f32 %v3785_v6, %v19329_v39  ;;  %19331 = vst [vmem:[#allocation56_spill] sm:$0xff] %v15132_v44  ;;  %v3477_v47 = vmul.f32 %v14459_v57, %v3185_v59  ;;  %v18390_v59 = vmax.f32 %v15132_v44, 0.0 }
 0x46a   :  { %4397 = vmatmul.bf16.vlgmr.msrb.gmra.mxu0 %v3845_v7  ;;  %4435 = vmatpush.bf16.msra.mxu3 %v8974_v34  ;;  %v18389_v34 = vmax.f32 %v15116_v22, 0.0 }
 0x46b   :  { %v3787_v6 = vadd.f32 %v3786_v50, %v18386_v9  ;;  %v15142_v50 = vadd.f32 %v14466_v52, %v3469_v53  ;;  %v15154_v53 = vadd.f32 %v14464_v40, %v3461_v28 }
 0x46c   :  { %v15121_v36 = vpop.f32.mrf.mxu1  ;;  %v15123_v7 = vpop.f32.mrf.mxu3 }
 0x46d   :  { %v3788_v39 = vadd.f32 %v3787_v6, %v18388_v1  ;;  %v3197_v6 = vadd.f32 %v3196_v20, %v3149_v29  ;;  %v18393_v37 = vmax.f32 %v15142_v50, 0.0  ;;  %v18392_v29 = vmax.f32 %v15154_v53, 0.0 }
 0x46e   :  { %v3199_v27 = vpop.f32.mrf.mxu2 }
 0x46f   :  { %v3152_v9 = vpop.f32.mrf.mxu0  ;;  %4371 = vmatmul.bf16.vlgmr.msra.gmra.mxu1 %v3843_v0  ;;  %v3789_v12 = vadd.f32 %v3788_v39, %v18387_v62  ;;  %v15157_v0 = vadd.f32 %v14493_v48, %v3477_v47  ;;  %v3501_v39 = vmul.f32 %v14525_v15, %v3194_v14  ;;  %v8971_v47 = vld [vmem:[%s18070_s7 + $0x128] sm:$0xff]  ;;  %v3509_v14 = vmul.f32 %v14566_v31, %v3197_v6 }
 0x470   :  { %4415 = vmatpush.bf16.msra.mxu1 %v8973_v2  ;;  %v15164_v2 = vadd.f32 %v14518_v25, %v3485_v55  ;;  %v3200_v62 = vadd.f32 %v3199_v27, %v3152_v9  ;;  %v15175_v55 = vadd.f32 %v14529_v38, %v3493_v13  ;;  %v3801_v27 = vadd.f32 %v18393_v37, %v18392_v29  ;;  %v8970_v13 = vld [vmem:[%s18070_s7 + $0x120] sm:$0xff]  ;;  %v19338_v29 = vld [vmem:[#allocation63_spill] sm:$0xff] }
 0x471   :  { %v3790_v54 = vadd.f32 %v3789_v12, %v18389_v34  ;;  %v18394_v11 = vmax.f32 %v15157_v0, 0.0  ;;  %v15195_v37 = vadd.f32 %v14650_v8, %v3509_v14  ;;  %v8969_v14 = vld [vmem:[%s18070_s7 + $0x118] sm:$0xff] }
 0x472   :  { %19332 = vst [vmem:[#allocation96_spill] sm:$0xff] %v15164_v2  ;;  %v18396_v12 = vmax.f32 %v15164_v2, 0.0  ;;  %v3517_v34 = vmul.f32 %v14581_v16, %v3200_v62 }
 0x473   :  { %v3791_v20 = vadd.f32 %v3790_v54, %v18390_v59  ;;  %19333 = vst [vmem:[#allocation86_spill] sm:$0xff] %v15175_v55  ;;  %v15184_v54 = vadd.f32 %v14571_v4, %v3501_v39  ;;  %v3802_v19 = vadd.f32 %v3801_v27, %v18394_v11 }
 0x474   :  { %v3052_v1 = vpop.f32.mrf.mxu1  ;;  %v3099_v28 = vpop.f32.mrf.mxu3  ;;  %4416 = vmatpush.bf16.msra.mxu1 %v8972_v18  ;;  %19335 = vst [vmem:[#allocation55_spill] sm:$0xff] %v15195_v37 }
 0x475   :  { %19334 = vst [vmem:[#allocation51_spill] sm:$0xff] %v15184_v54  ;;  %v3838_v6 = vmul.f32 %v14875_v46, %v3791_v20  ;;  %v3803_v62 = vadd.f32 %v3802_v19, %v18396_v12  ;;  %v15204_v20 = vadd.f32 %v14661_v43, %v3517_v34  ;;  %v19339_v19 = vmax.f32 %v15175_v55, 0.0 }
 0x476   :  { %v3202_v9 = vpop.f32.mrf.mxu2 }
 0x477   :  { %v3155_v18 = vpop.f32.mrf.mxu0  ;;  %19336 = vst [vmem:[#allocation78_spill] sm:$0xff] %v15204_v20  ;;  %v3846_v11 = vpack.c.bf16 %v3838_v6, %v3838_v6  ;;  %v3804_v12 = vadd.f32 %v3803_v62, %v19339_v19  ;;  %v19341_v6 = vmax.f32 %v15184_v54, 0.0  ;;  %v3094_v62 = vadd.f32 %v15075_v10, %v15073_v35  ;;  %v8967_v19 = vld [vmem:[%s18070_s7 + $0x108] sm:$0xff] }
 0x478   :  { %v3203_v59 = vadd.f32 %v3202_v9, %v3155_v18  ;;  %4417 = vmatpush.bf16.msra.mxu1 %v8971_v47  ;;  %v3088_v47 = vadd.f32 %v14936_v3, %v14934_v23  ;;  %v18402_v3 = vmax.f32 %v15195_v37, 0.0  ;;  %v8991_v37 = vld [vmem:[%s18070_s7 + $0x1c8] sm:$0xff] }
 0x479   :  { %v3805_v45 = vadd.f32 %v3804_v12, %v19341_v6 }
 0x47a   :  { %v3525_v39 = vmul.f32 %v14659_v42, %v3203_v59  ;;  %v19337_v59 = vld [vmem:[#allocation43_spill] sm:$0xff]  ;;  %v3468_v44 = vmul.f32 %v14438_v17, %v3088_v47 }
 0x47b   :  { %v3085_v22 = vadd.f32 %v19338_v29, %v19337_v59  ;;  %v18399_v29 = vmax.f32 %v15204_v20, 0.0 }
 0x47c   :  { %v3055_v18 = vpop.f32.mrf.mxu1  ;;  %v3102_v27 = vpop.f32.mrf.mxu3  ;;  %4418 = vmatpush.bf16.msra.mxu1 %v8970_v13  ;;  %v15215_v23 = vadd.f32 %v14748_v61, %v3525_v39  ;;  %v3091_v13 = vadd.f32 %v15012_v60, %v15010_v30  ;;  %v8968_v39 = vld [vmem:[%s18070_s7 + $0x110] sm:$0xff]  ;;  %v3806_v60 = vadd.f32 %v3805_v45, %v18402_v3 }
 0x47d   :  { %v3460_v30 = vmul.f32 %v14436_v32, %v3085_v22 }
 0x47e   :  { %19340 = vst [vmem:[#allocation31_spill] sm:$0xff] %v15215_v23  ;;  %v3205_v34 = vpop.f32.mrf.mxu2  ;;  %v3476_v47 = vmul.f32 %v14459_v57, %v3091_v13  ;;  %v3807_v35 = vadd.f32 %v3806_v60, %v18399_v29  ;;  %v3100_v13 = vadd.f32 %v3099_v28, %v3052_v1  ;;  %v3103_v60 = vadd.f32 %v3102_v27, %v3055_v18 }
 0x47f   :  { %v3158_v9 = vpop.f32.mrf.mxu0  ;;  %4410 = vmatmul.bf16.vlgmr.msrb.gmra.mxu1 %v3846_v11  ;;  %v18400_v11 = vmax.f32 %v15215_v23, 0.0 }
 0x480   :  { %v3206_v59 = vadd.f32 %v3205_v34, %v3158_v9  ;;  %4419 = vmatpush.bf16.msra.mxu1 %v8969_v14  ;;  %v3097_v9 = vadd.f32 %v15123_v7, %v15121_v36  ;;  %v15237_v14 = vadd.f32 %v14466_v52, %v3468_v44  ;;  %v3484_v34 = vmul.f32 %v14486_v26, %v3094_v62  ;;  %v8966_v62 = vld [vmem:[%s18070_s7 + $0x100] sm:$0xff] }
 0x481   :  { %v15249_v36 = vadd.f32 %v14464_v40, %v3460_v30  ;;  %v3808_v7 = vadd.f32 %v3807_v35, %v18400_v11 }
 0x482   :  { %v3533_v12 = vmul.f32 %v14741_v41, %v3206_v59  ;;  %v15257_v59 = vadd.f32 %v14493_v48, %v3476_v47  ;;  %v18404_v1 = vmax.f32 %v15237_v14, 0.0  ;;  %v15269_v30 = vadd.f32 %v14518_v25, %v3484_v34 }
 0x483   :  { %v3500_v47 = vmul.f32 %v14525_v15, %v3100_v13  ;;  %v18403_v18 = vmax.f32 %v15249_v36, 0.0 }
 0x484   :  { %v15242_v10 = vadd.f32 %v14750_v58, %v3533_v12  ;;  %v3058_v22 = vpop.f32.mrf.mxu1  ;;  %v3105_v45 = vpop.f32.mrf.mxu3  ;;  %4420 = vmatpush.bf16.msra.mxu1 %v8968_v39  ;;  %v3492_v39 = vmul.f32 %v14496_v49, %v3097_v9  ;;  %v18406_v9 = vmax.f32 %v15257_v59, 0.0 }
 0x485   :  { %v3106_v35 = vadd.f32 %v3105_v45, %v3058_v22  ;;  %v3792_v34 = vadd.f32 %v18404_v1, %v18403_v18  ;;  %v18405_v22 = vmax.f32 %v15269_v30, 0.0  ;;  %v15285_v45 = vadd.f32 %v14571_v4, %v3500_v47 }
 0x486   :  { %19342 = vst [vmem:[#allocation91_spill] sm:$0xff] %v15242_v10  ;;  %v18401_v44 = vmax.f32 %v15242_v10, 0.0  ;;  %v15254_v6 = vpop.f32.mrf.mxu2  ;;  %v15276_v29 = vadd.f32 %v14529_v38, %v3492_v39 }
 0x487   :  { %v15260_v12 = vpop.f32.mrf.mxu0  ;;  %19344 = vst [vmem:[#allocation45_spill] sm:$0xff] %v15285_v45  ;;  %v18410_v1 = vmax.f32 %v15285_v45, 0.0 }
 0x488   :  { %v3809_v28 = vadd.f32 %v3808_v7, %v18401_v44  ;;  %4421 = vmatpush.bf16.msra.mxu1 %v8967_v19  ;;  %19343 = vst [vmem:[#allocation69_spill] sm:$0xff] %v15276_v29  ;;  %v3508_v19 = vmul.f32 %v14566_v31, %v3103_v60  ;;  %v3793_v60 = vadd.f32 %v3792_v34, %v18406_v9  ;;  %v18408_v3 = vmax.f32 %v15276_v29, 0.0 }
 0x48a   :  { %v3840_v27 = vmul.f32 %v14875_v46, %v3809_v28  ;;  %v3516_v28 = vmul.f32 %v14581_v16, %v3106_v35  ;;  %v3794_v47 = vadd.f32 %v3793_v60, %v18405_v22 }
 0x48c   :  { %v3848_v7 = vpack.c.bf16 %v3840_v27, %v3840_v27  ;;  %v3061_v11 = vpop.f32.mrf.mxu1  ;;  %v3108_v13 = vpop.f32.mrf.mxu3  ;;  %4422 = vmatpush.bf16.msra.mxu1 %v8966_v62  ;;  %v15292_v27 = vadd.f32 %v14650_v8, %v3508_v19  ;;  %v3795_v35 = vadd.f32 %v3794_v47, %v18408_v3 }
 0x48d   :  { %v3109_v39 = vadd.f32 %v3108_v13, %v3061_v11  ;;  %v15299_v11 = vadd.f32 %v14661_v43, %v3516_v28 }
 0x48e   :  { %4436 = vmatmul.bf16.vlgmr.msra.gmra.mxu3 %v3848_v7  ;;  %v3369_v44 = vpop.f32.mrf.mxu2  ;;  %19345 = vst [vmem:[#allocation29_spill] sm:$0xff] %v15292_v27  ;;  %v18412_v34 = vmax.f32 %v15292_v27, 0.0 }
 0x48f   :  { %v3524_v62 = vmul.f32 %v14659_v42, %v3109_v39  ;;  %v3322_v18 = vpop.f32.mrf.mxu0  ;;  %19346 = vst [vmem:[#allocation101_spill] sm:$0xff] %v15299_v11  ;;  %v3796_v39 = vadd.f32 %v3795_v35, %v18410_v1  ;;  %v18411_v60 = vmax.f32 %v15299_v11, 0.0 }
 0x491   :  { %v15305_v7 = vadd.f32 %v14748_v61, %v3524_v62  ;;  %v3797_v28 = vadd.f32 %v3796_v39, %v18412_v34 }
 0x493   :  { %19347 = vst [vmem:[#allocation80_spill] sm:$0xff] %v15305_v7  ;;  %v18413_v20 = vmax.f32 %v15305_v7, 0.0  ;;  %v3798_v62 = vadd.f32 %v3797_v28, %v18411_v60  ;;  %v8997_v28 = vld [vmem:[%s18070_s7 + $0x1f8] sm:$0xff] }
 0x494   :  { %v3064_v19 = vpop.f32.mrf.mxu1  ;;  %v3111_v13 = vpop.f32.mrf.mxu3  ;;  %4454 = vmatpush.bf16.msra.mxu2 %v8997_v28 }
 0x495   :  { %v3112_v22 = vadd.f32 %v3111_v13, %v3064_v19  ;;  %v3799_v35 = vadd.f32 %v3798_v62, %v18413_v20  ;;  %v8996_v62 = vld [vmem:[%s18070_s7 + $0x1f0] sm:$0xff] }
 0x496   :  { %v3372_v9 = vpop.f32.mrf.mxu2 }
 0x497   :  { %v3532_v47 = vmul.f32 %v14741_v41, %v3112_v22  ;;  %v3325_v3 = vpop.f32.mrf.mxu0 }
 0x498   :  { %4455 = vmatpush.bf16.msra.mxu2 %v8996_v62  ;;  %v8993_v62 = vld [vmem:[%s18070_s7 + $0x1d8] sm:$0xff]  ;;  %v3373_v54 = vadd.f32 %v3372_v9, %v3325_v3 }
 0x499   :  { %v15317_v23 = vadd.f32 %v14750_v58, %v3532_v47 }
 0x49b   :  { %19348 = vst [vmem:[#allocation70_spill] sm:$0xff] %v15317_v23  ;;  %v18415_v19 = vmax.f32 %v15317_v23, 0.0 }
 0x49c   :  { %v15322_v13 = vpop.f32.mrf.mxu1  ;;  %v15324_v1 = vpop.f32.mrf.mxu3 }
 0x49d   :  { %v3800_v39 = vadd.f32 %v3799_v35, %v18415_v19  ;;  %v8995_v19 = vld [vmem:[%s18070_s7 + $0x1e8] sm:$0xff] }
 0x49e   :  { %v3375_v22 = vpop.f32.mrf.mxu2  ;;  %4456 = vmatpush.bf16.msra.mxu2 %v8995_v19  ;;  %v8992_v19 = vld [vmem:[%s18070_s7 + $0x1d0] sm:$0xff] }
 0x49f   :  { %v3839_v47 = vmul.f32 %v14875_v46, %v3800_v39  ;;  %v3328_v60 = vpop.f32.mrf.mxu0  ;;  %v8994_v39 = vld [vmem:[%s18070_s7 + $0x1e0] sm:$0xff] }
 0x4a0   :  { %v3376_v24 = vadd.f32 %v3375_v22, %v3328_v60 }
 0x4a1   :  { %v3847_v34 = vpack.c.bf16 %v3839_v47, %v3839_v47 }
 0x4a2   :  { %4457 = vmatpush.bf16.msra.mxu2 %v8994_v39  ;;  %v8989_v39 = vld [vmem:[%s18070_s7 + $0x1b8] sm:$0xff]  ;;  %v3487_v60 = vmul.f32 %v14486_v26, %v3376_v24 }
 0x4a3   :  { %4423 = vmatmul.bf16.vlgmr.msra.gmra.mxu1 %v3847_v34  ;;  %4441 = vmatpush.bf16.msra.mxu0 %v8989_v39  ;;  %v8990_v39 = vld [vmem:[%s18070_s7 + $0x1c0] sm:$0xff] }
 0x4a4   :  { %v15335_v20 = vpop.f32.mrf.mxu1  ;;  %v15337_v11 = vpop.f32.mrf.mxu3 }
 0x4a6   :  { %v3378_v35 = vpop.f32.mrf.mxu2  ;;  %4458 = vmatpush.bf16.msra.mxu2 %v8993_v62  ;;  %v3370_v62 = vadd.f32 %v3369_v44, %v3322_v18 }
 0x4a7   :  { %v3331_v7 = vpop.f32.mrf.mxu0  ;;  %4442 = vmatpush.bf16.msra.mxu0 %v8988_v5  ;;  %v3479_v5 = vmul.f32 %v14459_v57, %v3373_v54 }
 0x4a8   :  { %v3471_v45 = vmul.f32 %v14438_v17, %v3370_v62  ;;  %v3379_v3 = vadd.f32 %v3378_v35, %v3331_v7  ;;  %v8986_v62 = vld [vmem:[%s18070_s7 + $0x1a0] sm:$0xff]  ;;  %v15399_v35 = vadd.f32 %v14518_v25, %v3487_v60 }
 0x4aa   :  { %4459 = vmatpush.bf16.msra.mxu2 %v8992_v19  ;;  %v3367_v19 = vadd.f32 %v15254_v6, %v15260_v12  ;;  %v15384_v18 = vadd.f32 %v14466_v52, %v3471_v45  ;;  %v3495_v54 = vmul.f32 %v14496_v49, %v3379_v3  ;;  %19351 = vst [vmem:[#allocation46_spill] sm:$0xff] %v15399_v35 }
 0x4ac   :  { %v15345_v28 = vpop.f32.mrf.mxu1  ;;  %v15347_v47 = vpop.f32.mrf.mxu3  ;;  %v3463_v6 = vmul.f32 %v14436_v32, %v3367_v19  ;;  %19349 = vst [vmem:[#allocation93_spill] sm:$0xff] %v15384_v18  ;;  %v15394_v19 = vadd.f32 %v14493_v48, %v3479_v5  ;;  %v18431_v45 = vmax.f32 %v15384_v18, 0.0 }
 0x4ae   :  { %v3381_v34 = vpop.f32.mrf.mxu2  ;;  %4460 = vmatpush.bf16.msra.mxu2 %v8991_v37  ;;  %v8987_v37 = vld [vmem:[%s18070_s7 + $0x1a8] sm:$0xff] }
 0x4af   :  { %v3334_v10 = vpop.f32.mrf.mxu0  ;;  %4443 = vmatpush.bf16.msra.mxu0 %v8987_v37 }
 0x4b0   :  { %v3382_v22 = vadd.f32 %v3381_v34, %v3334_v10 }
 0x4b2   :  { %4461 = vmatpush.bf16.msra.mxu2 %v8990_v39  ;;  %v15391_v39 = vadd.f32 %v14464_v40, %v3463_v6  ;;  %v3503_v24 = vmul.f32 %v14525_v15, %v3382_v22  ;;  %v8985_v6 = vld [vmem:[%s18070_s7 + $0x198] sm:$0xff]  ;;  %v18432_v22 = vmax.f32 %v15399_v35, 0.0 }
 0x4b3   :  { %4444 = vmatpush.bf16.msra.mxu0 %v8986_v62 }
 0x4b4   :  { %v15355_v23 = vpop.f32.mrf.mxu1  ;;  %v15357_v55 = vpop.f32.mrf.mxu3  ;;  %19350 = vst [vmem:[#allocation116_spill] sm:$0xff] %v15391_v39  ;;  %v18430_v5 = vmax.f32 %v15391_v39, 0.0  ;;  %v15417_v62 = vadd.f32 %v14571_v4, %v3503_v24 }
 0x4b6   :  { %v3384_v29 = vpop.f32.mrf.mxu2  ;;  %v19354_v35 = vmax.f32 %v15417_v62, 0.0 }
 0x4b7   :  { %v3337_v27 = vpop.f32.mrf.mxu0  ;;  %4445 = vmatpush.bf16.msra.mxu0 %v8985_v6 }
 0x4b8   :  { %v3385_v7 = vadd.f32 %v3384_v29, %v3337_v27  ;;  %v15408_v29 = vadd.f32 %v14529_v38, %v3495_v54  ;;  %v8984_v54 = vld [vmem:[%s18070_s7 + $0x190] sm:$0xff] }
 0x4ba   :  { %v3511_v27 = vmul.f32 %v14566_v31, %v3385_v7  ;;  %v19352_v7 = vmax.f32 %v15394_v19, 0.0  ;;  %v18441_v39 = vmax.f32 %v15408_v29, 0.0 }
 0x4bb   :  { %4446 = vmatpush.bf16.msra.mxu0 %v8984_v54 }
 0x4bc   :  { %v15374_v63 = vpop.f32.mrf.mxu1  ;;  %v15376_v44 = vpop.f32.mrf.mxu3 }
 0x4be   :  { %v3387_v12 = vpop.f32.mrf.mxu2 }
 0x4bf   :  { %v3340_v9 = vpop.f32.mrf.mxu0 }
 0x4c0   :  { %v3388_v10 = vadd.f32 %v3387_v12, %v3340_v9  ;;  %v3819_v12 = vadd.f32 %v18431_v45, %v18430_v5  ;;  %v15427_v5 = vadd.f32 %v14650_v8, %v3511_v27  ;;  %v8983_v27 = vld [vmem:[%s18070_s7 + $0x188] sm:$0xff] }
 0x4c1   :  { %4447 = vmatpush.bf16.msra.mxu0 %v8983_v27 }
 0x4c2   :  { %v3519_v3 = vmul.f32 %v14581_v16, %v3388_v10  ;;  %v3820_v6 = vadd.f32 %v3819_v12, %v19352_v7  ;;  %v3276_v10 = vadd.f32 %v15337_v11, %v15335_v20 }
 0x4c4   :  { %v3240_v34 = vpop.f32.mrf.mxu1  ;;  %v3287_v37 = vpop.f32.mrf.mxu3  ;;  %v3821_v24 = vadd.f32 %v3820_v6, %v18432_v22  ;;  %v18443_v6 = vmax.f32 %v15427_v5, 0.0 }
 0x4c6   :  { %v3390_v60 = vpop.f32.mrf.mxu2  ;;  %v3822_v54 = vadd.f32 %v3821_v24, %v18441_v39  ;;  %v8982_v24 = vld [vmem:[%s18070_s7 + $0x180] sm:$0xff] }
 0x4c7   :  { %v3343_v9 = vpop.f32.mrf.mxu0  ;;  %4448 = vmatpush.bf16.msra.mxu0 %v8982_v24 }
 0x4c8   :  { %v3391_v2 = vadd.f32 %v3390_v60, %v3343_v9  ;;  %v15436_v9 = vadd.f32 %v14661_v43, %v3519_v3  ;;  %v3279_v3 = vadd.f32 %v15347_v47, %v15345_v28  ;;  %v3470_v60 = vmul.f32 %v14438_v17, %v3276_v10 }
 0x4c9   :  { %v3823_v18 = vadd.f32 %v3822_v54, %v19354_v35  ;;  %v3288_v54 = vadd.f32 %v3287_v37, %v3240_v34 }
 0x4ca   :  { %v3527_v45 = vmul.f32 %v14659_v42, %v3391_v2  ;;  %19353 = vst [vmem:[#allocation114_spill] sm:$0xff] %v15436_v9  ;;  %v3273_v2 = vadd.f32 %v15324_v1, %v15322_v13  ;;  %v18435_v1 = vmax.f32 %v15436_v9, 0.0  ;;  %v3478_v35 = vmul.f32 %v14459_v57, %v3279_v3 }
 0x4cb   :  { %v3824_v28 = vadd.f32 %v3823_v18, %v18443_v6  ;;  %v15469_v10 = vadd.f32 %v14466_v52, %v3470_v60  ;;  %v3502_v34 = vmul.f32 %v14525_v15, %v3288_v54 }
 0x4cc   :  { %v3243_v12 = vpop.f32.mrf.mxu1  ;;  %v3290_v7 = vpop.f32.mrf.mxu3  ;;  %v15447_v20 = vadd.f32 %v14748_v61, %v3527_v45  ;;  %v3282_v45 = vadd.f32 %v15357_v55, %v15355_v23  ;;  %v3462_v27 = vmul.f32 %v14436_v32, %v3273_v2 }
 0x4cd   :  { %v3825_v55 = vadd.f32 %v3824_v28, %v18435_v1  ;;  %v3291_v60 = vadd.f32 %v3290_v7, %v3243_v12 }
 0x4ce   :  { %v3393_v11 = vpop.f32.mrf.mxu2  ;;  %v18437_v17 = vmax.f32 %v15447_v20, 0.0  ;;  %v3486_v2 = vmul.f32 %v14486_v26, %v3282_v45 }
 0x4cf   :  { %v3346_v22 = vpop.f32.mrf.mxu0  ;;  %v3510_v12 = vmul.f32 %v14566_v31, %v3291_v60 }
 0x4d0   :  { %v3394_v13 = vadd.f32 %v3393_v11, %v3346_v22  ;;  %v3285_v22 = vadd.f32 %v15376_v44, %v15374_v63  ;;  %v15478_v11 = vadd.f32 %v14464_v40, %v3462_v27  ;;  %v3826_v57 = vadd.f32 %v3825_v55, %v18437_v17 }
 0x4d1   :  { %v15484_v63 = vadd.f32 %v14493_v48, %v3478_v35  ;;  %v15491_v40 = vadd.f32 %v14518_v25, %v3486_v2  ;;  %v15514_v55 = vadd.f32 %v14650_v8, %v3510_v12 }
 0x4d2   :  { %v3535_v47 = vmul.f32 %v14741_v41, %v3394_v13  ;;  %v3494_v44 = vmul.f32 %v14496_v49, %v3285_v22  ;;  %v18448_v13 = vmax.f32 %v15469_v10, 0.0  ;;  %v18447_v24 = vmax.f32 %v15478_v11, 0.0 }
 0x4d3   :  { %v18449_v45 = vmax.f32 %v15484_v63, 0.0  ;;  %v18446_v28 = vmax.f32 %v15491_v40, 0.0 }
 0x4d4   :  { %v15474_v32 = vadd.f32 %v14750_v58, %v3535_v47  ;;  %v3246_v23 = vpop.f32.mrf.mxu1  ;;  %v3293_v18 = vpop.f32.mrf.mxu3  ;;  %v15498_v49 = vadd.f32 %v14529_v38, %v3494_v44  ;;  %v3810_v25 = vadd.f32 %v18448_v13, %v18447_v24  ;;  %v15507_v47 = vadd.f32 %v14571_v4, %v3502_v34 }
 0x4d5   :  { %v3294_v37 = vadd.f32 %v3293_v18, %v3246_v23 }
 0x4d6   :  { %v18439_v52 = vmax.f32 %v15474_v32, 0.0  ;;  %v3811_v31 = vadd.f32 %v3810_v25, %v18449_v45  ;;  %v18442_v38 = vmax.f32 %v15498_v49, 0.0  ;;  %v18445_v4 = vmax.f32 %v15507_v47, 0.0 }
 0x4d7   :  { %v4385_v3 = vpop.f32.mrf.mxu0  ;;  %v3518_v35 = vmul.f32 %v14581_v16, %v3294_v37 }
 0x4d8   :  { %v3827_v26 = vadd.f32 %v3826_v57, %v18439_v52  ;;  %v3812_v2 = vadd.f32 %v3811_v31, %v18446_v28  ;;  %v18444_v57 = vmax.f32 %v15514_v55, 0.0 }
 0x4d9   :  { %v15521_v16 = vadd.f32 %v14661_v43, %v3518_v35 }
 0x4da   :  { %v3842_v48 = vmul.f32 %v14875_v46, %v3827_v26  ;;  %v3813_v54 = vadd.f32 %v3812_v2, %v18442_v38 }
 0x4db   :  { %19355 = vst [vmem:[#allocation36_spill] sm:$0xff] %v15521_v16  ;;  %v18436_v26 = vmax.f32 %v15521_v16, 0.0 }
 0x4dc   :  { %v3850_v7 = vpack.c.bf16 %v3842_v48, %v3842_v48  ;;  %v3249_v27 = vpop.f32.mrf.mxu1  ;;  %v3296_v15 = vpop.f32.mrf.mxu3 }
 0x4dd   :  { %v3297_v22 = vadd.f32 %v3296_v15, %v3249_v27 }
 0x4de   :  { %4462 = vmatmul.bf16.vlgmr.msra.gmra.mxu2 %v3850_v7 }
 0x4df   :  { %v3526_v23 = vmul.f32 %v14659_v42, %v3297_v22  ;;  %v4387_v18 = vpop.f32.mrf.mxu0  ;;  %v3814_v42 = vadd.f32 %v3813_v54, %v18445_v4 }
 0x4e1   :  { %v15527_v44 = vadd.f32 %v14748_v61, %v3526_v23  ;;  %v3815_v43 = vadd.f32 %v3814_v42, %v18444_v57 }
 0x4e3   :  { %v18438_v37 = vmax.f32 %v15527_v44, 0.0  ;;  %v3816_v61 = vadd.f32 %v3815_v43, %v18436_v26 }
 0x4e4   :  { %v3252_v8 = vpop.f32.mrf.mxu1  ;;  %v3299_v60 = vpop.f32.mrf.mxu3 }
 0x4e5   :  { %v3300_v34 = vadd.f32 %v3299_v60, %v3252_v8  ;;  %v3817_v7 = vadd.f32 %v3816_v61, %v18438_v37 }
 0x4e7   :  { %v3534_v48 = vmul.f32 %v14741_v41, %v3300_v34  ;;  %v4398_v12 = vpop.f32.mrf.mxu0 }
 0x4e9   :  { %v15539_v25 = vadd.f32 %v14750_v58, %v3534_v48 }
 0x4eb   :  { %v18440_v27 = vmax.f32 %v15539_v25, 0.0 }
 0x4ec   :  { %v4372_v15 = vpop.f32.mrf.mxu1 }
 0x4ed   :  { %v3818_v35 = vadd.f32 %v3817_v7, %v18440_v27  ;;  %v4386_v22 = vadd.f32 %v4385_v3, %v4372_v15  ;;  %v8360_v3 = vld [vmem:[%s18071_s8 + $0xc0] sm:$0xf]  ;;  %v9022_v7 = vld [vmem:[%s18071_s8 + $0xc4] sm:$0xf] }
 0x4ef   :  { %v3841_v31 = vmul.f32 %v14875_v46, %v3818_v35  ;;  %v4400_v41 = vpop.f32.mrf.mxu0  ;;  %v4399_v23 = vadd.f32 %v4398_v12, %v4386_v22  ;;  %v9026_v12 = vld [vmem:[%s18071_s8 + $0xdc] sm:$0xf0]  ;;  %v8362_v35 = vld [vmem:[%s18071_s8 + $0xe0] sm:$0xf0]  ;;  %v8368_v22 = vld [vmem:[%s18071_s8 + $0xc8] sm:$0xf] }
 0x4f0   :  { %v8361_v15 = vor.u32 %v9026_v12, %v8360_v3  ;;  %v8365_v41 = vor.u32 %v9022_v7, %v8362_v35  ;;  %v9019_v3 = vld [vmem:[%s18071_s8 + $0xa4] sm:$0xf0]  ;;  %v8344_v12 = vld [vmem:[%s18071_s8 + $0x90] sm:$0xf] }
 0x4f1   :  { %v3849_v18 = vpack.c.bf16 %v3841_v31, %v3841_v31  ;;  %v9027_v31 = vld [vmem:[%s18071_s8 + $0xe4] sm:$0xf0] }
 0x4f2   :  { %4668 = vmatpush.bf16.msrb.mxu1 %v8361_v15  ;;  %4681 = vmatpush.bf16.msrb.mxu3 %v8365_v41  ;;  %v9020_v15 = vld [vmem:[%s18071_s8 + $0xac] sm:$0xf0]  ;;  %v9006_v41 = vld [vmem:[%s18071_s8 + $0x44] sm:$0xf] }
 0x4f3   :  { %4449 = vmatmul.bf16.vlgmr.msra.gmra.mxu0 %v3849_v18  ;;  %v8376_v18 = vld [vmem:[%s18071_s8 + $0xd0] sm:$0xf]  ;;  %v8345_v35 = vor.u32 %v9020_v15, %v8344_v12  ;;  %v8272_v15 = vld [vmem:[%s18071_s8 + $0x8] sm:$0xf] }
 0x4f4   :  { %v4374_v2 = vpop.f32.mrf.mxu1 }
 0x4f5   :  { %v9028_v2 = vld [vmem:[%s18071_s8 + $0xec] sm:$0xf0] }
 0x4fc   :  { %v4411_v54 = vpop.f32.mrf.mxu1 }
 0x4fd   :  { %v4412_v58 = vadd.f32 %v4411_v54, %v4399_v23  ;;  %v8369_v23 = vor.u32 %v9027_v31, %v8368_v22  ;;  %v8328_v54 = vld [vmem:[%s18071_s8 + $0x80] sm:$0xf] }
 0x4fe   :  { %v8296_v22 = vld [vmem:[%s18071_s8 + $0x40] sm:$0xf] }
 0x4ff   :  { %4694 = vmatpush.bf16.msrb.mxu0 %v8369_v23  ;;  %v9010_v31 = vld [vmem:[%s18071_s8 + $0x5c] sm:$0xf0] }
 0x500   :  { %v8297_v23 = vor.u32 %v9010_v31, %v8296_v22 }
 0x504   :  { %v4413_v8 = vpop.f32.mrf.mxu1 }
 0x505   :  { %v9018_v8 = vld [vmem:[%s18071_s8 + $0x9c] sm:$0xf0] }
 0x511   :  { %v4437_v60 = vpop.f32.mrf.mxu3 }
 0x519   :  { %v4439_v42 = vpop.f32.mrf.mxu3 }
 0x51a   :  { %v8330_v42 = vld [vmem:[%s18071_s8 + $0xa0] sm:$0xf0] }
 0x520   :  { %v4424_v34 = vpop.f32.mrf.mxu1 }
 0x521   :  { %v4425_v43 = vadd.f32 %v4424_v34, %v4412_v58  ;;  %v8377_v58 = vor.u32 %v9028_v2, %v8376_v18  ;;  %v8329_v34 = vor.u32 %v9018_v8, %v8328_v54  ;;  %v8298_v18 = vld [vmem:[%s18071_s8 + $0x60] sm:$0xf0]  ;;  %v8304_v2 = vld [vmem:[%s18071_s8 + $0x48] sm:$0xf] }
 0x522   :  { %v9011_v54 = vld [vmem:[%s18071_s8 + $0x64] sm:$0xf0] }
 0x523   :  { %v15547_v48 = vadd.f32 %v4437_v60, %v4425_v43  ;;  %v9014_v60 = vld [vmem:[%s18071_s8 + $0x84] sm:$0xf]  ;;  %4720 = vmatpush.bf16.msrb.mxu2 %v8377_v58  ;;  %4669 = vmatpush.bf16.msrb.mxu1 %v8329_v34  ;;  %v8301_v58 = vor.u32 %v9006_v41, %v8298_v18  ;;  %v8305_v8 = vor.u32 %v9011_v54, %v8304_v2  ;;  %v8280_v41 = vld [vmem:[%s18071_s8 + $0x10] sm:$0xf]  ;;  %v9023_v2 = vld [vmem:[%s18071_s8 + $0xcc] sm:$0xf] }
 0x524   :  { %v8333_v43 = vor.u32 %v9014_v60, %v8330_v42  ;;  %v8312_v60 = vld [vmem:[%s18071_s8 + $0x50] sm:$0xf]  ;;  %v8370_v54 = vld [vmem:[%s18071_s8 + $0xe8] sm:$0xf0] }
 0x525   :  { %v9012_v42 = vld [vmem:[%s18071_s8 + $0x6c] sm:$0xf0] }
 0x526   :  { %4682 = vmatpush.bf16.msrb.mxu3 %v8333_v43  ;;  %v8313_v34 = vor.u32 %v9012_v42, %v8312_v60  ;;  %v8264_v43 = vld [vmem:[%s18071_s8] sm:$0xf]  ;;  %v8378_v60 = vld [vmem:[%s18071_s8 + $0xf0] sm:$0xf0]  ;;  %v8384_v42 = vld [vmem:[%s18071_s8 + $0xd8] sm:$0xf] }
 0x527   :  { %4721 = vmatpush.bf16.msrb.mxu2 %v8345_v35  ;;  %4670 = vmatpush.bf16.msrb.mxu1 %v8297_v23  ;;  %v9003_v35 = vld [vmem:[%s18071_s8 + $0x24] sm:$0xf0]  ;;  %v9004_v23 = vld [vmem:[%s18071_s8 + $0x2c] sm:$0xf0] }
 0x528   :  { %v4426_v61 = vpop.f32.mrf.mxu1  ;;  %v8273_v31 = vor.u32 %v9003_v35, %v8272_v15  ;;  %v8281_v18 = vor.u32 %v9004_v23, %v8280_v41  ;;  %v8346_v35 = vld [vmem:[%s18071_s8 + $0xb0] sm:$0xf0] }
 0x529   :  { %v8336_v61 = vld [vmem:[%s18071_s8 + $0x88] sm:$0xf] }
 0x52a   :  { %v8337_v7 = vor.u32 %v9019_v3, %v8336_v61  ;;  %4683 = vmatpush.bf16.msrb.mxu3 %v8301_v58  ;;  %v9002_v61 = vld [vmem:[%s18071_s8 + $0x1c] sm:$0xf0]  ;;  %v8998_v3 = vld [vmem:[%s18071_s8 + $0x4] sm:$0xf]  ;;  %v9024_v58 = vld [vmem:[%s18071_s8 + $0xd4] sm:$0xf] }
 0x52b   :  { %4722 = vmatpush.bf16.msrb.mxu2 %v8313_v34  ;;  %v8265_v12 = vor.u32 %v9002_v61, %v8264_v43  ;;  %v9029_v34 = vld [vmem:[%s18071_s8 + $0xf4] sm:$0xf0]  ;;  %v8381_v43 = vor.u32 %v9024_v58, %v8378_v60  ;;  %v8314_v58 = vld [vmem:[%s18071_s8 + $0x70] sm:$0xf0] }
 0x52c   :  { %4695 = vmatpush.bf16.msrb.mxu0 %v8337_v7  ;;  %v8266_v7 = vld [vmem:[%s18071_s8 + $0x20] sm:$0xf0]  ;;  %v8385_v61 = vor.u32 %v9029_v34, %v8384_v42  ;;  %v9013_v60 = vld [vmem:[%s18071_s8 + $0x74] sm:$0xf0] }
 0x52d   :  { %v8269_v22 = vor.u32 %v8998_v3, %v8266_v7  ;;  %4671 = vmatpush.bf16.msrb.mxu1 %v8265_v12  ;;  %v9015_v3 = vld [vmem:[%s18071_s8 + $0x8c] sm:$0xf]  ;;  %v9016_v7 = vld [vmem:[%s18071_s8 + $0x94] sm:$0xf] }
 0x52e   :  { %v8338_v12 = vld [vmem:[%s18071_s8 + $0xa8] sm:$0xf0]  ;;  %v8349_v41 = vor.u32 %v9016_v7, %v8346_v35  ;;  %v9000_v7 = vld [vmem:[%s18071_s8 + $0x14] sm:$0xf]  ;;  %v8288_v35 = vld [vmem:[%s18071_s8 + $0x18] sm:$0xf] }
 0x52f   :  { %4684 = vmatpush.bf16.msrb.mxu3 %v8269_v22  ;;  %4723 = vmatpush.bf16.msrb.mxu2 %v8281_v18  ;;  %v8341_v15 = vor.u32 %v9015_v3, %v8338_v12  ;;  %v8352_v22 = vld [vmem:[%s18071_s8 + $0x98] sm:$0xf]  ;;  %v9007_v18 = vld [vmem:[%s18071_s8 + $0x4c] sm:$0xf] }
 0x530   :  { %4696 = vmatpush.bf16.msrb.mxu0 %v8305_v8  ;;  %v8373_v8 = vor.u32 %v9023_v2, %v8370_v54  ;;  %v8306_v2 = vld [vmem:[%s18071_s8 + $0x68] sm:$0xf0]  ;;  %v9008_v54 = vld [vmem:[%s18071_s8 + $0x54] sm:$0xf] }
 0x531   :  { %v8309_v42 = vor.u32 %v9007_v18, %v8306_v2  ;;  %v8999_v3 = vld [vmem:[%s18071_s8 + $0xc] sm:$0xf] }
 0x532   :  { %4707 = vmatpush.bf16.msra.mxu1 %v8373_v8  ;;  %v8320_v8 = vld [vmem:[%s18071_s8 + $0x58] sm:$0xf]  ;;  %v8274_v12 = vld [vmem:[%s18071_s8 + $0x28] sm:$0xf0] }
 0x533   :  { %4733 = vmatpush.bf16.msra.mxu3 %v8381_v43  ;;  %v8317_v43 = vor.u32 %v9008_v54, %v8314_v58 }
 0x534   :  { %4697 = vmatpush.bf16.msrb.mxu0 %v8273_v31  ;;  %v9021_v31 = vld [vmem:[%s18071_s8 + $0xb4] sm:$0xf0] }
 0x535   :  { %v8353_v23 = vor.u32 %v9021_v31, %v8352_v22  ;;  %v9005_v22 = vld [vmem:[%s18071_s8 + $0x34] sm:$0xf0]  ;;  %v8277_v31 = vor.u32 %v8999_v3, %v8274_v12  ;;  %v9017_v12 = vld [vmem:[%s18071_s8 + $0x9c] sm:$0xf] }
 0x536   :  { %4708 = vmatpush.bf16.msra.mxu1 %v8341_v15  ;;  %v8282_v15 = vld [vmem:[%s18071_s8 + $0x30] sm:$0xf0] }
 0x537   :  { %4734 = vmatpush.bf16.msra.mxu3 %v8349_v41  ;;  %v8285_v41 = vor.u32 %v9000_v7, %v8282_v15  ;;  %v9009_v7 = vld [vmem:[%s18071_s8 + $0x5c] sm:$0xf] }
 0x538   :  { %4746 = vmatpush.bf16.msra.mxu0 %v8385_v61  ;;  %v8321_v61 = vor.u32 %v9013_v60, %v8320_v8  ;;  %v9025_v8 = vld [vmem:[%s18071_s8 + $0xdc] sm:$0xf] }
 0x539   :  { %v8386_v60 = vld [vmem:[%s18071_s8 + $0xf8] sm:$0xf0] }
 0x53a   :  { %4709 = vmatpush.bf16.msra.mxu1 %v8309_v42  ;;  %v8322_v15 = vld [vmem:[%s18071_s8 + $0x78] sm:$0xf0] }
 0x53b   :  { %4735 = vmatpush.bf16.msra.mxu3 %v8317_v43 }
 0x53c   :  { %4747 = vmatpush.bf16.msra.mxu0 %v8353_v23  ;;  %v8289_v23 = vor.u32 %v9005_v22, %v8288_v35  ;;  %v8325_v35 = vor.u32 %v9009_v7, %v8322_v15  ;;  %v9001_v22 = vld [vmem:[%s18071_s8 + $0x1c] sm:$0xf] }
 0x53e   :  { %4710 = vmatpush.bf16.msra.mxu1 %v8277_v31  ;;  %v8290_v31 = vld [vmem:[%s18071_s8 + $0x38] sm:$0xf0] }
 0x53f   :  { %4736 = vmatpush.bf16.msra.mxu3 %v8285_v41  ;;  %v8293_v41 = vor.u32 %v9001_v22, %v8290_v31 }
 0x540   :  { %4748 = vmatpush.bf16.msra.mxu0 %v8321_v61  ;;  %v8389_v61 = vor.u32 %v9025_v8, %v8386_v60 }
 0x544   :  { %4749 = vmatpush.bf16.msra.mxu0 %v8289_v23 }
 0x561   :  { %v4463_v34 = vpop.f32.mrf.mxu2 }
 0x569   :  { %v4465_v18 = vpop.f32.mrf.mxu2 }
 0x570   :  { %v4450_v2 = vpop.f32.mrf.mxu0 }
 0x571   :  { %v4451_v54 = vadd.f32 %v4450_v2, %v15547_v48  ;;  %v8354_v48 = vld [vmem:[%s18071_s8 + $0xb8] sm:$0xf0]  ;;  %s7826_s8 = sshll.u32 %s19916_s12, 4  ;;  %s7827_s8 = int_to_ptr.hbm [resolvable:$true] %s7826_s8 }
 0x573   :  { %v4464_v58 = vadd.f32 %v4463_v34, %v4451_v54  ;;  %v8357_v34 = vor.u32 %v9017_v12, %v8354_v48 }
 0x575   :  { %v4467_v42 = vmax.f32 %v4464_v58, 0.0 }
 0x577   :  { %v4468_v43 = vpack.c.bf16 %v4467_v42, %v4467_v42 }
 0x578   :  { %v4452_v3 = vpop.f32.mrf.mxu0 }
 0x579   :  { %8390 = vmatmul.msk.bf16.vlgmr.msrb.gmra.mxu1 %vm810_vm3, %v4468_v43  ;;  %8391 = vmatmul.msk.bf16.vlgmr.msrb.gmra.mxu3 %vm810_vm3, %v4468_v43 }
 0x57a   :  { %8392 = vmatmul.msk.bf16.vlgmr.msrb.gmra.mxu0 %vm810_vm3, %v4468_v43  ;;  %8394 = vmatmul.msk.bf16.vlgmr.msrb.gmra.mxu2 %vm810_vm3, %v4468_v43 }
 0x57b   :  { %4759 = vmatpush.bf16.msrb.mxu1 %v8389_v61 }
 0x57f   :  { %4760 = vmatpush.bf16.msrb.mxu1 %v8357_v34 }
 0x583   :  { %4761 = vmatpush.bf16.msrb.mxu1 %v8325_v35 }
 0x587   :  { %4762 = vmatpush.bf16.msrb.mxu1 %v8293_v41 }
 0x589   :  { %8393 = vmatmul.msk.bf16.vlgmr.msra.gmra.mxu1 %vm810_vm3, %v4468_v43  ;;  %8395 = vmatmul.msk.bf16.vlgmr.msra.gmra.mxu3 %vm810_vm3, %v4468_v43 }
 0x58a   :  { %8396 = vmatmul.msk.bf16.vlgmr.msra.gmra.mxu0 %vm810_vm3, %v4468_v43 }
 0x599   :  { %8397 = vmatmul.msk.bf16.vlgmr.msrb.gmra.mxu1 %vm810_vm3, %v4468_v43 }
 0x5f6   :  { %v4673_v23 = vpop.f32.mrf.mxu1 }
 0x5f7   :  { %v8398_v18 = vmul.f32 -1.442695, %v4673_v23  ;;  %v4699_v2 = vpop.f32.mrf.mxu0 }
 0x5f8   :  { %v8400_v54 = vmul.f32 -1.442695, %v4699_v2 }
 0x5f9   :  { %9726 = vpow2.f32 %v8398_v18 }
 0x5fa   :  { %9728 = vpow2.f32 %v8400_v54 }
 0x5fc   :  { %v4686_v58 = vpop.f32.mrf.mxu3 }
 0x5fd   :  { %v8399_v8 = vmul.f32 -1.442695, %v4686_v58  ;;  %v4725_v60 = vpop.f32.mrf.mxu2 }
 0x5fe   :  { %v8402_v42 = vmul.f32 -1.442695, %v4725_v60  ;;  %v4675_v61 = vpop.f32.mrf.mxu1 }
 0x5ff   :  { %v9727_v3 = vpop.eup %9726  ;;  %9730 = vpow2.f32 %v8399_v8  ;;  %v4701_v12 = vpop.f32.mrf.mxu0 }
 0x600   :  { %v9729_v48 = vpop.eup %9728  ;;  %v4792_v34 = vadd.f32 1.0, %v9727_v3  ;;  %9732 = vpow2.f32 %v8402_v42 }
 0x601   :  { %v4794_v7 = vadd.f32 1.0, %v9729_v48 }
 0x602   :  { %9734 = vrcp.f32 %v4792_v34  ;;  %v4809_v61 = vand.u32 2147483647, %v4792_v34  ;;  %v4811_v3 = vand.u32 2147483648, %v4792_v34  ;;  %vm4805_vm7 = vweird.f32 %v4792_v34 }
 0x603   :  { %9736 = vrcp.f32 %v4794_v7  ;;  %vm4835_vm11 = vweird.f32 %v4794_v7 }
 0x604   :  { %v4688_v43 = vpop.f32.mrf.mxu3  ;;  %vm15762_vm10 = vcmp.eq.f32.partialorder %v4809_v61, 8.507059e+37 }
 0x605   :  { %v9731_v15 = vpop.eup %9730  ;;  %v4727_v35 = vpop.f32.mrf.mxu2 }
 0x606   :  { %v9733_v22 = vpop.eup %9732  ;;  %v15750_v31 = vadd.f32 1.0, %v9731_v15  ;;  %v4712_v41 = vpop.f32.mrf.mxu1  ;;  %v4839_v35 = vand.u32 2147483647, %v4794_v7 }
 0x607   :  { %v15752_v23 = vadd.f32 1.0, %v9733_v22  ;;  %v8401_v18 = vmul.f32 -1.442695, %v4712_v41  ;;  %v4751_v2 = vpop.f32.mrf.mxu0  ;;  %v4841_v22 = vand.u32 2147483648, %v4794_v7 }
 0x608   :  { %v9735_v54 = vpop.eup %9734  ;;  %9738 = vrcp.f32 %v15750_v31  ;;  %v8404_v48 = vmul.f32 -1.442695, %v4751_v2  ;;  %vm15774_vm13 = vcmp.eq.f32.partialorder %v4839_v35, 8.507059e+37  ;;  %vm4820_vm0 = vweird.f32 %v15750_v31 }
 0x609   :  { %v9737_v58 = vpop.eup %9736  ;;  %v4801_v8 = vmul.f32 %v9735_v54, %v4792_v34  ;;  %9740 = vrcp.f32 %v15752_v23  ;;  %vm4806_vm8 = vweird.f32 %v9735_v54  ;;  %v4842_v61 = vor.u32 1.1754944e-38, %v4841_v22 }
 0x60a   :  { %v4831_v60 = vmul.f32 %v9737_v58, %v4794_v7  ;;  %9742 = vpow2.f32 %v8401_v18  ;;  %vm4836_vm9 = vweird.f32 %v9737_v58  ;;  %vm15770_vm12 = vmor %vm4805_vm7, %vm4806_vm8  ;;  %v4824_v7 = vand.u32 2147483647, %v15750_v31 }
 0x60b   :  { %v4802_v42 = vsub.f32 1.0, %v4801_v8  ;;  %9744 = vpow2.f32 %v8404_v48  ;;  %vm15778_vm14 = vmor %vm4835_vm11, %vm4836_vm9  ;;  %v4869_v39 = vand.u32 2147483647, %v15752_v23  ;;  %v4871_v38 = vand.u32 2147483648, %v15752_v23 }
 0x60c   :  { %v4832_v12 = vsub.f32 1.0, %v4831_v60  ;;  %v4738_v43 = vpop.f32.mrf.mxu3  ;;  %vm4865_vm3 = vweird.f32 %v15752_v23  ;;  %vm4825_vm6 = vcmp.eq.f32.partialorder %v4824_v7, 8.507059e+37 }
 0x60d   :  { %v4803_v15 = vmul.f32 %v9735_v54, %v4802_v42  ;;  %v8403_v41 = vmul.f32 -1.442695, %v4738_v43  ;;  %v4812_v43 = vor.u32 1.1754944e-38, %v4811_v3  ;;  %vm15822_vm7 = vcmp.eq.f32.partialorder %v4869_v39, 8.507059e+37 }
 0x60e   :  { %v15756_v1 = vpop.eup %9738  ;;  %v4833_v26 = vmul.f32 %v9737_v58, %v4832_v12  ;;  %v4714_v17 = vpop.f32.mrf.mxu1 }
 0x60f   :  { %v15758_v37 = vpop.eup %9740  ;;  %v4804_v8 = vadd.f32 %v9735_v54, %v4803_v15  ;;  %v4816_v18 = vmul.f32 %v15756_v1, %v15750_v31  ;;  %9746 = vpow2.f32 %v8403_v41  ;;  %v4753_v2 = vpop.f32.mrf.mxu0  ;;  %vm4821_vm15 = vweird.f32 %v15756_v1 }
 0x610   :  { %v4834_v42 = vadd.f32 %v9737_v58, %v4833_v26  ;;  %v4861_v12 = vmul.f32 %v15758_v37, %v15752_v23  ;;  %v9743_v48 = vpop.eup %9742  ;;  %v4826_v2 = vand.u32 2147483648, %v15750_v31  ;;  %vm15809_vm4 = vmor %vm4820_vm0, %vm4821_vm15  ;;  %vm4866_vm5 = vweird.f32 %v15758_v37 }
 0x611   :  { %v4817_v41 = vsub.f32 1.0, %v4816_v18  ;;  %v15784_v52 = vadd.f32 1.0, %v9743_v48  ;;  %v4808_v3 = vsel %vm15770_vm12, %v9735_v54, %v4804_v8  ;;  %v9745_v18 = vpop.eup %9744  ;;  %vm15844_vm8 = vmor %vm4865_vm3, %vm4866_vm5 }
 0x612   :  { %v4862_v34 = vsub.f32 1.0, %v4861_v12  ;;  %v4838_v35 = vsel %vm15778_vm14, %v9737_v58, %v4834_v42  ;;  %v15799_v58 = vadd.f32 1.0, %v9745_v18  ;;  %v15803_v8 = vsel %vm15762_vm10, %v4812_v43, %v4808_v3 }
 0x613   :  { %v4818_v22 = vmul.f32 %v15756_v1, %v4817_v41  ;;  %9748 = vrcp.f32 %v15784_v52  ;;  %v15807_v42 = vsel %vm15774_vm13, %v4842_v61, %v4838_v35  ;;  %v4854_v43 = vand.u32 2147483647, %v15784_v52  ;;  %v19368_v35 = vld [vmem:[#allocation28_spill] sm:$0xff] }
 0x614   :  { %v4863_v27 = vmul.f32 %v15758_v37, %v4862_v34  ;;  %v4740_v12 = vpop.f32.mrf.mxu3  ;;  %9750 = vrcp.f32 %v15799_v58  ;;  %v4827_v15 = vor.u32 1.1754944e-38, %v4826_v2  ;;  %v4872_v34 = vor.u32 1.1754944e-38, %v4871_v38  ;;  %v19381_v38 = vld [vmem:[#allocation113_spill] sm:$0xff] }
 0x615   :  { %v9747_v48 = vpop.eup %9746  ;;  %v4819_v54 = vadd.f32 %v15756_v1, %v4818_v22  ;;  %v4856_v3 = vand.u32 2147483648, %v15784_v52  ;;  %v19369_v22 = vmax.f32 %v19368_v35, 0.0  ;;  %vm4850_vm9 = vweird.f32 %v15784_v52 }
 0x616   :  { %v15814_v41 = vadd.f32 1.0, %v9747_v48  ;;  %v4764_v31 = vpop.f32.mrf.mxu1  ;;  %v4864_v60 = vadd.f32 %v15758_v37, %v4863_v27  ;;  %v19371_v27 = vld [vmem:[#allocation81_spill] sm:$0xff]  ;;  %v19376_v48 = vld [vmem:[#allocation44_spill] sm:$0xff]  ;;  %vm15858_vm10 = vcmp.eq.f32.partialorder %v4854_v43, 8.507059e+37  ;;  %v4901_v35 = vand.u32 2147483648, %v15799_v58  ;;  %v19384_v43 = vld [vmem:[#allocation47_spill] sm:$0xff] }
 0x617   :  { %v4823_v26 = vsel %vm15809_vm4, %v15756_v1, %v4819_v54  ;;  %v15831_v1 = vmul.f32 %v15803_v8, %v19369_v22  ;;  %v19372_v18 = vmax.f32 %v19371_v27, 0.0  ;;  %v8405_v2 = vmul.f32 -1.442695, %v4764_v31 }
 0x618   :  { %9752 = vrcp.f32 %v15814_v41  ;;  %v15838_v39 = vsel %vm4825_vm6, %v4827_v15, %v4823_v26  ;;  %v19377_v54 = vmax.f32 %v19376_v48, 0.0  ;;  %v4868_v26 = vsel %vm15844_vm8, %v15758_v37, %v4864_v60 }
 0x619   :  { %19370 = vst [vmem:[#allocation52_spill] sm:$0xff] %v15831_v1  ;;  %v15836_v12 = vmul.f32 %v15803_v8, %v19372_v18  ;;  %v9749_v7 = vpop.eup %9748  ;;  %v4899_v22 = vand.u32 2147483647, %v15799_v58  ;;  %v4884_v31 = vand.u32 2147483647, %v15814_v41  ;;  %v4886_v27 = vand.u32 2147483648, %v15814_v41 }
 0x61a   :  { %v15852_v17 = vmul.f32 %v15807_v42, %v19377_v54  ;;  %v4846_v15 = vmul.f32 %v9749_v7, %v15784_v52  ;;  %9754 = vpow2.f32 %v8405_v2  ;;  %v9751_v18 = vpop.eup %9750  ;;  %v4857_v54 = vor.u32 1.1754944e-38, %v4856_v3 }
 0x61b   :  { %19373 = vst [vmem:[#allocation112_spill] sm:$0xff] %v15836_v12  ;;  %v19382_v37 = vmax.f32 %v19381_v38, 0.0  ;;  %v19385_v6 = vmax.f32 %v19384_v43, 0.0  ;;  %v15878_v4 = vsel %vm15822_vm7, %v4872_v34, %v4868_v26  ;;  %v4891_v28 = vmul.f32 %v9751_v18, %v15799_v58 }
 0x61c   :  { %19378 = vst [vmem:[#allocation111_spill] sm:$0xff] %v15852_v17  ;;  %v4847_v48 = vsub.f32 1.0, %v4846_v15  ;;  %vm4895_vm11 = vweird.f32 %v15799_v58  ;;  %vm4880_vm12 = vweird.f32 %v15814_v41  ;;  %vm4851_vm13 = vweird.f32 %v9749_v7 }
 0x61d   :  { %v15869_v60 = vmul.f32 %v15838_v39, %v19382_v37  ;;  %v15874_v57 = vmul.f32 %v15807_v42, %v19385_v6  ;;  %v4902_v38 = vor.u32 1.1754944e-38, %v4901_v35  ;;  %v19387_v37 = vld [vmem:[#allocation117_spill] sm:$0xff]  ;;  %v4892_v24 = vsub.f32 1.0, %v4891_v28  ;;  %vm4852_vm0 = vmor %vm4850_vm9, %vm4851_vm13 }
 0x61e   :  { %v4766_v3 = vpop.f32.mrf.mxu1  ;;  %v9753_v2 = vpop.eup %9752  ;;  %v4848_v15 = vmul.f32 %v9749_v7, %v4847_v48  ;;  %v19388_v43 = vmax.f32 %v19387_v37, 0.0  ;;  %vm15888_vm14 = vcmp.eq.f32.partialorder %v4899_v22, 8.507059e+37  ;;  %vm15893_vm15 = vcmp.eq.f32.partialorder %v4884_v31, 8.507059e+37  ;;  %v19394_v48 = vld [vmem:[#allocation115_spill] sm:$0xff] }
 0x61f   :  { %19383 = vst [vmem:[#allocation75_spill] sm:$0xff] %v15869_v60  ;;  %v4876_v34 = vmul.f32 %v9753_v2, %v15814_v41  ;;  %v4887_v3 = vor.u32 1.1754944e-38, %v4886_v27  ;;  %v19395_v13 = vmax.f32 %v19394_v48, 0.0  ;;  %v5108_v22 = vadd.f32 %v15869_v60, %v15831_v1  ;;  %v19401_v48 = vld [vmem:[#allocation125_spill] sm:$0xff] }
 0x620   :  { %19386 = vst [vmem:[#allocation50_spill] sm:$0xff] %v15874_v57  ;;  %v15886_v6 = vmul.f32 %v15838_v39, %v19388_v43  ;;  %v4849_v37 = vadd.f32 %v9749_v7, %v4848_v15  ;;  %v19397_v43 = vmax.f32 %v15257_v59, 0.0  ;;  %v19399_v31 = vmax.f32 %v15237_v14, 0.0  ;;  %v9755_v27 = vpop.eup %9754 }
 0x621   :  { %v15900_v35 = vmul.f32 %v15838_v39, %v19395_v13  ;;  %v4893_v13 = vmul.f32 %v9751_v18, %v4892_v24  ;;  %vm4896_vm3 = vweird.f32 %v9751_v18  ;;  %v4877_v15 = vsub.f32 1.0, %v4876_v34 }
 0x622   :  { %19389 = vst [vmem:[#allocation54_spill] sm:$0xff] %v15886_v6  ;;  %v15905_v28 = vmul.f32 %v15878_v4, %v19397_v43  ;;  %v15912_v45 = vmul.f32 %v15878_v4, %v19399_v31  ;;  %v19402_v59 = vmax.f32 %v19401_v48, 0.0  ;;  %v4853_v46 = vsel %vm4852_vm0, %v9749_v7, %v4849_v37  ;;  %vm15933_vm5 = vmor %vm4895_vm11, %vm4896_vm3  ;;  %v19406_v37 = vld [vmem:[#allocation30_spill] sm:$0xff] }
 0x623   :  { %19396 = vst [vmem:[#allocation95_spill] sm:$0xff] %v15900_v35  ;;  %vm4881_vm4 = vweird.f32 %v9753_v2  ;;  %v15921_v9 = vadd.f32 1.0, %v9755_v27  ;;  %v5099_v14 = vadd.f32 %v15886_v6, %v15836_v12  ;;  %v15927_v31 = vsel %vm15858_vm10, %v4857_v54, %v4853_v46 }
 0x624   :  { %19398 = vst [vmem:[#allocation57_spill] sm:$0xff] %v15905_v28  ;;  %v15919_v43 = vmul.f32 %v15803_v8, %v19402_v59  ;;  %v4894_v52 = vadd.f32 %v9751_v18, %v4893_v13  ;;  %v4878_v24 = vmul.f32 %v9753_v2, %v4877_v15  ;;  %v5109_v7 = vadd.f32 %v5108_v22, %v15852_v17  ;;  %vm4882_vm6 = vmor %vm4880_vm12, %vm4881_vm4 }
 0x625   :  { %19400 = vst [vmem:[#allocation66_spill] sm:$0xff] %v15912_v45  ;;  %9756 = vrcp.f32 %v15921_v9  ;;  %v19407_v27 = vmax.f32 %v19406_v37, 0.0  ;;  %v5018_v23 = vmax.f32 %v15831_v1, %v15869_v60  ;;  %v19409_v13 = vmax.f32 %v15026_v56, 0.0  ;;  %v19453_v1 = vld [vmem:[#allocation100_spill] sm:$0xff] }
 0x626   :  { %19403 = vst [vmem:[#allocation92_spill] sm:$0xff] %v15919_v43  ;;  %v5090_v34 = vadd.f32 %v15900_v35, %v15919_v43  ;;  %v4898_v54 = vsel %vm15933_vm5, %v9751_v18, %v4894_v52  ;;  %v4879_v58 = vadd.f32 %v9753_v2, %v4878_v24  ;;  %v19411_v59 = vmax.f32 %v14999_v33, 0.0 }
 0x627   :  { %v15942_v46 = vmul.f32 %v15807_v42, %v19407_v27  ;;  %v15951_v15 = vmul.f32 %v15927_v31, %v19409_v13  ;;  %v4916_v37 = vand.u32 2147483648, %v15921_v9  ;;  %v5100_v48 = vadd.f32 %v5099_v14, %v15874_v57  ;;  %v19417_v13 = vld [vmem:[#allocation99_spill] sm:$0xff] }
 0x628   :  { %v15956_v22 = vmul.f32 %v15927_v31, %v19411_v59  ;;  %v19413_v18 = vmax.f32 %v15022_v51, 0.0  ;;  %v19415_v52 = vmax.f32 %v15249_v36, 0.0  ;;  %v4883_v24 = vsel %vm4882_vm6, %v9753_v2, %v4879_v58 }
 0x629   :  { %19408 = vst [vmem:[#allocation123_spill] sm:$0xff] %v15942_v46  ;;  %v4914_v27 = vand.u32 2147483647, %v15921_v9  ;;  %v5091_v41 = vadd.f32 %v5090_v34, %v15942_v46  ;;  %v19418_v59 = vmax.f32 %v19417_v13, 0.0  ;;  %v15982_v51 = vsel %vm15888_vm14, %v4902_v38, %v4898_v54  ;;  %v19420_v34 = vld [vmem:[#allocation118_spill] sm:$0xff]  ;;  %v19423_v13 = vld [vmem:[#allocation48_spill] sm:$0xff] }
 0x62a   :  { %19410 = vst [vmem:[#allocation102_spill] sm:$0xff] %v15951_v15  ;;  %v15966_v56 = vmul.f32 %v15927_v31, %v19413_v18  ;;  %v15971_v33 = vmul.f32 %v15878_v4, %v19415_v52  ;;  %v15986_v36 = vsel %vm15893_vm15, %v4887_v3, %v4883_v24  ;;  %v5110_v14 = vadd.f32 %v5109_v7, %v15951_v15 }
 0x62b   :  { %19412 = vst [vmem:[#allocation90_spill] sm:$0xff] %v15956_v22  ;;  %v15978_v60 = vmul.f32 %v15803_v8, %v19418_v59  ;;  %v5101_v2 = vadd.f32 %v5100_v48, %v15956_v22  ;;  %v5019_v58 = vmax.f32 %v5018_v23, %v15852_v17  ;;  %v19421_v18 = vmax.f32 %v19420_v34, 0.0  ;;  %v9757_v3 = vpop.eup %9756 }
 0x62c   :  { %19414 = vst [vmem:[#allocation35_spill] sm:$0xff] %v15966_v56  ;;  %v19424_v59 = vmax.f32 %v19423_v13, 0.0  ;;  %v19426_v61 = vmax.f32 %v15269_v30, 0.0  ;;  %vm4910_vm7 = vweird.f32 %v15921_v9  ;;  %v4917_v7 = vor.u32 1.1754944e-38, %v4916_v37 }
 0x62d   :  { %19416 = vst [vmem:[#allocation60_spill] sm:$0xff] %v15971_v33  ;;  %v15994_v52 = vmul.f32 %v15838_v39, %v19421_v18  ;;  %v19428_v23 = vmax.f32 %v15157_v0, 0.0  ;;  %v5092_v48 = vadd.f32 %v5091_v41, %v15966_v56  ;;  %v4906_v24 = vmul.f32 %v9757_v3, %v15921_v9 }
 0x62e   :  { %19419 = vst [vmem:[#allocation64_spill] sm:$0xff] %v15978_v60  ;;  %v15999_v38 = vmul.f32 %v15807_v42, %v19424_v59  ;;  %v16004_v26 = vmul.f32 %v15878_v4, %v19426_v61  ;;  %vm16014_vm8 = vcmp.eq.f32.partialorder %v4914_v27, 8.507059e+37  ;;  %v19432_v30 = vmax.f32 %v15484_v63, 0.0 }
 0x62f   :  { %19422 = vst [vmem:[#allocation76_spill] sm:$0xff] %v15994_v52  ;;  %v16010_v54 = vmul.f32 %v15986_v36, %v19428_v23  ;;  %v19434_v37 = vmax.f32 %v15142_v50, 0.0  ;;  %v19436_v13 = vmax.f32 %v15469_v10, 0.0  ;;  %v5111_v27 = vadd.f32 %v5110_v14, %v15905_v28 }
 0x630   :  { %19425 = vst [vmem:[#allocation62_spill] sm:$0xff] %v15999_v38  ;;  %v16021_v18 = vmul.f32 %v15982_v51, %v19432_v30  ;;  %v5102_v59 = vadd.f32 %v5101_v2, %v15912_v45  ;;  %v19438_v61 = vmax.f32 %v15154_v53, 0.0  ;;  %v5020_v23 = vmax.f32 %v5019_v58, %v15951_v15 }
 0x631   :  { %19427 = vst [vmem:[#allocation105_spill] sm:$0xff] %v16004_v26  ;;  %v16026_v0 = vmul.f32 %v15986_v36, %v19434_v37  ;;  %v16031_v41 = vmul.f32 %v15982_v51, %v19436_v13  ;;  %v4907_v50 = vsub.f32 1.0, %v4906_v24  ;;  %v19440_v30 = vmax.f32 %v15044_v21, 0.0 }
 0x632   :  { %19429 = vst [vmem:[#allocation24_spill] sm:$0xff] %v16010_v54  ;;  %v16038_v63 = vmul.f32 %v15986_v36, %v19438_v61  ;;  %v5117_v10 = vadd.f32 %v15994_v52, %v15978_v60  ;;  %v5000_v14 = vmax.f32 %v15919_v43, %v15900_v35  ;;  %vm4911_vm9 = vweird.f32 %v9757_v3 }
 0x633   :  { %19433 = vst [vmem:[#allocation42_spill] sm:$0xff] %v16021_v18  ;;  %v16044_v37 = vmul.f32 %v15927_v31, %v19440_v30  ;;  %v5112_v53 = vadd.f32 %v5111_v27, %v16010_v54  ;;  %v19442_v2 = vmax.f32 %v15478_v11, 0.0  ;;  %v5093_v58 = vadd.f32 %v5092_v48, %v15971_v33  ;;  %v19444_v30 = vld [vmem:[#allocation77_spill] sm:$0xff]  ;;  %v19447_v27 = vld [vmem:[#allocation96_spill] sm:$0xff]  ;;  %v19450_v48 = vld [vmem:[#allocation71_spill] sm:$0xff] }
 0x634   :  { %19435 = vst [vmem:[#allocation40_spill] sm:$0xff] %v16026_v0  ;;  %v4908_v21 = vmul.f32 %v9757_v3, %v4907_v50  ;;  %v5103_v24 = vadd.f32 %v5102_v59, %v16026_v0  ;;  %v5118_v61 = vadd.f32 %v5117_v10, %v15999_v38  ;;  %v19445_v15 = vmax.f32 %v19444_v30, 0.0  ;;  %vm4912_vm10 = vmor %vm4910_vm7, %vm4911_vm9 }
 0x635   :  { %19437 = vst [vmem:[#allocation79_spill] sm:$0xff] %v16031_v41  ;;  %v16054_v13 = vmul.f32 %v15982_v51, %v19442_v2  ;;  %v5094_v35 = vadd.f32 %v5093_v58, %v16038_v63  ;;  %v19448_v43 = vmax.f32 %v19447_v27, 0.0  ;;  %v5001_v2 = vmax.f32 %v5000_v14, %v15942_v46  ;;  %v19456_v14 = vld [vmem:[#allocation121_spill] sm:$0xff] }
 0x636   :  { %19439 = vst [vmem:[#allocation41_spill] sm:$0xff] %v16038_v63  ;;  %v16062_v17 = vmul.f32 %v15838_v39, %v19445_v15  ;;  %v19451_v50 = vmax.f32 %v19450_v48, 0.0  ;;  %v4909_v10 = vadd.f32 %v9757_v3, %v4908_v21  ;;  %v5021_v30 = vmax.f32 %v5020_v23, %v15905_v28 }
 0x637   :  { %19441 = vst [vmem:[#allocation37_spill] sm:$0xff] %v16044_v37  ;;  %v16068_v11 = vmul.f32 %v15986_v36, %v19448_v43  ;;  %v5119_v15 = vadd.f32 %v5118_v61, %v16044_v37  ;;  %v19454_v16 = vmax.f32 %v19453_v1, 0.0  ;;  %v5002_v43 = vmax.f32 %v5001_v2, %v15966_v56 }
 0x638   :  { %19443 = vst [vmem:[#allocation128_spill] sm:$0xff] %v16054_v13  ;;  %v16074_v59 = vmul.f32 %v15803_v8, %v19451_v50  ;;  %v19457_v27 = vmax.f32 %v19456_v14, 0.0  ;;  %v5027_v1 = vmax.f32 %v15978_v60, %v15994_v52  ;;  %v4913_v21 = vsel %vm4912_vm10, %v9757_v3, %v4909_v10  ;;  %v19464_v60 = vld [vmem:[#allocation116_spill] sm:$0xff] }
 0x639   :  { %19446 = vst [vmem:[#allocation120_spill] sm:$0xff] %v16062_v17  ;;  %v16081_v58 = vmul.f32 %v15807_v42, %v19454_v16  ;;  %v5113_v16 = vadd.f32 %v5112_v53, %v16021_v18  ;;  %v5104_v61 = vadd.f32 %v5103_v24, %v16031_v41  ;;  %v5009_v9 = vmax.f32 %v15836_v12, %v15886_v6  ;;  %v19461_v53 = vld [vmem:[#allocation93_spill] sm:$0xff] }
 0x63a   :  { %19449 = vst [vmem:[#allocation119_spill] sm:$0xff] %v16068_v11  ;;  %v16090_v48 = vmul.f32 %v15927_v31, %v19457_v27  ;;  %v5135_v23 = vadd.f32 %v16062_v17, %v16074_v59  ;;  %v16102_v2 = vsel %vm16014_vm8, %v4917_v7, %v4913_v21  ;;  %v5095_v50 = vadd.f32 %v5094_v35, %v16054_v13 }
 0x63b   :  { %19452 = vst [vmem:[#allocation58_spill] sm:$0xff] %v16074_v59  ;;  %v5022_v14 = vmax.f32 %v5021_v30, %v16010_v54  ;;  %v19459_v52 = vmax.f32 %v15394_v19, 0.0  ;;  %v19462_v24 = vmax.f32 %v19461_v53, 0.0  ;;  %v19465_v34 = vmax.f32 %v19464_v60, 0.0 }
 0x63c   :  { %19455 = vst [vmem:[#allocation127_spill] sm:$0xff] %v16081_v58  ;;  %v5136_v27 = vadd.f32 %v5135_v23, %v16081_v58  ;;  %v5120_v35 = vadd.f32 %v5119_v15, %v16004_v26  ;;  %v5003_v30 = vmax.f32 %v5002_v43, %v15971_v33  ;;  %v5028_v19 = vmax.f32 %v5027_v1, %v15999_v38  ;;  %v19470_v43 = vld [vmem:[#allocation51_spill] sm:$0xff] }
 0x63d   :  { %19458 = vst [vmem:[#allocation53_spill] sm:$0xff] %v16090_v48  ;;  %v16110_v3 = vmul.f32 %v16102_v2, %v19459_v52  ;;  %v16115_v10 = vmul.f32 %v16102_v2, %v19462_v24  ;;  %v16120_v7 = vmul.f32 %v16102_v2, %v19465_v34  ;;  %v5045_v52 = vmax.f32 %v16074_v59, %v16062_v17  ;;  %v19467_v34 = vld [vmem:[#allocation45_spill] sm:$0xff] }
 0x63e   :  { %v5137_v23 = vadd.f32 %v5136_v27, %v16090_v48  ;;  %v5010_v24 = vmax.f32 %v5009_v9, %v15874_v57  ;;  %v19468_v56 = vmax.f32 %v19467_v34, 0.0  ;;  %v19471_v27 = vmax.f32 %v19470_v43, 0.0 }
 0x63f   :  { %19460 = vst [vmem:[#allocation109_spill] sm:$0xff] %v16110_v3  ;;  %v5114_v21 = vadd.f32 %v5113_v16, %v16110_v3  ;;  %v5105_v53 = vadd.f32 %v5104_v61, %v16115_v10  ;;  %v5096_v60 = vadd.f32 %v5095_v50, %v16120_v7  ;;  %v5029_v17 = vmax.f32 %v5028_v19, %v16044_v37  ;;  %v19503_v37 = vld [vmem:[#allocation73_spill] sm:$0xff] }
 0x640   :  { %19463 = vst [vmem:[#allocation33_spill] sm:$0xff] %v16115_v10  ;;  %v16135_v15 = vmul.f32 %v15878_v4, %v19468_v56  ;;  %v16140_v1 = vmul.f32 %v15986_v36, %v19471_v27  ;;  %v5121_v16 = vadd.f32 %v5120_v35, %v16068_v11  ;;  %v5004_v61 = vmax.f32 %v5003_v30, %v16038_v63  ;;  %v19475_v27 = vld [vmem:[#allocation46_spill] sm:$0xff] }
 0x641   :  { %19466 = vst [vmem:[#allocation110_spill] sm:$0xff] %v16120_v7  ;;  %5115 = vadd.xlane.f32.xlu1 %v5114_v21  ;;  %5106 = vadd.xlane.f32.xlu0 %v5105_v53  ;;  %v5011_v9 = vmax.f32 %v5010_v24, %v15956_v22  ;;  %v5023_v50 = vmax.f32 %v5022_v14, %v16021_v18  ;;  %v19473_v56 = vmax.f32 %v15491_v40, 0.0  ;;  %v19476_v19 = vmax.f32 %v19475_v27, 0.0  ;;  %v19480_v14 = vld [vmem:[#allocation74_spill] sm:$0xff] }
 0x642   :  { %19469 = vst [vmem:[#allocation49_spill] sm:$0xff] %v16135_v15  ;;  %5097 = vadd.xlane.f32.xlu2 %v5096_v60  ;;  %v5138_v43 = vadd.f32 %v5137_v23, %v16135_v15  ;;  %v19478_v35 = vmax.f32 %v15507_v47, 0.0  ;;  %v5046_v53 = vmax.f32 %v5045_v52, %v16081_v58  ;;  %v19481_v60 = vmax.f32 %v19480_v14, 0.0  ;;  %v19483_v27 = vld [vmem:[#allocation94_spill] sm:$0xff] }
 0x643   :  { %19472 = vst [vmem:[#allocation82_spill] sm:$0xff] %v16140_v1  ;;  %v16150_v34 = vmul.f32 %v15982_v51, %v19473_v56  ;;  %v16156_v21 = vmul.f32 %v16102_v2, %v19476_v19  ;;  %v5030_v23 = vmax.f32 %v5029_v17, %v16004_v26  ;;  %v5012_v56 = vmax.f32 %v5011_v9, %v15912_v45  ;;  %v19486_v58 = vld [vmem:[#allocation98_spill] sm:$0xff] }
 0x644   :  { %v16161_v30 = vmul.f32 %v15982_v51, %v19478_v35  ;;  %v16167_v40 = vmul.f32 %v15838_v39, %v19481_v60  ;;  %v5139_v24 = vadd.f32 %v5138_v43, %v16140_v1  ;;  %v19484_v19 = vmax.f32 %v19483_v27, 0.0  ;;  %v19489_v43 = vld [vmem:[#allocation87_spill] sm:$0xff] }
 0x645   :  { %19474 = vst [vmem:[#allocation97_spill] sm:$0xff] %v16150_v34  ;;  %v5122_v35 = vadd.f32 %v5121_v16, %v16150_v34  ;;  %v5005_v52 = vmax.f32 %v5004_v61, %v16054_v13  ;;  %v5047_v14 = vmax.f32 %v5046_v53, %v16090_v48  ;;  %v19487_v60 = vmax.f32 %v19486_v58, 0.0 }
 0x646   :  { %19477 = vst [vmem:[#allocation25_spill] sm:$0xff] %v16156_v21  ;;  %v16175_v47 = vmul.f32 %v15803_v8, %v19484_v19  ;;  %v5031_v17 = vmax.f32 %v5030_v23, %v16068_v11  ;;  %v5013_v9 = vmax.f32 %v5012_v56, %v16026_v0  ;;  %v19490_v27 = vmax.f32 %v19489_v43, 0.0  ;;  %v19494_v23 = vld [vmem:[#allocation104_spill] sm:$0xff]  ;;  %v19497_v11 = vld [vmem:[#allocation29_spill] sm:$0xff] }
 0x647   :  { %19479 = vst [vmem:[#allocation59_spill] sm:$0xff] %v16161_v30  ;;  %v16183_v59 = vmul.f32 %v15807_v42, %v19487_v60  ;;  %v5024_v61 = vmax.f32 %v5023_v50, %v16110_v3  ;;  %v5123_v53 = vadd.f32 %v5122_v35, %v16156_v21  ;;  %v19492_v58 = vmax.f32 %v15417_v62, 0.0 }
 0x648   :  { %19482 = vst [vmem:[#allocation65_spill] sm:$0xff] %v16167_v40  ;;  %v16190_v19 = vmul.f32 %v15927_v31, %v19490_v27  ;;  %v5144_v16 = vadd.f32 %v16167_v40, %v16175_v47  ;;  %v19495_v48 = vmax.f32 %v19494_v23, 0.0  ;;  %v5006_v43 = vmax.f32 %v5005_v52, %v16120_v7 }
 0x649   :  { %19485 = vst [vmem:[#allocation126_spill] sm:$0xff] %v16175_v47  ;;  %v16199_v60 = vmul.f32 %v16102_v2, %v19492_v58  ;;  %v5140_v27 = vadd.f32 %v5139_v24, %v16161_v30  ;;  %v19498_v26 = vmax.f32 %v19497_v11, 0.0  ;;  %5025 = vmax.xlane.f32.xlu1 %v5024_v61  ;;  %5124 = vadd.xlane.f32.xlu0 %v5123_v53  ;;  %v19500_v58 = vld [vmem:[#allocation55_spill] sm:$0xff]  ;;  %v19504_v52 = vmax.f32 %v19503_v37, 0.0  ;;  %v19508_v53 = vld [vmem:[#allocation34_spill] sm:$0xff]  ;;  %v19511_v37 = vld [vmem:[#allocation32_spill] sm:$0xff] }
 0x64a   :  { %19488 = vst [vmem:[#allocation85_spill] sm:$0xff] %v16183_v59  ;;  %v16204_v56 = vmul.f32 %v15838_v39, %v19495_v48  ;;  %v5145_v35 = vadd.f32 %v5144_v16, %v16183_v59  ;;  %v5048_v62 = vmax.f32 %v5047_v14, %v16135_v15  ;;  %v19501_v23 = vmax.f32 %v19500_v58, 0.0  ;;  %5007 = vmax.xlane.f32.xlu2 %v5006_v43 }
 0x64b   :  { %19491 = vst [vmem:[#allocation108_spill] sm:$0xff] %v16190_v19  ;;  %v16211_v50 = vmul.f32 %v15878_v4, %v19498_v26  ;;  %v16223_v24 = vmul.f32 %v15803_v8, %v19504_v52  ;;  %v5032_v26 = vmax.f32 %v5031_v17, %v16150_v34  ;;  %v5014_v11 = vmax.f32 %v5013_v9, %v16031_v41  ;;  %v19514_v9 = vld [vmem:[#allocation67_spill] sm:$0xff]  ;;  %v19537_v41 = vld [vmem:[#allocation68_spill] sm:$0xff] }
 0x64c   :  { %19493 = vst [vmem:[#allocation84_spill] sm:$0xff] %v16199_v60  ;;  %v16218_v48 = vmul.f32 %v15986_v36, %v19501_v23  ;;  %v19506_v16 = vmax.f32 %v15514_v55, 0.0  ;;  %v5146_v14 = vadd.f32 %v5145_v35, %v16190_v19  ;;  %v19509_v58 = vmax.f32 %v19508_v53, 0.0 }
 0x64d   :  { %19496 = vst [vmem:[#allocation39_spill] sm:$0xff] %v16204_v56  ;;  %v19512_v52 = vmax.f32 %v19511_v37, 0.0  ;;  %v5126_v17 = vadd.f32 %v16204_v56, %v16223_v24  ;;  %v19515_v55 = vmax.f32 %v19514_v9, 0.0  ;;  %v5141_v35 = vadd.f32 %v5140_v27, %v16199_v60  ;;  %v19519_v37 = vld [vmem:[#allocation38_spill] sm:$0xff] }
 0x64e   :  { %19499 = vst [vmem:[#allocation83_spill] sm:$0xff] %v16211_v50  ;;  %v16230_v61 = vmul.f32 %v15982_v51, %v19506_v16  ;;  %v16236_v23 = vmul.f32 %v15807_v42, %v19509_v58  ;;  %v5049_v53 = vmax.f32 %v5048_v62, %v16140_v1  ;;  %v19517_v58 = vmax.f32 %v15427_v5, 0.0 }
 0x64f   :  { %19502 = vst [vmem:[#allocation43_spill] sm:$0xff] %v16218_v48  ;;  %v16241_v43 = vmul.f32 %v15927_v31, %v19512_v52  ;;  %v16248_v16 = vmul.f32 %v15838_v39, %v19515_v55  ;;  %v19520_v52 = vmax.f32 %v19519_v37, 0.0  ;;  %v5033_v38 = vmax.f32 %v5032_v26, %v16156_v21  ;;  %v19522_v55 = vld [vmem:[#allocation69_spill] sm:$0xff] }
 0x650   :  { %19505 = vst [vmem:[#allocation63_spill] sm:$0xff] %v16223_v24  ;;  %v16255_v15 = vmul.f32 %v16102_v2, %v19517_v58  ;;  %v5015_v9 = vmax.f32 %v5014_v11, %v16115_v10  ;;  %v19523_v13 = vmax.f32 %v19522_v55, 0.0  ;;  %v5127_v62 = vadd.f32 %v5126_v17, %v16236_v23  ;;  %v19525_v58 = vld [vmem:[#allocation86_spill] sm:$0xff]  ;;  %v19528_v26 = vld [vmem:[#allocation89_spill] sm:$0xff]  ;;  %v19568_v10 = vld [vmem:[#allocation103_spill] sm:$0xff] }
 0x651   :  { %19507 = vst [vmem:[#allocation28_spill] sm:$0xff] %v16230_v61  ;;  %v16260_v34 = vmul.f32 %v15803_v8, %v19520_v52  ;;  %v5147_v5 = vadd.f32 %v5146_v14, %v16211_v50  ;;  %v19526_v1 = vmax.f32 %v19525_v58, 0.0  ;;  %v19529_v21 = vmax.f32 %v19528_v26, 0.0  ;;  %v19531_v55 = vld [vmem:[#allocation122_spill] sm:$0xff]  ;;  %v19534_v14 = vld [vmem:[#allocation56_spill] sm:$0xff]  ;;  %5142 = vadd.xlane.f32.xlu1 %v5141_v35  ;;  %5034 = vmax.xlane.f32.xlu0 %v5033_v38 }
 0x652   :  { %19510 = vst [vmem:[#allocation81_spill] sm:$0xff] %v16236_v23  ;;  %v16267_v27 = vmul.f32 %v15878_v4, %v19523_v13  ;;  %v5128_v13 = vadd.f32 %v5127_v62, %v16241_v43  ;;  %v19532_v63 = vmax.f32 %v19531_v55, 0.0  ;;  %v19535_v58 = vmax.f32 %v19534_v14, 0.0  ;;  %v19540_v62 = vld [vmem:[#allocation106_spill] sm:$0xff]  ;;  %5016 = vmax.xlane.f32.xlu2 %v5015_v9 }
 0x653   :  { %19513 = vst [vmem:[#allocation44_spill] sm:$0xff] %v16241_v43  ;;  %v16274_v37 = vmul.f32 %v15986_v36, %v19526_v1  ;;  %v5171_v52 = vadd.f32 %v16248_v16, %v16260_v34  ;;  %v16281_v11 = vmul.f32 %v15838_v39, %v19529_v21  ;;  %v19538_v0 = vmax.f32 %v19537_v41, 0.0 }
 0x654   :  { %19516 = vst [vmem:[#allocation113_spill] sm:$0xff] %v16248_v16  ;;  %v16287_v17 = vmul.f32 %v15807_v42, %v19532_v63  ;;  %v16292_v1 = vmul.f32 %v15927_v31, %v19535_v58  ;;  %v5050_v21 = vmax.f32 %v5049_v53, %v16161_v30  ;;  %v5148_v26 = vadd.f32 %v5147_v5, %v16218_v48  ;;  %v19543_v63 = vld [vmem:[#allocation61_spill] sm:$0xff] }
 0x655   :  { %19518 = vst [vmem:[#allocation47_spill] sm:$0xff] %v16255_v15  ;;  %v16297_v7 = vmul.f32 %v15803_v8, %v19538_v0  ;;  %v19541_v33 = vmax.f32 %v19540_v62, 0.0  ;;  %v19544_v45 = vmax.f32 %v19543_v63, 0.0  ;;  %v5129_v41 = vadd.f32 %v5128_v13, %v16267_v27  ;;  %v19550_v62 = vld [vmem:[#allocation70_spill] sm:$0xff] }
 0x656   :  { %19521 = vst [vmem:[#allocation117_spill] sm:$0xff] %v16260_v34  ;;  %v5172_v0 = vadd.f32 %v5171_v52, %v16287_v17  ;;  %v5051_v5 = vmax.f32 %v5050_v21, %v16199_v60  ;;  %v5036_v38 = vmax.f32 %v16223_v24, %v16204_v56  ;;  %v5149_v21 = vadd.f32 %v5148_v26, %v16230_v61 }
 0x657   :  { %19524 = vst [vmem:[#allocation115_spill] sm:$0xff] %v16267_v27  ;;  %v16304_v55 = vmul.f32 %v15807_v42, %v19541_v33  ;;  %v16309_v14 = vmul.f32 %v15927_v31, %v19544_v45  ;;  %v5162_v53 = vadd.f32 %v16281_v11, %v16297_v7  ;;  %v19546_v33 = vmax.f32 %v15498_v49, 0.0 }
 0x658   :  { %19527 = vst [vmem:[#allocation125_spill] sm:$0xff] %v16274_v37  ;;  %v19548_v45 = vmax.f32 %v15408_v29, 0.0  ;;  %v5130_v52 = vadd.f32 %v5129_v41, %v16274_v37  ;;  %v5173_v13 = vadd.f32 %v5172_v0, %v16292_v1  ;;  %v5072_v49 = vmax.f32 %v16297_v7, %v16281_v11  ;;  %v19556_v0 = vld [vmem:[#allocation91_spill] sm:$0xff] }
 0x659   :  { %19530 = vst [vmem:[#allocation30_spill] sm:$0xff] %v16281_v11  ;;  %v16319_v58 = vmul.f32 %v15982_v51, %v19546_v33  ;;  %v5163_v9 = vadd.f32 %v5162_v53, %v16304_v55  ;;  %v19551_v63 = vmax.f32 %v19550_v62, 0.0  ;;  %v5037_v33 = vmax.f32 %v5036_v38, %v16236_v23  ;;  %v19559_v11 = vld [vmem:[#allocation80_spill] sm:$0xff]  ;;  %v19562_v62 = vld [vmem:[#allocation31_spill] sm:$0xff]  ;;  %5052 = vmax.xlane.f32.xlu1 %v5051_v5 }
 0x65a   :  { %19533 = vst [vmem:[#allocation99_spill] sm:$0xff] %v16287_v17  ;;  %v16324_v35 = vmul.f32 %v16102_v2, %v19548_v45  ;;  %v19553_v45 = vld [vmem:[#allocation124_spill] sm:$0xff]  ;;  %v19557_v60 = vmax.f32 %v19556_v0, 0.0  ;;  %v19569_v22 = vmax.f32 %v19568_v10, 0.0  ;;  %vm5229_vm12 = vcmask 1041409  }
 0x65b   :  { %19536 = vst [vmem:[#allocation118_spill] sm:$0xff] %v16292_v1  ;;  %v16337_v29 = vmul.f32 %v15878_v4, %v19551_v63  ;;  %v19554_v30 = vmax.f32 %v19553_v45, 0.0  ;;  %v19563_v63 = vmax.f32 %v19562_v62, 0.0  ;;  %v5164_v38 = vadd.f32 %v5163_v9, %v16309_v14 }
 0x65c   :  { %19539 = vst [vmem:[#allocation48_spill] sm:$0xff] %v16297_v7  ;;  %v16348_v53 = vmul.f32 %v15986_v36, %v19557_v60  ;;  %v19560_v7 = vmax.f32 %v19559_v11, 0.0  ;;  %v5038_v45 = vmax.f32 %v5037_v33, %v16241_v43  ;;  %v19565_v60 = vld [vmem:[#allocation72_spill] sm:$0xff]  ;;  %v16375_v9 = vmul.f32 %v15807_v42, %v19569_v22 }
 0x65d   :  { %19542 = vst [vmem:[#allocation77_spill] sm:$0xff] %v16304_v55  ;;  %v16343_v41 = vmul.f32 %v15838_v39, %v19554_v30  ;;  %v16358_v46 = vmul.f32 %v15986_v36, %v19563_v63  ;;  %v5150_v39 = vadd.f32 %v5149_v21, %v16255_v15  ;;  %v5131_v30 = vadd.f32 %v5130_v52, %v16319_v58  ;;  %v19571_v33 = vld [vmem:[#allocation88_spill] sm:$0xff] }
 0x65e   :  { %19545 = vst [vmem:[#allocation96_spill] sm:$0xff] %v16309_v14  ;;  %v16353_v26 = vmul.f32 %v15878_v4, %v19560_v7  ;;  %v19566_v0 = vmax.f32 %v19565_v60, 0.0  ;;  %v5174_v7 = vadd.f32 %v5173_v13, %v16337_v29  ;;  %v5073_v63 = vmax.f32 %v5072_v49, %v16304_v55 }
 0x65f   :  { %19547 = vst [vmem:[#allocation71_spill] sm:$0xff] %v16319_v58  ;;  %v5132_v52 = vadd.f32 %v5131_v30, %v16324_v35  ;;  %v5039_v21 = vmax.f32 %v5038_v45, %v16267_v27  ;;  %v19572_v60 = vmax.f32 %v19571_v33, 0.0  ;;  %5151 = vadd.xlane.f32.xlu0 %v5150_v39  ;;  %v19574_v22 = vmax.f32 %v15539_v25, 0.0 }
 0x660   :  { %19549 = vst [vmem:[#allocation100_spill] sm:$0xff] %v16324_v35  ;;  %v16367_v11 = vmul.f32 %v15803_v8, %v19566_v0  ;;  %v5165_v62 = vadd.f32 %v5164_v38, %v16353_v26  ;;  %v5175_v49 = vadd.f32 %v5174_v7, %v16348_v53  ;;  %v19578_v45 = vmax.f32 %v15527_v44, 0.0 }
 0x661   :  { %19552 = vst [vmem:[#allocation121_spill] sm:$0xff] %v16337_v29  ;;  %v16382_v8 = vmul.f32 %v15927_v31, %v19572_v60  ;;  %5133 = vadd.xlane.f32.xlu2 %v5132_v52  ;;  %v16393_v38 = vmul.f32 %v15982_v51, %v19574_v22  ;;  %v19576_v31 = vmax.f32 %v15474_v32, 0.0  ;;  %v5040_v5 = vmax.f32 %v5039_v21, %v16274_v37  ;;  %v19582_v52 = vld [vmem:[#allocation101_spill] sm:$0xff]  ;;  %v19585_v22 = vld [vmem:[#allocation78_spill] sm:$0xff] }
 0x662   :  { %19555 = vst [vmem:[#allocation93_spill] sm:$0xff] %v16343_v41  ;;  %v5063_v13 = vmax.f32 %v16367_v11, %v16343_v41  ;;  %v5166_v10 = vadd.f32 %v5165_v62, %v16358_v46  ;;  %v5153_v42 = vadd.f32 %v16343_v41, %v16367_v11  ;;  %v16405_v0 = vmul.f32 %v15982_v51, %v19578_v45 }
 0x663   :  { %19558 = vst [vmem:[#allocation116_spill] sm:$0xff] %v16348_v53  ;;  %v16398_v30 = vmul.f32 %v16102_v2, %v19576_v31  ;;  %v19580_v7 = vmax.f32 %v15447_v20, 0.0  ;;  %v5074_v62 = vmax.f32 %v5073_v63, %v16309_v14  ;;  %v19583_v33 = vmax.f32 %v19582_v52, 0.0 }
 0x664   :  { %19561 = vst [vmem:[#allocation45_spill] sm:$0xff] %v16353_v26  ;;  %v5064_v39 = vmax.f32 %v5063_v13, %v16375_v9  ;;  %v5154_v32 = vadd.f32 %v5153_v42, %v16375_v9  ;;  %v5176_v44 = vadd.f32 %v5175_v49, %v16393_v38  ;;  %v5167_v13 = vadd.f32 %v5166_v10, %v16405_v0 }
 0x665   :  { %19564 = vst [vmem:[#allocation51_spill] sm:$0xff] %v16358_v46  ;;  %v16410_v25 = vmul.f32 %v16102_v2, %v19580_v7  ;;  %v16417_v21 = vmul.f32 %v15878_v4, %v19583_v33  ;;  %v19586_v20 = vmax.f32 %v19585_v22, 0.0  ;;  %v5041_v42 = vmax.f32 %v5040_v5, %v16319_v58 }
 0x666   :  { %19567 = vst [vmem:[#allocation46_spill] sm:$0xff] %v16367_v11  ;;  %v5065_v60 = vmax.f32 %v5064_v39, %v16382_v8  ;;  %v5155_v63 = vadd.f32 %v5154_v32, %v16382_v8  ;;  %v5054_v45 = vmax.f32 %v16175_v47, %v16167_v40  ;;  %v5177_v4 = vadd.f32 %v5176_v44, %v16398_v30  ;;  %v19588_v44 = vld [vmem:[#allocation36_spill] sm:$0xff] }
 0x667   :  { %19570 = vst [vmem:[#allocation74_spill] sm:$0xff] %v16375_v9  ;;  %v16425_v31 = vmul.f32 %v15986_v36, %v19586_v20  ;;  %v5168_v39 = vadd.f32 %v5167_v13, %v16410_v25  ;;  %v5075_v49 = vmax.f32 %v5074_v62, %v16353_v26  ;;  %v5042_v7 = vmax.f32 %v5041_v42, %v16324_v35 }
 0x668   :  { %19573 = vst [vmem:[#allocation94_spill] sm:$0xff] %v16382_v8  ;;  %v5066_v10 = vmax.f32 %v5065_v60, %v16417_v21  ;;  %v5156_v36 = vadd.f32 %v5155_v63, %v16417_v21  ;;  %5178 = vadd.xlane.f32.xlu1 %v5177_v4  ;;  %v5055_v33 = vmax.f32 %v5054_v45, %v16183_v59  ;;  %v19589_v13 = vmax.f32 %v19588_v44, 0.0  ;;  %v19591_v60 = vld [vmem:[#allocation114_spill] sm:$0xff] }
 0x669   :  { %19575 = vst [vmem:[#allocation98_spill] sm:$0xff] %v16393_v38  ;;  %5169 = vadd.xlane.f32.xlu0 %v5168_v39  ;;  %v5076_v32 = vmax.f32 %v5075_v49, %v16358_v46  ;;  %5043 = vmax.xlane.f32.xlu2 %v5042_v7  ;;  %v19592_v22 = vmax.f32 %v19591_v60, 0.0  ;;  %v5081_v45 = vmax.f32 %v16260_v34, %v16248_v16  ;;  %vm5231_vm13 = vcmask 1042434  }
 0x66a   :  { %19577 = vst [vmem:[#allocation87_spill] sm:$0xff] %v16398_v30  ;;  %v5067_v5 = vmax.f32 %v5066_v10, %v16425_v31  ;;  %v5157_v52 = vadd.f32 %v5156_v36, %v16425_v31  ;;  %v16444_v62 = vmul.f32 %v15982_v51, %v19589_v13  ;;  %v5056_v63 = vmax.f32 %v5055_v33, %v16190_v19 }
 0x66b   :  { %19579 = vst [vmem:[#allocation104_spill] sm:$0xff] %v16405_v0  ;;  %v16449_v20 = vmul.f32 %v16102_v2, %v19592_v22  ;;  %v5077_v42 = vmax.f32 %v5076_v32, %v16405_v0  ;;  %v5082_v36 = vmax.f32 %v5081_v45, %v16287_v17  ;;  %v5303_v22 = vld [vmem:[%s18073_s10 + $0x8] sm:$0x3]  ;;  %vm5233_vm14 = vcmask 1043459  }
 0x66c   :  { %19581 = vst [vmem:[#allocation29_spill] sm:$0xff] %v16410_v25  ;;  %v5068_v4 = vmax.f32 %v5067_v5, %v16444_v62  ;;  %v5158_v39 = vadd.f32 %v5157_v52, %v16444_v62  ;;  %v5057_v2 = vmax.f32 %v5056_v63, %v16211_v50  ;;  %v5198_v63 = vld [vmem:[%s18072_s9 + $0x8] sm:$0x3]  ;;  %vm5235_vm15 = vcmask 1044484   ;;  %s16942_s9 = sld [smem:[#allocation8 + $0x2]] }
 0x66d   :  { %19584 = vst [vmem:[#allocation55_spill] sm:$0xff] %v16417_v21  ;;  %v5078_v49 = vmax.f32 %v5077_v42, %v16410_v25  ;;  %v5083_v32 = vmax.f32 %v5082_v36, %v16292_v1  ;;  %v5302_v42 = vld [vmem:[%s18073_s10] sm:$0xff]  ;;  %vm5237_vm0 = vcmask 1045509   ;;  %vm5239_vm3 = vcmask 1046534   ;;  %s16958_s10 = sld [smem:[#allocation8 + $0x3]] }
 0x66e   :  { %19587 = vst [vmem:[#allocation73_spill] sm:$0xff] %v16425_v31  ;;  %v5069_v51 = vmax.f32 %v5068_v4, %v16449_v20  ;;  %v5159_v10 = vadd.f32 %v5158_v39, %v16449_v20  ;;  %v5058_v7 = vmax.f32 %v5057_v2, %v16218_v48  ;;  %v16479_v4 = vpop.permute.xlu0 %5201  ;;  %vm5241_vm4 = vcmask 1047559  }
 0x66f   :  { %19590 = vst [vmem:[#allocation34_spill] sm:$0xff] %v16444_v62  ;;  %v5084_v33 = vmax.f32 %v5083_v32, %v16337_v29  ;;  %vm5248_vm5 = vcmask 64512   ;;  %vm5250_vm6 = vcmask 58368  }
 0x670   :  { %19593 = vst [vmem:[#allocation32_spill] sm:$0xff] %v16449_v20  ;;  %5079 = vmax.xlane.f32.xlu1 %v5078_v49  ;;  %v5059_v5 = vmax.f32 %v5058_v7, %v16230_v61 }
 0x671   :  { %5070 = vmax.xlane.f32.xlu0 %v5069_v51  ;;  %5160 = vadd.xlane.f32.xlu2 %v5159_v10  ;;  %v5085_v44 = vmax.f32 %v5084_v33, %v16348_v53  ;;  %v10077_v10 = vmov 1024.0  }
 0x672   :  { %v5060_v52 = vmax.f32 %v5059_v5, %v16255_v15  ;;  %9758 = vrcp.f32 %v10077_v10  ;;  %v19594_v10 = vld [vmem:[#allocation26_spill] sm:$0xff] }
 0x673   :  { %v5086_v13 = vmax.f32 %v5085_v44, %v16393_v38 }
 0x675   :  { %v5087_v60 = vmax.f32 %v5086_v13, %v16398_v30 }
 0x678   :  { %v9759_v32 = vpop.eup %9758 }
 0x679   :  { %5061 = vmax.xlane.f32.xlu2 %v5060_v52  ;;  %v5181_v5 = vmul.f32 1024.0, %v9759_v32  ;;  %vm5185_vm11 = vweird.f32 %v9759_v32 }
 0x67b   :  { %v5182_v52 = vsub.f32 1.0, %v5181_v5 }
 0x681   :  { %5088 = vmax.xlane.f32.xlu2 %v5087_v60  ;;  %v5183_v60 = vmul.f32 %v9759_v32, %v5182_v52 }
 0x685   :  { %5312 = vperm.xlu0 %9417, %v5303_v22   ;;  %v5184_v22 = vadd.f32 %v9759_v32, %v5183_v60 }
 0x687   :  { %v5186_v0 = vsel %vm5185_vm11, %v9759_v32, %v5184_v22 }
 0x689   :  { %5206 = vperm.xlu1 %9418, %v5198_v63  }
 0x699   :  { %5307 = vperm.xlu2 %9416, %v5302_v42  }
 0x6b4   :  { %v5107_v45 = vpop.xlane.xlu0 %5106  ;;  %v5116_v49 = vpop.xlane.xlu1 %5115 }
 0x6b5   :  { %v5098_v39 = vpop.xlane.xlu2 %5097  ;;  %v5188_v53 = vmul.f32 %v5186_v0, %v5107_v45  ;;  %v5189_v31 = vmul.f32 %v5186_v0, %v5116_v49 }
 0x6b6   :  { %v5187_v38 = vmul.f32 %v5186_v0, %v5098_v39 }
 0x6b7   :  { %v5271_v61 = vperm.slane %v5188_v53, %v19594_v10  ;;  %v5272_v45 = vperm.slane %v5189_v31, %v19594_v10 }
 0x6b8   :  { %v5270_v5 = vperm.slane %v5187_v38, %v19594_v10 }
 0x6ba   :  { %v5280_v53 = vsel %vm5229_vm12, %v5271_v61, %v5270_v5 }
 0x6bc   :  { %v5125_v2 = vpop.xlane.xlu0 %5124  ;;  %v5026_v7 = vpop.xlane.xlu1 %5025 }
 0x6bd   :  { %v5008_v51 = vpop.xlane.xlu2 %5007  ;;  %v5190_v50 = vmul.f32 %v5186_v0, %v5125_v2  ;;  %v5221_v39 = vperm.slane %v5026_v7, %v19594_v10 }
 0x6be   :  { %v5219_v62 = vperm.slane %v5008_v51, %v19594_v10 }
 0x6c4   :  { %v5035_v33 = vpop.xlane.xlu0 %5034  ;;  %v5143_v13 = vpop.xlane.xlu1 %5142 }
 0x6c5   :  { %v5017_v36 = vpop.xlane.xlu2 %5016  ;;  %v5192_v32 = vmul.f32 %v5186_v0, %v5143_v13 }
 0x6c6   :  { %v5220_v29 = vperm.slane %v5017_v36, %v19594_v10  ;;  %v5273_v36 = vperm.slane %v5190_v50, %v19594_v10 }
 0x6c8   :  { %v5230_v14 = vsel %vm5229_vm12, %v5220_v29, %v5219_v62  ;;  %v5222_v29 = vperm.slane %v5035_v33, %v19594_v10  ;;  %v5281_v62 = vsel %vm5231_vm13, %v5272_v45, %v5280_v53 }
 0x6c9   :  { %v5232_v49 = vsel %vm5231_vm13, %v5221_v39, %v5230_v14  ;;  %v5282_v31 = vsel %vm5233_vm14, %v5273_v36, %v5281_v62  ;;  %v5275_v14 = vperm.slane %v5192_v32, %v19594_v10 }
 0x6ca   :  { %v5234_v7 = vsel %vm5233_vm14, %v5222_v29, %v5232_v49 }
 0x6cc   :  { %v5053_v46 = vpop.xlane.xlu1 %5052 }
 0x6cd   :  { %v5224_v5 = vperm.slane %v5053_v46, %v19594_v10 }
 0x6d2   :  { %v5152_v42 = vpop.xlane.xlu0 %5151 }
 0x6d3   :  { %v5193_v50 = vmul.f32 %v5186_v0, %v5152_v42 }
 0x6d4   :  { %v5134_v44 = vpop.xlane.xlu2 %5133 }
 0x6d5   :  { %v5191_v52 = vmul.f32 %v5186_v0, %v5134_v44  ;;  %v5276_v42 = vperm.slane %v5193_v50, %v19594_v10 }
 0x6d7   :  { %v5274_v38 = vperm.slane %v5191_v52, %v19594_v10 }
 0x6d9   :  { %v5283_v22 = vsel %vm5235_vm15, %v5274_v38, %v5282_v31 }
 0x6da   :  { %v5284_v33 = vsel %vm5237_vm0, %v5275_v14, %v5283_v22 }
 0x6db   :  { %v5179_v1 = vpop.xlane.xlu1 %5178 }
 0x6dc   :  { %v5044_v63 = vpop.xlane.xlu2 %5043  ;;  %v5170_v60 = vpop.xlane.xlu0 %5169 }
 0x6dd   :  { %v5223_v51 = vperm.slane %v5044_v63, %v19594_v10  ;;  %v5196_v63 = vmul.f32 %v5186_v0, %v5179_v1  ;;  %v5195_v13 = vmul.f32 %v5186_v0, %v5170_v60  ;;  %v5285_v1 = vsel %vm5239_vm3, %v5276_v42, %v5284_v33 }
 0x6df   :  { %v5236_v55 = vsel %vm5235_vm15, %v5223_v51, %v5234_v7  ;;  %v5279_v46 = vperm.slane %v5196_v63, %v19594_v10  ;;  %v5278_v38 = vperm.slane %v5195_v13, %v19594_v10 }
 0x6e1   :  { %v5287_v31 = vsel %vm5229_vm12, %v5279_v46, %v5278_v38 }
 0x6e3   :  { %v5080_v45 = vpop.xlane.xlu1 %5079 }
 0x6e4   :  { %v5161_v26 = vpop.xlane.xlu2 %5160  ;;  %v5071_v52 = vpop.xlane.xlu0 %5070  ;;  %v5227_v60 = vperm.slane %v5080_v45, %v19594_v10 }
 0x6e5   :  { %v5194_v44 = vmul.f32 %v5186_v0, %v5161_v26  ;;  %v5238_v26 = vsel %vm5237_vm0, %v5224_v5, %v5236_v55  ;;  %v5226_v49 = vperm.slane %v5071_v52, %v19594_v10 }
 0x6e7   :  { %v5277_v39 = vperm.slane %v5194_v44, %v19594_v10 }
 0x6e9   :  { %v5286_v51 = vsel %vm5241_vm4, %v5277_v39, %v5285_v1 }
 0x6ea   :  { %v5290_v32 = vmul.f32 %v5286_v51, %v16479_v4 }
 0x6ec   :  { %v5062_v2 = vpop.xlane.xlu2 %5061 }
 0x6ed   :  { %v5225_v61 = vperm.slane %v5062_v2, %v19594_v10 }
 0x6ef   :  { %v5240_v36 = vsel %vm5239_vm3, %v5225_v61, %v5238_v26  ;;  %v5292_v61 = vsel %vm5248_vm5, %v5290_v32, 0.0 }
 0x6f0   :  { %v5242_v2 = vsel %vm5241_vm4, %v5226_v49, %v5240_v36 }
 0x6f1   :  { %v5246_v55 = vmul.f32 %v5242_v2, %v16479_v4  ;;  %v19595_v2 = vlaneseq }
 0x6f3   :  { %v5249_v50 = vsel %vm5248_vm5, %v5246_v55, 0.0 }
 0x6f4   :  { %v5089_v53 = vpop.xlane.xlu2 %5088 }
 0x6f5   :  { %v5228_v0 = vperm.slane %v5089_v53, %v19594_v10 }
 0x6f7   :  { %v5243_v62 = vsel %vm5229_vm12, %v5228_v0, %v5227_v60  ;;  %v5357_v0 = vshrl.u32 %v19595_v2, 7  ;;  %v5313_v60 = vpop.permute.xlu0 %5312 }
 0x6f9   :  { %9719 = vset.pattern.permute.xlu1 %v5357_v0  ;;  %9720 = vset.pattern.permute.xlu0 %v5357_v0 }
 0x6fa   :  { %9721 = vset.pattern.permute.xlu2 %v5357_v0 }
 0x6fb   :  { %v5207_v29 = vpop.permute.xlu1 %5206 }
 0x6fc   :  { %v5247_v7 = vmul.f32 %v5243_v62, %v5207_v29  ;;  %v5291_v44 = vmul.f32 %v5287_v31, %v5207_v29  ;;  %v5308_v55 = vpop.permute.xlu2 %5307 }
 0x6fe   :  { %v5251_v22 = vsel %vm5250_vm6, %v5247_v7, 0.0  ;;  %v5293_v14 = vsel %vm5250_vm6, %v5291_v44, 0.0 }
 0x6ff   :  { %v5252_v5 = vadd.f32 %v5251_v22, %v5249_v50  ;;  %v5294_v63 = vadd.f32 %v5293_v14, %v5292_v61 }
 0x701   :  { %v5253_v52 = vrot.slane %v5252_v5, 4  ;;  %v5295_v33 = vrot.slane %v5294_v63, 4 }
 0x703   :  { %v5254_v13 = vadd.f32 %v5253_v52, %v5252_v5  ;;  %v5296_v45 = vadd.f32 %v5295_v33, %v5294_v63 }
 0x705   :  { %v5255_v4 = vrot.slane %v5254_v13, 2  ;;  %v5297_v39 = vrot.slane %v5296_v45, 2 }
 0x707   :  { %v5256_v26 = vadd.f32 %v5255_v4, %v5254_v13  ;;  %v5298_v42 = vadd.f32 %v5297_v39, %v5296_v45 }
 0x709   :  { %v5257_v36 = vrot.slane %v5256_v26, 1  ;;  %v5299_v53 = vrot.slane %v5298_v42, 1 }
 0x70b   :  { %v5258_v49 = vadd.f32 %v5257_v36, %v5256_v26  ;;  %v5300_v46 = vadd.f32 %v5299_v53, %v5298_v42 }
 0x70d   :  { %v5259_v1 = vmax.f32 %v5258_v49, 0.0  ;;  %v5301_v38 = vmax.f32 %v5300_v46, 0.0 }
 0x70f   :  { %v5304_v51 = vadd.f32 %v5301_v38, %v5259_v1 }
 0x711   :  { %v5316_v32 = vmul.f32 %v5313_v60, %v5304_v51  ;;  %v5315_v29 = vmul.f32 %v5308_v55, %v5304_v51 }
 0x713   :  { %v8407_v62 = vmul.f32 -1.442695, %v5316_v32  ;;  %v8406_v31 = vmul.f32 -1.442695, %v5315_v29 }
 0x715   :  { %9760 = vpow2.f32 %v8407_v62 }
 0x716   :  { %9762 = vpow2.f32 %v8406_v31 }
 0x71b   :  { %v9761_v7 = vpop.eup %9760 }
 0x71c   :  { %v9763_v44 = vpop.eup %9762  ;;  %v5324_v50 = vadd.f32 1.0, %v9761_v7 }
 0x71d   :  { %v5323_v22 = vadd.f32 1.0, %v9763_v44 }
 0x71e   :  { %v5351_v51 = vand.u32 2147483648, %v5324_v50  ;;  %vm5345_vm12 = vweird.f32 %v5324_v50  ;;  %v5349_v60 = vand.u32 2147483647, %v5324_v50 }
 0x71f   :  { %9764 = vrcp.f32 %v5323_v22  ;;  %v5336_v52 = vand.u32 2147483648, %v5323_v22  ;;  %v5334_v13 = vand.u32 2147483647, %v5323_v22  ;;  %vm5330_vm8 = vweird.f32 %v5323_v22 }
 0x720   :  { %9766 = vrcp.f32 %v5324_v50  ;;  %v5352_v29 = vor.u32 1.1754944e-38, %v5351_v51  ;;  %vm5350_vm14 = vcmp.eq.f32.partialorder %v5349_v60, 8.507059e+37 }
 0x721   :  { %v5337_v39 = vor.u32 1.1754944e-38, %v5336_v52  ;;  %vm5335_vm10 = vcmp.eq.f32.partialorder %v5334_v13, 8.507059e+37  ;;  %v19598_v52 = vld [vmem:[#allocation75_spill] sm:$0xff] }
 0x725   :  { %v9765_v61 = vpop.eup %9764 }
 0x726   :  { %v5326_v14 = vmul.f32 %v9765_v61, %v5323_v22  ;;  %v9767_v5 = vpop.eup %9766  ;;  %vm5331_vm7 = vweird.f32 %v9765_v61 }
 0x727   :  { %v5341_v45 = vmul.f32 %v9767_v5, %v5324_v50  ;;  %vm5332_vm9 = vmor %vm5330_vm8, %vm5331_vm7  ;;  %vm5346_vm11 = vweird.f32 %v9767_v5  ;;  %v19596_v50 = vld [vmem:[#allocation52_spill] sm:$0xff] }
 0x728   :  { %v5327_v63 = vsub.f32 1.0, %v5326_v14  ;;  %vm5347_vm13 = vmor %vm5345_vm12, %vm5346_vm11 }
 0x729   :  { %v5342_v42 = vsub.f32 1.0, %v5341_v45  ;;  %v19601_v45 = vld [vmem:[#allocation102_spill] sm:$0xff] }
 0x72a   :  { %v5328_v33 = vmul.f32 %v9765_v61, %v5327_v63 }
 0x72b   :  { %v5343_v1 = vmul.f32 %v9767_v5, %v5342_v42 }
 0x72c   :  { %v5329_v4 = vadd.f32 %v9765_v61, %v5328_v33 }
 0x72d   :  { %v5344_v38 = vadd.f32 %v9767_v5, %v5343_v1 }
 0x72e   :  { %v5333_v26 = vsel %vm5332_vm9, %v9765_v61, %v5329_v4 }
 0x72f   :  { %v5338_v36 = vsel %vm5335_vm10, %v5337_v39, %v5333_v26  ;;  %v5348_v32 = vsel %vm5347_vm13, %v9767_v5, %v5344_v38  ;;  %v19600_v5 = vld [vmem:[#allocation111_spill] sm:$0xff] }
 0x730   :  { %v5369_v53 = vperm.slane %v5338_v36, 2  ;;  %v5362_v49 = vperm.slane %v5338_v36, 1  ;;  %v5355_v46 = vperm.slane %v5338_v36, 0  ;;  %v5383_v2 = vperm.slane %v5338_v36, 4 }
 0x731   :  { %v5397_v0 = vperm.slane %v5338_v36, 6  ;;  %v5376_v55 = vperm.slane %v5338_v36, 3  ;;  %v5353_v62 = vsel %vm5350_vm14, %v5352_v29, %v5348_v32  ;;  %v5404_v31 = vperm.slane %v5338_v36, 7 }
 0x732   :  { %5374 = vperm.xlu2 %9721, %v5369_v53   ;;  %5367 = vperm.xlu0 %9720, %v5362_v49   ;;  %v5418_v7 = vperm.slane %v5353_v62, 1  ;;  %v5390_v44 = vperm.slane %v5338_v36, 5  ;;  %v5411_v22 = vperm.slane %v5353_v62, 0  ;;  %v19614_v62 = vld [vmem:[#allocation90_spill] sm:$0xff] }
 0x733   :  { %5360 = vperm.xlu1 %9719, %v5355_v46  }
 0x73a   :  { %5388 = vperm.xlu2 %9721, %v5383_v2   ;;  %5402 = vperm.xlu0 %9720, %v5397_v0  }
 0x73b   :  { %5381 = vperm.xlu1 %9719, %v5376_v55  }
 0x742   :  { %5409 = vperm.xlu2 %9721, %v5404_v31   ;;  %5423 = vperm.xlu0 %9720, %v5418_v7  }
 0x743   :  { %5395 = vperm.xlu1 %9719, %v5390_v44   ;;  %v19615_v44 = vld [vmem:[#allocation33_spill] sm:$0xff] }
 0x74b   :  { %5416 = vperm.xlu1 %9719, %v5411_v22  }
 0x78c   :  { %v5375_v61 = vpop.permute.xlu2 %5374 }
 0x78d   :  { %v16511_v63 = vmul.f32 %v5375_v61, %v19596_v50  ;;  %v16514_v33 = vmul.f32 %v5375_v61, %v19598_v52  ;;  %v16517_v13 = vmul.f32 %v5375_v61, %v19600_v5  ;;  %v16520_v4 = vmul.f32 %v5375_v61, %v19601_v45  ;;  %v19630_v5 = vld [vmem:[#allocation40_spill] sm:$0xff]  ;;  %v19632_v52 = vld [vmem:[#allocation79_spill] sm:$0xff] }
 0x78e   :  { %v16523_v39 = vmul.f32 %v5375_v61, %v15905_v28  ;;  %v16526_v26 = vmul.f32 %v5375_v61, %v16010_v54  ;;  %v16529_v42 = vmul.f32 %v5375_v61, %v16021_v18  ;;  %v16532_v36 = vmul.f32 %v5375_v61, %v16110_v3  ;;  %v19617_v61 = vld [vmem:[#allocation92_spill] sm:$0xff]  ;;  %v19623_v54 = vld [vmem:[#allocation66_spill] sm:$0xff] }
 0x78f   :  { %19597 = vst [vmem:[#allocation67_spill] sm:$0xff] %v16511_v63 }
 0x790   :  { %19599 = vst [vmem:[#allocation38_spill] sm:$0xff] %v16514_v33 }
 0x791   :  { %19602 = vst [vmem:[#allocation69_spill] sm:$0xff] %v16523_v39 }
 0x792   :  { %19603 = vst [vmem:[#allocation86_spill] sm:$0xff] %v16526_v26 }
 0x793   :  { %19604 = vst [vmem:[#allocation89_spill] sm:$0xff] %v16529_v42 }
 0x794   :  { %v5389_v14 = vpop.permute.xlu2 %5388  ;;  %19605 = vst [vmem:[#allocation122_spill] sm:$0xff] %v16532_v36 }
 0x795   :  { %v16535_v53 = vmul.f32 %v5389_v14, %v16223_v24  ;;  %v16538_v49 = vmul.f32 %v5389_v14, %v16204_v56  ;;  %v16541_v46 = vmul.f32 %v5389_v14, %v16236_v23  ;;  %v16544_v38 = vmul.f32 %v5389_v14, %v16241_v43  ;;  %v19625_v43 = vld [vmem:[#allocation35_spill] sm:$0xff]  ;;  %v19626_v56 = vld [vmem:[#allocation60_spill] sm:$0xff] }
 0x796   :  { %v16547_v51 = vmul.f32 %v5389_v14, %v16267_v27  ;;  %v16550_v2 = vmul.f32 %v5389_v14, %v16274_v37  ;;  %v16553_v0 = vmul.f32 %v5389_v14, %v16319_v58  ;;  %v19619_v37 = vld [vmem:[#allocation95_spill] sm:$0xff] }
 0x797   :  { %19606 = vst [vmem:[#allocation56_spill] sm:$0xff] %v16535_v53  ;;  %v19621_v27 = vld [vmem:[#allocation123_spill] sm:$0xff] }
 0x798   :  { %19607 = vst [vmem:[#allocation68_spill] sm:$0xff] %v16538_v49 }
 0x799   :  { %19608 = vst [vmem:[#allocation106_spill] sm:$0xff] %v16547_v51 }
 0x79a   :  { %19609 = vst [vmem:[#allocation61_spill] sm:$0xff] %v16550_v2 }
 0x79b   :  { %19610 = vst [vmem:[#allocation70_spill] sm:$0xff] %v16553_v0 }
 0x79c   :  { %v16567_v7 = vpop.permute.xlu2 %5409 }
 0x79d   :  { %v16658_v10 = vmul.f32 %v16567_v7, %v16343_v41 }
 0x79f   :  { %19644 = vst [vmem:[#allocation138_spill] sm:$0xff] %v16658_v10 }
 0x7a4   :  { %v5368_v1 = vpop.permute.xlu0 %5367 }
 0x7a5   :  { %v5361_v60 = vpop.permute.xlu1 %5360  ;;  %v16556_v55 = vmul.f32 %v5368_v1, %v15836_v12  ;;  %v16559_v32 = vmul.f32 %v5368_v1, %v15886_v6  ;;  %v16562_v29 = vmul.f32 %v5368_v1, %v15874_v57  ;;  %v16565_v31 = vmul.f32 %v5368_v1, %v19614_v62  ;;  %v19634_v57 = vld [vmem:[#allocation41_spill] sm:$0xff] }
 0x7a6   :  { %v16570_v22 = vmul.f32 %v5368_v1, %v19615_v44  ;;  %v16573_v58 = vmul.f32 %v5361_v60, %v19617_v61  ;;  %v16576_v3 = vmul.f32 %v5361_v60, %v19619_v37  ;;  %v16579_v18 = vmul.f32 %v5361_v60, %v19621_v27  ;;  %v19628_v44 = vld [vmem:[#allocation110_spill] sm:$0xff] }
 0x7a7   :  { %19611 = vst [vmem:[#allocation124_spill] sm:$0xff] %v16556_v55  ;;  %v16582_v28 = vmul.f32 %v5368_v1, %v19623_v54  ;;  %v16585_v23 = vmul.f32 %v5361_v60, %v19625_v43  ;;  %v16588_v45 = vmul.f32 %v5361_v60, %v19626_v56  ;;  %v16591_v24 = vmul.f32 %v5361_v60, %v19628_v44  ;;  %v19636_v54 = vld [vmem:[#allocation128_spill] sm:$0xff] }
 0x7a8   :  { %19612 = vst [vmem:[#allocation91_spill] sm:$0xff] %v16559_v32  ;;  %v16594_v62 = vmul.f32 %v5368_v1, %v19630_v5  ;;  %v16597_v50 = vmul.f32 %v5368_v1, %v19632_v52  ;;  %v16600_v27 = vmul.f32 %v5361_v60, %v19634_v57  ;;  %v16603_v6 = vmul.f32 %v5361_v60, %v19636_v54 }
 0x7a9   :  { %19613 = vst [vmem:[#allocation80_spill] sm:$0xff] %v16562_v29  ;;  %v16606_v43 = vmul.f32 %v5389_v14, %v16324_v35  ;;  %v5577_v56 = vadd.f32 %v16556_v55, %v16573_v58  ;;  %v16612_v44 = vmul.f32 %v16567_v7, %v16449_v20  ;;  %v16616_v1 = vmul.f32 %v16567_v7, %v16375_v9 }
 0x7aa   :  { %19616 = vst [vmem:[#allocation31_spill] sm:$0xff] %v16570_v22  ;;  %v5586_v52 = vadd.f32 %v16559_v32, %v16576_v3  ;;  %v16622_v60 = vadd.f32 %v16562_v29, %v16579_v18  ;;  %v5568_v14 = vmax.f32 %v16591_v24, %v16570_v22  ;;  %v16628_v35 = vmul.f32 %v16567_v7, %v16367_v11 }
 0x7ab   :  { %19618 = vst [vmem:[#allocation72_spill] sm:$0xff] %v16573_v58  ;;  %v16632_v20 = vadd.f32 %v16565_v31, %v16585_v23  ;;  %v16636_v54 = vadd.f32 %v16582_v28, %v16588_v45  ;;  %v5523_v57 = vmax.f32 %v16579_v18, %v16562_v29  ;;  %v5505_v9 = vmax.f32 %v16573_v58, %v16556_v55  ;;  %v19645_v29 = vld [vmem:[#allocation64_spill] sm:$0xff]  ;;  %v19647_v55 = vld [vmem:[#allocation62_spill] sm:$0xff] }
 0x7ac   :  { %19620 = vst [vmem:[#allocation103_spill] sm:$0xff] %v16576_v3  ;;  %v16638_v5 = vpop.permute.xlu0 %5402  ;;  %v16646_v11 = vadd.f32 %v16594_v62, %v16600_v27  ;;  %v16650_v37 = vadd.f32 %v16597_v50, %v16603_v6  ;;  %v16654_v12 = vadd.f32 %v16570_v22, %v16591_v24  ;;  %v5514_v2 = vmax.f32 %v16576_v3, %v16559_v32  ;;  %v19654_v3 = vld [vmem:[#allocation37_spill] sm:$0xff] }
 0x7ad   :  { %19622 = vst [vmem:[#allocation88_spill] sm:$0xff] %v16579_v18  ;;  %v5382_v61 = vpop.permute.xlu1 %5381  ;;  %v16671_v22 = vmul.f32 %v16638_v5, %v16218_v48  ;;  %v16678_v41 = vmul.f32 %v16638_v5, %v16255_v15  ;;  %v16686_v32 = vmul.f32 %v16638_v5, %v16183_v59  ;;  %v5506_v48 = vmax.f32 %v5505_v9, %v16511_v63  ;;  %v19659_v9 = vld [vmem:[#allocation97_spill] sm:$0xff] }
 0x7ae   :  { %19624 = vst [vmem:[#allocation101_spill] sm:$0xff] %v16582_v28  ;;  %v16661_v18 = vmul.f32 %v5382_v61, %v19645_v29  ;;  %v16664_v58 = vmul.f32 %v5382_v61, %v19647_v55  ;;  %v5569_v29 = vmax.f32 %v5568_v14, %v16532_v36  ;;  %v19652_v55 = vld [vmem:[#allocation76_spill] sm:$0xff] }
 0x7af   :  { %19627 = vst [vmem:[#allocation78_spill] sm:$0xff] %v16588_v45 }
 0x7b0   :  { %19629 = vst [vmem:[#allocation36_spill] sm:$0xff] %v16591_v24  ;;  %v19649_v24 = vld [vmem:[#allocation25_spill] sm:$0xff]  ;;  %v5507_v26 = vmax.f32 %v5506_v48, %v16661_v18 }
 0x7b1   :  { %19631 = vst [vmem:[#allocation114_spill] sm:$0xff] %v16594_v62  ;;  %v16682_v62 = vmul.f32 %v5382_v61, %v19652_v55  ;;  %v19657_v55 = vld [vmem:[#allocation119_spill] sm:$0xff] }
 0x7b2   :  { %19633 = vst [vmem:[#allocation129_spill] sm:$0xff] %v16597_v50 }
 0x7b3   :  { %19635 = vst [vmem:[#allocation130_spill] sm:$0xff] %v16600_v27  ;;  %v16674_v27 = vmul.f32 %v5382_v61, %v19649_v24  ;;  %v16691_v24 = vmul.f32 %v5382_v61, %v19654_v3 }
 0x7b4   :  { %19637 = vst [vmem:[#allocation131_spill] sm:$0xff] %v16603_v6  ;;  %v19680_v6 = vld [vmem:[#allocation59_spill] sm:$0xff] }
 0x7b5   :  { %19638 = vst [vmem:[#allocation132_spill] sm:$0xff] %v16606_v43  ;;  %v5570_v15 = vmax.f32 %v5569_v29, %v16674_v27  ;;  %v16716_v29 = vpop.permute.xlu0 %5423 }
 0x7b6   :  { %19639 = vst [vmem:[#allocation133_spill] sm:$0xff] %v16612_v44 }
 0x7b7   :  { %19640 = vst [vmem:[#allocation134_spill] sm:$0xff] %v16616_v1  ;;  %v5571_v3 = vmax.f32 %v5570_v15, %v16606_v43  ;;  %v5396_v15 = vpop.permute.xlu1 %5395 }
 0x7b8   :  { %19641 = vst [vmem:[#allocation135_spill] sm:$0xff] %v16628_v35 }
 0x7b9   :  { %19642 = vst [vmem:[#allocation136_spill] sm:$0xff] %v16646_v11  ;;  %v16699_v11 = vmul.f32 %v5382_v61, %v19657_v55  ;;  %v5508_v55 = vmax.f32 %v5507_v26, %v16535_v53  ;;  %v19671_v26 = vld [vmem:[#allocation53_spill] sm:$0xff] }
 0x7ba   :  { %19643 = vst [vmem:[#allocation137_spill] sm:$0xff] %v16650_v37  ;;  %v5578_v37 = vadd.f32 %v5577_v56, %v16511_v63  ;;  %v5524_v56 = vmax.f32 %v5523_v57, %v16517_v13  ;;  %v5515_v57 = vmax.f32 %v5514_v2, %v16514_v33  ;;  %v16705_v63 = vmul.f32 %v5382_v61, %v19659_v9 }
 0x7bb   :  { %19646 = vst [vmem:[#allocation139_spill] sm:$0xff] %v16661_v18  ;;  %v16727_v9 = vmul.f32 %v16716_v29, %v16398_v30  ;;  %v16746_v30 = vmul.f32 %v16716_v29, %v16287_v17 }
 0x7bc   :  { %19648 = vst [vmem:[#allocation140_spill] sm:$0xff] %v16671_v22  ;;  %v19655_v22 = vld [vmem:[#allocation105_spill] sm:$0xff]  ;;  %v5579_v14 = vadd.f32 %v5578_v37, %v16661_v18  ;;  %v5525_v59 = vmax.f32 %v5524_v56, %v16664_v58  ;;  %v16714_v37 = vmul.f32 %v16638_v5, %v16167_v40  ;;  %v5516_v48 = vmax.f32 %v5515_v57, %v16682_v62  ;;  %v19665_v57 = vld [vmem:[#allocation58_spill] sm:$0xff] }
 0x7bd   :  { %19650 = vst [vmem:[#allocation141_spill] sm:$0xff] %v16674_v27  ;;  %v16694_v0 = vmul.f32 %v5382_v61, %v19655_v22  ;;  %v16710_v22 = vmul.f32 %v16638_v5, %v16175_v47  ;;  %v16723_v61 = vmul.f32 %v16567_v7, %v16382_v8  ;;  %v5587_v40 = vadd.f32 %v5586_v52, %v16514_v33  ;;  %v19669_v8 = vld [vmem:[#allocation127_spill] sm:$0xff]  ;;  %v19672_v52 = vld [vmem:[#allocation84_spill] sm:$0xff] }
 0x7be   :  { %19651 = vst [vmem:[#allocation142_spill] sm:$0xff] %v16678_v41  ;;  %v5526_v56 = vmax.f32 %v5525_v59, %v16541_v46  ;;  %v5580_v2 = vadd.f32 %v5579_v14, %v16535_v53  ;;  %v16733_v59 = vmul.f32 %v16567_v7, %v16417_v21  ;;  %v16736_v47 = vmul.f32 %v5396_v15, %v19665_v57  ;;  %v19667_v14 = vld [vmem:[#allocation120_spill] sm:$0xff] }
 0x7bf   :  { %19653 = vst [vmem:[#allocation143_spill] sm:$0xff] %v16686_v32  ;;  %v16739_v18 = vmul.f32 %v5396_v15, %v19667_v14  ;;  %v16749_v53 = vmul.f32 %v5396_v15, %v19671_v26  ;;  %v16752_v33 = vmul.f32 %v5396_v15, %v19672_v52  ;;  %v16756_v21 = vmul.f32 %v16716_v29, %v16260_v34  ;;  %v19678_v52 = vld [vmem:[#allocation82_spill] sm:$0xff] }
 0x7c0   :  { %19656 = vst [vmem:[#allocation144_spill] sm:$0xff] %v16694_v0  ;;  %v16760_v14 = vmul.f32 %v16716_v29, %v16248_v16  ;;  %v5509_v57 = vmax.f32 %v5508_v55, %v16736_v47  ;;  %v5517_v17 = vmax.f32 %v5516_v48, %v16538_v49  ;;  %v5581_v26 = vadd.f32 %v5580_v2, %v16736_v47 }
 0x7c1   :  { %19658 = vst [vmem:[#allocation145_spill] sm:$0xff] %v16699_v11  ;;  %v16742_v11 = vmul.f32 %v5396_v15, %v19669_v8  ;;  %v16770_v42 = vmul.f32 %v5396_v15, %v19678_v52  ;;  %v5572_v34 = vmax.f32 %v5571_v3, %v16752_v33  ;;  %v5588_v51 = vadd.f32 %v5587_v40, %v16682_v62 }
 0x7c2   :  { %19660 = vst [vmem:[#allocation146_spill] sm:$0xff] %v16705_v63  ;;  %v5518_v55 = vmax.f32 %v5517_v17, %v16739_v18  ;;  %v5582_v48 = vadd.f32 %v5581_v26, %v16710_v22  ;;  %v16779_v2 = vmul.f32 %v5396_v15, %v19680_v6  ;;  %v5532_v3 = vmax.f32 %v16585_v23, %v16565_v31  ;;  %v16792_v26 = vpop.permute.xlu1 %5416 }
 0x7c3   :  { %19661 = vst [vmem:[#allocation147_spill] sm:$0xff] %v16710_v22  ;;  %v5527_v8 = vmax.f32 %v5526_v56, %v16742_v11  ;;  %v5510_v56 = vmax.f32 %v5509_v57, %v16710_v22  ;;  %v5589_v52 = vadd.f32 %v5588_v51, %v16538_v49  ;;  %v16790_v17 = vmul.f32 %v16638_v5, %v16190_v19  ;;  %v19686_v19 = vld [vmem:[#allocation48_spill] sm:$0xff]  ;;  %v19688_v49 = vld [vmem:[#allocation30_spill] sm:$0xff] }
 0x7c4   :  { %19662 = vst [vmem:[#allocation148_spill] sm:$0xff] %v16723_v61  ;;  %v5519_v57 = vmax.f32 %v5518_v55, %v16714_v37  ;;  %v5533_v6 = vmax.f32 %v5532_v3, %v16520_v4  ;;  %v16808_v22 = vmul.f32 %v16792_v26, %v19686_v19 }
 0x7c5   :  { %19663 = vst [vmem:[#allocation149_spill] sm:$0xff] %v16727_v9  ;;  %v5528_v16 = vmax.f32 %v5527_v8, %v16686_v32  ;;  %v5511_v8 = vmax.f32 %v5510_v56, %v16628_v35  ;;  %v5590_v51 = vadd.f32 %v5589_v52, %v16739_v18  ;;  %v19684_v56 = vld [vmem:[#allocation77_spill] sm:$0xff] }
 0x7c6   :  { %19664 = vst [vmem:[#allocation150_spill] sm:$0xff] %v16733_v59  ;;  %v19676_v59 = vld [vmem:[#allocation49_spill] sm:$0xff]  ;;  %v16804_v55 = vmul.f32 %v16792_v26, %v19684_v56  ;;  %v5520_v52 = vmax.f32 %v5519_v57, %v16658_v10  ;;  %v5534_v3 = vmax.f32 %v5533_v6, %v16691_v24 }
 0x7c7   :  { %19666 = vst [vmem:[#allocation151_spill] sm:$0xff] %v16736_v47  ;;  %v16767_v63 = vmul.f32 %v5396_v15, %v19676_v59  ;;  %v5573_v59 = vmax.f32 %v5572_v34, %v16678_v41  ;;  %v5529_v40 = vmax.f32 %v5528_v16, %v16616_v1  ;;  %v5583_v34 = vadd.f32 %v5582_v48, %v16628_v35 }
 0x7c8   :  { %19668 = vst [vmem:[#allocation152_spill] sm:$0xff] %v16739_v18  ;;  %v16800_v16 = vmul.f32 %v16792_v26, %v16410_v25  ;;  %v5591_v48 = vadd.f32 %v5590_v51, %v16714_v37  ;;  %v5596_v25 = vadd.f32 %v16622_v60, %v16517_v13  ;;  %v5512_v19 = vmax.f32 %v5511_v8, %v16808_v22  ;;  %v19690_v8 = vld [vmem:[#allocation118_spill] sm:$0xff] }
 0x7c9   :  { %19670 = vst [vmem:[#allocation153_spill] sm:$0xff] %v16746_v30  ;;  %v5574_v15 = vmax.f32 %v5573_v59, %v16612_v44  ;;  %v16812_v59 = vmul.f32 %v16792_v26, %v19688_v49  ;;  %v5530_v35 = vmax.f32 %v5529_v40, %v16804_v55  ;;  %v5584_v18 = vadd.f32 %v5583_v34, %v16808_v22 }
 0x7ca   :  { %19673 = vst [vmem:[#allocation154_spill] sm:$0xff] %v16752_v33  ;;  %v5592_v47 = vadd.f32 %v5591_v48, %v16658_v10  ;;  %v5535_v57 = vmax.f32 %v5534_v3, %v16544_v38  ;;  %v5597_v51 = vadd.f32 %v5596_v25, %v16664_v58  ;;  %v16834_v40 = vmax.f32 %v5512_v19, %v16756_v21  ;;  %v19692_v19 = vld [vmem:[#allocation96_spill] sm:$0xff] }
 0x7cb   :  { %19674 = vst [vmem:[#allocation155_spill] sm:$0xff] %v16756_v21  ;;  %v5575_v56 = vmax.f32 %v5574_v15, %v16800_v16  ;;  %v5521_v49 = vmax.f32 %v5520_v52, %v16812_v59  ;;  %v16831_v60 = vmax.f32 %v5530_v35, %v16746_v30  ;;  %v16838_v15 = vmul.f32 %v16716_v29, %v19690_v8 }
 0x7cc   :  { %19675 = vst [vmem:[#allocation156_spill] sm:$0xff] %v16760_v14  ;;  %v5585_v34 = vadd.f32 %v5584_v18, %v16756_v21  ;;  %v5593_v52 = vadd.f32 %v5592_v47, %v16812_v59  ;;  %v5536_v48 = vmax.f32 %v5535_v57, %v16749_v53  ;;  %v5598_v25 = vadd.f32 %v5597_v51, %v16541_v46  ;;  %v19694_v18 = vld [vmem:[#allocation34_spill] sm:$0xff] }
 0x7cd   :  { %19677 = vst [vmem:[#allocation157_spill] sm:$0xff] %v16767_v63  ;;  %v16828_v6 = vmax.f32 %v5575_v56, %v16727_v9  ;;  %5790 = vrot.lane.b32.xlu0 %v16831_v60, %s10073_s27  ;;  %v16850_v35 = vmul.f32 %v16792_v26, %v19692_v19  ;;  %v5641_v56 = vadd.f32 %v16654_v12, %v16532_v36 }
 0x7ce   :  { %19679 = vst [vmem:[#allocation158_spill] sm:$0xff] %v16770_v42  ;;  %v16856_v47 = vmul.f32 %v16567_v7, %v19694_v18  ;;  %5686 = vrot.lane.b32.xlu2 %v16834_v40, %s10072_s1  ;;  %v16861_v3 = vmax.f32 %v5521_v49, %v16760_v14  ;;  %v5537_v57 = vmax.f32 %v5536_v48, %v16790_v17 }
 0x7cf   :  { %19681 = vst [vmem:[#allocation159_spill] sm:$0xff] %v16779_v2  ;;  %5700 = vrot.lane.b32.xlu1 %v16828_v6, %s10072_s1  ;;  %v5599_v51 = vadd.f32 %v5598_v25, %v16742_v11  ;;  %v5541_v8 = vmax.f32 %v16588_v45, %v16582_v28  ;;  %v5594_v19 = vadd.f32 %v5593_v52, %v16760_v14  ;;  %v19698_v45 = vld [vmem:[#allocation83_spill] sm:$0xff] }
 0x7d0   :  { %19682 = vst [vmem:[#allocation160_spill] sm:$0xff] %v16790_v17  ;;  %v5642_v12 = vadd.f32 %v5641_v56, %v16674_v27  ;;  %v5605_v18 = vadd.f32 %v16632_v20, %v16520_v4  ;;  %v5614_v36 = vadd.f32 %v16636_v54, %v16523_v39  ;;  %v5538_v48 = vmax.f32 %v5537_v57, %v16723_v61  ;;  %v19697_v20 = vld [vmem:[#allocation131_spill] sm:$0xff] }
 0x7d1   :  { %19683 = vst [vmem:[#allocation161_spill] sm:$0xff] %v16800_v16  ;;  %v5600_v25 = vadd.f32 %v5599_v51, %v16686_v32  ;;  %v5542_v21 = vmax.f32 %v5541_v8, %v16523_v39  ;;  %v5559_v27 = vmax.f32 %v19697_v20, %v16597_v50  ;;  %v16888_v57 = vmul.f32 %v16638_v5, %v19698_v45  ;;  %v19703_v50 = vld [vmem:[#allocation73_spill] sm:$0xff] }
 0x7d2   :  { %19685 = vst [vmem:[#allocation162_spill] sm:$0xff] %v16804_v55  ;;  %v5643_v28 = vadd.f32 %v5642_v12, %v16606_v43  ;;  %v5606_v52 = vadd.f32 %v5605_v18, %v16691_v24  ;;  %v5615_v56 = vadd.f32 %v5614_v36, %v16694_v0  ;;  %v5539_v54 = vmax.f32 %v5538_v48, %v16850_v35  ;;  %v19700_v12 = vld [vmem:[#allocation28_spill] sm:$0xff] }
 0x7d3   :  { %19687 = vst [vmem:[#allocation163_spill] sm:$0xff] %v16808_v22  ;;  %v5543_v51 = vmax.f32 %v5542_v21, %v16694_v0  ;;  %v16898_v43 = vmul.f32 %v16638_v5, %v19700_v12  ;;  %v16905_v21 = vmul.f32 %v16567_v7, %v19703_v50  ;;  %v19706_v7 = vld [vmem:[#allocation121_spill] sm:$0xff]  ;;  %v19710_v50 = vld [vmem:[#allocation146_spill] sm:$0xff]  ;;  %v8504_v22 = vld [vmem:[#allocation9 + $0xa0] sm:$0xf] }
 0x7d4   :  { %19689 = vst [vmem:[#allocation164_spill] sm:$0xff] %v16812_v59  ;;  %v19696_v59 = vld [vmem:[#allocation107_spill] sm:$0xff]  ;;  %v5644_v18 = vadd.f32 %v5643_v28, %v16752_v33  ;;  %v5607_v36 = vadd.f32 %v5606_v52, %v16544_v38  ;;  %v19711_v0 = vld [vmem:[#allocation86_spill] sm:$0xff] }
 0x7d5   :  { %19691 = vst [vmem:[#allocation165_spill] sm:$0xff] %v16838_v15  ;;  %v16874_v49 = vmul.f32 %v5585_v34, %v19696_v59  ;;  %v5601_v34 = vadd.f32 %v5600_v25, %v16616_v1  ;;  %v16892_v8 = vmul.f32 %v5594_v19, %v19696_v59  ;;  %v19702_v25 = vld [vmem:[#allocation106_spill] sm:$0xff]  ;;  %v19705_v19 = vld [vmem:[#allocation89_spill] sm:$0xff] }
 0x7d6   :  { %19693 = vst [vmem:[#allocation166_spill] sm:$0xff] %v16850_v35  ;;  %v5544_v39 = vmax.f32 %v5543_v51, %v19702_v25  ;;  %v5616_v45 = vadd.f32 %v5615_v56, %v19702_v25  ;;  %v5645_v28 = vadd.f32 %v5644_v18, %v16678_v41  ;;  %v5608_v5 = vadd.f32 %v5607_v36, %v16749_v53  ;;  %v19708_v41 = vld [vmem:[#allocation45_spill] sm:$0xff] }
 0x7d7   :  { %19695 = vst [vmem:[#allocation167_spill] sm:$0xff] %v16856_v47  ;;  %v5602_v48 = vadd.f32 %v5601_v34, %v16804_v55  ;;  %5688 = vrot.lane.b32.xlu1 %v16861_v3, %s10072_s1  ;;  %5736 = vrot.lane.b32.xlu0 %v16874_v49, %s10072_s1  ;;  %v5560_v52 = vmax.f32 %v5559_v27, %v19705_v19  ;;  %v19715_v55 = vld [vmem:[#allocation130_spill] sm:$0xff]  ;;  %v9051_v1 = vld [vmem:[#allocation9 + $0xa4] sm:$0xf0] }
 0x7d8   :  { %19699 = vst [vmem:[#allocation168_spill] sm:$0xff] %v16888_v57  ;;  %5786 = vrot.lane.b32.xlu2 %v16834_v40, %s10073_s27  ;;  %v16917_v56 = vmax.f32 %v5539_v54, %v16838_v15  ;;  %v16921_v34 = vmul.f32 %v16716_v29, %v19706_v7  ;;  %v5545_v51 = vmax.f32 %v5544_v39, %v16767_v63  ;;  %v19712_v39 = vld [vmem:[#allocation136_spill] sm:$0xff] }
 0x7d9   :  { %19701 = vst [vmem:[#allocation169_spill] sm:$0xff] %v16898_v43  ;;  %v5617_v12 = vadd.f32 %v5616_v45, %v16767_v63  ;;  %v5646_v18 = vadd.f32 %v5645_v28, %v16612_v44  ;;  %v16928_v36 = vmul.f32 %v16792_v26, %v19708_v41  ;;  %v5609_v27 = vadd.f32 %v5608_v5, %v16790_v17  ;;  %v19713_v44 = vld [vmem:[#allocation70_spill] sm:$0xff]  ;;  %v9073_v17 = vld [vmem:[#allocation9 + $0x154] sm:$0xf0] }
 0x7da   :  { %19704 = vst [vmem:[#allocation170_spill] sm:$0xff] %v16905_v21  ;;  %v5561_v33 = vmax.f32 %v5560_v52, %v19710_v50  ;;  %v5603_v54 = vadd.f32 %v5602_v48, %v16746_v30  ;;  %v5546_v25 = vmax.f32 %v5545_v51, %v16888_v57  ;;  %v5623_v20 = vadd.f32 %v19712_v39, %v19711_v0  ;;  %v19714_v63 = vld [vmem:[#allocation114_spill] sm:$0xff]  ;;  %v19719_v39 = vld [vmem:[#allocation145_spill] sm:$0xff] }
 0x7db   :  { %19707 = vst [vmem:[#allocation171_spill] sm:$0xff] %v16921_v34  ;;  %v5618_v7 = vadd.f32 %v5617_v12, %v16888_v57  ;;  %v5647_v45 = vadd.f32 %v5646_v18, %v16800_v16  ;;  %v5610_v28 = vadd.f32 %v5609_v27, %v16723_v61  ;;  %v5550_v5 = vmax.f32 %v19715_v55, %v19714_v63  ;;  %v19716_v52 = vld [vmem:[#allocation150_spill] sm:$0xff]  ;;  %v19720_v16 = vld [vmem:[#allocation116_spill] sm:$0xff]  ;;  %v9075_v55 = vld [vmem:[#allocation9 + $0x164] sm:$0xf0] }
 0x7dc   :  { %19709 = vst [vmem:[#allocation172_spill] sm:$0xff] %v16928_v36  ;;  %v5562_v41 = vmax.f32 %v5561_v33, %v19713_v44  ;;  %v5547_v48 = vmax.f32 %v5546_v25, %v19716_v52  ;;  %v19717_v30 = vld [vmem:[#allocation98_spill] sm:$0xff]  ;;  %v5624_v57 = vadd.f32 %v5623_v20, %v19719_v39  ;;  %v16956_v63 = vmul.f32 %v16716_v29, %v19720_v16  ;;  %v19722_v20 = vld [vmem:[#allocation137_spill] sm:$0xff]  ;;  %v19726_v16 = vld [vmem:[#allocation51_spill] sm:$0xff] }
 0x7dd   :  { %v5619_v51 = vadd.f32 %v5618_v7, %v19716_v52  ;;  %v16948_v12 = vmul.f32 %v16716_v29, %v19717_v30  ;;  %v5648_v18 = vadd.f32 %v5647_v45, %v16727_v9  ;;  %v5611_v27 = vadd.f32 %v5610_v28, %v16850_v35  ;;  %v19723_v29 = vld [vmem:[#allocation104_spill] sm:$0xff]  ;;  %v8592_v61 = vld [vmem:[#allocation9 + $0x150] sm:$0xf] }
 0x7de   :  { %v5563_v33 = vmax.f32 %v5562_v41, %v16779_v2  ;;  %19721 = vst [vmem:[#allocation173_spill] sm:$0xff] %v16956_v63  ;;  %v5548_v25 = vmax.f32 %v5547_v48, %v16928_v36  ;;  %v5551_v30 = vmax.f32 %v5550_v5, %v19711_v0  ;;  %v5632_v52 = vadd.f32 %v19722_v20, %v19705_v19 }
 0x7df   :  { %19718 = vst [vmem:[#allocation136_spill] sm:$0xff] %v16948_v12  ;;  %v5620_v7 = vadd.f32 %v5619_v51, %v16928_v36  ;;  %5788 = vrot.lane.b32.xlu1 %v16861_v3, %s10073_s27  ;;  %5738 = vrot.lane.b32.xlu0 %v16892_v8, %s10072_s1  ;;  %v5612_v41 = vadd.f32 %v5611_v27, %v16838_v15  ;;  %v19725_v51 = vld [vmem:[#allocation61_spill] sm:$0xff] }
 0x7e0   :  { %v16972_v45 = vmul.f32 %v16792_v26, %v19723_v29  ;;  %v5564_v28 = vmax.f32 %v5563_v33, %v16898_v43  ;;  %5690 = vrot.lane.b32.xlu2 %v16831_v60, %s10072_s1  ;;  %v5651_v5 = vmul.f32 %v5603_v54, %v19696_v59  ;;  %v5625_v20 = vadd.f32 %v5624_v57, %v19725_v51 }
 0x7e1   :  { %v5621_v48 = vadd.f32 %v5620_v7, %v16921_v34  ;;  %v5552_v9 = vmax.f32 %v5551_v30, %v19719_v39  ;;  %v16982_v27 = vmul.f32 %v5648_v18, %v19696_v59  ;;  %v16987_v33 = vmul.f32 %v16792_v26, %v19726_v16  ;;  %v19728_v26 = vld [vmem:[#allocation140_spill] sm:$0xff] }
 0x7e2   :  { %19724 = vst [vmem:[#allocation137_spill] sm:$0xff] %v16972_v45  ;;  %v5565_v29 = vmax.f32 %v5564_v28, %v16856_v47  ;;  %v5633_v36 = vadd.f32 %v5632_v52, %v19710_v50  ;;  %v5549_v54 = vmax.f32 %v5548_v25, %v16921_v34  ;;  %v5652_v7 = vmul.f32 %v5612_v41, %v19696_v59 }
 0x7e3   :  { %19727 = vst [vmem:[#allocation174_spill] sm:$0xff] %v16987_v33  ;;  %v5626_v57 = vadd.f32 %v5625_v20, %v16770_v42  ;;  %v5553_v30 = vmax.f32 %v5552_v9, %v19725_v51  ;;  %v5653_v18 = vmul.f32 %v5621_v48, %v19696_v59  ;;  %v5658_v39 = vstv %s16942_s9 }
 0x7e4   :  { %v5566_v19 = vmax.f32 %v5565_v29, %v16972_v45  ;;  %v5634_v28 = vadd.f32 %v5633_v36, %v19713_v44  ;;  %v5659_v52 = vmul.f32 %v5658_v39, %v16834_v40  ;;  %v5661_v25 = vmul.f32 %v5658_v39, %v16831_v60 }
 0x7e5   :  { %v5627_v16 = vadd.f32 %v5626_v57, %v19728_v26  ;;  %v5554_v0 = vmax.f32 %v5553_v30, %v16770_v42  ;;  %v5668_v9 = vstv %s16958_s10  ;;  %v5660_v48 = vmul.f32 %v5658_v39, %v16861_v3 }
 0x7e6   :  { %v5567_v41 = vmax.f32 %v5566_v19, %v16948_v12  ;;  %v5635_v20 = vadd.f32 %v5634_v28, %v16779_v2  ;;  %v5669_v34 = vmul.f32 %v5668_v9, %v16874_v49  ;;  %v5670_v57 = vmul.f32 %v5668_v9, %v16892_v8 }
 0x7e7   :  { %v5628_v29 = vadd.f32 %v5627_v16, %v16905_v21  ;;  %v5555_v36 = vmax.f32 %v5554_v0, %v19728_v26  ;;  %5692 = vrot.lane.b32.xlu1 %v16917_v56, %s10072_s1  ;;  %5840 = vrot.lane.b32.xlu0 %v5651_v5, %s10073_s27  ;;  %v5671_v40 = vmul.f32 %v5668_v9, %v5651_v5 }
 0x7e8   :  { %v5636_v60 = vadd.f32 %v5635_v20, %v16898_v43  ;;  %v5662_v19 = vmul.f32 %v5658_v39, %v16917_v56  ;;  %5750 = vrot.lane.b32.xlu2 %v16982_v27, %s10072_s1  ;;  %v17019_v3 = vadd.f32 %v5669_v34, %v5659_v52  ;;  %v17021_v30 = vadd.f32 %v5670_v57, %v5660_v48 }
 0x7e9   :  { %v5629_v16 = vadd.f32 %v5628_v29, %v16987_v33  ;;  %v5556_v0 = vmax.f32 %v5555_v36, %v16905_v21  ;;  %v17024_v26 = vadd.f32 %v5671_v40, %v5661_v25  ;;  %v5672_v2 = vmul.f32 %v5668_v9, %v5652_v7 }
 0x7ea   :  { %v5637_v28 = vadd.f32 %v5636_v60, %v16856_v47  ;;  %v5663_v20 = vmul.f32 %v5658_v39, %v5549_v54  ;;  %v5673_v42 = vmul.f32 %v5668_v9, %v5653_v18  ;;  %v5665_v51 = vmul.f32 %v5658_v39, %v5567_v41 }
 0x7eb   :  { %v5630_v43 = vadd.f32 %v5629_v16, %v16956_v63  ;;  %v5557_v44 = vmax.f32 %v5556_v0, %v16987_v33  ;;  %v17029_v50 = vadd.f32 %v5672_v2, %v5662_v19  ;;  %v5666_v34 = vmul.f32 %v5658_v39, %v16828_v6 }
 0x7ec   :  { %v5638_v29 = vadd.f32 %v5637_v28, %v16972_v45  ;;  %v5676_v52 = vmul.f32 %v5668_v9, %v16982_v27  ;;  %v17035_v36 = vadd.f32 %v5673_v42, %v5663_v20  ;;  %v19730_v20 = vld [vmem:[#allocation27_spill] sm:$0xff]  ;;  %v17120_v47 = vstv %s8412_s3 }
 0x7ed   :  { %v5654_v48 = vmul.f32 %v5630_v43, %v19696_v59  ;;  %v5558_v25 = vmax.f32 %v5557_v44, %v16956_v63 }
 0x7ee   :  { %v5639_v57 = vadd.f32 %v5638_v29, %v16948_v12  ;;  %v17038_v60 = vadd.f32 %v5676_v52, %v5666_v34 }
 0x7ef   :  { %v5664_v40 = vmul.f32 %v5658_v39, %v5558_v25  ;;  %v5674_v16 = vmul.f32 %v5668_v9, %v5654_v48  ;;  %5838 = vrot.lane.b32.xlu1 %v16892_v8, %s10073_s27  ;;  %5740 = vrot.lane.b32.xlu0 %v5651_v5, %s10072_s1 }
 0x7f0   :  { %v5655_v2 = vmul.f32 %v5639_v57, %v19696_v59  ;;  %5836 = vrot.lane.b32.xlu2 %v16874_v49, %s10073_s27 }
 0x7f1   :  { %v17046_v43 = vadd.f32 %v5674_v16, %v5664_v40  ;;  %v17099_v40 = vstv %s8410_s24 }
 0x7f2   :  { %v5675_v42 = vmul.f32 %v5668_v9, %v5655_v2 }
 0x7f4   :  { %v17048_v44 = vadd.f32 %v5675_v42, %v5665_v51 }
 0x7f7   :  { %5792 = vrot.lane.b32.xlu1 %v16917_v56, %s10073_s27  ;;  %5794 = vrot.lane.b32.xlu0 %v5549_v54, %s10073_s27 }
 0x7f8   :  { %5742 = vrot.lane.b32.xlu2 %v5652_v7, %s10072_s1 }
 0x7ff   :  { %5844 = vrot.lane.b32.xlu1 %v5653_v18, %s10073_s27  ;;  %5694 = vrot.lane.b32.xlu0 %v5549_v54, %s10072_s1 }
 0x800   :  { %5842 = vrot.lane.b32.xlu2 %v5652_v7, %s10073_s27 }
 0x807   :  { %5798 = vrot.lane.b32.xlu1 %v5567_v41, %s10073_s27  ;;  %5746 = vrot.lane.b32.xlu0 %v5654_v48, %s10072_s1 }
 0x808   :  { %5696 = vrot.lane.b32.xlu2 %v5558_v25, %s10072_s1 }
 0x80f   :  { %5744 = vrot.lane.b32.xlu1 %v5653_v18, %s10072_s1  ;;  %5846 = vrot.lane.b32.xlu0 %v5654_v48, %s10073_s27 }
 0x810   :  { %5796 = vrot.lane.b32.xlu2 %v5558_v25, %s10073_s27 }
 0x817   :  { %5698 = vrot.lane.b32.xlu1 %v5567_v41, %s10072_s1  ;;  %5748 = vrot.lane.b32.xlu0 %v5655_v2, %s10072_s1  ;;  %s5685_s1 = sld [smem:[#allocation8]] }
 0x818   :  { %5848 = vrot.lane.b32.xlu2 %v5655_v2, %s10073_s27 }
 0x81d   :  { %v17091_v34 = vstv %s5685_s1 }
 0x81f   :  { %5850 = vrot.lane.b32.xlu1 %v16982_v27, %s10073_s27 }
 0x820   :  { %5800 = vrot.lane.b32.xlu2 %v16828_v6, %s10073_s27  ;;  %s8411_s27 = sld [smem:[#allocation8 + $0x4]] }
 0x828   :  { %v5687_v49 = vpop.permute.xlu2 %5686 }
 0x832   :  { %v17070_v8 = vpop.permute.xlu2 %5786 }
 0x83a   :  { %v5691_v56 = vpop.permute.xlu2 %5690 }
 0x83f   :  { %v17074_v5 = vpop.permute.xlu0 %5790 }
 0x841   :  { %v17072_v39 = vpop.permute.xlu1 %5700 }
 0x842   :  { %v17076_v51 = vpop.permute.xlu2 %5750  ;;  %v5709_v19 = vsel %vm424_vm1, %v17072_v39, %v5687_v49 }
 0x843   :  { %v5710_v29 = vmul.f32 %v19730_v20, %v5709_v19  ;;  %v17105_v19 = vstv %s8411_s27 }
 0x845   :  { %v5719_v16 = vmul.f32 %v17091_v34, %v5710_v29 }
 0x847   :  { %v5727_v29 = vadd.f32 %v5719_v16, %v17019_v3 }
 0x849   :  { %v5689_v54 = vpop.permute.xlu1 %5688  ;;  %v5737_v7 = vpop.permute.xlu0 %5736 }
 0x84a   :  { %v17078_v18 = vpop.permute.xlu2 %5836  ;;  %v5708_v0 = vsel %vm424_vm1, %v5687_v49, %v5689_v54  ;;  %v5759_v28 = vsel %vm424_vm1, %v17076_v51, %v5737_v7  ;;  %v5707_v33 = vsel %vm424_vm1, %v5689_v54, %v5691_v56 }
 0x84b   :  { %v5720_v48 = vmul.f32 %v17091_v34, %v5708_v0  ;;  %v5760_v25 = vmul.f32 %v19730_v20, %v5759_v28 }
 0x84d   :  { %v5728_v0 = vadd.f32 %v5720_v48, %v17021_v30  ;;  %v5769_v28 = vmul.f32 %v17099_v40, %v5760_v25 }
 0x84f   :  { %v5777_v12 = vadd.f32 %v5769_v28, %v5727_v29 }
 0x851   :  { %v5789_v41 = vpop.permute.xlu1 %5788  ;;  %v5739_v27 = vpop.permute.xlu0 %5738 }
 0x852   :  { %v17080_v9 = vpop.permute.xlu2 %5742  ;;  %v5758_v52 = vsel %vm424_vm1, %v5737_v7, %v5739_v27  ;;  %v5808_v7 = vsel %vm681_vm2, %v17070_v8, %v5789_v41  ;;  %v5807_v20 = vsel %vm681_vm2, %v5789_v41, %v17074_v5 }
 0x853   :  { %v5770_v2 = vmul.f32 %v17099_v40, %v5758_v52  ;;  %v5819_v52 = vmul.f32 %v17105_v19, %v5808_v7  ;;  %v5820_v45 = vmul.f32 %v17105_v19, %v5807_v20  ;;  %v5721_v7 = vmul.f32 %v17091_v34, %v5707_v33 }
 0x855   :  { %v5778_v59 = vadd.f32 %v5770_v2, %v5728_v0  ;;  %v5827_v3 = vadd.f32 %v5819_v52, %v5777_v12  ;;  %v17129_v2 = vstv %s8413_s19 }
 0x857   :  { %v5828_v48 = vadd.f32 %v5820_v45, %v5778_v59  ;;  %v5729_v45 = vadd.f32 %v5721_v7, %v17024_v26 }
 0x859   :  { %v17097_v57 = vpop.permute.xlu1 %5692  ;;  %v5841_v42 = vpop.permute.xlu0 %5840 }
 0x85a   :  { %v17103_v49 = vpop.permute.xlu2 %5842  ;;  %v5706_v33 = vsel %vm424_vm1, %v5691_v56, %v17097_v57 }
 0x85b   :  { %v5722_v56 = vmul.f32 %v17091_v34, %v5706_v33 }
 0x861   :  { %v5839_v63 = vpop.permute.xlu1 %5838  ;;  %v5741_v28 = vpop.permute.xlu0 %5740 }
 0x862   :  { %v5857_v30 = vsel %vm681_vm2, %v5839_v63, %v5841_v42  ;;  %v5858_v41 = vsel %vm681_vm2, %v17078_v18, %v5839_v63  ;;  %v17132_v20 = vpop.permute.xlu2 %5696  ;;  %v5757_v29 = vsel %vm424_vm1, %v5739_v27, %v5741_v28  ;;  %v5756_v26 = vsel %vm424_vm1, %v5741_v28, %v17080_v9 }
 0x863   :  { %v5869_v25 = vmul.f32 %v17120_v47, %v5858_v41  ;;  %v5870_v16 = vmul.f32 %v17120_v47, %v5857_v30  ;;  %v5771_v12 = vmul.f32 %v17099_v40, %v5757_v29  ;;  %v5730_v28 = vadd.f32 %v5722_v56, %v17029_v50  ;;  %v8536_v56 = vld [vmem:[#allocation9 + $0xe0] sm:$0xf] }
 0x865   :  { %v5877_v54 = vadd.f32 %v5869_v25, %v5827_v3  ;;  %v5878_v0 = vadd.f32 %v5870_v16, %v5828_v48  ;;  %v5856_v3 = vsel %vm681_vm2, %v5841_v42, %v17103_v49  ;;  %v5779_v48 = vadd.f32 %v5771_v12, %v5729_v45 }
 0x866   :  { %v5871_v16 = vmul.f32 %v17120_v47, %v5856_v3  ;;  %v5772_v42 = vmul.f32 %v17099_v40, %v5756_v26  ;;  %v9043_v3 = vld [vmem:[#allocation9 + $0x64] sm:$0xf0] }
 0x867   :  { %v5887_v63 = vadd.f32 %v17129_v2, %v5877_v54  ;;  %v5888_v59 = vadd.f32 %v17129_v2, %v5878_v0 }
 0x869   :  { %v8414_v52 = vmul.f32 -1.442695, %v5887_v63  ;;  %v8415_v30 = vmul.f32 -1.442695, %v5888_v59  ;;  %v5793_v41 = vpop.permute.xlu1 %5792  ;;  %v5795_v0 = vpop.permute.xlu0 %5794  ;;  %v9045_v63 = vld [vmem:[#allocation9 + $0x74] sm:$0xf0] }
 0x86a   :  { %v5806_v27 = vsel %vm681_vm2, %v17074_v5, %v5793_v41  ;;  %v17156_v29 = vpop.permute.xlu2 %5796  ;;  %v8480_v5 = vld [vmem:[#allocation9 + $0x70] sm:$0xf]  ;;  %v5805_v12 = vsel %vm681_vm2, %v5793_v41, %v5795_v0 }
 0x86b   :  { %9768 = vpow2.f32 %v8414_v52  ;;  %v5821_v25 = vmul.f32 %v17105_v19, %v5806_v27  ;;  %v8544_v59 = vld [vmem:[#allocation9 + $0xf0] sm:$0xf]  ;;  %v5804_v45 = vsel %vm681_vm2, %v5795_v0, %v17156_v29  ;;  %v8481_v33 = vor.u32 %v9045_v63, %v8480_v5  ;;  %v9061_v52 = vld [vmem:[#allocation9 + $0xf4] sm:$0xf0] }
 0x86c   :  { %9770 = vpow2.f32 %v8415_v30  ;;  %v8472_v30 = vld [vmem:[#allocation9 + $0x60] sm:$0xf]  ;;  %v8545_v50 = vor.u32 %v9061_v52, %v8544_v59  ;;  %v5780_v0 = vadd.f32 %v5772_v42, %v5730_v28  ;;  %v8464_v42 = vld [vmem:[#allocation9 + $0x50] sm:$0xf] }
 0x86d   :  { %v5829_v7 = vadd.f32 %v5821_v25, %v5779_v48  ;;  %v5822_v48 = vmul.f32 %v17105_v19, %v5805_v12  ;;  %v17167_v25 = vmul.f32 %v17105_v19, %v5804_v45  ;;  %7021 = vmatpush.bf16.msra.mxu2 %v8481_v33  ;;  %v8473_v5 = vor.u32 %v9043_v3, %v8472_v30  ;;  %v9041_v33 = vld [vmem:[#allocation9 + $0x54] sm:$0xf0]  ;;  %v8528_v30 = vld [vmem:[#allocation9 + $0xd0] sm:$0xf] }
 0x86e   :  { %7055 = vmatpush.bf16.msrb.mxu3 %v8545_v50  ;;  %v8465_v3 = vor.u32 %v9041_v33, %v8464_v42  ;;  %v8600_v33 = vld [vmem:[#allocation9 + $0x160] sm:$0xf] }
 0x86f   :  { %v5879_v54 = vadd.f32 %v5871_v16, %v5829_v7  ;;  %v9059_v16 = vld [vmem:[#allocation9 + $0xe4] sm:$0xf0]  ;;  %v5830_v52 = vadd.f32 %v5822_v48, %v5780_v0  ;;  %v8601_v14 = vor.u32 %v9075_v55, %v8600_v33  ;;  %v8440_v33 = vld [vmem:[#allocation9 + $0x20] sm:$0xf] }
 0x870   :  { %v8537_v59 = vor.u32 %v9059_v16, %v8536_v56  ;;  %v9077_v16 = vld [vmem:[#allocation9 + $0x174] sm:$0xf0]  ;;  %v9039_v0 = vld [vmem:[#allocation9 + $0x44] sm:$0xf0] }
 0x871   :  { %v9769_v27 = vpop.eup %9768  ;;  %v5889_v26 = vadd.f32 %v17129_v2, %v5879_v54  ;;  %v17169_v41 = vpop.permute.xlu1 %5844  ;;  %7022 = vmatpush.bf16.msra.mxu2 %v8473_v5 }
 0x872   :  { %v9771_v7 = vpop.eup %9770  ;;  %v17171_v21 = vadd.f32 1.0, %v9769_v27  ;;  %v5855_v54 = vsel %vm681_vm2, %v17103_v49, %v17169_v41  ;;  %7056 = vmatpush.bf16.msrb.mxu3 %v8537_v59  ;;  %v5695_v49 = vpop.permute.xlu0 %5694  ;;  %v9057_v27 = vld [vmem:[#allocation9 + $0xd4] sm:$0xf0] }
 0x873   :  { %v17177_v63 = vadd.f32 1.0, %v9771_v7  ;;  %v8416_v12 = vmul.f32 -1.442695, %v5889_v26  ;;  %v5872_v45 = vmul.f32 %v17120_v47, %v5855_v54  ;;  %v8608_v26 = vld [vmem:[#allocation9 + $0x170] sm:$0xf]  ;;  %v5705_v56 = vsel %vm424_vm1, %v17097_v57, %v5695_v49  ;;  %v17196_v35 = vpop.permute.xlu2 %5848 }
 0x874   :  { %9772 = vrcp.f32 %v17171_v21  ;;  %v8529_v48 = vor.u32 %v9057_v27, %v8528_v30  ;;  %v8456_v7 = vld [vmem:[#allocation9 + $0x40] sm:$0xf]  ;;  %v5723_v5 = vmul.f32 %v17091_v34, %v5705_v56  ;;  %v8609_v54 = vor.u32 %v9077_v16, %v8608_v26  ;;  %v8448_v27 = vld [vmem:[#allocation9 + $0x30] sm:$0xf]  ;;  %v9037_v26 = vld [vmem:[#allocation9 + $0x34] sm:$0xf0] }
 0x875   :  { %9774 = vrcp.f32 %v17177_v63  ;;  %v5880_v28 = vadd.f32 %v5872_v45, %v5830_v52  ;;  %v9055_v45 = vld [vmem:[#allocation9 + $0xc4] sm:$0xf0]  ;;  %7023 = vmatpush.bf16.msra.mxu2 %v8465_v3  ;;  %v8512_v56 = vld [vmem:[#allocation9 + $0xb0] sm:$0xf]  ;;  %vm5932_vm15 = vweird.f32 %v17171_v21  ;;  %v5951_v10 = vand.u32 2147483647, %v17177_v63 }
 0x876   :  { %9776 = vpow2.f32 %v8416_v12  ;;  %v8520_v12 = vld [vmem:[#allocation9 + $0xc0] sm:$0xf]  ;;  %v17194_v57 = vadd.f32 %v5723_v5, %v17035_v36  ;;  %7057 = vmatpush.bf16.msrb.mxu3 %v8529_v48  ;;  %7089 = vmatpush.bf16.msrb.mxu0 %v8609_v54  ;;  %v8672_v3 = vld [vmem:[#allocation9 + $0x1f0] sm:$0xf]  ;;  %v5704_v48 = vsel %vm424_vm1, %v5695_v49, %v17132_v20  ;;  %v8449_v5 = vor.u32 %v9037_v26, %v8448_v27 }
 0x877   :  { %v5890_v50 = vadd.f32 %v17129_v2, %v5880_v28  ;;  %v8457_v28 = vor.u32 %v9039_v0, %v8456_v7  ;;  %v8521_v30 = vor.u32 %v9055_v45, %v8520_v12  ;;  %v9093_v7 = vld [vmem:[#allocation9 + $0x1f4] sm:$0xf0]  ;;  %v8664_v49 = vld [vmem:[#allocation9 + $0x1e0] sm:$0xf]  ;;  %v5938_v27 = vand.u32 2147483648, %v17171_v21 }
 0x878   :  { %v8673_v54 = vor.u32 %v9093_v7, %v8672_v3  ;;  %v5953_v26 = vand.u32 2147483648, %v17177_v63  ;;  %vm17254_vm5 = vcmp.eq.f32.partialorder %v5951_v10, 8.507059e+37  ;;  %vm5947_vm6 = vweird.f32 %v17177_v63 }
 0x879   :  { %v17187_v59 = vpop.permute.xlu1 %5798  ;;  %v8417_v42 = vmul.f32 -1.442695, %v5890_v50  ;;  %v9053_v50 = vld [vmem:[#allocation9 + $0xb4] sm:$0xf0]  ;;  %7024 = vmatpush.bf16.msra.mxu2 %v8457_v28  ;;  %v9091_v28 = vld [vmem:[#allocation9 + $0x1e4] sm:$0xf0] }
 0x87a   :  { %v17189_v52 = vpop.eup %9772  ;;  %7058 = vmatpush.bf16.msrb.mxu3 %v8521_v30  ;;  %v17208_v45 = vpop.permute.xlu0 %5746  ;;  %7090 = vmatpush.bf16.msrb.mxu0 %v8601_v14  ;;  %v8513_v55 = vor.u32 %v9053_v50, %v8512_v56  ;;  %v5724_v30 = vmul.f32 %v17091_v34, %v5704_v48  ;;  %v8665_v50 = vor.u32 %v9091_v28, %v8664_v49 }
 0x87b   :  { %v17191_v15 = vpop.eup %9774  ;;  %9778 = vpow2.f32 %v8417_v42  ;;  %v5928_v36 = vmul.f32 %v17189_v52, %v17171_v21  ;;  %v8593_v42 = vor.u32 %v9073_v17, %v8592_v61  ;;  %7123 = vmatpush.bf16.msra.mxu1 %v8673_v54  ;;  %v8505_v17 = vor.u32 %v9051_v1, %v8504_v22 }
 0x87c   :  { %v9777_v16 = vpop.eup %9776  ;;  %v5943_v12 = vmul.f32 %v17191_v15, %v17177_v63  ;;  %v5936_v54 = vand.u32 2147483647, %v17171_v21  ;;  %v17228_v22 = vor.u32 1.1754944e-38, %v5953_v26  ;;  %v5803_v1 = vsel %vm681_vm2, %v17156_v29, %v17187_v59  ;;  %v8424_v21 = vld [vmem:[#allocation9] sm:$0xf] }
 0x87d   :  { %v17198_v0 = vadd.f32 1.0, %v9777_v16  ;;  %v9035_v16 = vld [vmem:[#allocation9 + $0x24] sm:$0xf0]  ;;  %v5929_v32 = vsub.f32 1.0, %v5928_v36  ;;  %7025 = vmatpush.bf16.msra.mxu2 %v8449_v5  ;;  %vm5933_vm0 = vweird.f32 %v17189_v52  ;;  %vm5948_vm3 = vweird.f32 %v17191_v15 }
 0x87e   :  { %v8441_v14 = vor.u32 %v9035_v16, %v8440_v33  ;;  %v5944_v56 = vsub.f32 1.0, %v5943_v12  ;;  %7059 = vmatpush.bf16.msrb.mxu3 %v8513_v55  ;;  %7091 = vmatpush.bf16.msrb.mxu0 %v8593_v42  ;;  %v17226_v12 = vor.u32 1.1754944e-38, %v5938_v27  ;;  %v5801_v42 = vpop.permute.xlu2 %5800  ;;  %vm17244_vm4 = vcmp.eq.f32.partialorder %v5936_v54, 8.507059e+37  ;;  %vm17284_vm7 = vmor %vm5932_vm15, %vm5933_vm0 }
 0x87f   :  { %9780 = vrcp.f32 %v17198_v0  ;;  %7124 = vmatpush.bf16.msra.mxu1 %v8665_v50  ;;  %v5930_v55 = vmul.f32 %v17189_v52, %v5929_v32  ;;  %v5824_v27 = vmul.f32 %v17105_v19, %v5803_v1  ;;  %v5968_v10 = vand.u32 2147483648, %v17198_v0  ;;  %vm17300_vm8 = vmor %vm5947_vm6, %vm5948_vm3  ;;  %v8648_v32 = vld [vmem:[#allocation9 + $0x1c0] sm:$0xf] }
 0x880   :  { %v5945_v16 = vmul.f32 %v17191_v15, %v5944_v56  ;;  %vm5962_vm9 = vweird.f32 %v17198_v0 }
 0x881   :  { %v5745_v3 = vpop.permute.xlu1 %5744  ;;  %v9779_v7 = vpop.eup %9778  ;;  %7026 = vmatpush.bf16.msra.mxu2 %v8441_v14  ;;  %v5809_v14 = vsel %vm681_vm2, %v5801_v42, %v17070_v8 }
 0x882   :  { %v17213_v61 = vadd.f32 1.0, %v9779_v7  ;;  %v5754_v36 = vsel %vm424_vm1, %v5745_v3, %v17208_v45  ;;  %v5755_v48 = vsel %vm424_vm1, %v17080_v9, %v5745_v3  ;;  %v5732_v9 = vadd.f32 %v5724_v30, %v17046_v43  ;;  %7060 = vmatpush.bf16.msrb.mxu3 %v8505_v17  ;;  %v5847_v28 = vpop.permute.xlu0 %5846 }
 0x883   :  { %v5773_v33 = vmul.f32 %v17099_v40, %v5755_v48  ;;  %v5774_v29 = vmul.f32 %v17099_v40, %v5754_v36  ;;  %v5966_v43 = vand.u32 2147483647, %v17198_v0  ;;  %v5853_v3 = vsel %vm681_vm2, %v5847_v28, %v17196_v35 }
 0x884   :  { %9782 = vrcp.f32 %v17213_v61  ;;  %v5802_v30 = vsel %vm681_vm2, %v17187_v59, %v5801_v42  ;;  %v5931_v17 = vadd.f32 %v17189_v52, %v5930_v55  ;;  %v5946_v59 = vadd.f32 %v17191_v15, %v5945_v16 }
 0x885   :  { %v17224_v5 = vpop.eup %9780  ;;  %v5781_v26 = vadd.f32 %v5773_v33, %v17194_v57  ;;  %v5782_v56 = vadd.f32 %v5774_v29, %v5732_v9  ;;  %v5854_v57 = vsel %vm681_vm2, %v17169_v41, %v5847_v28  ;;  %v5874_v8 = vmul.f32 %v17120_v47, %v5853_v3  ;;  %v19735_v9 = vld [vmem:[#allocation23_spill] sm:$0xff]  ;;  %v8584_v33 = vld [vmem:[#allocation9 + $0x140] sm:$0xf]  ;;  %v8432_v29 = vld [vmem:[#allocation9 + $0x10] sm:$0xf] }
 0x886   :  { %v5958_v49 = vmul.f32 %v17224_v5, %v17198_v0  ;;  %v5873_v54 = vmul.f32 %v17120_v47, %v5854_v57  ;;  %v5817_v41 = vmul.f32 %v19735_v9, %v5809_v14  ;;  %v17278_v55 = vmul.f32 %v17105_v19, %v5802_v30  ;;  %v9033_v3 = vld [vmem:[#allocation9 + $0x14] sm:$0xf0]  ;;  %v8496_v30 = vld [vmem:[#allocation9 + $0x90] sm:$0xf] }
 0x887   :  { %v5831_v50 = vadd.f32 %v17167_v25, %v5781_v26  ;;  %v5832_v1 = vadd.f32 %v5824_v27, %v5782_v56  ;;  %v9071_v25 = vld [vmem:[#allocation9 + $0x144] sm:$0xf0]  ;;  %v5935_v56 = vsel %vm17284_vm7, %v17189_v52, %v5931_v17  ;;  %v5950_v63 = vsel %vm17300_vm8, %v17191_v15, %v5946_v59 }
 0x888   :  { %v5959_v48 = vsub.f32 1.0, %v5958_v49  ;;  %v8585_v26 = vor.u32 %v9071_v25, %v8584_v33  ;;  %v8576_v33 = vld [vmem:[#allocation9 + $0x130] sm:$0xf]  ;;  %v9031_v15 = vld [vmem:[#allocation9 + $0x4] sm:$0xf0]  ;;  %v17323_v59 = vsel %vm17244_vm4, %v17226_v12, %v5935_v56  ;;  %vm17333_vm10 = vcmp.eq.f32.partialorder %v5966_v43, 8.507059e+37 }
 0x889   :  { %v5881_v42 = vadd.f32 %v5873_v54, %v5831_v50  ;;  %v5699_v28 = vpop.permute.xlu1 %5698  ;;  %v5882_v27 = vadd.f32 %v5874_v8, %v5832_v1  ;;  %v8433_v50 = vor.u32 %v9033_v3, %v8432_v29  ;;  %v9049_v54 = vld [vmem:[#allocation9 + $0x94] sm:$0xf0]  ;;  %v5826_v3 = vmul.f32 %v17105_v19, %v5817_v41  ;;  %v9087_v41 = vld [vmem:[#allocation9 + $0x1c4] sm:$0xf0]  ;;  %v8568_v56 = vld [vmem:[#allocation9 + $0x120] sm:$0xf] }
 0x88a   :  { %v17271_v36 = vpop.eup %9782  ;;  %v5703_v14 = vsel %vm424_vm1, %v17132_v20, %v5699_v28  ;;  %v8656_v20 = vld [vmem:[#allocation9 + $0x1d0] sm:$0xf]  ;;  %v5702_v52 = vsel %vm424_vm1, %v5699_v28, %v17072_v39  ;;  %7092 = vmatpush.bf16.msrb.mxu0 %v8585_v26  ;;  %v8497_v1 = vor.u32 %v9049_v54, %v8496_v30  ;;  %v9089_v8 = vld [vmem:[#allocation9 + $0x1d4] sm:$0xf0]  ;;  %v5749_v29 = vpop.permute.xlu0 %5748  ;;  %v5960_v16 = vmul.f32 %v17224_v5, %v5959_v48  ;;  %v8488_v30 = vld [vmem:[#allocation9 + $0x80] sm:$0xf] }
 0x88b   :  { %v5973_v49 = vmul.f32 %v17271_v36, %v17213_v61  ;;  %v17306_v57 = vadd.f32 %v17129_v2, %v5881_v42  ;;  %v17315_v17 = vadd.f32 %v17129_v2, %v5882_v27  ;;  %v9069_v42 = vld [vmem:[#allocation9 + $0x134] sm:$0xf0]  ;;  %v5725_v25 = vmul.f32 %v17091_v34, %v5703_v14  ;;  %7027 = vmatpush.bf16.msra.mxu2 %v8433_v50  ;;  %v9047_v14 = vld [vmem:[#allocation9 + $0x84] sm:$0xf0] }
 0x88c   :  { %v8657_v39 = vor.u32 %v9089_v8, %v8656_v20  ;;  %v8577_v28 = vor.u32 %v9069_v42, %v8576_v33  ;;  %7061 = vmatpush.bf16.msrb.mxu3 %v8497_v1  ;;  %v8425_v26 = vor.u32 %v9031_v15, %v8424_v21  ;;  %v5726_v54 = vmul.f32 %v17091_v34, %v5702_v52  ;;  %v9067_v50 = vld [vmem:[#allocation9 + $0x124] sm:$0xf0]  ;;  %v8640_v20 = vld [vmem:[#allocation9 + $0x1b0] sm:$0xf]  ;;  %v9085_v52 = vld [vmem:[#allocation9 + $0x1b4] sm:$0xf0] }
 0x88d   :  { %v5974_v27 = vsub.f32 1.0, %v5973_v49  ;;  %v17329_v19 = vsel %vm17254_vm5, %v17228_v22, %v5950_v63  ;;  %v8489_v12 = vor.u32 %v9047_v14, %v8488_v30  ;;  %v5733_v49 = vadd.f32 %v5725_v25, %v17048_v44  ;;  %v8560_v8 = vld [vmem:[#allocation9 + $0x110] sm:$0xf]  ;;  %v9065_v33 = vld [vmem:[#allocation9 + $0x114] sm:$0xf0]  ;;  %v19748_v14 = vld [vmem:[#allocation92_spill] sm:$0xff] }
 0x88e   :  { %7125 = vmatpush.bf16.msra.mxu1 %v8657_v39  ;;  %v5752_v34 = vsel %vm424_vm1, %v5749_v29, %v17076_v51  ;;  %vm5963_vm11 = vweird.f32 %v17224_v5  ;;  %7093 = vmatpush.bf16.msrb.mxu0 %v8577_v28  ;;  %v8649_v22 = vor.u32 %v9087_v41, %v8648_v32  ;;  %v5734_v43 = vadd.f32 %v5726_v54, %v17038_v60  ;;  %v19742_v60 = vld [vmem:[#allocation72_spill] sm:$0xff]  ;;  %v19744_v39 = vld [vmem:[#allocation103_spill] sm:$0xff] }
 0x88f   :  { %v5753_v7 = vsel %vm424_vm1, %v17208_v45, %v5749_v29  ;;  %v5961_v44 = vadd.f32 %v17224_v5, %v5960_v16  ;;  %7028 = vmatpush.bf16.msra.mxu2 %v8425_v26  ;;  %v5776_v51 = vmul.f32 %v17099_v40, %v5752_v34  ;;  %v8569_v1 = vor.u32 %v9067_v50, %v8568_v56  ;;  %v19743_v45 = vld [vmem:[#allocation124_spill] sm:$0xff]  ;;  %v19745_v15 = vld [vmem:[#allocation91_spill] sm:$0xff]  ;;  %vm17362_vm1 = vmor %vm5962_vm9, %vm5963_vm11 }
 0x890   :  { %v5775_v63 = vmul.f32 %v17099_v40, %v5753_v7  ;;  %v5975_v42 = vmul.f32 %v17271_v36, %v5974_v27  ;;  %7062 = vmatpush.bf16.msrb.mxu3 %v8489_v12  ;;  %v6047_v25 = vmul.f32 %v17323_v59, %v19742_v60  ;;  %v6055_v29 = vmul.f32 %v17323_v59, %v19743_v45  ;;  %v19749_v12 = vld [vmem:[#allocation112_spill] sm:$0xff]  ;;  %v19750_v41 = vld [vmem:[#allocation95_spill] sm:$0xff]  ;;  %v19751_v50 = vld [vmem:[#allocation54_spill] sm:$0xff] }
 0x891   :  { %v6048_v16 = vmul.f32 %v17329_v19, %v19744_v39  ;;  %v5784_v21 = vadd.f32 %v5776_v51, %v5734_v43  ;;  %v6056_v40 = vmul.f32 %v17329_v19, %v19745_v15  ;;  %v8641_v26 = vor.u32 %v9085_v52, %v8640_v20  ;;  %v5851_v30 = vpop.permute.xlu1 %5850  ;;  %v8632_v56 = vld [vmem:[#allocation9 + $0x1a0] sm:$0xf]  ;;  %v9063_v60 = vld [vmem:[#allocation9 + $0x104] sm:$0xf0]  ;;  %v9081_v15 = vld [vmem:[#allocation9 + $0x194] sm:$0xf0] }
 0x892   :  { %7126 = vmatpush.bf16.msra.mxu1 %v8649_v22  ;;  %v5783_v28 = vadd.f32 %v5775_v63, %v5733_v49  ;;  %7094 = vmatpush.bf16.msrb.mxu0 %v8569_v1  ;;  %v6127_v54 = vadd.f32 %v6047_v25, %v19748_v14  ;;  %v6135_v32 = vadd.f32 %v6055_v29, %v19749_v12  ;;  %v9083_v22 = vld [vmem:[#allocation9 + $0x1a4] sm:$0xf0]  ;;  %v5969_v63 = vor.u32 1.1754944e-38, %v5968_v10  ;;  %v19754_v25 = vld [vmem:[#allocation88_spill] sm:$0xff]  ;;  %v19756_v27 = vld [vmem:[#allocation123_spill] sm:$0xff] }
 0x893   :  { %v6128_v49 = vadd.f32 %v6048_v16, %v19750_v41  ;;  %v8561_v34 = vor.u32 %v9065_v33, %v8560_v8  ;;  %v5965_v43 = vsel %vm17362_vm1, %v17224_v5, %v5961_v44  ;;  %v5834_v7 = vadd.f32 %v5826_v3, %v5784_v21  ;;  %v19755_v29 = vld [vmem:[#allocation80_spill] sm:$0xff]  ;;  %v8624_v21 = vld [vmem:[#allocation9 + $0x190] sm:$0xf] }
 0x894   :  { %v6136_v20 = vadd.f32 %v6056_v40, %v19751_v50  ;;  %v5833_v52 = vadd.f32 %v17278_v55, %v5783_v28  ;;  %v17376_v51 = vpack.c.bf16 %v6135_v32, %v6127_v54  ;;  %v5852_v1 = vsel %vm681_vm2, %v17196_v35, %v5851_v30  ;;  %v8616_v40 = vld [vmem:[#allocation9 + $0x180] sm:$0xf]  ;;  %v19757_v54 = vld [vmem:[#allocation50_spill] sm:$0xff]  ;;  %v9079_v32 = vld [vmem:[#allocation9 + $0x184] sm:$0xf0] }
 0x895   :  { %v5859_v8 = vsel %vm681_vm2, %v5851_v30, %v17078_v18  ;;  %v8633_v5 = vor.u32 %v9083_v22, %v8632_v56  ;;  %v5875_v55 = vmul.f32 %v17120_v47, %v5852_v1  ;;  %v17390_v0 = vsel %vm17333_vm10, %v5969_v63, %v5965_v43  ;;  %v19760_v50 = vld [vmem:[#allocation38_spill] sm:$0xff]  ;;  %v19762_v1 = vld [vmem:[#allocation64_spill] sm:$0xff] }
 0x896   :  { %v17384_v33 = vpack.c.bf16 %v6136_v20, %v6128_v49  ;;  %7127 = vmatpush.bf16.msra.mxu1 %v8641_v26  ;;  %v5867_v3 = vmul.f32 %v19735_v9, %v5859_v8  ;;  %v5976_v10 = vadd.f32 %v17271_v36, %v5975_v42  ;;  %vm5978_vm12 = vweird.f32 %v17271_v36  ;;  %7029 = vmatmul.bf16.vlgmr.msra.gmra.mxu2 %v17376_v51  ;;  %v8552_v42 = vld [vmem:[#allocation9 + $0x100] sm:$0xf]  ;;  %v8800_v44 = vld [vmem:[#allocation9 + $0x2f0] sm:$0xf] }
 0x897   :  { %7095 = vmatpush.bf16.msrb.mxu0 %v8561_v34  ;;  %v5983_v35 = vand.u32 2147483648, %v17213_v61  ;;  %vm5977_vm2 = vweird.f32 %v17213_v61  ;;  %v5981_v18 = vand.u32 2147483647, %v17213_v61  ;;  %v5883_v48 = vadd.f32 %v5875_v55, %v5833_v52  ;;  %v19759_v34 = vld [vmem:[#allocation139_spill] sm:$0xff]  ;;  %v19761_v52 = vld [vmem:[#allocation52_spill] sm:$0xff] }
 0x898   :  { %7063 = vmatmul.bf16.vlgmr.msrb.gmra.mxu3 %v17384_v33  ;;  %v5876_v9 = vmul.f32 %v17120_v47, %v5867_v3  ;;  %vm17400_vm13 = vmor %vm5977_vm2, %vm5978_vm12  ;;  %v6049_v45 = vmul.f32 %v17390_v0, %v19754_v25  ;;  %v6057_v39 = vmul.f32 %v17390_v0, %v19755_v29  ;;  %v8553_v28 = vor.u32 %v9063_v60, %v8552_v42  ;;  %v8736_v55 = vld [vmem:[#allocation9 + $0x270] sm:$0xf]  ;;  %v9125_v42 = vld [vmem:[#allocation9 + $0x2f4] sm:$0xf0] }
 0x899   :  { %v5980_v61 = vsel %vm17400_vm13, %v17271_v36, %v5976_v10  ;;  %v17412_v47 = vadd.f32 %v17129_v2, %v5883_v48  ;;  %v5984_v26 = vor.u32 1.1754944e-38, %v5983_v35  ;;  %v8625_v30 = vor.u32 %v9081_v15, %v8624_v21  ;;  %v19758_v36 = vld [vmem:[#allocation67_spill] sm:$0xff]  ;;  %v19766_v25 = vld [vmem:[#allocation90_spill] sm:$0xff] }
 0x89a   :  { %7128 = vmatpush.bf16.msra.mxu1 %v8633_v5  ;;  %v5884_v16 = vadd.f32 %v5876_v9, %v5834_v7  ;;  %v6129_v14 = vadd.f32 %v6049_v45, %v19756_v27  ;;  %v6137_v12 = vadd.f32 %v6057_v39, %v19757_v54  ;;  %vm5982_vm14 = vcmp.eq.f32.partialorder %v5981_v18, 8.507059e+37  ;;  %v9109_v10 = vld [vmem:[#allocation9 + $0x274] sm:$0xf0]  ;;  %v19764_v9 = vld [vmem:[#allocation76_spill] sm:$0xff]  ;;  %v8864_v27 = vld [vmem:[#allocation9 + $0x370] sm:$0xf] }
 0x89b   :  { %7096 = vmatpush.bf16.msrb.mxu0 %v8553_v28  ;;  %v6063_v49 = vmul.f32 %v17323_v59, %v19758_v36  ;;  %v6071_v56 = vmul.f32 %v17323_v59, %v19759_v34  ;;  %v17423_v22 = vsel %vm5982_vm14, %v5984_v26, %v5980_v61  ;;  %v8617_v7 = vor.u32 %v9079_v32, %v8616_v40  ;;  %v19763_v35 = vld [vmem:[#allocation75_spill] sm:$0xff]  ;;  %v8728_v26 = vld [vmem:[#allocation9 + $0x260] sm:$0xf]  ;;  %v9123_v54 = vld [vmem:[#allocation9 + $0x2e4] sm:$0xf0] }
 0x89c   :  { %v17417_v41 = vadd.f32 %v17129_v2, %v5884_v16  ;;  %v17425_v43 = vpack.c.bf16 %v6137_v12, %v6129_v14  ;;  %v6064_v20 = vmul.f32 %v17329_v19, %v19760_v50  ;;  %v6072_v2 = vmul.f32 %v17329_v19, %v16682_v62  ;;  %v19765_v62 = vld [vmem:[#allocation35_spill] sm:$0xff]  ;;  %v8928_v12 = vld [vmem:[#allocation9 + $0x3f0] sm:$0xf]  ;;  %v19769_v34 = vld [vmem:[#allocation56_spill] sm:$0xff] }
 0x89d   :  { %v6143_v63 = vadd.f32 %v6063_v49, %v19761_v52  ;;  %v6151_v8 = vadd.f32 %v6071_v56, %v19762_v1  ;;  %v6050_v5 = vmul.f32 %v17423_v22, %v16585_v23  ;;  %v6058_v3 = vmul.f32 %v17423_v22, %v16565_v31  ;;  %v9141_v14 = vld [vmem:[#allocation9 + $0x374] sm:$0xf0]  ;;  %v19771_v1 = vld [vmem:[#allocation68_spill] sm:$0xff] }
 0x89e   :  { %7129 = vmatpush.bf16.msra.mxu1 %v8625_v30  ;;  %7097 = vmatmul.bf16.vlgmr.msrb.gmra.mxu0 %v17425_v43  ;;  %v6144_v18 = vadd.f32 %v6064_v20, %v19763_v35  ;;  %v6152_v48 = vadd.f32 %v6072_v2, %v19764_v9  ;;  %v6065_v29 = vmul.f32 %v17390_v0, %v16517_v13  ;;  %v8418_v28 = vmul.f32 -1.442695, %v17306_v57  ;;  %v19767_v13 = vld [vmem:[#allocation111_spill] sm:$0xff]  ;;  %v9107_v30 = vld [vmem:[#allocation9 + $0x264] sm:$0xf0]  ;;  %v19775_v9 = vld [vmem:[#allocation102_spill] sm:$0xff] }
 0x89f   :  { %v6130_v60 = vadd.f32 %v6050_v5, %v19765_v62  ;;  %v6138_v45 = vadd.f32 %v6058_v3, %v19766_v25  ;;  %v6073_v23 = vmul.f32 %v17390_v0, %v16664_v58  ;;  %v8737_v31 = vor.u32 %v9109_v10, %v8736_v55  ;;  %v19768_v58 = vld [vmem:[#allocation62_spill] sm:$0xff]  ;;  %v8792_v57 = vld [vmem:[#allocation9 + $0x2e0] sm:$0xf]  ;;  %v9157_v32 = vld [vmem:[#allocation9 + $0x3f4] sm:$0xf0] }
 0x8a0   :  { %v17446_v39 = vpack.c.bf16 %v6151_v8, %v6143_v63  ;;  %v8801_v16 = vor.u32 %v9125_v42, %v8800_v44  ;;  %v17451_v21 = vpack.c.bf16 %v6152_v48, %v6144_v18  ;;  %v6145_v15 = vadd.f32 %v6065_v29, %v19767_v13  ;;  %v19776_v44 = vld [vmem:[#allocation37_spill] sm:$0xff]  ;;  %v19777_v62 = vld [vmem:[#allocation39_spill] sm:$0xff]  ;;  %v19778_v25 = vld [vmem:[#allocation120_spill] sm:$0xff] }
 0x8a1   :  { %v17448_v61 = vpack.c.bf16 %v6138_v45, %v6130_v60  ;;  %7157 = vmatpush.bf16.msrb.mxu2 %v8737_v31  ;;  %v6153_v40 = vadd.f32 %v6073_v23, %v19768_v58  ;;  %9784 = vpow2.f32 %v8418_v28  ;;  %v8419_v36 = vmul.f32 -1.442695, %v17315_v17  ;;  %v19772_v17 = vld [vmem:[#allocation152_spill] sm:$0xff]  ;;  %v8720_v23 = vld [vmem:[#allocation9 + $0x250] sm:$0xf] }
 0x8a2   :  { %7130 = vmatpush.bf16.msra.mxu1 %v8617_v7  ;;  %7191 = vmatpush.bf16.msra.mxu3 %v8801_v16  ;;  %v6079_v56 = vmul.f32 %v17323_v59, %v19769_v34  ;;  %v19770_v7 = vld [vmem:[#allocation151_spill] sm:$0xff]  ;;  %v6066_v20 = vmul.f32 %v17423_v22, %v16520_v4  ;;  %v6074_v2 = vmul.f32 %v17423_v22, %v16691_v24  ;;  %v19774_v24 = vld [vmem:[#allocation58_spill] sm:$0xff]  ;;  %v8420_v16 = vmul.f32 -1.442695, %v17412_v47  ;;  %v8856_v28 = vld [vmem:[#allocation9 + $0x360] sm:$0xf] }
 0x8a3   :  { %v17459_v49 = vpack.c.bf16 %v6153_v40, %v6145_v15  ;;  %v6087_v50 = vmul.f32 %v17323_v59, %v19770_v7  ;;  %v8729_v52 = vor.u32 %v9107_v30, %v8728_v26  ;;  %v8865_v63 = vor.u32 %v9141_v14, %v8864_v27  ;;  %v19773_v4 = vld [vmem:[#allocation63_spill] sm:$0xff]  ;;  %v9139_v13 = vld [vmem:[#allocation9 + $0x364] sm:$0xf0]  ;;  %v8784_v40 = vld [vmem:[#allocation9 + $0x2d0] sm:$0xf] }
 0x8a4   :  { %v6080_v8 = vmul.f32 %v17329_v19, %v19771_v1  ;;  %v6088_v5 = vmul.f32 %v17329_v19, %v19772_v17  ;;  %v8793_v3 = vor.u32 %v9123_v54, %v8792_v57  ;;  %v8929_v55 = vor.u32 %v9157_v32, %v8928_v12  ;;  %v9105_v31 = vld [vmem:[#allocation9 + $0x254] sm:$0xf0]  ;;  %v8920_v30 = vld [vmem:[#allocation9 + $0x3e0] sm:$0xf]  ;;  %v9155_v47 = vld [vmem:[#allocation9 + $0x3e4] sm:$0xf0] }
 0x8a5   :  { %7131 = vmatmul.bf16.vlgmr.msra.gmra.mxu1 %v17448_v61  ;;  %7158 = vmatpush.bf16.msrb.mxu2 %v8729_v52  ;;  %9786 = vpow2.f32 %v8419_v36  ;;  %v6159_v35 = vadd.f32 %v6079_v56, %v19773_v4  ;;  %v6167_v18 = vadd.f32 %v6087_v50, %v19774_v24  ;;  %v6146_v48 = vadd.f32 %v6066_v20, %v19775_v9  ;;  %v9121_v26 = vld [vmem:[#allocation9 + $0x2d4] sm:$0xf0]  ;;  %v8712_v32 = vld [vmem:[#allocation9 + $0x240] sm:$0xf]  ;;  %v9103_v36 = vld [vmem:[#allocation9 + $0x244] sm:$0xf0] }
 0x8a6   :  { %7034 = vmatmul.bf16.gmra.mxu2 %v17446_v39  ;;  %7225 = vmatpush.bf16.msra.mxu0 %v8865_v63  ;;  %v6154_v42 = vadd.f32 %v6074_v2, %v19776_v44  ;;  %v6160_v60 = vadd.f32 %v6080_v8, %v19777_v62  ;;  %v6168_v45 = vadd.f32 %v6088_v5, %v19778_v25  ;;  %v8848_v34 = vld [vmem:[#allocation9 + $0x350] sm:$0xf]  ;;  %v9137_v56 = vld [vmem:[#allocation9 + $0x354] sm:$0xf0]  ;;  %v8776_v7 = vld [vmem:[#allocation9 + $0x2c0] sm:$0xf]  ;;  %9788 = vpow2.f32 %v8420_v16 }
 0x8a7   :  { %v9785_v10 = vpop.eup %9784  ;;  %7192 = vmatpush.bf16.msra.mxu3 %v8793_v3  ;;  %7259 = vmatpush.bf16.msrb.mxu1 %v8929_v55  ;;  %v17483_v15 = vpack.c.bf16 %v6167_v18, %v6159_v35  ;;  %v6081_v57 = vmul.f32 %v17390_v0, %v16541_v46  ;;  %v6089_v54 = vmul.f32 %v17390_v0, %v16742_v11  ;;  %v9119_v20 = vld [vmem:[#allocation9 + $0x2c4] sm:$0xf0]  ;;  %v8912_v46 = vld [vmem:[#allocation9 + $0x3d0] sm:$0xf]  ;;  %v9153_v2 = vld [vmem:[#allocation9 + $0x3d4] sm:$0xf0] }
 0x8a8   :  { %7068 = vmatmul.bf16.gmra.mxu3 %v17451_v21  ;;  %v17480_v29 = vadd.f32 1.0, %v9785_v10  ;;  %v17485_v58 = vpack.c.bf16 %v6154_v42, %v6146_v48  ;;  %v17487_v14 = vpack.c.bf16 %v6168_v45, %v6160_v60  ;;  %v8721_v12 = vor.u32 %v9105_v31, %v8720_v23  ;;  %v19779_v1 = vld [vmem:[#allocation81_spill] sm:$0xff]  ;;  %v19780_v17 = vld [vmem:[#allocation127_spill] sm:$0xff]  ;;  %v8704_v10 = vld [vmem:[#allocation9 + $0x230] sm:$0xf] }
 0x8a9   :  { %v8857_v50 = vor.u32 %v9139_v13, %v8856_v28  ;;  %v8785_v11 = vor.u32 %v9121_v26, %v8784_v40  ;;  %v8921_v63 = vor.u32 %v9155_v47, %v8920_v30  ;;  %v6161_v8 = vadd.f32 %v6081_v57, %v19779_v1  ;;  %v9101_v4 = vld [vmem:[#allocation9 + $0x234] sm:$0xf0]  ;;  %v8768_v44 = vld [vmem:[#allocation9 + $0x2b0] sm:$0xf]  ;;  %v8696_v23 = vld [vmem:[#allocation9 + $0x220] sm:$0xf] }
 0x8aa   :  { %7159 = vmatpush.bf16.msrb.mxu2 %v8721_v12  ;;  %v6169_v5 = vadd.f32 %v6089_v54, %v19780_v17  ;;  %v8713_v3 = vor.u32 %v9103_v36, %v8712_v32  ;;  %v8849_v55 = vor.u32 %v9137_v56, %v8848_v34  ;;  %v8421_v35 = vmul.f32 -1.442695, %v17417_v41  ;;  %v19781_v9 = vld [vmem:[#allocation147_spill] sm:$0xff]  ;;  %v9099_v31 = vld [vmem:[#allocation9 + $0x224] sm:$0xf0]  ;;  %v19783_v13 = vld [vmem:[#allocation138_spill] sm:$0xff] }
 0x8ab   :  { %v9787_v27 = vpop.eup %9786  ;;  %7226 = vmatpush.bf16.msra.mxu0 %v8857_v50  ;;  %7193 = vmatpush.bf16.msra.mxu3 %v8785_v11  ;;  %v8777_v24 = vor.u32 %v9119_v20, %v8776_v7  ;;  %v8913_v18 = vor.u32 %v9153_v2, %v8912_v46  ;;  %9790 = vrcp.f32 %v17480_v29  ;;  %v6095_v48 = vmul.f32 %v17323_v59, %v19781_v9  ;;  %v19782_v42 = vld [vmem:[#allocation135_spill] sm:$0xff]  ;;  %v8840_v26 = vld [vmem:[#allocation9 + $0x340] sm:$0xf]  ;;  %v19784_v57 = vld [vmem:[#allocation126_spill] sm:$0xff] }
 0x8ac   :  { %v17496_v52 = vadd.f32 1.0, %v9787_v27  ;;  %7260 = vmatpush.bf16.msrb.mxu1 %v8921_v63  ;;  %v6103_v62 = vmul.f32 %v17323_v59, %v19782_v42  ;;  %v6082_v60 = vmul.f32 %v17423_v22, %v16544_v38  ;;  %v6090_v41 = vmul.f32 %v17423_v22, %v16749_v53  ;;  %v9117_v45 = vld [vmem:[#allocation9 + $0x2b4] sm:$0xf0]  ;;  %v9135_v38 = vld [vmem:[#allocation9 + $0x344] sm:$0xf0]  ;;  %v9789_v30 = vpop.eup %9788  ;;  %v19786_v36 = vld [vmem:[#allocation44_spill] sm:$0xff] }
 0x8ad   :  { %v8705_v25 = vor.u32 %v9101_v4, %v8704_v10  ;;  %v17511_v16 = vpack.c.bf16 %v6169_v5, %v6161_v8  ;;  %v6096_v28 = vmul.f32 %v17329_v19, %v16714_v37  ;;  %v6104_v40 = vmul.f32 %v17329_v19, %v19783_v13  ;;  %v8904_v53 = vld [vmem:[#allocation9 + $0x3c0] sm:$0xf]  ;;  %v9151_v27 = vld [vmem:[#allocation9 + $0x3c4] sm:$0xf0]  ;;  %v19785_v37 = vld [vmem:[#allocation46_spill] sm:$0xff] }
 0x8ae   :  { %7102 = vmatmul.bf16.gmra.mxu0 %v17459_v49  ;;  %7160 = vmatpush.bf16.msrb.mxu2 %v8713_v3  ;;  %9792 = vrcp.f32 %v17496_v52  ;;  %v6175_v54 = vadd.f32 %v6095_v48, %v19784_v57  ;;  %v8769_v12 = vor.u32 %v9117_v45, %v8768_v44  ;;  %v8697_v47 = vor.u32 %v9099_v31, %v8696_v23  ;;  %v19787_v56 = vld [vmem:[#allocation53_spill] sm:$0xff]  ;;  %v8760_v50 = vld [vmem:[#allocation9 + $0x2a0] sm:$0xf]  ;;  %v8688_v46 = vld [vmem:[#allocation9 + $0x210] sm:$0xf] }
 0x8af   :  { %7227 = vmatpush.bf16.msra.mxu0 %v8849_v55  ;;  %9794 = vpow2.f32 %v8421_v35  ;;  %7194 = vmatpush.bf16.msra.mxu3 %v8777_v24  ;;  %v6183_v32 = vadd.f32 %v6103_v62, %v19785_v37  ;;  %v6162_v34 = vadd.f32 %v6082_v60, %v19786_v36  ;;  %v6170_v7 = vadd.f32 %v6090_v41, %v19787_v56  ;;  %v9097_v2 = vld [vmem:[#allocation9 + $0x214] sm:$0xf0]  ;;  %v19788_v63 = vld [vmem:[#allocation65_spill] sm:$0xff]  ;;  %v8832_v55 = vld [vmem:[#allocation9 + $0x330] sm:$0xf] }
 0x8b0   :  { %7261 = vmatpush.bf16.msrb.mxu1 %v8913_v18  ;;  %v8841_v20 = vor.u32 %v9135_v38, %v8840_v26  ;;  %v6176_v1 = vadd.f32 %v6096_v28, %v19788_v63  ;;  %v19789_v8 = vld [vmem:[#allocation93_spill] sm:$0xff]  ;;  %v8905_v3 = vor.u32 %v9151_v27, %v8904_v53  ;;  %v9133_v10 = vld [vmem:[#allocation9 + $0x334] sm:$0xf0]  ;;  %v17526_v4 = vadd.f32 1.0, %v9789_v30  ;;  %v8752_v42 = vld [vmem:[#allocation9 + $0x290] sm:$0xf] }
 0x8b1   :  { %v17522_v11 = vpop.eup %9790  ;;  %v6184_v17 = vadd.f32 %v6104_v40, %v19789_v8  ;;  %v9115_v5 = vld [vmem:[#allocation9 + $0x2a4] sm:$0xf0]  ;;  %v8689_v24 = vor.u32 %v9097_v2, %v8688_v46  ;;  %v17530_v9 = vpack.c.bf16 %v6183_v32, %v6175_v54  ;;  %v17532_v48 = vpack.c.bf16 %v6170_v7, %v6162_v34  ;;  %v8680_v60 = vld [vmem:[#allocation9 + $0x200] sm:$0xf]  ;;  %v19790_v45 = vld [vmem:[#allocation143_spill] sm:$0xff] }
 0x8b2   :  { %7161 = vmatpush.bf16.msrb.mxu2 %v8705_v25  ;;  %v8761_v44 = vor.u32 %v9115_v5, %v8760_v50  ;;  %v8833_v62 = vor.u32 %v9133_v10, %v8832_v55  ;;  %v9095_v41 = vld [vmem:[#allocation9 + $0x204] sm:$0xf0]  ;;  %v6097_v23 = vmul.f32 %v17390_v0, %v19790_v45  ;;  %v19791_v31 = vld [vmem:[#allocation134_spill] sm:$0xff]  ;;  %v9113_v13 = vld [vmem:[#allocation9 + $0x294] sm:$0xf0]  ;;  %v5988_v38 = vmul.f32 %v17522_v11, %v17480_v29 }
 0x8b3   :  { %7195 = vmatpush.bf16.msra.mxu3 %v8769_v12  ;;  %7228 = vmatpush.bf16.msra.mxu0 %v8841_v20  ;;  %v17534_v25 = vpack.c.bf16 %v6184_v17, %v6176_v1  ;;  %v6105_v28 = vmul.f32 %v17390_v0, %v19791_v31  ;;  %v8824_v40 = vld [vmem:[#allocation9 + $0x320] sm:$0xf]  ;;  %v9131_v26 = vld [vmem:[#allocation9 + $0x324] sm:$0xf0]  ;;  %9796 = vrcp.f32 %v17526_v4  ;;  %v8681_v27 = vor.u32 %v9095_v41, %v8680_v60  ;;  %v8896_v57 = vld [vmem:[#allocation9 + $0x3b0] sm:$0xf] }
 0x8b4   :  { %v17528_v35 = vpop.eup %9792  ;;  %7262 = vmatpush.bf16.msrb.mxu1 %v8905_v3  ;;  %v9149_v54 = vld [vmem:[#allocation9 + $0x3b4] sm:$0xf0]  ;;  %v8753_v12 = vor.u32 %v9113_v13, %v8752_v42  ;;  %v8825_v37 = vor.u32 %v9131_v26, %v8824_v40  ;;  %v8888_v36 = vld [vmem:[#allocation9 + $0x3a0] sm:$0xf]  ;;  %v9147_v34 = vld [vmem:[#allocation9 + $0x3a4] sm:$0xf0]  ;;  %vm5992_vm15 = vweird.f32 %v17480_v29  ;;  %vm5993_vm0 = vweird.f32 %v17522_v11 }
 0x8b5   :  { %7136 = vmatmul.bf16.gmra.mxu1 %v17485_v58  ;;  %v9795_v18 = vpop.eup %9794  ;;  %v6003_v30 = vmul.f32 %v17528_v35, %v17496_v52  ;;  %v8897_v32 = vor.u32 %v9149_v54, %v8896_v57  ;;  %v19792_v56 = vld [vmem:[#allocation85_spill] sm:$0xff]  ;;  %v19793_v50 = vld [vmem:[#allocation74_spill] sm:$0xff]  ;;  %v9129_v63 = vld [vmem:[#allocation9 + $0x314] sm:$0xf0]  ;;  %v5989_v1 = vsub.f32 1.0, %v5988_v38  ;;  %v8889_v8 = vor.u32 %v9147_v34, %v8888_v36 }
 0x8b6   :  { %7039 = vmatmul.bf16.gmra.mxu2 %v17483_v15  ;;  %v17547_v53 = vadd.f32 1.0, %v9795_v18  ;;  %v6177_v7 = vadd.f32 %v6097_v23, %v19792_v56  ;;  %v6185_v20 = vadd.f32 %v6105_v28, %v19793_v50  ;;  %v9111_v46 = vld [vmem:[#allocation9 + $0x284] sm:$0xf0]  ;;  %v8816_v2 = vld [vmem:[#allocation9 + $0x310] sm:$0xf]  ;;  %v19794_v5 = vld [vmem:[#allocation163_spill] sm:$0xff]  ;;  %vm6007_vm3 = vweird.f32 %v17496_v52 }
 0x8b7   :  { %7162 = vmatpush.bf16.msrb.mxu2 %v8697_v47  ;;  %7196 = vmatpush.bf16.msra.mxu3 %v8761_v44  ;;  %v8744_v47 = vld [vmem:[#allocation9 + $0x280] sm:$0xf]  ;;  %v6004_v17 = vsub.f32 1.0, %v6003_v30  ;;  %v6111_v3 = vmul.f32 %v17323_v59, %v19794_v5  ;;  %v19795_v55 = vld [vmem:[#allocation155_spill] sm:$0xff]  ;;  %v8880_v44 = vld [vmem:[#allocation9 + $0x390] sm:$0xf]  ;;  %v8817_v23 = vor.u32 %v9129_v63, %v8816_v2  ;;  %v5990_v30 = vmul.f32 %v17522_v11, %v5989_v1 }
 0x8b8   :  { %7073 = vmatmul.bf16.gmra.mxu3 %v17487_v14  ;;  %7229 = vmatpush.bf16.msra.mxu0 %v8833_v62  ;;  %v6119_v10 = vmul.f32 %v17323_v59, %v19795_v55  ;;  %v9145_v42 = vld [vmem:[#allocation9 + $0x394] sm:$0xf0]  ;;  %9798 = vrcp.f32 %v17547_v53  ;;  %v19797_v60 = vld [vmem:[#allocation148_spill] sm:$0xff]  ;;  %v8745_v45 = vor.u32 %v9111_v46, %v8744_v47  ;;  %v17563_v31 = vpack.c.bf16 %v6185_v20, %v6177_v7  ;;  %v9127_v38 = vld [vmem:[#allocation9 + $0x304] sm:$0xf0] }
 0x8b9   :  { %7263 = vmatpush.bf16.msrb.mxu1 %v8897_v32  ;;  %v17558_v62 = vpop.eup %9796  ;;  %v6106_v41 = vmul.f32 %v17423_v22, %v19797_v60  ;;  %v19798_v59 = vld [vmem:[#allocation164_spill] sm:$0xff]  ;;  %v6005_v57 = vmul.f32 %v17528_v35, %v6004_v17  ;;  %v9143_v20 = vld [vmem:[#allocation9 + $0x384] sm:$0xf0]  ;;  %v5996_v46 = vand.u32 2147483647, %v17480_v29  ;;  %v19804_v2 = vld [vmem:[#allocation30_spill] sm:$0xff]  ;;  %v5991_v5 = vadd.f32 %v17522_v11, %v5990_v30 }
 0x8ba   :  { %v6112_v28 = vmul.f32 %v17329_v19, %v19798_v59  ;;  %v19799_v13 = vld [vmem:[#allocation156_spill] sm:$0xff]  ;;  %v6018_v54 = vmul.f32 %v17558_v62, %v17526_v4  ;;  %v19805_v1 = vld [vmem:[#allocation113_spill] sm:$0xff]  ;;  %vm6008_vm4 = vweird.f32 %v17528_v35  ;;  %vm17598_vm5 = vmor %vm5992_vm15, %vm5993_vm0  ;;  %vm6023_vm9 = vweird.f32 %v17558_v62 }
 0x8bb   :  { %7163 = vmatpush.bf16.msrb.mxu2 %v8689_v24  ;;  %v19796_v24 = vld [vmem:[#allocation160_spill] sm:$0xff]  ;;  %7197 = vmatpush.bf16.msra.mxu3 %v8753_v12  ;;  %v6120_v40 = vmul.f32 %v17329_v19, %v19799_v13  ;;  %v19803_v19 = vld [vmem:[#allocation94_spill] sm:$0xff]  ;;  %v6006_v55 = vadd.f32 %v17528_v35, %v6005_v57  ;;  %v19809_v13 = vld [vmem:[#allocation153_spill] sm:$0xff]  ;;  %vm5997_vm7 = vcmp.eq.f32.partialorder %v5996_v46, 8.507059e+37  ;;  %vm6022_vm10 = vweird.f32 %v17526_v4 }
 0x8bc   :  { %v6098_v18 = vmul.f32 %v17423_v22, %v19796_v24  ;;  %7230 = vmatpush.bf16.msra.mxu0 %v8825_v37  ;;  %v8808_v26 = vld [vmem:[#allocation9 + $0x300] sm:$0xf]  ;;  %v19801_v37 = vld [vmem:[#allocation117_spill] sm:$0xff]  ;;  %v6186_v56 = vadd.f32 %v6106_v41, %v19803_v19  ;;  %v6192_v63 = vadd.f32 %v6112_v28, %v19804_v2  ;;  %v19808_v59 = vld [vmem:[#allocation162_spill] sm:$0xff]  ;;  %vm6037_vm2 = vweird.f32 %v17547_v53 }
 0x8bd   :  { %7264 = vmatpush.bf16.msrb.mxu1 %v8889_v8  ;;  %v19800_v12 = vld [vmem:[#allocation48_spill] sm:$0xff]  ;;  %v6199_v32 = vadd.f32 %v6119_v10, %v19801_v37  ;;  %v8809_v7 = vor.u32 %v9127_v38, %v8808_v26  ;;  %v6200_v8 = vadd.f32 %v6120_v40, %v19805_v1  ;;  %v6019_v10 = vsub.f32 1.0, %v6018_v54  ;;  %vm17615_vm6 = vmor %vm6007_vm3, %vm6008_vm4  ;;  %v19812_v57 = vld [vmem:[#allocation77_spill] sm:$0xff] }
 0x8be   :  { %7107 = vmatmul.bf16.gmra.mxu0 %v17511_v16  ;;  %v6191_v47 = vadd.f32 %v6111_v3, %v19800_v12  ;;  %v19802_v36 = vld [vmem:[#allocation108_spill] sm:$0xff]  ;;  %v17582_v17 = vpop.eup %9798  ;;  %v5998_v3 = vand.u32 2147483648, %v17480_v29  ;;  %v6113_v28 = vmul.f32 %v17390_v0, %v19808_v59  ;;  %v6121_v40 = vmul.f32 %v17390_v0, %v19809_v13  ;;  %v19813_v12 = vld [vmem:[#allocation99_spill] sm:$0xff]  ;;  %v19817_v46 = vld [vmem:[#allocation101_spill] sm:$0xff] }
 0x8bf   :  { %7164 = vmatpush.bf16.msrb.mxu2 %v8681_v27  ;;  %v8881_v27 = vor.u32 %v9145_v42, %v8880_v44  ;;  %v6178_v34 = vadd.f32 %v6098_v18, %v19802_v36  ;;  %7198 = vmatpush.bf16.msra.mxu3 %v8745_v45  ;;  %v8872_v50 = vld [vmem:[#allocation9 + $0x380] sm:$0xf]  ;;  %v6011_v18 = vand.u32 2147483647, %v17496_v52  ;;  %v6013_v44 = vand.u32 2147483648, %v17496_v52  ;;  %vm17652_vm11 = vmor %vm6022_vm10, %vm6023_vm9  ;;  %v19827_v29 = vld [vmem:[#allocation66_spill] sm:$0xff] }
 0x8c0   :  { %7231 = vmatpush.bf16.msra.mxu0 %v8817_v23  ;;  %v8873_v24 = vor.u32 %v9143_v20, %v8872_v50  ;;  %v17592_v42 = vpack.c.bf16 %v6199_v32, %v6191_v47  ;;  %v6033_v45 = vmul.f32 %v17582_v17, %v17547_v53  ;;  %v17604_v23 = vpack.c.bf16 %v6200_v8, %v6192_v63  ;;  %v19816_v50 = vld [vmem:[#allocation78_spill] sm:$0xff] }
 0x8c1   :  { %7265 = vmatpush.bf16.msrb.mxu1 %v8881_v27  ;;  %v17594_v60 = vpack.c.bf16 %v6186_v56, %v6178_v34  ;;  %v5995_v26 = vsel %vm17598_vm5, %v17522_v11, %v5991_v5  ;;  %v5999_v38 = vor.u32 1.1754944e-38, %v5998_v3  ;;  %v6010_v30 = vsel %vm17615_vm6, %v17528_v35, %v6006_v55  ;;  %v19814_v34 = vld [vmem:[#allocation166_spill] sm:$0xff]  ;;  %v19815_v56 = vld [vmem:[#allocation165_spill] sm:$0xff] }
 0x8c2   :  { %v6020_v0 = vmul.f32 %v17558_v62, %v6019_v10  ;;  %vm6012_vm8 = vcmp.eq.f32.partialorder %v6011_v18, 8.507059e+37  ;;  %v6014_v52 = vor.u32 1.1754944e-38, %v6013_v44  ;;  %v6034_v27 = vsub.f32 1.0, %v6033_v45  ;;  %v19818_v8 = vld [vmem:[#allocation130_spill] sm:$0xff]  ;;  %v19824_v18 = vld [vmem:[#allocation96_spill] sm:$0xff] }
 0x8c3   :  { %v17626_v11 = vsel %vm5997_vm7, %v5999_v38, %v5995_v26  ;;  %v6193_v54 = vadd.f32 %v6113_v28, %v19812_v57  ;;  %v6201_v47 = vadd.f32 %v6121_v40, %v19813_v12  ;;  %v6026_v32 = vand.u32 2147483647, %v17526_v4  ;;  %v19819_v3 = vld [vmem:[#allocation114_spill] sm:$0xff]  ;;  %v8482_v45 = vld [vmem:[#allocation9 + $0x78] sm:$0xf0]  ;;  %v19826_v40 = vld [vmem:[#allocation60_spill] sm:$0xff] }
 0x8c4   :  { %7232 = vmatpush.bf16.msra.mxu0 %v8809_v7  ;;  %v17630_v37 = vsel %vm6012_vm8, %v6014_v52, %v6010_v30  ;;  %v6028_v35 = vand.u32 2147483648, %v17526_v4  ;;  %v6021_v36 = vadd.f32 %v17558_v62, %v6020_v0  ;;  %v6114_v19 = vmul.f32 %v17423_v22, %v19814_v34  ;;  %v9044_v41 = vld [vmem:[#allocation9 + $0x74] sm:$0xf]  ;;  %v8546_v0 = vld [vmem:[#allocation9 + $0xf8] sm:$0xf0]  ;;  %v19829_v57 = vld [vmem:[#allocation40_spill] sm:$0xff] }
 0x8c5   :  { %7141 = vmatmul.bf16.gmra.mxu1 %v17532_v48  ;;  %v6122_v7 = vmul.f32 %v17423_v22, %v19815_v56  ;;  %v6051_v20 = vmul.f32 %v17626_v11, %v19816_v50  ;;  %v6059_v2 = vmul.f32 %v17626_v11, %v19817_v46  ;;  %v6035_v63 = vmul.f32 %v17582_v17, %v6034_v27  ;;  %v9060_v59 = vld [vmem:[#allocation9 + $0xf4] sm:$0xf]  ;;  %v19832_v50 = vld [vmem:[#allocation131_spill] sm:$0xff]  ;;  %v9058_v4 = vld [vmem:[#allocation9 + $0xe4] sm:$0xf] }
 0x8c6   :  { %7044 = vmatmul.bf16.gmra.mxu2 %v17530_v9  ;;  %7266 = vmatpush.bf16.msrb.mxu1 %v8873_v24  ;;  %v17646_v1 = vpack.c.bf16 %v6201_v47, %v6193_v54  ;;  %v6052_v5 = vmul.f32 %v17630_v37, %v19818_v8  ;;  %v6060_v55 = vmul.f32 %v17630_v37, %v19819_v3  ;;  %vm17656_vm1 = vcmp.eq.f32.partialorder %v6026_v32, 8.507059e+37  ;;  %v19825_v28 = vld [vmem:[#allocation118_spill] sm:$0xff]  ;;  %v8474_v8 = vld [vmem:[#allocation9 + $0x68] sm:$0xf0] }
 0x8c7   :  { %v6029_v10 = vor.u32 1.1754944e-38, %v6028_v35  ;;  %v6025_v24 = vsel %vm17652_vm11, %v17558_v62, %v6021_v36  ;;  %vm6038_vm12 = vweird.f32 %v17582_v17  ;;  %v6194_v44 = vadd.f32 %v6114_v19, %v19824_v18  ;;  %v19828_v62 = vld [vmem:[#allocation41_spill] sm:$0xff]  ;;  %v19835_v18 = vld [vmem:[#allocation79_spill] sm:$0xff] }
 0x8c8   :  { %7078 = vmatmul.bf16.gmra.mxu3 %v17534_v25  ;;  %v6202_v13 = vadd.f32 %v6122_v7, %v19825_v28  ;;  %v6131_v26 = vadd.f32 %v6051_v20, %v19826_v40  ;;  %v6139_v38 = vadd.f32 %v6059_v2, %v19827_v29  ;;  %v8485_v30 = vor.u32 %v9044_v41, %v8482_v45  ;;  %vm17681_vm13 = vmor %vm6037_vm2, %vm6038_vm12  ;;  %v19833_v20 = vld [vmem:[#allocation129_spill] sm:$0xff]  ;;  %v8674_v28 = vld [vmem:[#allocation9 + $0x1f8] sm:$0xf0] }
 0x8c9   :  { %v6036_v52 = vadd.f32 %v17582_v17, %v6035_v63  ;;  %v6132_v27 = vadd.f32 %v6052_v5, %v19828_v62  ;;  %v6140_v54 = vadd.f32 %v6060_v55, %v19829_v57  ;;  %v8549_v12 = vor.u32 %v9060_v59, %v8546_v0  ;;  %v9042_v63 = vld [vmem:[#allocation9 + $0x64] sm:$0xf]  ;;  %v9076_v5 = vld [vmem:[#allocation9 + $0x174] sm:$0xf]  ;;  %v8610_v55 = vld [vmem:[#allocation9 + $0x178] sm:$0xf0] }
 0x8ca   :  { %v17674_v47 = vsel %vm17656_vm1, %v6029_v10, %v6025_v24  ;;  %v6041_v32 = vand.u32 2147483647, %v17547_v53  ;;  %v6043_v35 = vand.u32 2147483648, %v17547_v53  ;;  %7293 = vmatpush.bf16.msra.mxu2 %v8485_v30  ;;  %v17685_v34 = vpack.c.bf16 %v6202_v13, %v6194_v44  ;;  %v8538_v22 = vld [vmem:[#allocation9 + $0xe8] sm:$0xf0]  ;;  %v19834_v10 = vld [vmem:[#allocation128_spill] sm:$0xff] }
 0x8cb   :  { %7327 = vmatpush.bf16.msrb.mxu3 %v8549_v12  ;;  %v17687_v19 = vpack.c.bf16 %v6139_v38, %v6131_v26  ;;  %v6040_v56 = vsel %vm17681_vm13, %v17582_v17, %v6036_v52  ;;  %v17692_v7 = vpack.c.bf16 %v6140_v54, %v6132_v27  ;;  %v6053_v53 = vmul.f32 %v17674_v47, %v19832_v50  ;;  %v9092_v59 = vld [vmem:[#allocation9 + $0x1f4] sm:$0xf]  ;;  %v19836_v40 = vld [vmem:[#allocation69_spill] sm:$0xff]  ;;  %v19837_v29 = vld [vmem:[#allocation144_spill] sm:$0xff] }
 0x8cc   :  { %v6061_v46 = vmul.f32 %v17674_v47, %v19833_v20  ;;  %vm6042_vm14 = vcmp.eq.f32.partialorder %v6041_v32, 8.507059e+37  ;;  %v6044_v2 = vor.u32 1.1754944e-38, %v6043_v35  ;;  %v8477_v3 = vor.u32 %v9042_v63, %v8474_v8  ;;  %v19838_v30 = vld [vmem:[#allocation36_spill] sm:$0xff]  ;;  %v19839_v52 = vld [vmem:[#allocation31_spill] sm:$0xff]  ;;  %v19840_v57 = vld [vmem:[#allocation86_spill] sm:$0xff] }
 0x8cd   :  { %v6133_v24 = vadd.f32 %v6053_v53, %v19834_v10  ;;  %v8613_v41 = vor.u32 %v9076_v5, %v8610_v55  ;;  %v8541_v45 = vor.u32 %v9058_v4, %v8538_v22  ;;  %v8677_v13 = vor.u32 %v9092_v59, %v8674_v28  ;;  %v19841_v12 = vld [vmem:[#allocation145_spill] sm:$0xff]  ;;  %v19844_v53 = vld [vmem:[#allocation110_spill] sm:$0xff]  ;;  %v19846_v63 = vld [vmem:[#allocation24_spill] sm:$0xff] }
 0x8ce   :  { %7112 = vmatmul.bf16.gmra.mxu0 %v17563_v31  ;;  %v17701_v17 = vsel %vm6042_vm14, %v6044_v2, %v6040_v56  ;;  %v6141_v44 = vadd.f32 %v6061_v46, %v19835_v18  ;;  %7294 = vmatpush.bf16.msra.mxu2 %v8477_v3  ;;  %v6067_v26 = vmul.f32 %v17626_v11, %v19836_v40  ;;  %v19842_v35 = vld [vmem:[#allocation57_spill] sm:$0xff]  ;;  %v19847_v5 = vld [vmem:[#allocation119_spill] sm:$0xff]  ;;  %v19849_v18 = vld [vmem:[#allocation146_spill] sm:$0xff] }
 0x8cf   :  { %7361 = vmatpush.bf16.msrb.mxu0 %v8613_v41  ;;  %7328 = vmatpush.bf16.msrb.mxu3 %v8541_v45  ;;  %v6075_v38 = vmul.f32 %v17626_v11, %v19837_v29  ;;  %v6054_v0 = vmul.f32 %v17701_v17, %v19838_v30  ;;  %v6062_v62 = vmul.f32 %v17701_v17, %v19839_v52  ;;  %v19843_v56 = vld [vmem:[#allocation105_spill] sm:$0xff]  ;;  %v9040_v41 = vld [vmem:[#allocation9 + $0x54] sm:$0xf]  ;;  %v8466_v45 = vld [vmem:[#allocation9 + $0x58] sm:$0xf0] }
 0x8d0   :  { %7395 = vmatpush.bf16.msra.mxu1 %v8677_v13  ;;  %v17713_v27 = vpack.c.bf16 %v6141_v44, %v6133_v24  ;;  %v6068_v54 = vmul.f32 %v17630_v37, %v19840_v57  ;;  %v6076_v32 = vmul.f32 %v17630_v37, %v19841_v12  ;;  %v6147_v36 = vadd.f32 %v6067_v26, %v19842_v35  ;;  %v19845_v46 = vld [vmem:[#allocation33_spill] sm:$0xff]  ;;  %v9074_v59 = vld [vmem:[#allocation9 + $0x164] sm:$0xf]  ;;  %v19850_v40 = vld [vmem:[#allocation42_spill] sm:$0xff] }
 0x8d1   :  { %v6155_v50 = vadd.f32 %v6075_v38, %v19843_v56  ;;  %v6134_v20 = vadd.f32 %v6054_v0, %v19844_v53  ;;  %v6142_v2 = vadd.f32 %v6062_v62, %v19845_v46  ;;  %v19848_v10 = vld [vmem:[#allocation89_spill] sm:$0xff]  ;;  %v6077_v44 = vmul.f32 %v17674_v47, %v19849_v18  ;;  %v19852_v0 = vld [vmem:[#allocation106_spill] sm:$0xff]  ;;  %v8530_v56 = vld [vmem:[#allocation9 + $0xd8] sm:$0xf0] }
 0x8d2   :  { %v6148_v8 = vadd.f32 %v6068_v54, %v19846_v63  ;;  %v6156_v3 = vadd.f32 %v6076_v32, %v19847_v5  ;;  %v6069_v24 = vmul.f32 %v17674_v47, %v19848_v10  ;;  %v8469_v28 = vor.u32 %v9040_v41, %v8466_v45  ;;  %v8602_v13 = vld [vmem:[#allocation9 + $0x168] sm:$0xf0]  ;;  %v19854_v54 = vld [vmem:[#allocation122_spill] sm:$0xff]  ;;  %v19858_v10 = vld [vmem:[#allocation115_spill] sm:$0xff] }
 0x8d3   :  { %v17726_v55 = vpack.c.bf16 %v6155_v50, %v6147_v36  ;;  %v17728_v4 = vpack.c.bf16 %v6142_v2, %v6134_v20  ;;  %v19851_v29 = vld [vmem:[#allocation97_spill] sm:$0xff]  ;;  %v8605_v30 = vor.u32 %v9074_v59, %v8602_v13  ;;  %v6083_v52 = vmul.f32 %v17626_v11, %v19852_v0  ;;  %v9056_v36 = vld [vmem:[#allocation9 + $0xd4] sm:$0xf]  ;;  %v9090_v50 = vld [vmem:[#allocation9 + $0x1e4] sm:$0xf] }
 0x8d4   :  { %v17730_v22 = vpack.c.bf16 %v6156_v3, %v6148_v8  ;;  %v6149_v26 = vadd.f32 %v6069_v24, %v19850_v40  ;;  %v6157_v38 = vadd.f32 %v6077_v44, %v19851_v29  ;;  %7295 = vmatpush.bf16.msra.mxu2 %v8469_v28  ;;  %v19853_v62 = vld [vmem:[#allocation157_spill] sm:$0xff]  ;;  %v6070_v12 = vmul.f32 %v17701_v17, %v19854_v54  ;;  %v19857_v2 = vld [vmem:[#allocation158_spill] sm:$0xff]  ;;  %v9038_v0 = vld [vmem:[#allocation9 + $0x44] sm:$0xf] }
 0x8d5   :  { %7146 = vmatmul.bf16.gmra.mxu1 %v17594_v60  ;;  %7362 = vmatpush.bf16.msrb.mxu0 %v8605_v30  ;;  %v6091_v57 = vmul.f32 %v17626_v11, %v19853_v62  ;;  %v19855_v32 = vld [vmem:[#allocation141_spill] sm:$0xff]  ;;  %v6092_v63 = vmul.f32 %v17630_v37, %v19857_v2  ;;  %v8533_v8 = vor.u32 %v9056_v36, %v8530_v56  ;;  %v9072_v54 = vld [vmem:[#allocation9 + $0x154] sm:$0xf]  ;;  %v8594_v56 = vld [vmem:[#allocation9 + $0x158] sm:$0xf0] }
 0x8d6   :  { %7049 = vmatmul.bf16.gmra.mxu2 %v17592_v42  ;;  %v6078_v35 = vmul.f32 %v17701_v17, %v19855_v32  ;;  %v17749_v53 = vpack.c.bf16 %v6157_v38, %v6149_v26  ;;  %v19856_v20 = vld [vmem:[#allocation61_spill] sm:$0xff]  ;;  %v6163_v24 = vadd.f32 %v6083_v52, %v19858_v10  ;;  %v19863_v26 = vld [vmem:[#allocation82_spill] sm:$0xff]  ;;  %v8450_v10 = vld [vmem:[#allocation9 + $0x38] sm:$0xf0] }
 0x8d7   :  { %v6084_v46 = vmul.f32 %v17630_v37, %v19856_v20  ;;  %v8666_v5 = vld [vmem:[#allocation9 + $0x1e8] sm:$0xf0]  ;;  %7329 = vmatpush.bf16.msrb.mxu3 %v8533_v8  ;;  %v6172_v29 = vadd.f32 %v6092_v63, %v19863_v26  ;;  %v19864_v52 = vld [vmem:[#allocation70_spill] sm:$0xff]  ;;  %v8658_v8 = vld [vmem:[#allocation9 + $0x1d8] sm:$0xf0] }
 0x8d8   :  { %7083 = vmatmul.bf16.gmra.mxu3 %v17604_v23  ;;  %v8669_v3 = vor.u32 %v9090_v50, %v8666_v5  ;;  %v19859_v18 = vld [vmem:[#allocation49_spill] sm:$0xff]  ;;  %v9054_v50 = vld [vmem:[#allocation9 + $0xc4] sm:$0xf]  ;;  %v9088_v63 = vld [vmem:[#allocation9 + $0x1d4] sm:$0xf] }
 0x8d9   :  { %v6171_v44 = vadd.f32 %v6091_v57, %v19859_v18  ;;  %v19860_v41 = vld [vmem:[#allocation109_spill] sm:$0xff]  ;;  %v6085_v57 = vmul.f32 %v17674_v47, %v19864_v52  ;;  %v8661_v5 = vor.u32 %v9088_v63, %v8658_v8  ;;  %v19871_v52 = vld [vmem:[#allocation154_spill] sm:$0xff] }
 0x8da   :  { %v6150_v45 = vadd.f32 %v6070_v12, %v19860_v41  ;;  %v19861_v59 = vld [vmem:[#allocation25_spill] sm:$0xff]  ;;  %7396 = vmatpush.bf16.msra.mxu1 %v8669_v3  ;;  %v19865_v12 = vld [vmem:[#allocation159_spill] sm:$0xff]  ;;  %v9036_v3 = vld [vmem:[#allocation9 + $0x34] sm:$0xf] }
 0x8db   :  { %v6158_v28 = vadd.f32 %v6078_v35, %v19861_v59  ;;  %v19862_v13 = vld [vmem:[#allocation125_spill] sm:$0xff]  ;;  %v17762_v38 = vpack.c.bf16 %v6171_v44, %v6163_v24  ;;  %v6093_v35 = vmul.f32 %v17674_v47, %v19865_v12  ;;  %v9052_v24 = vld [vmem:[#allocation9 + $0xb4] sm:$0xf]  ;;  %v8453_v18 = vor.u32 %v9036_v3, %v8450_v10  ;;  %v8514_v44 = vld [vmem:[#allocation9 + $0xb8] sm:$0xf0] }
 0x8dc   :  { %v6164_v40 = vadd.f32 %v6084_v46, %v19862_v13  ;;  %v8458_v62 = vld [vmem:[#allocation9 + $0x48] sm:$0xf0]  ;;  %v8597_v46 = vor.u32 %v9072_v54, %v8594_v56  ;;  %v19866_v41 = vld [vmem:[#allocation71_spill] sm:$0xff]  ;;  %v8517_v13 = vor.u32 %v9052_v24, %v8514_v44  ;;  %v6094_v12 = vmul.f32 %v17701_v17, %v19871_v52  ;;  %v9050_v56 = vld [vmem:[#allocation9 + $0xa4] sm:$0xf] }
 0x8dd   :  { %v17764_v30 = vpack.c.bf16 %v6158_v28, %v6150_v45  ;;  %v8461_v36 = vor.u32 %v9038_v0, %v8458_v62  ;;  %v8522_v20 = vld [vmem:[#allocation9 + $0xc8] sm:$0xf0]  ;;  %v6165_v45 = vadd.f32 %v6085_v57, %v19866_v41  ;;  %v19867_v59 = vld [vmem:[#allocation59_spill] sm:$0xff]  ;;  %v19870_v62 = vld [vmem:[#allocation132_spill] sm:$0xff] }
 0x8de   :  { %7117 = vmatmul.bf16.gmra.mxu0 %v17646_v1  ;;  %v17766_v32 = vpack.c.bf16 %v6172_v29, %v6164_v40  ;;  %v8525_v2 = vor.u32 %v9054_v50, %v8522_v20  ;;  %v6173_v28 = vadd.f32 %v6093_v35, %v19867_v59  ;;  %7397 = vmatpush.bf16.msra.mxu1 %v8661_v5  ;;  %v19868_v40 = vld [vmem:[#allocation168_spill] sm:$0xff]  ;;  %v19869_v29 = vld [vmem:[#allocation150_spill] sm:$0xff]  ;;  %v8442_v57 = vld [vmem:[#allocation9 + $0x28] sm:$0xf0] }
 0x8df   :  { %7296 = vmatpush.bf16.msra.mxu2 %v8461_v36  ;;  %7363 = vmatpush.bf16.msrb.mxu0 %v8597_v46  ;;  %v6099_v26 = vmul.f32 %v17626_v11, %v19868_v40  ;;  %v6107_v0 = vmul.f32 %v17626_v11, %v19869_v29  ;;  %v6086_v54 = vmul.f32 %v17701_v17, %v19870_v62  ;;  %v9034_v36 = vld [vmem:[#allocation9 + $0x24] sm:$0xf]  ;;  %v19873_v46 = vld [vmem:[#allocation170_spill] sm:$0xff]  ;;  %v8506_v8 = vld [vmem:[#allocation9 + $0xa8] sm:$0xf0] }
 0x8e0   :  { %7330 = vmatpush.bf16.msrb.mxu3 %v8525_v2  ;;  %v17785_v35 = vpack.c.bf16 %v6173_v28, %v6165_v45  ;;  %v19872_v50 = vld [vmem:[#allocation140_spill] sm:$0xff]  ;;  %v6108_v2 = vmul.f32 %v17630_v37, %v19873_v46  ;;  %v8445_v63 = vor.u32 %v9034_v36, %v8442_v57  ;;  %v8586_v3 = vld [vmem:[#allocation9 + $0x148] sm:$0xf0]  ;;  %v19874_v10 = vld [vmem:[#allocation83_spill] sm:$0xff] }
 0x8e1   :  { %v6100_v20 = vmul.f32 %v17630_v37, %v19872_v50  ;;  %v9070_v5 = vld [vmem:[#allocation9 + $0x144] sm:$0xf]  ;;  %v6179_v24 = vadd.f32 %v6099_v26, %v19874_v10  ;;  %v8650_v59 = vld [vmem:[#allocation9 + $0x1c8] sm:$0xf0]  ;;  %v19875_v45 = vld [vmem:[#allocation55_spill] sm:$0xff] }
 0x8e2   :  { %v8589_v44 = vor.u32 %v9070_v5, %v8586_v3  ;;  %v9086_v41 = vld [vmem:[#allocation9 + $0x1c4] sm:$0xf]  ;;  %v6187_v28 = vadd.f32 %v6107_v0, %v19875_v45  ;;  %v8434_v52 = vld [vmem:[#allocation9 + $0x18] sm:$0xf0]  ;;  %v9048_v36 = vld [vmem:[#allocation9 + $0x94] sm:$0xf] }
 0x8e3   :  { %7297 = vmatpush.bf16.msra.mxu2 %v8453_v18  ;;  %v8509_v18 = vor.u32 %v9050_v56, %v8506_v8  ;;  %v19876_v40 = vld [vmem:[#allocation100_spill] sm:$0xff]  ;;  %v8653_v62 = vor.u32 %v9086_v41, %v8650_v59  ;;  %v8498_v57 = vld [vmem:[#allocation9 + $0x98] sm:$0xf0]  ;;  %v19879_v3 = vld [vmem:[#allocation73_spill] sm:$0xff] }
 0x8e4   :  { %7331 = vmatpush.bf16.msrb.mxu3 %v8517_v13  ;;  %v9032_v13 = vld [vmem:[#allocation9 + $0x14] sm:$0xf]  ;;  %v6166_v29 = vadd.f32 %v6086_v54, %v19876_v40  ;;  %v19877_v50 = vld [vmem:[#allocation84_spill] sm:$0xff]  ;;  %7364 = vmatpush.bf16.msrb.mxu0 %v8589_v44  ;;  %v8501_v56 = vor.u32 %v9048_v36, %v8498_v57  ;;  %v19878_v8 = vld [vmem:[#allocation43_spill] sm:$0xff]  ;;  %v6188_v10 = vadd.f32 %v6108_v2, %v19879_v3 }
 0x8e5   :  { %7151 = vmatmul.bf16.gmra.mxu1 %v17685_v34  ;;  %v6174_v46 = vadd.f32 %v6094_v12, %v19877_v50  ;;  %v8437_v26 = vor.u32 %v9032_v13, %v8434_v52  ;;  %v6180_v5 = vadd.f32 %v6100_v20, %v19878_v8  ;;  %v17801_v0 = vld [vmem:[%s18076_s13] sm:$0x3]  ;;  %v17803_v54 = vpack.c.bf16 %v6187_v28, %v6179_v24  ;;  %v9068_v12 = vld [vmem:[#allocation9 + $0x134] sm:$0xf]  ;;  %v9030_v44 = vld [vmem:[#allocation9 + $0x4] sm:$0xf] }
 0x8e6   :  { %7165 = vmatmul.bf16.vlgmr.msrb.gmra.mxu2 %v17687_v19  ;;  %7398 = vmatpush.bf16.msra.mxu1 %v8653_v62  ;;  %19880 = vst [vmem:[#allocation27_spill] sm:$0xff] %v17801_v0  ;;  %v19884_v20 = vld [vmem:[#allocation169_spill] sm:$0xff]  ;;  %v19885_v59 = vld [vmem:[#allocation167_spill] sm:$0xff]  ;;  %v9046_v62 = vld [vmem:[#allocation9 + $0x84] sm:$0xf]  ;;  %v17816_v24 = vperm.slane %v17801_v0, 0 }
 0x8e7   :  { %7298 = vmatpush.bf16.msra.mxu2 %v8445_v63  ;;  %19881 = vst [vmem:[#allocation23_spill] sm:$0xff] %v17803_v54  ;;  %v17805_v63 = vpack.c.bf16 %v6174_v46, %v6166_v29  ;;  %v17807_v41 = vpack.c.bf16 %v6188_v10, %v6180_v5  ;;  %v6101_v2 = vmul.f32 %v17674_v47, %v19884_v20  ;;  %v8426_v40 = vld [vmem:[#allocation9 + $0x8] sm:$0xf0]  ;;  %v9066_v36 = vld [vmem:[#allocation9 + $0x124] sm:$0xf]  ;;  %v19887_v10 = vld [vmem:[#allocation34_spill] sm:$0xff] }
 0x8e8   :  { %7199 = vmatmul.bf16.vlgmr.msra.gmra.mxu3 %v17692_v7  ;;  %v6109_v13 = vmul.f32 %v17674_v47, %v19885_v59  ;;  %v8490_v52 = vld [vmem:[#allocation9 + $0x88] sm:$0xf0]  ;;  %v8429_v28 = vor.u32 %v9030_v44, %v8426_v40  ;;  %v9084_v46 = vld [vmem:[#allocation9 + $0x1b4] sm:$0xf]  ;;  %v19886_v5 = vld [vmem:[#allocation28_spill] sm:$0xff] }
 0x8e9   :  { %7332 = vmatpush.bf16.msrb.mxu3 %v8509_v18  ;;  %19882 = vst [vmem:[#allocation72_spill] sm:$0xff] %v17805_v63  ;;  %v8578_v18 = vld [vmem:[#allocation9 + $0x138] sm:$0xf0]  ;;  %v8493_v29 = vor.u32 %v9046_v62, %v8490_v52  ;;  %v8570_v57 = vld [vmem:[#allocation9 + $0x128] sm:$0xf0]  ;;  %v6181_v3 = vadd.f32 %v6101_v2, %v19886_v5  ;;  %v19888_v20 = vld [vmem:[#allocation172_spill] sm:$0xff] }
 0x8ea   :  { %19883 = vst [vmem:[#allocation124_spill] sm:$0xff] %v17807_v41  ;;  %v8581_v45 = vor.u32 %v9068_v12, %v8578_v18  ;;  %v8573_v50 = vor.u32 %v9066_v36, %v8570_v57  ;;  %v6189_v12 = vadd.f32 %v6109_v13, %v19887_v10  ;;  %v6115_v59 = vmul.f32 %v17626_v11, %v19888_v20  ;;  %v19889_v40 = vld [vmem:[#allocation171_spill] sm:$0xff]  ;;  %v19890_v62 = vld [vmem:[#allocation142_spill] sm:$0xff]  ;;  %v19891_v36 = vld [vmem:[#allocation133_spill] sm:$0xff] }
 0x8eb   :  { %7299 = vmatpush.bf16.msra.mxu2 %v8437_v26  ;;  %v8642_v26 = vld [vmem:[#allocation9 + $0x1b8] sm:$0xf0]  ;;  %v6102_v52 = vmul.f32 %v17701_v17, %v19890_v62  ;;  %v6110_v2 = vmul.f32 %v17701_v17, %v19891_v36  ;;  %v9064_v13 = vld [vmem:[#allocation9 + $0x114] sm:$0xf]  ;;  %v19894_v5 = vld [vmem:[#allocation173_spill] sm:$0xff] }
 0x8ec   :  { %7365 = vmatpush.bf16.msrb.mxu0 %v8581_v45  ;;  %v6123_v45 = vmul.f32 %v17626_v11, %v19889_v40  ;;  %v8562_v57 = vld [vmem:[#allocation9 + $0x118] sm:$0xf0]  ;;  %v6124_v11 = vmul.f32 %v17630_v37, %v19894_v5  ;;  %v8634_v20 = vld [vmem:[#allocation9 + $0x1a8] sm:$0xf0]  ;;  %v9080_v62 = vld [vmem:[#allocation9 + $0x194] sm:$0xf] }
 0x8ed   :  { %7333 = vmatpush.bf16.msrb.mxu3 %v8501_v56  ;;  %v8645_v56 = vor.u32 %v9084_v46, %v8642_v26  ;;  %v9082_v46 = vld [vmem:[#allocation9 + $0x1a4] sm:$0xf]  ;;  %v17830_v26 = vpack.c.bf16 %v6189_v12, %v6181_v3  ;;  %v8565_v10 = vor.u32 %v9064_v13, %v8562_v57  ;;  %v19895_v36 = vld [vmem:[#allocation45_spill] sm:$0xff]  ;;  %v19897_v12 = vld [vmem:[#allocation47_spill] sm:$0xff] }
 0x8ee   :  { %7233 = vmatmul.bf16.vlgmr.msra.gmra.mxu0 %v17713_v27  ;;  %v6195_v6 = vadd.f32 %v6115_v59, %v19895_v36  ;;  %v6182_v0 = vadd.f32 %v6102_v52, %v19897_v12 }
 0x8ef   :  { %7300 = vmatpush.bf16.msra.mxu2 %v8429_v28  ;;  %7399 = vmatpush.bf16.msra.mxu1 %v8645_v56  ;;  %19892 = vst [vmem:[#allocation103_spill] sm:$0xff] %v17830_v26  ;;  %v19893_v56 = vld [vmem:[#allocation174_spill] sm:$0xff] }
 0x8f0   :  { %7366 = vmatpush.bf16.msrb.mxu0 %v8573_v50  ;;  %v8637_v50 = vor.u32 %v9082_v46, %v8634_v20  ;;  %v19900_v46 = vld [vmem:[#allocation116_spill] sm:$0xff] }
 0x8f1   :  { %7334 = vmatpush.bf16.msrb.mxu3 %v8493_v29  ;;  %v6204_v5 = vadd.f32 %v6124_v11, %v19900_v46  ;;  %v19906_v46 = vld [vmem:[#allocation149_spill] sm:$0xff] }
 0x8f3   :  { %7400 = vmatpush.bf16.msra.mxu1 %v8637_v50 }
 0x8f4   :  { %7367 = vmatpush.bf16.msrb.mxu0 %v8565_v10  ;;  %v8618_v10 = vld [vmem:[#allocation9 + $0x188] sm:$0xf0] }
 0x8f5   :  { %7267 = vmatmul.bf16.vlgmr.msrb.gmra.mxu1 %v17728_v4 }
 0x8f6   :  { %7170 = vmatmul.bf16.gmra.mxu2 %v17726_v55 }
 0x8f8   :  { %7204 = vmatmul.bf16.gmra.mxu3 %v17730_v22 }
 0x8fe   :  { %7238 = vmatmul.bf16.gmra.mxu0 %v17749_v53 }
 0x905   :  { %7272 = vmatmul.bf16.gmra.mxu1 %v17764_v30 }
 0x906   :  { %7175 = vmatmul.bf16.gmra.mxu2 %v17762_v38 }
 0x908   :  { %7209 = vmatmul.bf16.gmra.mxu3 %v17766_v32 }
 0x90e   :  { %7243 = vmatmul.bf16.gmra.mxu0 %v17785_v35 }
 0x915   :  { %7277 = vmatmul.bf16.gmra.mxu1 %v17805_v63  ;;  %v8626_v63 = vld [vmem:[#allocation9 + $0x198] sm:$0xf0] }
 0x916   :  { %7180 = vmatmul.bf16.gmra.mxu2 %v17803_v54  ;;  %v8629_v13 = vor.u32 %v9080_v62, %v8626_v63  ;;  %v9078_v63 = vld [vmem:[#allocation9 + $0x184] sm:$0xf] }
 0x918   :  { %7214 = vmatmul.bf16.gmra.mxu3 %v17807_v41  ;;  %v19896_v41 = vld [vmem:[#allocation121_spill] sm:$0xff]  ;;  %7401 = vmatpush.bf16.msra.mxu1 %v8629_v13 }
 0x919   :  { %v7030_v8 = vpop.f32.mrf.mxu2  ;;  %v6203_v3 = vadd.f32 %v6123_v45, %v19896_v41 }
 0x91a   :  { %v7031_v18 = vadd.f32 %v7030_v8, %v17816_v24  ;;  %v6116_v8 = vmul.f32 %v17630_v37, %v19893_v56  ;;  %v19898_v56 = vld [vmem:[#allocation32_spill] sm:$0xff] }
 0x91b   :  { %v7064_v44 = vpop.f32.mrf.mxu3  ;;  %v7098_v29 = vpop.f32.mrf.mxu0  ;;  %v6190_v54 = vadd.f32 %v6110_v2, %v19898_v56  ;;  %v17844_v36 = vpack.c.bf16 %v6203_v3, %v6195_v6  ;;  %v8621_v6 = vor.u32 %v9078_v63, %v8618_v10  ;;  %v19908_v63 = vld [vmem:[#allocation87_spill] sm:$0xff] }
 0x91c   :  { %v7065_v28 = vadd.f32 %v7064_v44, %v7031_v18  ;;  %v9062_v18 = vld [vmem:[#allocation9 + $0x104] sm:$0xf]  ;;  %v8554_v44 = vld [vmem:[#allocation9 + $0x108] sm:$0xf0] }
 0x91d   :  { %v8557_v37 = vor.u32 %v9062_v18, %v8554_v44  ;;  %v17848_v2 = vpack.c.bf16 %v6190_v54, %v6182_v0  ;;  %v19902_v18 = vld [vmem:[#allocation136_spill] sm:$0xff]  ;;  %7402 = vmatpush.bf16.msra.mxu1 %v8621_v6 }
 0x91e   :  { %v7099_v40 = vadd.f32 %v7098_v29, %v7065_v28  ;;  %7248 = vmatmul.bf16.gmra.mxu0 %v17830_v26  ;;  %v19899_v29 = vld [vmem:[#allocation51_spill] sm:$0xff]  ;;  %v6125_v44 = vmul.f32 %v17674_v47, %v19902_v18  ;;  %v19903_v54 = vld [vmem:[#allocation104_spill] sm:$0xff] }
 0x91f   :  { %v6196_v57 = vadd.f32 %v6116_v8, %v19899_v29  ;;  %7368 = vmatpush.bf16.msrb.mxu0 %v8557_v37  ;;  %v19901_v8 = vld [vmem:[#allocation137_spill] sm:$0xff] }
 0x920   :  { %v6117_v11 = vmul.f32 %v17674_v47, %v19901_v8  ;;  %v19905_v29 = vld [vmem:[#allocation161_spill] sm:$0xff] }
 0x921   :  { %v7032_v28 = vpop.f32.mrf.mxu2  ;;  %v17850_v50 = vpack.c.bf16 %v6204_v5, %v6196_v57  ;;  %v6118_v57 = vmul.f32 %v17701_v17, %v19905_v29  ;;  %v6126_v5 = vmul.f32 %v17701_v17, %v19906_v46  ;;  %v9108_v17 = vld [vmem:[#allocation9 + $0x274] sm:$0xf] }
 0x922   :  { %v7033_v20 = vadd.f32 %v7032_v28, %v17816_v24  ;;  %v7132_v59 = vpop.f32.mrf.mxu1 }
 0x923   :  { %v7066_v26 = vpop.f32.mrf.mxu3  ;;  %v17846_v45 = vadd.f32 %v7132_v59, %v7099_v40  ;;  %v7100_v52 = vpop.f32.mrf.mxu0  ;;  %v19904_v40 = vld [vmem:[#allocation98_spill] sm:$0xff]  ;;  %v6206_v10 = vadd.f32 %v6126_v5, %v19908_v63  ;;  %v8730_v63 = vld [vmem:[#allocation9 + $0x268] sm:$0xf0] }
 0x924   :  { %v7067_v41 = vadd.f32 %v7066_v26, %v7033_v20  ;;  %v6197_v26 = vadd.f32 %v6117_v11, %v19903_v54  ;;  %v6205_v3 = vadd.f32 %v6125_v44, %v19904_v40 }
 0x925   :  { %7282 = vmatmul.bf16.gmra.mxu1 %v17848_v2 }
 0x926   :  { %v7101_v62 = vadd.f32 %v7100_v52, %v7067_v41  ;;  %7185 = vmatmul.bf16.gmra.mxu2 %v17844_v36  ;;  %v17868_v20 = vpack.c.bf16 %v6205_v3, %v6197_v26  ;;  %v19907_v41 = vld [vmem:[#allocation29_spill] sm:$0xff]  ;;  %v8738_v26 = vld [vmem:[#allocation9 + $0x278] sm:$0xf0] }
 0x927   :  { %v6198_v52 = vadd.f32 %v6118_v57, %v19907_v41  ;;  %v8741_v40 = vor.u32 %v9108_v17, %v8738_v26 }
 0x928   :  { %7219 = vmatmul.bf16.gmra.mxu3 %v17850_v50 }
 0x929   :  { %v7035_v0 = vpop.f32.mrf.mxu2  ;;  %v17876_v54 = vpack.c.bf16 %v6206_v10, %v6198_v52  ;;  %7429 = vmatpush.bf16.msrb.mxu2 %v8741_v40  ;;  %v9106_v52 = vld [vmem:[#allocation9 + $0x264] sm:$0xf] }
 0x92a   :  { %v7036_v12 = vadd.f32 %v7035_v0, %v17816_v24  ;;  %v7134_v37 = vpop.f32.mrf.mxu1  ;;  %v8733_v10 = vor.u32 %v9106_v52, %v8730_v63 }
 0x92b   :  { %v7069_v56 = vpop.f32.mrf.mxu3  ;;  %v17862_v47 = vadd.f32 %v7134_v37, %v7101_v62  ;;  %v7103_v28 = vpop.f32.mrf.mxu0 }
 0x92c   :  { %v7070_v13 = vadd.f32 %v7069_v56, %v7036_v12  ;;  %v9124_v12 = vld [vmem:[#allocation9 + $0x2f4] sm:$0xf]  ;;  %v8802_v56 = vld [vmem:[#allocation9 + $0x2f8] sm:$0xf0] }
 0x92d   :  { %v8805_v37 = vor.u32 %v9124_v12, %v8802_v56  ;;  %7430 = vmatpush.bf16.msrb.mxu2 %v8733_v10 }
 0x92e   :  { %v7104_v59 = vadd.f32 %v7103_v28, %v7070_v13  ;;  %7253 = vmatmul.bf16.gmra.mxu0 %v17868_v20 }
 0x92f   :  { %7463 = vmatpush.bf16.msra.mxu3 %v8805_v37 }
 0x931   :  { %v7037_v8 = vpop.f32.mrf.mxu2 }
 0x932   :  { %v7038_v11 = vadd.f32 %v7037_v8, %v17816_v24  ;;  %v7137_v44 = vpop.f32.mrf.mxu1  ;;  %v9122_v8 = vld [vmem:[#allocation9 + $0x2e4] sm:$0xf] }
 0x933   :  { %v7071_v18 = vpop.f32.mrf.mxu3  ;;  %v17874_v62 = vadd.f32 %v7137_v44, %v7104_v59  ;;  %v7105_v0 = vpop.f32.mrf.mxu0 }
 0x934   :  { %v7072_v6 = vadd.f32 %v7071_v18, %v7038_v11  ;;  %v8794_v11 = vld [vmem:[#allocation9 + $0x2e8] sm:$0xf0] }
 0x935   :  { %7287 = vmatmul.bf16.gmra.mxu1 %v17876_v54  ;;  %v8797_v44 = vor.u32 %v9122_v8, %v8794_v11  ;;  %v8786_v11 = vld [vmem:[#allocation9 + $0x2d8] sm:$0xf0] }
 0x936   :  { %v7106_v3 = vadd.f32 %v7105_v0, %v7072_v6  ;;  %7301 = vmatmul.bf16.vlgmr.msra.gmra.mxu2 %v17376_v51  ;;  %v9140_v51 = vld [vmem:[#allocation9 + $0x374] sm:$0xf]  ;;  %v8930_v0 = vld [vmem:[#allocation9 + $0x3f8] sm:$0xf0] }
 0x937   :  { %v9156_v6 = vld [vmem:[#allocation9 + $0x3f4] sm:$0xf]  ;;  %7464 = vmatpush.bf16.msra.mxu3 %v8797_v44  ;;  %v8922_v44 = vld [vmem:[#allocation9 + $0x3e8] sm:$0xf0] }
 0x938   :  { %7335 = vmatmul.bf16.vlgmr.msrb.gmra.mxu3 %v17384_v33  ;;  %v8866_v33 = vld [vmem:[#allocation9 + $0x378] sm:$0xf0]  ;;  %v8933_v26 = vor.u32 %v9156_v6, %v8930_v0 }
 0x939   :  { %v7040_v13 = vpop.f32.mrf.mxu2  ;;  %v8869_v18 = vor.u32 %v9140_v51, %v8866_v33 }
 0x93a   :  { %v7041_v28 = vadd.f32 %v7040_v13, %v17816_v24  ;;  %v7139_v57 = vpop.f32.mrf.mxu1  ;;  %7531 = vmatpush.bf16.msrb.mxu1 %v8933_v26 }
 0x93b   :  { %v7074_v29 = vpop.f32.mrf.mxu3  ;;  %v17882_v5 = vadd.f32 %v7139_v57, %v7106_v3  ;;  %v7108_v59 = vpop.f32.mrf.mxu0  ;;  %7497 = vmatpush.bf16.msra.mxu0 %v8869_v18  ;;  %v9138_v57 = vld [vmem:[#allocation9 + $0x364] sm:$0xf] }
 0x93c   :  { %v7075_v46 = vadd.f32 %v7074_v29, %v7041_v28  ;;  %v9104_v28 = vld [vmem:[#allocation9 + $0x254] sm:$0xf]  ;;  %v8722_v29 = vld [vmem:[#allocation9 + $0x258] sm:$0xf0] }
 0x93e   :  { %v7109_v41 = vadd.f32 %v7108_v59, %v7075_v46  ;;  %7369 = vmatmul.bf16.vlgmr.msrb.gmra.mxu0 %v17425_v43  ;;  %v8725_v46 = vor.u32 %v9104_v28, %v8722_v29  ;;  %v8858_v59 = vld [vmem:[#allocation9 + $0x368] sm:$0xf0]  ;;  %v9136_v29 = vld [vmem:[#allocation9 + $0x354] sm:$0xf] }
 0x93f   :  { %v8861_v63 = vor.u32 %v9138_v57, %v8858_v59  ;;  %v8714_v28 = vld [vmem:[#allocation9 + $0x248] sm:$0xf0] }
 0x940   :  { %7431 = vmatpush.bf16.msrb.mxu2 %v8725_v46  ;;  %v8850_v46 = vld [vmem:[#allocation9 + $0x358] sm:$0xf0] }
 0x941   :  { %v7042_v17 = vpop.f32.mrf.mxu2  ;;  %7498 = vmatpush.bf16.msra.mxu0 %v8861_v63  ;;  %v8778_v63 = vld [vmem:[#allocation9 + $0x2c8] sm:$0xf0] }
 0x942   :  { %v7043_v40 = vadd.f32 %v7042_v17, %v17816_v24  ;;  %v7142_v12 = vpop.f32.mrf.mxu1 }
 0x943   :  { %v7076_v3 = vpop.f32.mrf.mxu3  ;;  %v17886_v43 = vadd.f32 %v7142_v12, %v7109_v41  ;;  %v7110_v37 = vpop.f32.mrf.mxu0 }
 0x944   :  { %v7077_v56 = vadd.f32 %v7076_v3, %v7043_v40 }
 0x945   :  { %7403 = vmatmul.bf16.vlgmr.msra.gmra.mxu1 %v17448_v61  ;;  %v9120_v61 = vld [vmem:[#allocation9 + $0x2d4] sm:$0xf] }
 0x946   :  { %v7111_v13 = vadd.f32 %v7110_v37, %v7077_v56  ;;  %7306 = vmatmul.bf16.gmra.mxu2 %v17446_v39  ;;  %v8789_v18 = vor.u32 %v9120_v61, %v8786_v11 }
 0x948   :  { %7340 = vmatmul.bf16.gmra.mxu3 %v17451_v21  ;;  %v9154_v21 = vld [vmem:[#allocation9 + $0x3e4] sm:$0xf] }
 0x949   :  { %v7045_v52 = vpop.f32.mrf.mxu2  ;;  %v8925_v0 = vor.u32 %v9154_v21, %v8922_v44  ;;  %7465 = vmatpush.bf16.msra.mxu3 %v8789_v18  ;;  %v9116_v21 = vld [vmem:[#allocation9 + $0x2b4] sm:$0xf]  ;;  %v8770_v18 = vld [vmem:[#allocation9 + $0x2b8] sm:$0xf0] }
 0x94a   :  { %v7046_v51 = vadd.f32 %v7045_v52, %v17816_v24  ;;  %v7144_v41 = vpop.f32.mrf.mxu1  ;;  %v9118_v52 = vld [vmem:[#allocation9 + $0x2c4] sm:$0xf] }
 0x94b   :  { %v7079_v10 = vpop.f32.mrf.mxu3  ;;  %v17892_v8 = vadd.f32 %v7144_v41, %v7111_v13  ;;  %v7113_v39 = vpop.f32.mrf.mxu0  ;;  %7532 = vmatpush.bf16.msrb.mxu1 %v8925_v0  ;;  %v9102_v13 = vld [vmem:[#allocation9 + $0x244] sm:$0xf]  ;;  %v8914_v41 = vld [vmem:[#allocation9 + $0x3d8] sm:$0xf0] }
 0x94c   :  { %v7080_v33 = vadd.f32 %v7079_v10, %v7046_v51  ;;  %v8717_v57 = vor.u32 %v9102_v13, %v8714_v28  ;;  %v9152_v51 = vld [vmem:[#allocation9 + $0x3d4] sm:$0xf]  ;;  %v8781_v10 = vor.u32 %v9118_v52, %v8778_v63  ;;  %v8762_v28 = vld [vmem:[#allocation9 + $0x2a8] sm:$0xf0]  ;;  %v9150_v52 = vld [vmem:[#allocation9 + $0x3c4] sm:$0xf] }
 0x94d   :  { %v8917_v61 = vor.u32 %v9152_v51, %v8914_v41  ;;  %v8906_v63 = vld [vmem:[#allocation9 + $0x3c8] sm:$0xf0]  ;;  %v9096_v51 = vld [vmem:[#allocation9 + $0x214] sm:$0xf]  ;;  %v8690_v41 = vld [vmem:[#allocation9 + $0x218] sm:$0xf0] }
 0x94e   :  { %v7114_v6 = vadd.f32 %v7113_v39, %v7080_v33  ;;  %7374 = vmatmul.bf16.gmra.mxu0 %v17459_v49  ;;  %v8853_v49 = vor.u32 %v9136_v29, %v8850_v46  ;;  %7432 = vmatpush.bf16.msrb.mxu2 %v8717_v57  ;;  %v9100_v33 = vld [vmem:[#allocation9 + $0x234] sm:$0xf]  ;;  %v8706_v39 = vld [vmem:[#allocation9 + $0x238] sm:$0xf0]  ;;  %v9134_v29 = vld [vmem:[#allocation9 + $0x344] sm:$0xf] }
 0x94f   :  { %v8709_v11 = vor.u32 %v9100_v33, %v8706_v39  ;;  %7466 = vmatpush.bf16.msra.mxu3 %v8781_v10  ;;  %7533 = vmatpush.bf16.msrb.mxu1 %v8917_v61  ;;  %v8842_v57 = vld [vmem:[#allocation9 + $0x348] sm:$0xf0]  ;;  %v9112_v33 = vld [vmem:[#allocation9 + $0x294] sm:$0xf]  ;;  %v8754_v39 = vld [vmem:[#allocation9 + $0x298] sm:$0xf0] }
 0x950   :  { %7499 = vmatpush.bf16.msra.mxu0 %v8853_v49  ;;  %v8845_v49 = vor.u32 %v9134_v29, %v8842_v57 }
 0x951   :  { %v7047_v17 = vpop.f32.mrf.mxu2 }
 0x952   :  { %v7048_v26 = vadd.f32 %v7047_v17, %v17816_v24  ;;  %v7147_v3 = vpop.f32.mrf.mxu1  ;;  %7433 = vmatpush.bf16.msrb.mxu2 %v8709_v11 }
 0x953   :  { %v7081_v40 = vpop.f32.mrf.mxu3  ;;  %v17896_v56 = vadd.f32 %v7147_v3, %v7114_v6  ;;  %v7115_v37 = vpop.f32.mrf.mxu0  ;;  %v9098_v3 = vld [vmem:[#allocation9 + $0x224] sm:$0xf] }
 0x954   :  { %v7082_v12 = vadd.f32 %v7081_v40, %v7048_v26  ;;  %7500 = vmatpush.bf16.msra.mxu0 %v8845_v49  ;;  %v8898_v49 = vld [vmem:[#allocation9 + $0x3b8] sm:$0xf0] }
 0x955   :  { %7408 = vmatmul.bf16.gmra.mxu1 %v17485_v58 }
 0x956   :  { %v7116_v59 = vadd.f32 %v7115_v37, %v7082_v12  ;;  %7311 = vmatmul.bf16.gmra.mxu2 %v17483_v15  ;;  %v8773_v15 = vor.u32 %v9116_v21, %v8770_v18  ;;  %v8698_v12 = vld [vmem:[#allocation9 + $0x228] sm:$0xf0]  ;;  %v9114_v37 = vld [vmem:[#allocation9 + $0x2a4] sm:$0xf] }
 0x957   :  { %v8701_v13 = vor.u32 %v9098_v3, %v8698_v12  ;;  %v8765_v46 = vor.u32 %v9114_v37, %v8762_v28  ;;  %v8682_v3 = vld [vmem:[#allocation9 + $0x208] sm:$0xf0]  ;;  %v9110_v12 = vld [vmem:[#allocation9 + $0x284] sm:$0xf] }
 0x958   :  { %7345 = vmatmul.bf16.gmra.mxu3 %v17487_v14  ;;  %v8826_v28 = vld [vmem:[#allocation9 + $0x328] sm:$0xf0] }
 0x959   :  { %v7050_v44 = vpop.f32.mrf.mxu2  ;;  %7467 = vmatpush.bf16.msra.mxu3 %v8773_v15  ;;  %7434 = vmatpush.bf16.msrb.mxu2 %v8701_v13  ;;  %v9130_v13 = vld [vmem:[#allocation9 + $0x324] sm:$0xf] }
 0x95a   :  { %v7051_v58 = vadd.f32 %v7050_v44, %v17816_v24  ;;  %v7149_v0 = vpop.f32.mrf.mxu1  ;;  %v8829_v57 = vor.u32 %v9130_v13, %v8826_v28  ;;  %v9142_v13 = vld [vmem:[#allocation9 + $0x384] sm:$0xf]  ;;  %v8874_v28 = vld [vmem:[#allocation9 + $0x388] sm:$0xf0] }
 0x95b   :  { %v7084_v6 = vpop.f32.mrf.mxu3  ;;  %v17902_v17 = vadd.f32 %v7149_v0, %v7116_v59  ;;  %v7118_v26 = vpop.f32.mrf.mxu0  ;;  %v8909_v59 = vor.u32 %v9150_v52, %v8906_v63  ;;  %v8834_v0 = vld [vmem:[#allocation9 + $0x338] sm:$0xf0] }
 0x95c   :  { %v7085_v14 = vadd.f32 %v7084_v6, %v7051_v58  ;;  %v8757_v58 = vor.u32 %v9112_v33, %v8754_v39  ;;  %v9132_v6 = vld [vmem:[#allocation9 + $0x334] sm:$0xf]  ;;  %v8818_v33 = vld [vmem:[#allocation9 + $0x318] sm:$0xf0] }
 0x95d   :  { %7468 = vmatpush.bf16.msra.mxu3 %v8765_v46  ;;  %7534 = vmatpush.bf16.msrb.mxu1 %v8909_v59  ;;  %v9148_v46 = vld [vmem:[#allocation9 + $0x3b4] sm:$0xf] }
 0x95e   :  { %v7119_v40 = vadd.f32 %v7118_v26, %v7085_v14  ;;  %7379 = vmatmul.bf16.gmra.mxu0 %v17511_v16  ;;  %v8693_v16 = vor.u32 %v9096_v51, %v8690_v41  ;;  %v8837_v14 = vor.u32 %v9132_v6, %v8834_v0  ;;  %v9128_v41 = vld [vmem:[#allocation9 + $0x314] sm:$0xf] }
 0x95f   :  { %v8821_v39 = vor.u32 %v9128_v41, %v8818_v33 }
 0x960   :  { %7435 = vmatpush.bf16.msrb.mxu2 %v8693_v16  ;;  %7501 = vmatpush.bf16.msra.mxu0 %v8837_v14  ;;  %v8890_v16 = vld [vmem:[#allocation9 + $0x3a8] sm:$0xf0] }
 0x961   :  { %v7052_v10 = vpop.f32.mrf.mxu2  ;;  %7469 = vmatpush.bf16.msra.mxu3 %v8757_v58  ;;  %v8882_v58 = vld [vmem:[#allocation9 + $0x398] sm:$0xf0] }
 0x962   :  { %v7053_v61 = vadd.f32 %v7052_v10, %v17816_v24  ;;  %v7152_v21 = vpop.f32.mrf.mxu1  ;;  %v9094_v24 = vld [vmem:[#allocation9 + $0x204] sm:$0xf] }
 0x963   :  { %v7086_v11 = vpop.f32.mrf.mxu3  ;;  %v17906_v44 = vadd.f32 %v7152_v21, %v7119_v40  ;;  %v7120_v15 = vpop.f32.mrf.mxu0  ;;  %v8685_v37 = vor.u32 %v9094_v24, %v8682_v3  ;;  %v8746_v40 = vld [vmem:[#allocation9 + $0x288] sm:$0xf0]  ;;  %v9126_v21 = vld [vmem:[#allocation9 + $0x304] sm:$0xf] }
 0x964   :  { %v7087_v18 = vadd.f32 %v7086_v11, %v7053_v61  ;;  %v8749_v29 = vor.u32 %v9110_v12, %v8746_v40  ;;  %7502 = vmatpush.bf16.msra.mxu0 %v8829_v57  ;;  %v9146_v11 = vld [vmem:[#allocation9 + $0x3a4] sm:$0xf] }
 0x965   :  { %7413 = vmatmul.bf16.gmra.mxu1 %v17532_v48  ;;  %7436 = vmatpush.bf16.msrb.mxu2 %v8685_v37 }
 0x966   :  { %v7121_v26 = vadd.f32 %v7120_v15, %v7087_v18  ;;  %7316 = vmatmul.bf16.gmra.mxu2 %v17530_v9  ;;  %v8901_v9 = vor.u32 %v9148_v46, %v8898_v49  ;;  %7470 = vmatpush.bf16.msra.mxu3 %v8749_v29  ;;  %v8893_v18 = vor.u32 %v9146_v11, %v8890_v16  ;;  %v9144_v15 = vld [vmem:[#allocation9 + $0x394] sm:$0xf] }
 0x967   :  { %v8885_v14 = vor.u32 %v9144_v15, %v8882_v58  ;;  %v8877_v29 = vor.u32 %v9142_v13, %v8874_v28 }
 0x968   :  { %7350 = vmatmul.bf16.gmra.mxu3 %v17534_v25  ;;  %7535 = vmatpush.bf16.msrb.mxu1 %v8901_v9 }
 0x969   :  { %v7166_v52 = vpop.f32.mrf.mxu2  ;;  %7503 = vmatpush.bf16.msra.mxu0 %v8821_v39 }
 0x96a   :  { %v7167_v48 = vadd.f32 %v7166_v52, %v17846_v45  ;;  %v7154_v51 = vpop.f32.mrf.mxu1  ;;  %v8810_v45 = vld [vmem:[#allocation9 + $0x308] sm:$0xf0] }
 0x96b   :  { %v7200_v63 = vpop.f32.mrf.mxu3  ;;  %v17912_v10 = vadd.f32 %v7154_v51, %v7121_v26  ;;  %v7234_v59 = vpop.f32.mrf.mxu0  ;;  %v8813_v6 = vor.u32 %v9126_v21, %v8810_v45 }
 0x96c   :  { %v7201_v25 = vadd.f32 %v7200_v63, %v7167_v48  ;;  %7536 = vmatpush.bf16.msrb.mxu1 %v8893_v18 }
 0x96d   :  { %7504 = vmatpush.bf16.msra.mxu0 %v8813_v6 }
 0x96e   :  { %v7235_v61 = vadd.f32 %v7234_v59, %v7201_v25  ;;  %7384 = vmatmul.bf16.gmra.mxu0 %v17563_v31 }
 0x970   :  { %7537 = vmatpush.bf16.msrb.mxu1 %v8885_v14 }
 0x971   :  { %v7168_v0 = vpop.f32.mrf.mxu2 }
 0x972   :  { %v7169_v26 = vadd.f32 %v7168_v0, %v17862_v47  ;;  %v7268_v3 = vpop.f32.mrf.mxu1 }
 0x973   :  { %v7202_v24 = vpop.f32.mrf.mxu3  ;;  %v17916_v37 = vadd.f32 %v7268_v3, %v7235_v61  ;;  %v7236_v40 = vpop.f32.mrf.mxu0  ;;  %v7599_v3 = vld [vmem:[#allocation10 + $0x70] sm:$0xff] }
 0x974   :  { %v7203_v12 = vadd.f32 %v7202_v24, %v7169_v26  ;;  %7538 = vmatpush.bf16.msrb.mxu1 %v8877_v29 }
 0x975   :  { %7418 = vmatmul.bf16.gmra.mxu1 %v17594_v60 }
 0x976   :  { %v7237_v31 = vadd.f32 %v7236_v40, %v7203_v12  ;;  %7321 = vmatmul.bf16.gmra.mxu2 %v17592_v42  ;;  %v7598_v40 = vld [vmem:[#allocation10 + $0x68] sm:$0xff] }
 0x978   :  { %7355 = vmatmul.bf16.gmra.mxu3 %v17604_v23 }
 0x979   :  { %v7171_v57 = vpop.f32.mrf.mxu2 }
 0x97a   :  { %v7172_v47 = vadd.f32 %v7171_v57, %v17874_v62  ;;  %v7270_v49 = vpop.f32.mrf.mxu1 }
 0x97b   :  { %v7205_v46 = vpop.f32.mrf.mxu3  ;;  %v17922_v9 = vadd.f32 %v7270_v49, %v7237_v31  ;;  %v7239_v48 = vpop.f32.mrf.mxu0  ;;  %v7597_v31 = vld [vmem:[#allocation10 + $0x60] sm:$0xff]  ;;  %v7594_v49 = vld [vmem:[#allocation10 + $0x48] sm:$0xff] }
 0x97c   :  { %v7206_v52 = vadd.f32 %v7205_v46, %v7172_v47  ;;  %v7595_v46 = vld [vmem:[#allocation10 + $0x50] sm:$0xff] }
 0x97e   :  { %v7240_v63 = vadd.f32 %v7239_v48, %v7206_v52  ;;  %7389 = vmatmul.bf16.gmra.mxu0 %v17646_v1 }
 0x981   :  { %v7173_v42 = vpop.f32.mrf.mxu2 }
 0x982   :  { %v7174_v60 = vadd.f32 %v7173_v42, %v17882_v5  ;;  %v7273_v25 = vpop.f32.mrf.mxu1 }
 0x983   :  { %v7207_v51 = vpop.f32.mrf.mxu3  ;;  %v17926_v59 = vadd.f32 %v7273_v25, %v7240_v63  ;;  %v7241_v41 = vpop.f32.mrf.mxu0 }
 0x984   :  { %v7208_v23 = vadd.f32 %v7207_v51, %v7174_v60 }
 0x985   :  { %7423 = vmatmul.bf16.gmra.mxu1 %v17685_v34 }
 0x986   :  { %v7242_v33 = vadd.f32 %v7241_v41, %v7208_v23  ;;  %7437 = vmatmul.bf16.vlgmr.msrb.gmra.mxu2 %v17687_v19  ;;  %v7591_v41 = vld [vmem:[#allocation10 + $0x30] sm:$0xff] }
 0x988   :  { %7471 = vmatmul.bf16.vlgmr.msra.gmra.mxu3 %v17692_v7 }
 0x989   :  { %v7176_v62 = vpop.f32.mrf.mxu2 }
 0x98a   :  { %v7177_v39 = vadd.f32 %v7176_v62, %v17886_v43  ;;  %v7275_v61 = vpop.f32.mrf.mxu1  ;;  %v7600_v43 = vld [vmem:[#allocation10 + $0x78] sm:$0xff] }
 0x98b   :  { %v7210_v1 = vpop.f32.mrf.mxu3  ;;  %v17932_v5 = vadd.f32 %v7275_v61, %v7242_v33  ;;  %v7244_v16 = vpop.f32.mrf.mxu0  ;;  %7621 = vmatpush.msra.mxu2 %v7600_v43  ;;  %v7589_v33 = vld [vmem:[#allocation10 + $0x20] sm:$0xff] }
 0x98c   :  { %v7211_v11 = vadd.f32 %v7210_v1, %v7177_v39 }
 0x98d   :  { %7622 = vmatpush.msra.mxu2 %v7599_v3 }
 0x98e   :  { %v7245_v21 = vadd.f32 %v7244_v16, %v7211_v11  ;;  %7505 = vmatmul.bf16.vlgmr.msra.gmra.mxu0 %v17713_v27 }
 0x98f   :  { %7623 = vmatpush.msra.mxu2 %v7598_v40 }
 0x991   :  { %v7178_v18 = vpop.f32.mrf.mxu2  ;;  %7624 = vmatpush.msra.mxu2 %v7597_v31 }
 0x992   :  { %v7179_v45 = vadd.f32 %v7178_v18, %v17892_v8  ;;  %v7278_v15 = vpop.f32.mrf.mxu1  ;;  %v7586_v18 = vld [vmem:[#allocation10 + $0x8] sm:$0xff] }
 0x993   :  { %v7212_v34 = vpop.f32.mrf.mxu3  ;;  %v17936_v58 = vadd.f32 %v7278_v15, %v7245_v21  ;;  %v7246_v7 = vpop.f32.mrf.mxu0  ;;  %v7587_v21 = vld [vmem:[#allocation10 + $0x10] sm:$0xff]  ;;  %v19911_v15 = vld [vmem:[#allocation27_spill] sm:$0xff] }
 0x994   :  { %v7213_v19 = vadd.f32 %v7212_v34, %v7179_v45  ;;  %v19909_v34 = vld [vmem:[#allocation23_spill] sm:$0xff] }
 0x995   :  { %7539 = vmatmul.bf16.vlgmr.msrb.gmra.mxu1 %v17728_v4 }
 0x996   :  { %v7247_v6 = vadd.f32 %v7246_v7, %v7213_v19  ;;  %7442 = vmatmul.bf16.gmra.mxu2 %v17726_v55  ;;  %v7596_v55 = vld [vmem:[#allocation10 + $0x58] sm:$0xff]  ;;  %v17961_v19 = vperm.slane %v19911_v15, 1  ;;  %v7585_v7 = vld [vmem:[#allocation10] sm:$0xff] }
 0x997   :  { %7625 = vmatpush.msra.mxu2 %v7596_v55 }
 0x998   :  { %7476 = vmatmul.bf16.gmra.mxu3 %v17730_v22 }
 0x999   :  { %v7181_v0 = vpop.f32.mrf.mxu2  ;;  %7626 = vmatpush.msra.mxu2 %v7595_v46 }
 0x99a   :  { %v7182_v27 = vadd.f32 %v7181_v0, %v17896_v56  ;;  %v7280_v8 = vpop.f32.mrf.mxu1 }
 0x99b   :  { %v7215_v14 = vpop.f32.mrf.mxu3  ;;  %v17942_v26 = vadd.f32 %v7280_v8, %v7247_v6  ;;  %v7249_v24 = vpop.f32.mrf.mxu0  ;;  %7627 = vmatpush.msra.mxu2 %v7594_v49 }
 0x99c   :  { %v7216_v12 = vadd.f32 %v7215_v14, %v7182_v27 }
 0x99e   :  { %7510 = vmatmul.bf16.gmra.mxu0 %v17749_v53  ;;  %v7250_v22 = vadd.f32 %v7249_v24, %v7216_v12  ;;  %v7593_v53 = vld [vmem:[#allocation10 + $0x40] sm:$0xff]  ;;  %v19913_v12 = vld [vmem:[#allocation103_spill] sm:$0xff] }
 0x99f   :  { %7628 = vmatpush.msra.mxu2 %v7593_v53 }
 0x9a1   :  { %v7183_v4 = vpop.f32.mrf.mxu2 }
 0x9a2   :  { %v7184_v13 = vadd.f32 %v7183_v4, %v17902_v17  ;;  %v7283_v28 = vpop.f32.mrf.mxu1  ;;  %v7592_v17 = vld [vmem:[#allocation10 + $0x38] sm:$0xff] }
 0x9a3   :  { %v7217_v56 = vpop.f32.mrf.mxu3  ;;  %v17946_v57 = vadd.f32 %v7283_v28, %v7250_v22  ;;  %v7251_v47 = vpop.f32.mrf.mxu0  ;;  %7629 = vmatpush.msra.mxu2 %v7592_v17  ;;  %v7616_v28 = vld [vmem:[#allocation10 + $0xf8] sm:$0xff] }
 0x9a4   :  { %v7218_v29 = vadd.f32 %v7217_v56, %v7184_v13  ;;  %7668 = vmatpush.msrb.mxu3 %v7616_v28  ;;  %v7606_v28 = vld [vmem:[#allocation10 + $0xa8] sm:$0xff] }
 0x9a5   :  { %7544 = vmatmul.bf16.gmra.mxu1 %v17764_v30  ;;  %7630 = vmatpush.msra.mxu2 %v7591_v41  ;;  %v7565_v41 = vmax.f32 %v17916_v37, 0.0 }
 0x9a6   :  { %v7252_v52 = vadd.f32 %v7251_v47, %v7218_v29  ;;  %7447 = vmatmul.bf16.gmra.mxu2 %v17762_v38  ;;  %v7590_v38 = vld [vmem:[#allocation10 + $0x28] sm:$0xff]  ;;  %v7615_v47 = vld [vmem:[#allocation10 + $0xf0] sm:$0xff] }
 0x9a7   :  { %7631 = vmatpush.msra.mxu2 %v7590_v38  ;;  %7669 = vmatpush.msrb.mxu3 %v7615_v47 }
 0x9a8   :  { %7481 = vmatmul.bf16.gmra.mxu3 %v17766_v32  ;;  %v7588_v32 = vld [vmem:[#allocation10 + $0x18] sm:$0xff] }
 0x9a9   :  { %v7186_v48 = vpop.f32.mrf.mxu2  ;;  %7632 = vmatpush.msra.mxu2 %v7589_v33 }
 0x9aa   :  { %v7187_v63 = vadd.f32 %v7186_v48, %v17906_v44  ;;  %v7285_v60 = vpop.f32.mrf.mxu1 }
 0x9ab   :  { %v7220_v42 = vpop.f32.mrf.mxu3  ;;  %v17952_v25 = vadd.f32 %v7285_v60, %v7252_v52  ;;  %v7254_v23 = vpop.f32.mrf.mxu0  ;;  %7633 = vmatpush.msra.mxu2 %v7588_v32 }
 0x9ac   :  { %v7221_v51 = vadd.f32 %v7220_v42, %v7187_v63  ;;  %v7614_v42 = vld [vmem:[#allocation10 + $0xe8] sm:$0xff] }
 0x9ad   :  { %7634 = vmatpush.msra.mxu2 %v7587_v21  ;;  %7670 = vmatpush.msrb.mxu3 %v7614_v42  ;;  %v7604_v42 = vld [vmem:[#allocation10 + $0x98] sm:$0xff] }
 0x9ae   :  { %v7255_v30 = vadd.f32 %v7254_v23, %v7221_v51  ;;  %7515 = vmatmul.bf16.gmra.mxu0 %v17785_v35  ;;  %v19910_v35 = vld [vmem:[#allocation72_spill] sm:$0xff] }
 0x9af   :  { %7635 = vmatpush.msra.mxu2 %v7586_v18  ;;  %v7613_v51 = vld [vmem:[#allocation10 + $0xe0] sm:$0xff]  ;;  %v7611_v18 = vld [vmem:[#allocation10 + $0xd0] sm:$0xff] }
 0x9b0   :  { %7671 = vmatpush.msrb.mxu3 %v7613_v51  ;;  %v7603_v51 = vld [vmem:[#allocation10 + $0x90] sm:$0xff] }
 0x9b1   :  { %v7188_v62 = vpop.f32.mrf.mxu2  ;;  %7636 = vmatpush.msra.mxu2 %v7585_v7 }
 0x9b2   :  { %v7189_v44 = vadd.f32 %v7188_v62, %v17912_v10  ;;  %v7288_v1 = vpop.f32.mrf.mxu1  ;;  %v19912_v10 = vld [vmem:[#allocation124_spill] sm:$0xff]  ;;  %v7612_v62 = vld [vmem:[#allocation10 + $0xd8] sm:$0xff] }
 0x9b3   :  { %v7222_v39 = vpop.f32.mrf.mxu3  ;;  %v17956_v11 = vadd.f32 %v7288_v1, %v7255_v30  ;;  %v7256_v16 = vpop.f32.mrf.mxu0  ;;  %7672 = vmatpush.msrb.mxu3 %v7612_v62 }
 0x9b4   :  { %v7223_v61 = vadd.f32 %v7222_v39, %v7189_v44 }
 0x9b5   :  { %7549 = vmatmul.bf16.gmra.mxu1 %v19910_v35  ;;  %7673 = vmatpush.msrb.mxu3 %v7611_v18 }
 0x9b6   :  { %v7257_v45 = vadd.f32 %v7256_v16, %v7223_v61  ;;  %7452 = vmatmul.bf16.gmra.mxu2 %v19909_v34  ;;  %v7567_v61 = vmax.f32 %v17922_v9, 0.0  ;;  %v7610_v34 = vld [vmem:[#allocation10 + $0xc8] sm:$0xff] }
 0x9b7   :  { %7674 = vmatpush.msrb.mxu3 %v7610_v34 }
 0x9b8   :  { %7486 = vmatmul.bf16.gmra.mxu3 %v19912_v10  ;;  %v7569_v10 = vmax.f32 %v17926_v59, 0.0  ;;  %v7608_v59 = vld [vmem:[#allocation10 + $0xb8] sm:$0xff] }
 0x9b9   :  { %v7302_v6 = vpop.f32.mrf.mxu2 }
 0x9ba   :  { %v7303_v43 = vadd.f32 %v7302_v6, %v17961_v19  ;;  %v7290_v27 = vpop.f32.mrf.mxu1 }
 0x9bb   :  { %v7336_v0 = vpop.f32.mrf.mxu3  ;;  %v17965_v8 = vadd.f32 %v7290_v27, %v7257_v45  ;;  %v7370_v24 = vpop.f32.mrf.mxu0 }
 0x9bc   :  { %v7337_v14 = vadd.f32 %v7336_v0, %v7303_v43  ;;  %v7609_v0 = vld [vmem:[#allocation10 + $0xc0] sm:$0xff] }
 0x9bd   :  { %7675 = vmatpush.msrb.mxu3 %v7609_v0 }
 0x9be   :  { %v7371_v3 = vadd.f32 %v7370_v24, %v7337_v14  ;;  %7520 = vmatmul.bf16.gmra.mxu0 %v19913_v12 }
 0x9bf   :  { %7676 = vmatpush.msrb.mxu3 %v7608_v59 }
 0x9c1   :  { %v7304_v40 = vpop.f32.mrf.mxu2 }
 0x9c2   :  { %v7305_v31 = vadd.f32 %v7304_v40, %v17961_v19  ;;  %v7404_v4 = vpop.f32.mrf.mxu1  ;;  %v7571_v40 = vmax.f32 %v17932_v5, 0.0  ;;  %v7573_v5 = vmax.f32 %v17936_v58, 0.0  ;;  %v7575_v58 = vmax.f32 %v17942_v26, 0.0 }
 0x9c3   :  { %v7338_v55 = vpop.f32.mrf.mxu3  ;;  %v17969_v13 = vadd.f32 %v7404_v4, %v7371_v3  ;;  %v7372_v56 = vpop.f32.mrf.mxu0 }
 0x9c4   :  { %v7339_v22 = vadd.f32 %v7338_v55, %v7305_v31 }
 0x9c5   :  { %7554 = vmatmul.bf16.gmra.mxu1 %v17848_v2 }
 0x9c6   :  { %v7373_v29 = vadd.f32 %v7372_v56, %v7339_v22  ;;  %7457 = vmatmul.bf16.gmra.mxu2 %v17844_v36  ;;  %v7607_v22 = vld [vmem:[#allocation10 + $0xb0] sm:$0xff] }
 0x9c7   :  { %7677 = vmatpush.msrb.mxu3 %v7607_v22 }
 0x9c8   :  { %7491 = vmatmul.bf16.gmra.mxu3 %v17850_v50 }
 0x9c9   :  { %v7307_v46 = vpop.f32.mrf.mxu2  ;;  %7678 = vmatpush.msrb.mxu3 %v7606_v28 }
 0x9ca   :  { %v7308_v49 = vadd.f32 %v7307_v46, %v17961_v19  ;;  %v7406_v53 = vpop.f32.mrf.mxu1 }
 0x9cb   :  { %v7341_v52 = vpop.f32.mrf.mxu3  ;;  %v17975_v48 = vadd.f32 %v7406_v53, %v7373_v29  ;;  %v7375_v63 = vpop.f32.mrf.mxu0  ;;  %v7605_v29 = vld [vmem:[#allocation10 + $0xa0] sm:$0xff] }
 0x9cc   :  { %v7342_v17 = vadd.f32 %v7341_v52, %v7308_v49  ;;  %7679 = vmatpush.msrb.mxu3 %v7605_v29 }
 0x9ce   :  { %v7376_v60 = vadd.f32 %v7375_v63, %v7342_v17  ;;  %7525 = vmatmul.bf16.gmra.mxu0 %v17868_v20  ;;  %7680 = vmatpush.msrb.mxu3 %v7604_v42 }
 0x9d0   :  { %7681 = vmatpush.msrb.mxu3 %v7603_v51 }
 0x9d1   :  { %v7309_v36 = vpop.f32.mrf.mxu2 }
 0x9d2   :  { %v7310_v2 = vadd.f32 %v7309_v36, %v17961_v19  ;;  %v7409_v23 = vpop.f32.mrf.mxu1  ;;  %v7602_v36 = vld [vmem:[#allocation10 + $0x88] sm:$0xff] }
 0x9d3   :  { %v7343_v50 = vpop.f32.mrf.mxu3  ;;  %v17980_v30 = vadd.f32 %v7409_v23, %v7376_v60  ;;  %v7377_v33 = vpop.f32.mrf.mxu0  ;;  %7682 = vmatpush.msrb.mxu3 %v7602_v36 }
 0x9d4   :  { %v7344_v38 = vadd.f32 %v7343_v50, %v7310_v2  ;;  %v7601_v2 = vld [vmem:[#allocation10 + $0x80] sm:$0xff] }
 0x9d5   :  { %7559 = vmatmul.bf16.gmra.mxu1 %v17876_v54  ;;  %7683 = vmatpush.msrb.mxu3 %v7601_v2 }
 0x9d6   :  { %v7378_v32 = vadd.f32 %v7377_v33, %v7344_v38  ;;  %7637 = vmatmul.f32.vlgmr.msra.gmra.mxu2 %v7565_v41 }
 0x9d9   :  { %v7312_v44 = vpop.f32.mrf.mxu2 }
 0x9da   :  { %v7313_v20 = vadd.f32 %v7312_v44, %v17961_v19  ;;  %v7411_v1 = vpop.f32.mrf.mxu1 }
 0x9db   :  { %v7346_v39 = vpop.f32.mrf.mxu3  ;;  %v17985_v21 = vadd.f32 %v7411_v1, %v7378_v32  ;;  %v7380_v37 = vpop.f32.mrf.mxu0 }
 0x9dc   :  { %v7347_v16 = vadd.f32 %v7346_v39, %v7313_v20 }
 0x9de   :  { %v7381_v45 = vadd.f32 %v7380_v37, %v7347_v16  ;;  %7640 = vmatmul.f32.gmra.mxu2 %v7567_v61  ;;  %v7577_v16 = vmax.f32 %v17946_v57, 0.0 }
 0x9e1   :  { %v7314_v54 = vpop.f32.mrf.mxu2 }
 0x9e2   :  { %v7315_v35 = vadd.f32 %v7314_v54, %v17961_v19  ;;  %v7414_v7 = vpop.f32.mrf.mxu1 }
 0x9e3   :  { %v7348_v15 = vpop.f32.mrf.mxu3  ;;  %v17989_v43 = vadd.f32 %v7414_v7, %v7381_v45  ;;  %v7382_v9 = vpop.f32.mrf.mxu0  ;;  %v7579_v7 = vmax.f32 %v17952_v25, 0.0 }
 0x9e4   :  { %v7349_v6 = vadd.f32 %v7348_v15, %v7315_v35 }
 0x9e6   :  { %v7383_v27 = vadd.f32 %v7382_v9, %v7349_v6  ;;  %7643 = vmatmul.f32.gmra.mxu2 %v7569_v10 }
 0x9e9   :  { %v7317_v14 = vpop.f32.mrf.mxu2 }
 0x9ea   :  { %v7318_v24 = vadd.f32 %v7317_v14, %v17961_v19  ;;  %v7416_v12 = vpop.f32.mrf.mxu1 }
 0x9eb   :  { %v7351_v3 = vpop.f32.mrf.mxu3  ;;  %v17993_v55 = vadd.f32 %v7416_v12, %v7383_v27  ;;  %v7385_v4 = vpop.f32.mrf.mxu0 }
 0x9ec   :  { %v7352_v31 = vadd.f32 %v7351_v3, %v7318_v24  ;;  %v7581_v24 = vmax.f32 %v17956_v11, 0.0 }
 0x9ee   :  { %v7386_v56 = vadd.f32 %v7385_v4, %v7352_v31  ;;  %7646 = vmatmul.f32.gmra.mxu2 %v7571_v40 }
 0x9f1   :  { %v7319_v47 = vpop.f32.mrf.mxu2 }
 0x9f2   :  { %v7320_v46 = vadd.f32 %v7319_v47, %v17961_v19  ;;  %v7419_v52 = vpop.f32.mrf.mxu1 }
 0x9f3   :  { %v7353_v49 = vpop.f32.mrf.mxu3  ;;  %v17997_v17 = vadd.f32 %v7419_v52, %v7386_v56  ;;  %v7387_v63 = vpop.f32.mrf.mxu0  ;;  %v7583_v56 = vmax.f32 %v17965_v8, 0.0 }
 0x9f4   :  { %v7354_v53 = vadd.f32 %v7353_v49, %v7320_v46 }
 0x9f6   :  { %v7388_v60 = vadd.f32 %v7387_v63, %v7354_v53  ;;  %7649 = vmatmul.f32.gmra.mxu2 %v7573_v5 }
 0x9f9   :  { %v7322_v50 = vpop.f32.mrf.mxu2 }
 0x9fa   :  { %v7323_v23 = vadd.f32 %v7322_v50, %v17961_v19  ;;  %v7421_v38 = vpop.f32.mrf.mxu1 }
 0x9fb   :  { %v7356_v41 = vpop.f32.mrf.mxu3  ;;  %v18001_v32 = vadd.f32 %v7421_v38, %v7388_v60  ;;  %v7390_v62 = vpop.f32.mrf.mxu0 }
 0x9fc   :  { %v7357_v33 = vadd.f32 %v7356_v41, %v7323_v23 }
 0x9fe   :  { %v7391_v44 = vadd.f32 %v7390_v62, %v7357_v33  ;;  %7652 = vmatmul.f32.gmra.mxu2 %v7575_v58 }
 0xa01   :  { %v7324_v20 = vpop.f32.mrf.mxu2 }
 0xa02   :  { %v7325_v39 = vadd.f32 %v7324_v20, %v17961_v19  ;;  %v7424_v61 = vpop.f32.mrf.mxu1 }
 0xa03   :  { %v7358_v1 = vpop.f32.mrf.mxu3  ;;  %v18005_v18 = vadd.f32 %v7424_v61, %v7391_v44  ;;  %v7392_v45 = vpop.f32.mrf.mxu0 }
 0xa04   :  { %v7359_v37 = vadd.f32 %v7358_v1, %v7325_v39 }
 0xa06   :  { %v7393_v34 = vadd.f32 %v7392_v45, %v7359_v37  ;;  %7655 = vmatmul.f32.gmra.mxu2 %v7577_v16 }
 0xa09   :  { %v7438_v26 = vpop.f32.mrf.mxu2 }
 0xa0a   :  { %v7439_v54 = vadd.f32 %v7438_v26, %v17969_v13  ;;  %v7426_v15 = vpop.f32.mrf.mxu1 }
 0xa0b   :  { %v7472_v35 = vpop.f32.mrf.mxu3  ;;  %v18009_v10 = vadd.f32 %v7426_v15, %v7393_v34  ;;  %v7506_v19 = vpop.f32.mrf.mxu0 }
 0xa0c   :  { %v7473_v6 = vadd.f32 %v7472_v35, %v7439_v54 }
 0xa0e   :  { %7658 = vmatmul.f32.gmra.mxu2 %v7579_v7  ;;  %v7507_v57 = vadd.f32 %v7506_v19, %v7473_v6 }
 0xa11   :  { %v7440_v9 = vpop.f32.mrf.mxu2 }
 0xa12   :  { %v7441_v0 = vadd.f32 %v7440_v9, %v17975_v48  ;;  %v7540_v14 = vpop.f32.mrf.mxu1 }
 0xa13   :  { %v7474_v27 = vpop.f32.mrf.mxu3  ;;  %v7541_v3 = vadd.f32 %v7540_v14, %v7507_v57  ;;  %v7508_v12 = vpop.f32.mrf.mxu0 }
 0xa14   :  { %v7475_v13 = vadd.f32 %v7474_v27, %v7441_v0 }
 0xa15   :  { %v7566_v40 = vmax.f32 %v7541_v3, 0.0 }
 0xa16   :  { %7661 = vmatmul.f32.gmra.mxu2 %v7581_v24  ;;  %v7509_v31 = vadd.f32 %v7508_v12, %v7475_v13 }
 0xa17   :  { %7684 = vmatmul.f32.vlgmr.msrb.gmra.mxu3 %v7566_v40 }
 0xa19   :  { %v7443_v25 = vpop.f32.mrf.mxu2 }
 0xa1a   :  { %v7444_v4 = vadd.f32 %v7443_v25, %v17980_v30  ;;  %v7542_v22 = vpop.f32.mrf.mxu1 }
 0xa1b   :  { %v7477_v59 = vpop.f32.mrf.mxu3  ;;  %v7543_v28 = vadd.f32 %v7542_v22, %v7509_v31  ;;  %v7511_v48 = vpop.f32.mrf.mxu0 }
 0xa1c   :  { %v7478_v29 = vadd.f32 %v7477_v59, %v7444_v4 }
 0xa1d   :  { %v7568_v47 = vmax.f32 %v7543_v28, 0.0 }
 0xa1e   :  { %7664 = vmatmul.f32.gmra.mxu2 %v7583_v56  ;;  %v7512_v46 = vadd.f32 %v7511_v48, %v7478_v29 }
 0xa1f   :  { %7687 = vmatmul.f32.gmra.mxu3 %v7568_v47 }
 0xa21   :  { %v7445_v11 = vpop.f32.mrf.mxu2 }
 0xa22   :  { %v7446_v49 = vadd.f32 %v7445_v11, %v17985_v21  ;;  %v7545_v5 = vpop.f32.mrf.mxu1 }
 0xa23   :  { %v7479_v52 = vpop.f32.mrf.mxu3  ;;  %v7546_v53 = vadd.f32 %v7545_v5, %v7512_v46  ;;  %v7513_v63 = vpop.f32.mrf.mxu0 }
 0xa24   :  { %v7480_v42 = vadd.f32 %v7479_v52, %v7446_v49 }
 0xa25   :  { %v7570_v30 = vmax.f32 %v7546_v53, 0.0 }
 0xa26   :  { %v7514_v51 = vadd.f32 %v7513_v63, %v7480_v42  ;;  %v18025_v63 = vld [vmem:[%s18078_s15] ss:$0 sm:$0xff]  ;;  %v7759_v42 = vld [vmem:[#allocation12 + $0x70] sm:$0xff] }
 0xa27   :  { %7690 = vmatmul.f32.gmra.mxu3 %v7570_v30 }
 0xa29   :  { %v7448_v60 = vpop.f32.mrf.mxu2 }
 0xa2a   :  { %v7449_v8 = vadd.f32 %v7448_v60, %v17989_v43  ;;  %v7547_v2 = vpop.f32.mrf.mxu1 }
 0xa2b   :  { %v7482_v36 = vpop.f32.mrf.mxu3  ;;  %v7548_v50 = vadd.f32 %v7547_v2, %v7514_v51  ;;  %v7516_v23 = vpop.f32.mrf.mxu0  ;;  %v7758_v2 = vld [vmem:[#allocation12 + $0x68] sm:$0xff] }
 0xa2c   :  { %v7483_v41 = vadd.f32 %v7482_v36, %v7449_v8 }
 0xa2d   :  { %v7572_v38 = vmax.f32 %v7548_v50, 0.0 }
 0xa2e   :  { %v7517_v21 = vadd.f32 %v7516_v23, %v7483_v41 }
 0xa2f   :  { %7693 = vmatmul.f32.gmra.mxu3 %v7572_v38 }
 0xa31   :  { %v7450_v58 = vpop.f32.mrf.mxu2 }
 0xa32   :  { %v7451_v33 = vadd.f32 %v7450_v58, %v17993_v55  ;;  %v7550_v44 = vpop.f32.mrf.mxu1 }
 0xa33   :  { %v7484_v62 = vpop.f32.mrf.mxu3  ;;  %v7551_v20 = vadd.f32 %v7550_v44, %v7517_v21  ;;  %v7518_v39 = vpop.f32.mrf.mxu0  ;;  %v7757_v21 = vld [vmem:[#allocation12 + $0x60] sm:$0xff] }
 0xa34   :  { %v7485_v1 = vadd.f32 %v7484_v62, %v7451_v33  ;;  %v7756_v33 = vld [vmem:[#allocation12 + $0x58] sm:$0xff] }
 0xa35   :  { %v7574_v61 = vmax.f32 %v7551_v20, 0.0 }
 0xa36   :  { %v7519_v43 = vadd.f32 %v7518_v39, %v7485_v1 }
 0xa37   :  { %7696 = vmatmul.f32.gmra.mxu3 %v7574_v61  ;;  %v7755_v61 = vld [vmem:[#allocation12 + $0x50] sm:$0xff] }
 0xa39   :  { %v7453_v16 = vpop.f32.mrf.mxu2 }
 0xa3a   :  { %v7454_v37 = vadd.f32 %v7453_v16, %v17997_v17  ;;  %v7552_v34 = vpop.f32.mrf.mxu1 }
 0xa3b   :  { %v7487_v45 = vpop.f32.mrf.mxu3  ;;  %v7553_v26 = vadd.f32 %v7552_v34, %v7519_v43  ;;  %v7521_v54 = vpop.f32.mrf.mxu0 }
 0xa3c   :  { %v7488_v35 = vadd.f32 %v7487_v45, %v7454_v37 }
 0xa3d   :  { %v7576_v15 = vmax.f32 %v7553_v26, 0.0  ;;  %v7754_v26 = vld [vmem:[#allocation12 + $0x48] sm:$0xff] }
 0xa3e   :  { %v7522_v55 = vadd.f32 %v7521_v54, %v7488_v35  ;;  %v7753_v54 = vld [vmem:[#allocation12 + $0x40] sm:$0xff] }
 0xa3f   :  { %7699 = vmatmul.f32.gmra.mxu3 %v7576_v15 }
 0xa41   :  { %v7455_v7 = vpop.f32.mrf.mxu2 }
 0xa42   :  { %v7456_v19 = vadd.f32 %v7455_v7, %v18001_v32  ;;  %v7555_v9 = vpop.f32.mrf.mxu1 }
 0xa43   :  { %v7489_v6 = vpop.f32.mrf.mxu3  ;;  %v7556_v57 = vadd.f32 %v7555_v9, %v7522_v55  ;;  %v7523_v0 = vpop.f32.mrf.mxu0 }
 0xa44   :  { %v7490_v27 = vadd.f32 %v7489_v6, %v7456_v19  ;;  %v7752_v19 = vld [vmem:[#allocation12 + $0x38] sm:$0xff]  ;;  %v7751_v6 = vld [vmem:[#allocation12 + $0x30] sm:$0xff] }
 0xa45   :  { %v7578_v14 = vmax.f32 %v7556_v57, 0.0 }
 0xa46   :  { %v7524_v17 = vadd.f32 %v7523_v0, %v7490_v27  ;;  %v7750_v0 = vld [vmem:[#allocation12 + $0x28] sm:$0xff] }
 0xa47   :  { %7702 = vmatmul.f32.gmra.mxu3 %v7578_v14 }
 0xa49   :  { %v7458_v24 = vpop.f32.mrf.mxu2 }
 0xa4a   :  { %v7459_v3 = vadd.f32 %v7458_v24, %v18005_v18  ;;  %v7557_v13 = vpop.f32.mrf.mxu1 }
 0xa4b   :  { %v7492_v12 = vpop.f32.mrf.mxu3  ;;  %v7558_v40 = vadd.f32 %v7557_v13, %v7524_v17  ;;  %v7526_v25 = vpop.f32.mrf.mxu0 }
 0xa4c   :  { %v7493_v31 = vadd.f32 %v7492_v12, %v7459_v3  ;;  %v7749_v3 = vld [vmem:[#allocation12 + $0x20] sm:$0xff]  ;;  %v7748_v12 = vld [vmem:[#allocation12 + $0x18] sm:$0xff] }
 0xa4d   :  { %v7580_v4 = vmax.f32 %v7558_v40, 0.0 }
 0xa4e   :  { %v7527_v32 = vadd.f32 %v7526_v25, %v7493_v31  ;;  %v7747_v31 = vld [vmem:[#allocation12 + $0x10] sm:$0xff] }
 0xa4f   :  { %7705 = vmatmul.f32.gmra.mxu3 %v7580_v4 }
 0xa51   :  { %v7460_v59 = vpop.f32.mrf.mxu2 }
 0xa52   :  { %v7461_v22 = vadd.f32 %v7460_v59, %v18009_v10  ;;  %v7560_v56 = vpop.f32.mrf.mxu1  ;;  %v7760_v10 = vld [vmem:[#allocation12 + $0x78] sm:$0xff]  ;;  %v7746_v59 = vld [vmem:[#allocation12 + $0x8] sm:$0xff] }
 0xa53   :  { %v7561_v28 = vadd.f32 %v7560_v56, %v7527_v32  ;;  %v7494_v48 = vpop.f32.mrf.mxu3  ;;  %v7528_v11 = vpop.f32.mrf.mxu0  ;;  %7765 = vmatpush.msrb.mxu0 %v7760_v10  ;;  %v7745_v32 = vld [vmem:[#allocation12] sm:$0xff] }
 0xa54   :  { %v7495_v29 = vadd.f32 %v7494_v48, %v7461_v22 }
 0xa55   :  { %v7582_v47 = vmax.f32 %v7561_v28, 0.0  ;;  %7766 = vmatpush.msrb.mxu0 %v7759_v42 }
 0xa56   :  { %v7529_v46 = vadd.f32 %v7528_v11, %v7495_v29 }
 0xa57   :  { %7708 = vmatmul.f32.gmra.mxu3 %v7582_v47  ;;  %7767 = vmatpush.msrb.mxu0 %v7758_v2 }
 0xa59   :  { %v7638_v5 = vpop.f32.mrf.mxu2  ;;  %7768 = vmatpush.msrb.mxu0 %v7757_v21  ;;  %v19915_v21 = vld [vmem:[#allocation26_spill] sm:$0xff] }
 0xa5a   :  { %v7562_v18 = vpop.f32.mrf.mxu1  ;;  %v7639_v60 = vadd.f32 %v18025_v63, %v7638_v5  ;;  %vm7786_vm15 = vcmp.ge.s32.totalorder %v19915_v21, 1  ;;  %vm7787_vm0 = vcmp.le.s32.totalorder %v19915_v21, 58  ;;  %vm7785_vm4 = vcmp.eq.s32.totalorder %v19915_v21, 0 }
 0xa5b   :  { %v7563_v49 = vadd.f32 %v7562_v18, %v7529_v46  ;;  %7769 = vmatpush.msrb.mxu0 %v7756_v33  ;;  %vm7788_vm3 = vmand %vm7786_vm15, %vm7787_vm0 }
 0xa5d   :  { %v7584_v52 = vmax.f32 %v7563_v49, 0.0  ;;  %7770 = vmatpush.msrb.mxu0 %v7755_v61 }
 0xa5f   :  { %7711 = vmatmul.f32.gmra.mxu3 %v7584_v52  ;;  %7771 = vmatpush.msrb.mxu0 %v7754_v26 }
 0xa61   :  { %v7641_v53 = vpop.f32.mrf.mxu2  ;;  %7772 = vmatpush.msrb.mxu0 %v7753_v54 }
 0xa62   :  { %v7642_v50 = vadd.f32 %v18025_v63, %v7641_v53 }
 0xa63   :  { %7773 = vmatpush.msrb.mxu0 %v7752_v19 }
 0xa65   :  { %7774 = vmatpush.msrb.mxu0 %v7751_v6 }
 0xa67   :  { %7775 = vmatpush.msrb.mxu0 %v7750_v0 }
 0xa69   :  { %v7644_v30 = vpop.f32.mrf.mxu2  ;;  %7776 = vmatpush.msrb.mxu0 %v7749_v3 }
 0xa6a   :  { %v7645_v62 = vadd.f32 %v18025_v63, %v7644_v30 }
 0xa6b   :  { %7777 = vmatpush.msrb.mxu0 %v7748_v12 }
 0xa6d   :  { %7778 = vmatpush.msrb.mxu0 %v7747_v31 }
 0xa6f   :  { %7779 = vmatpush.msrb.mxu0 %v7746_v59 }
 0xa71   :  { %v7647_v23 = vpop.f32.mrf.mxu2  ;;  %7780 = vmatpush.msrb.mxu0 %v7745_v32 }
 0xa72   :  { %v7648_v16 = vadd.f32 %v18025_v63, %v7647_v23 }
 0xa79   :  { %v7650_v39 = vpop.f32.mrf.mxu2 }
 0xa7a   :  { %v7651_v35 = vadd.f32 %v18025_v63, %v7650_v39 }
 0xa81   :  { %v7653_v34 = vpop.f32.mrf.mxu2 }
 0xa82   :  { %v7654_v57 = vadd.f32 %v18025_v63, %v7653_v34 }
 0xa89   :  { %v7656_v9 = vpop.f32.mrf.mxu2 }
 0xa8a   :  { %v7657_v17 = vadd.f32 %v18025_v63, %v7656_v9 }
 0xa91   :  { %v7659_v13 = vpop.f32.mrf.mxu2 }
 0xa92   :  { %v7660_v22 = vadd.f32 %v18025_v63, %v7659_v13 }
 0xa99   :  { %v7662_v48 = vpop.f32.mrf.mxu2 }
 0xa9a   :  { %v7685_v51 = vpop.f32.mrf.mxu3  ;;  %v7663_v11 = vadd.f32 %v18025_v63, %v7662_v48 }
 0xa9b   :  { %v18028_v8 = vadd.f32 %v7685_v51, %v7639_v60 }
 0xa9d   :  { %v7715_v36 = vmax.f32 %v18028_v8, 0.0 }
 0xa9f   :  { %7725 = vst [vmem:[#allocation13] sm:$0xff] %v7715_v36 }
 0xaa1   :  { %v7665_v10 = vpop.f32.mrf.mxu2 }
 0xaa2   :  { %v7688_v41 = vpop.f32.mrf.mxu3  ;;  %v7666_v30 = vadd.f32 %v18025_v63, %v7665_v10 }
 0xaa3   :  { %v18034_v38 = vadd.f32 %v7688_v41, %v7642_v50  ;;  %v19914_v41 = vld [vmem:[#allocation107_spill] sm:$0xff] }
 0xaa5   :  { %v7716_v58 = vmax.f32 %v18034_v38, 0.0 }
 0xaa7   :  { %7726 = vst [vmem:[#allocation13 + $0x8] sm:$0xff] %v7716_v58  ;;  %v7735_v47 = vadd.f32 %v7716_v58, %v7715_v36  ;;  %v9723_v58 = vld [vmem:[%s18080_s17] ss:$0 sm:$0xff]  ;;  %s10079_s17 = smov [#allocation14]  }
 0xaa8   :  { %s7824_s18 = sshll.u32 %s10079_s17, 4  ;;  %s7825_s18 = int_to_ptr.vmem [resolvable:$true] %s7824_s18 }
 0xaaa   :  { %v7691_v44 = vpop.f32.mrf.mxu3 }
 0xaab   :  { %v7692_v20 = vadd.f32 %v7691_v44, %v7645_v62 }
 0xaad   :  { %v7717_v1 = vmax.f32 %v7692_v20, 0.0 }
 0xaaf   :  { %7727 = vst [vmem:[#allocation13 + $0x10] sm:$0xff] %v7717_v1  ;;  %v7736_v46 = vadd.f32 %v7735_v47, %v7717_v1 }
 0xab2   :  { %v7694_v43 = vpop.f32.mrf.mxu3 }
 0xab3   :  { %v7695_v37 = vadd.f32 %v7694_v43, %v7648_v16 }
 0xab5   :  { %v7718_v45 = vmax.f32 %v7695_v37, 0.0 }
 0xab7   :  { %7728 = vst [vmem:[#allocation13 + $0x18] sm:$0xff] %v7718_v45  ;;  %v7737_v49 = vadd.f32 %v7736_v46, %v7718_v45 }
 0xaba   :  { %v7697_v15 = vpop.f32.mrf.mxu3 }
 0xabb   :  { %v7698_v7 = vadd.f32 %v7697_v15, %v7651_v35 }
 0xabd   :  { %v7719_v55 = vmax.f32 %v7698_v7, 0.0 }
 0xabf   :  { %7729 = vst [vmem:[#allocation13 + $0x20] sm:$0xff] %v7719_v55  ;;  %v7738_v5 = vadd.f32 %v7737_v49, %v7719_v55 }
 0xac2   :  { %v7700_v27 = vpop.f32.mrf.mxu3 }
 0xac3   :  { %v7701_v14 = vadd.f32 %v7700_v27, %v7654_v57 }
 0xac5   :  { %v7720_v24 = vmax.f32 %v7701_v14, 0.0 }
 0xac7   :  { %7730 = vst [vmem:[#allocation13 + $0x28] sm:$0xff] %v7720_v24  ;;  %v7739_v42 = vadd.f32 %v7738_v5, %v7720_v24 }
 0xaca   :  { %v7703_v40 = vpop.f32.mrf.mxu3 }
 0xacb   :  { %v7704_v25 = vadd.f32 %v7703_v40, %v7657_v17 }
 0xacd   :  { %v7721_v4 = vmax.f32 %v7704_v25, 0.0 }
 0xacf   :  { %7731 = vst [vmem:[#allocation13 + $0x30] sm:$0xff] %v7721_v4  ;;  %v7740_v60 = vadd.f32 %v7739_v42, %v7721_v4 }
 0xad2   :  { %v7706_v56 = vpop.f32.mrf.mxu3 }
 0xad3   :  { %v7707_v28 = vadd.f32 %v7706_v56, %v7660_v22 }
 0xad5   :  { %v7722_v29 = vmax.f32 %v7707_v28, 0.0 }
 0xad7   :  { %7732 = vst [vmem:[#allocation13 + $0x38] sm:$0xff] %v7722_v29  ;;  %v7741_v2 = vadd.f32 %v7740_v60, %v7722_v29 }
 0xada   :  { %v7709_v18 = vpop.f32.mrf.mxu3 }
 0xadb   :  { %v7710_v52 = vadd.f32 %v7709_v18, %v7663_v11 }
 0xadd   :  { %v7723_v53 = vmax.f32 %v7710_v52, 0.0 }
 0xadf   :  { %7733 = vst [vmem:[#allocation13 + $0x40] sm:$0xff] %v7723_v53  ;;  %v7742_v8 = vadd.f32 %v7741_v2, %v7723_v53 }
 0xae2   :  { %v7712_v51 = vpop.f32.mrf.mxu3 }
 0xae3   :  { %v7713_v50 = vadd.f32 %v7712_v51, %v7666_v30 }
 0xae5   :  { %v7724_v36 = vmax.f32 %v7713_v50, 0.0 }
 0xae7   :  { %7734 = vst [vmem:[#allocation13 + $0x48] sm:$0xff] %v7724_v36  ;;  %v7743_v23 = vadd.f32 %v7742_v8, %v7724_v36 }
 0xae8   :  { %7818 = dma.vmem_to_hbm [thread:$0]  %s7811_s30, 1280, %s7813_s26, [#allocation4], %s10066_s4, %s10066_s4, %s10067_s0  }
 0xae9   :  { %v7744_v38 = vmul.f32 %v7743_v23, %v19914_v41 }
 0xaeb   :  { %7781 = vmatmul.f32.vlgmr.msrb.gmra.mxu0 %v7744_v38 }
 0xb68   :  { %v7782_v63 = vpop.f32.mrf.mxu0 }
 0xb69   :  { %v7783_v33 = vadd.f32 %v9723_v58, %v7782_v63 }
 0xb6b   :  { %v7791_v62 = vsel %vm7788_vm3, %v7783_v33, -1e+30  ;;  %v7803_v37 = vsel %vm7785_vm4, %v7783_v33, 0.0 }
 0xb6c   :  { %7792 = vmax.xlane.f32.xlu0 %v7791_v62 }
 0xbdf   :  { %v7793_v44 = vpop.xlane.xlu0 %7792 }
 0xbe0   :  { %v7794_v20 = vsub.f32 %v7791_v62, %v7793_v44 }
 0xbe2   :  { %v7795_v39 = vmul.f32 1.442695, %v7794_v20 }
 0xbe4   :  { %9800 = vpow2.f32 %v7795_v39 }
 0xbea   :  { %v9801_v1 = vpop.eup %9800 }
 0xbeb   :  { %7797 = vadd.xlane.f32.xlu2 %v9801_v1 }
 0xc5e   :  { %v7798_v61 = vpop.xlane.xlu2 %7797 }
 0xc5f   :  { %9802 = vrcp.f32 %v7798_v61 }
 0xc65   :  { %v9803_v16 = vpop.eup %9802 }
 0xc66   :  { %v7800_v43 = vmul.f32 %v9803_v16, %v9801_v1 }
 0xc68   :  { %v7804_v45 = vadd.f32 %v7803_v37, %v7800_v43 }
 0xc6a   :  { %7805 = vst [vmem:[#allocation14] sm:$0xff] %v7804_v45 }
 0xc6b   :  { %7829 = dma.vmem_to_hbm [thread:$0]  %s7825_s18, 128, %s7827_s8, [#allocation15]  }
 0xc6c   :  { %10058 = dma.done.wait [#allocation4], 1280  }
 0xc6d   :  { %10059 = vsyncadd [#allocation4], 4294966016 }
 0xc6e   :  { %10060 = dma.done.wait [#allocation15], 128  }
 0xc6f   :  { %10061 = vsyncadd [#allocation15], 4294967168 }
 0xc70   :  { %7838 = vsyncpa [#allocation3], 1 }
 0xc71   :  { %7839 = vsyncpa [#allocation7], 1 }
 0xc72   :  { %7840 = vsyncpa [#allocation11], 1 }
 0xc73   :  { %7841 = vsyncpa [#allocation4], 1 }
 0xc74   :  { %7842 = vsyncpa [#allocation15], 1 }
 0xc75   :  { %7843 = vsyncpa [#allocation5], 1 }

</bundles_post_ra>
